<compile_context>
chip_gen: v5e
topology: v5e:2x2
jax: 0.10.0
libtpu: 0.0.40
codegen_flags: <defaults>
</compile_context>

<pallas_src>
import functools

import jax
import jax.numpy as jnp
from jax.experimental import pallas as pl
from jax.experimental.pallas import tpu as pltpu


# ----------------- fused (bn+relu) -> matmul -> (bn+relu) kernel ------------------

def _fused_mm_kernel(x_ref, w_ref, ps_ref, pb_ref, qs_ref, qb_ref, o_ref, *,
                     pre_relu, post_relu):
    x = x_ref[...] * ps_ref[...] + pb_ref[...]
    if pre_relu:
        x = jnp.maximum(x, 0.0)
    acc = jnp.dot(x.astype(jnp.bfloat16), w_ref[...],
                  preferred_element_type=jnp.float32)
    y = acc * qs_ref[...] + qb_ref[...]
    if post_relu:
        y = jnp.maximum(y, 0.0)
    o_ref[...] = y


def fused_matmul(x, w_bf16, pre=None, post=None, tm=512):
    """out = post_bn_relu( relu(pre_bn(x)) @ w ).   x: (M, K) f32, w: (K, N) bf16."""
    M, K = x.shape
    K2, Nn = w_bf16.shape
    assert K == K2
    ps, pb = pre if pre is not None else (jnp.ones((K,), jnp.float32),
                                          jnp.zeros((K,), jnp.float32))
    qs, qb = post if post is not None else (jnp.ones((Nn,), jnp.float32),
                                            jnp.zeros((Nn,), jnp.float32))
    tm = min(tm, ((M + 7) // 8) * 8)
    kernel = functools.partial(_fused_mm_kernel,
                               pre_relu=pre is not None,
                               post_relu=post is not None)
    return pl.pallas_call(
        kernel,
        out_shape=jax.ShapeDtypeStruct((M, Nn), jnp.float32),
        grid=(pl.cdiv(M, tm),),
        in_specs=[
            pl.BlockSpec((tm, K), lambda i: (i, 0)),
            pl.BlockSpec((K, Nn), lambda i: (0, 0)),
            pl.BlockSpec((1, K), lambda i: (0, 0)),
            pl.BlockSpec((1, K), lambda i: (0, 0)),
            pl.BlockSpec((1, Nn), lambda i: (0, 0)),
            pl.BlockSpec((1, Nn), lambda i: (0, 0)),
        ],
        out_specs=pl.BlockSpec((tm, Nn), lambda i: (i, 0)),
        compiler_params=pltpu.CompilerParams(dimension_semantics=("parallel",)),
        cost_estimate=pl.CostEstimate(
            flops=2 * M * K * Nn, transcendentals=0,
            bytes_accessed=M * K * 4 + K * Nn * 2 + M * Nn * 4),
    )(x, w_bf16, ps.reshape(1, K), pb.reshape(1, K),
      qs.reshape(1, Nn), qb.reshape(1, Nn))


# --------------- 3x3 conv: 9 shifted matmul accumulations (no im2col) ---------------

def _conv3x3_kernel(a_ref, w_ref, o_ref, *, Wp, Lq):
    acc = None
    for ki in range(3):
        for kj in range(3):
            off = ki * Wp + kj
            patch = a_ref[0, pl.ds(off, Lq), :].astype(jnp.bfloat16)
            d = jnp.dot(patch, w_ref[ki * 3 + kj], preferred_element_type=jnp.float32)
            acc = d if acc is None else acc + d
    o_ref[0] = acc


def conv3x3(a_flat, w2_bf16, H, Wp):
    """a_flat: (N, Lp, C) zero-padded, spatially flattened activation (already bn+relu).
    Returns conv output in width-padded coords: (N, H*Wp, G)."""
    N, Lp, C = a_flat.shape
    G = w2_bf16.shape[-1]
    Lq = H * Wp
    kernel = functools.partial(_conv3x3_kernel, Wp=Wp, Lq=Lq)
    return pl.pallas_call(
        kernel,
        out_shape=jax.ShapeDtypeStruct((N, Lq, G), jnp.float32),
        grid=(N,),
        in_specs=[pl.BlockSpec((1, Lp, C), lambda n: (n, 0, 0)),
                  pl.BlockSpec((9, C, G), lambda n: (0, 0, 0))],
        out_specs=pl.BlockSpec((1, Lq, G), lambda n: (n, 0, 0)),
        compiler_params=pltpu.CompilerParams(dimension_semantics=("parallel",)),
    )(a_flat, w2_bf16)


# ------------------- pooling: shifted elementwise reduce (no im2col) ----------------

def _shift_pool_kernel(a_ref, o_ref, *, offsets, Lq, op):
    acc = a_ref[0, pl.ds(offsets[0], Lq), :]
    for off in offsets[1:]:
        v = a_ref[0, pl.ds(off, Lq), :]
        acc = jnp.maximum(acc, v) if op == "max" else acc + v
    if op == "mean":
        acc = acc * (1.0 / len(offsets))
    o_ref[0] = acc


def shift_pool(a_flat, offsets, Lq, op):
    N, Lp, C = a_flat.shape
    kernel = functools.partial(_shift_pool_kernel, offsets=tuple(offsets), Lq=Lq, op=op)
    return pl.pallas_call(
        kernel,
        out_shape=jax.ShapeDtypeStruct((N, Lq, C), jnp.float32),
        grid=(N,),
        in_specs=[pl.BlockSpec((1, Lp, C), lambda n: (n, 0, 0))],
        out_specs=pl.BlockSpec((1, Lq, C), lambda n: (n, 0, 0)),
        compiler_params=pltpu.CompilerParams(dimension_semantics=("parallel",)),
    )(a_flat)


# --------------- norm5 (features) + relu + global 7x7 average pool, fused -----------

def _bn_relu_pool_kernel(x_ref, s_ref, b_ref, feat_ref, pool_ref):
    f = x_ref[0] * s_ref[...] + b_ref[...]
    feat_ref[0] = f                                            # features (no relu)
    pool_ref[0] = jnp.mean(jnp.maximum(f, 0.0), axis=0, keepdims=True)


def bn_relu_global_pool(h3d, scale, shift):
    N, L, C = h3d.shape
    return pl.pallas_call(
        _bn_relu_pool_kernel,
        out_shape=(jax.ShapeDtypeStruct((N, L, C), jnp.float32),
                   jax.ShapeDtypeStruct((N, 1, C), jnp.float32)),
        grid=(N,),
        in_specs=[pl.BlockSpec((1, L, C), lambda n: (n, 0, 0)),
                  pl.BlockSpec((1, C), lambda n: (0, 0)),
                  pl.BlockSpec((1, C), lambda n: (0, 0))],
        out_specs=(pl.BlockSpec((1, L, C), lambda n: (n, 0, 0)),
                   pl.BlockSpec((1, 1, C), lambda n: (n, 0, 0))),
        compiler_params=pltpu.CompilerParams(dimension_semantics=("parallel",)),
    )(h3d, scale.reshape(1, C), shift.reshape(1, C))


# ----------------------------- classifier + sigmoid --------------------------------

def _linear_sigmoid_kernel(x_ref, w_ref, b_ref, o_ref):
    y = jnp.dot(x_ref[...], w_ref[...], preferred_element_type=jnp.float32) + b_ref[...]
    o_ref[...] = jax.nn.sigmoid(y)


def linear_sigmoid(x, w, b):
    M, K = x.shape
    K2, Nn = w.shape
    assert K == K2
    return pl.pallas_call(
        _linear_sigmoid_kernel,
        out_shape=jax.ShapeDtypeStruct((M, Nn), jnp.float32),
        in_specs=[pl.BlockSpec(memory_space=pltpu.MemorySpace.VMEM)] * 3,
        out_specs=pl.BlockSpec(memory_space=pltpu.MemorySpace.VMEM),
    )(x, w, b.reshape(1, Nn))


# --------------------------------- JAX glue -----------------------------------------

def pad_flatten(x, pad, value):
    """Pad NHWC spatially by `pad` (plus one extra bottom row of slack for the shifted
    slices) and flatten the spatial dims.  Returns ((N, (H+2p+1)*(W+2p), C), W+2p)."""
    N, H, W, C = x.shape
    xp = jnp.pad(x, ((0, 0), (pad, pad + 1), (pad, pad), (0, 0)),
                 constant_values=value)
    return xp.reshape(N, -1, C), W + 2 * pad


def im2col(x, kh, kw, stride, pad):
    """Only used for conv0 (3 input channels -> negligible bytes)."""
    N, H, W, C = x.shape
    xp = jnp.pad(x, ((0, 0), (pad, pad), (pad, pad), (0, 0)))
    Ho = (H + 2 * pad - kh) // stride + 1
    Wo = (W + 2 * pad - kw) // stride + 1
    cols = [xp[:, i:i + stride * Ho:stride, j:j + stride * Wo:stride, :]
            for i in range(kh) for j in range(kw)]
    p = jnp.stack(cols, axis=3)                      # (N, Ho, Wo, kh*kw, C)
    return p.reshape(N * Ho * Wo, kh * kw * C), Ho, Wo


# ------------------------------ parameter creation ----------------------------------

def kaiming_normal(key, kh, kw, cin, cout):
    fan_in = cin * kh * kw
    std = (2.0 / fan_in) ** 0.5
    return std * jax.random.normal(key, (kh, kw, cin, cout), jnp.float32)


def bn_params(c, eps=1e-5):
    # eval-mode BatchNorm2d (weight=1, bias=0, running_mean=0, running_var=1), folded.
    gamma = jnp.ones((c,), jnp.float32)
    beta = jnp.zeros((c,), jnp.float32)
    running_mean = jnp.zeros((c,), jnp.float32)
    running_var = jnp.ones((c,), jnp.float32)
    scale = gamma / jnp.sqrt(running_var + eps)
    shift = beta - running_mean * scale
    return scale, shift


def init_densenet_params(key, growth_rate, block_config, num_init_features, bn_size,
                         num_classes):
    keys = iter(jax.random.split(key, 256))
    params = {}
    params["conv0"] = (kaiming_normal(next(keys), 7, 7, 3, num_init_features)
                       .reshape(49 * 3, num_init_features).astype(jnp.bfloat16))
    params["bn0"] = bn_params(num_init_features)
    num_features = num_init_features
    blocks = []
    for i, num_layers in enumerate(block_config):
        layers = []
        for l in range(num_layers):
            cin = num_features + l * growth_rate
            cmid = bn_size * growth_rate
            layers.append({
                "bn1": bn_params(cin),
                "w1": (kaiming_normal(next(keys), 1, 1, cin, cmid)
                       .reshape(cin, cmid).astype(jnp.bfloat16)),
                "bn2": bn_params(cmid),
                "w2": (kaiming_normal(next(keys), 3, 3, cmid, growth_rate)
                       .reshape(9, cmid, growth_rate).astype(jnp.bfloat16)),
            })
        num_features += num_layers * growth_rate
        trans = None
        if i != len(block_config) - 1:
            cout = num_features // 2
            trans = {
                "bn": bn_params(num_features),
                "w": (kaiming_normal(next(keys), 1, 1, num_features, cout)
                      .reshape(num_features, cout).astype(jnp.bfloat16)),
            }
            num_features = cout
        blocks.append((layers, trans))
    params["blocks"] = blocks
    params["bn5"] = bn_params(num_features)
    bound = 1.0 / (num_features ** 0.5)
    params["fc_w"] = jax.random.uniform(next(keys), (num_features, num_classes),
                                        jnp.float32, -bound, bound)
    params["fc_b"] = jnp.zeros((num_classes,), jnp.float32)  # nn.init.constant_(bias, 0)
    return params, num_features


# -------------------------------- forward pass --------------------------------------

def densenet_forward(x_nchw, params, *, growth_rate, num_init_features):
    x = jnp.transpose(x_nchw, (0, 2, 3, 1)).astype(jnp.float32)  # NCHW -> NHWC
    N = x.shape[0]

    # conv0 (7x7 / s2 / p3) with bn0+relu0 fused into the matmul epilogue.
    p, Ho, Wo = im2col(x, 7, 7, 2, 3)
    C = num_init_features
    h = fused_matmul(p, params["conv0"], pre=None, post=params["bn0"])
    h = h.reshape(N, Ho, Wo, C)

    # pool0: maxpool 3x3 / s2 / p1 = 9 shifted elementwise maxes on the flat (-inf)
    # padded map, then a stride-2 subsample of the full-resolution result.
    flat, Wp = pad_flatten(h, pad=1, value=-jnp.inf)
    offs = tuple(ki * Wp + kj for ki in range(3) for kj in range(3))
    h = shift_pool(flat, offs, Lq=Ho * Wp, op="max")
    h = h.reshape(N, Ho, Wp, C)[:, ::2, 0:Wo:2, :]

    # dense blocks + transitions
    for layers, trans in params["blocks"]:
        for layer in layers:
            Nb, Hh, Ww, Cin = h.shape
            # norm1 -> relu1 -> conv1(1x1) -> norm2 -> relu2, all in one matmul kernel.
            a = fused_matmul(h.reshape(-1, Cin), layer["w1"],
                             pre=layer["bn1"], post=layer["bn2"])
            Cmid = a.shape[-1]
            a = a.reshape(Nb, Hh, Ww, Cmid)
            # conv2 (3x3 / s1 / p1): zero-pad (correct, input is post-relu2), flatten,
            # 9 shifted MXU accumulations in one kernel.  Garbage columns (width Wp-Ww)
            # are sliced off afterwards.
            aflat, Wp2 = pad_flatten(a, pad=1, value=0.0)
            new = conv3x3(aflat, layer["w2"], H=Hh, Wp=Wp2)
            new = new.reshape(Nb, Hh, Wp2, growth_rate)[:, :, :Ww, :]
            # TODO(synk): write conv2 output straight into a preallocated block buffer
            # (input_output_aliases) to avoid this per-layer concat copy.
            h = jnp.concatenate([h, new], axis=-1)
        if trans is not None:
            Nb, Hh, Ww, Cc = h.shape
            # norm -> relu -> conv(1x1) in one kernel, then avgpool 2x2/s2 via shifted sums.
            t = fused_matmul(h.reshape(-1, Cc), trans["w"], pre=trans["bn"], post=None)
            Cout = t.shape[-1]
            t = t.reshape(Nb, Hh, Ww, Cout)
            tflat, _ = pad_flatten(t, pad=0, value=0.0)
            pooled = shift_pool(tflat, (0, 1, Ww, Ww + 1), Lq=(Hh - 1) * Ww, op="mean")
            h = pooled.reshape(Nb, Hh - 1, Ww, Cout)[:, ::2, ::2, :]

    # norm5 (features, no relu) + relu + global 7x7 average pool, fused in one kernel.
    Nb, Hh, Ww, Cc = h.shape
    assert Hh == 7 and Ww == 7, "final feature map must be 7x7 (as in the PyTorch module)"
    feat, pooled = bn_relu_global_pool(h.reshape(Nb, Hh * Ww, Cc), *params["bn5"])
    features_nchw = jnp.transpose(feat.reshape(Nb, Hh, Ww, Cc), (0, 3, 1, 2))
    out_after_pooling = pooled.reshape(Nb, Cc)

    # classifier + sigmoid (fused kernel)
    out = linear_sigmoid(out_after_pooling, params["fc_w"], params["fc_b"])
    return out, features_nchw, out_after_pooling


# ----------------------------------- main --------------------------------------------

if __name__ == "__main__":
    # Small DenseNet config (same class / forward structure, scaled down):
    growth_rate = 8
    block_config = (2, 2)       # two dense blocks, one transition
    num_init_features = 16
    bn_size = 2
    num_classes = 10

    key = jax.random.PRNGKey(0)
    pkey, xkey = jax.random.split(key)
    params, nf = init_densenet_params(pkey, growth_rate, block_config,
                                      num_init_features, bn_size, num_classes)

    # Input spatial 56 so the final feature map is 7x7 (56 -> 28 -> 14 -> 7), NCHW.
    x = jax.random.normal(xkey, (2, 3, 56, 56), jnp.float32)

    fwd = jax.jit(functools.partial(densenet_forward, growth_rate=growth_rate,
                                    num_init_features=num_init_features))
    out, features, out_after_pooling = fwd(x, params)
    jax.block_until_ready((out, features, out_after_pooling))

    assert out.shape == (2, num_classes)
    assert features.shape == (2, nf, 7, 7)
    assert out_after_pooling.shape == (2, nf)
    assert bool(jnp.all(jnp.isfinite(out)))
    assert bool(jnp.all(jnp.isfinite(features)))
    print("KERNEL_OK")
</pallas_src>

<mosaic_0001>
module attributes {stable_mosaic.version = 11 : i64} {
  func.func @_fused_mm_kernel(%arg0: i32, %arg1: memref<512x147xf32, #tpu.memory_space<vmem>>, %arg2: memref<147x16xbf16, #tpu.memory_space<vmem>>, %arg3: memref<1x147xf32, #tpu.memory_space<vmem>>, %arg4: memref<1x147xf32, #tpu.memory_space<vmem>>, %arg5: memref<1x16xf32, #tpu.memory_space<vmem>>, %arg6: memref<1x16xf32, #tpu.memory_space<vmem>>, %arg7: memref<512x16xf32, #tpu.memory_space<vmem>>) attributes {dimension_semantics = [#tpu.dimension_semantics<parallel>], iteration_bounds = array<i64: 4>, scalar_prefetch = 0 : i64, scratch_operands = 0 : i64, tpu.core_type = #tpu.core_type<tc>, window_params = [{transform_indices = @transform_0, window_bounds = array<i64: 512, 147>}, {pipeline_mode = #tpu.pipeline_mode<synchronous>, transform_indices = @transform_1, window_bounds = array<i64: 147, 16>}, {pipeline_mode = #tpu.pipeline_mode<synchronous>, transform_indices = @transform_2, window_bounds = array<i64: 1, 147>}, {pipeline_mode = #tpu.pipeline_mode<synchronous>, transform_indices = @transform_3, window_bounds = array<i64: 1, 147>}, {pipeline_mode = #tpu.pipeline_mode<synchronous>, transform_indices = @transform_4, window_bounds = array<i64: 1, 16>}, {pipeline_mode = #tpu.pipeline_mode<synchronous>, transform_indices = @transform_5, window_bounds = array<i64: 1, 16>}, {transform_indices = @transform_6, window_bounds = array<i64: 512, 16>}]} {
    %c0 = arith.constant 0 : index
    %c0_0 = arith.constant 0 : index
    %0 = vector.load %arg1[%c0, %c0_0] : memref<512x147xf32, #tpu.memory_space<vmem>>, vector<512x147xf32>
    %c0_1 = arith.constant 0 : index
    %c0_2 = arith.constant 0 : index
    %1 = vector.load %arg3[%c0_1, %c0_2] : memref<1x147xf32, #tpu.memory_space<vmem>>, vector<1x147xf32>
    %2 = vector.broadcast %1 : vector<1x147xf32> to vector<512x147xf32>
    %3 = arith.mulf %0, %2 : vector<512x147xf32>
    %c0_3 = arith.constant 0 : index
    %c0_4 = arith.constant 0 : index
    %4 = vector.load %arg4[%c0_3, %c0_4] : memref<1x147xf32, #tpu.memory_space<vmem>>, vector<1x147xf32>
    %5 = vector.broadcast %4 : vector<1x147xf32> to vector<512x147xf32>
    %6 = arith.addf %3, %5 : vector<512x147xf32>
    %7 = arith.truncf %6 : vector<512x147xf32> to vector<512x147xbf16>
    %c0_5 = arith.constant 0 : index
    %c0_6 = arith.constant 0 : index
    %8 = vector.load %arg2[%c0_5, %c0_6] : memref<147x16xbf16, #tpu.memory_space<vmem>>, vector<147x16xbf16>
    %cst = arith.constant dense<0.000000e+00> : vector<512x16xf32>
    %9 = tpu.matmul %7, %8, %cst {dimension_numbers = #tpu.dot_dimension_numbers<[1], [0], [0], [1], [0, 0, 1, 1], [], []>} : vector<512x147xbf16>, vector<147x16xbf16>, vector<512x16xf32> -> vector<512x16xf32>
    %c0_7 = arith.constant 0 : index
    %c0_8 = arith.constant 0 : index
    %10 = vector.load %arg5[%c0_7, %c0_8] : memref<1x16xf32, #tpu.memory_space<vmem>>, vector<1x16xf32>
    %11 = vector.broadcast %10 : vector<1x16xf32> to vector<512x16xf32>
    %12 = arith.mulf %9, %11 : vector<512x16xf32>
    %c0_9 = arith.constant 0 : index
    %c0_10 = arith.constant 0 : index
    %13 = vector.load %arg6[%c0_9, %c0_10] : memref<1x16xf32, #tpu.memory_space<vmem>>, vector<1x16xf32>
    %14 = vector.broadcast %13 : vector<1x16xf32> to vector<512x16xf32>
    %15 = arith.addf %12, %14 : vector<512x16xf32>
    %cst_11 = arith.constant 0.000000e+00 : f32
    %16 = vector.broadcast %cst_11 : f32 to vector<512x16xf32>
    %17 = arith.maximumf %15, %16 : vector<512x16xf32>
    %c0_12 = arith.constant 0 : index
    %c0_13 = arith.constant 0 : index
    %18 = vector.load %arg7[%c0_12, %c0_13] : memref<512x16xf32, #tpu.memory_space<vmem>>, vector<512x16xf32>
    tpu.vector_store %arg7[%c0_12, %c0_13], %17 {strides = array<i32>} : memref<512x16xf32, #tpu.memory_space<vmem>>, vector<512x16xf32>,
    return
  }
  func.func @transform_0(%arg0: i32) -> (i32, i32) {
    %c0_i32 = arith.constant 0 : i32
    %c0_i32_0 = arith.constant 0 : i32
    return %arg0, %c0_i32 : i32, i32
  }
  func.func @transform_1(%arg0: i32) -> (i32, i32) {
    %c0_i32 = arith.constant 0 : i32
    %c0_i32_0 = arith.constant 0 : i32
    %c0_i32_1 = arith.constant 0 : i32
    return %c0_i32, %c0_i32_0 : i32, i32
  }
  func.func @transform_2(%arg0: i32) -> (i32, i32) {
    %c0_i32 = arith.constant 0 : i32
    %c0_i32_0 = arith.constant 0 : i32
    %c0_i32_1 = arith.constant 0 : i32
    return %c0_i32, %c0_i32_0 : i32, i32
  }
  func.func @transform_3(%arg0: i32) -> (i32, i32) {
    %c0_i32 = arith.constant 0 : i32
    %c0_i32_0 = arith.constant 0 : i32
    %c0_i32_1 = arith.constant 0 : i32
    return %c0_i32, %c0_i32_0 : i32, i32
  }
  func.func @transform_4(%arg0: i32) -> (i32, i32) {
    %c0_i32 = arith.constant 0 : i32
    %c0_i32_0 = arith.constant 0 : i32
    %c0_i32_1 = arith.constant 0 : i32
    return %c0_i32, %c0_i32_0 : i32, i32
  }
  func.func @transform_5(%arg0: i32) -> (i32, i32) {
    %c0_i32 = arith.constant 0 : i32
    %c0_i32_0 = arith.constant 0 : i32
    %c0_i32_1 = arith.constant 0 : i32
    return %c0_i32, %c0_i32_0 : i32, i32
  }
  func.func @transform_6(%arg0: i32) -> (i32, i32) {
    %c0_i32 = arith.constant 0 : i32
    %c0_i32_0 = arith.constant 0 : i32
    return %arg0, %c0_i32 : i32, i32
  }
}

module attributes {stable_mosaic.version = 11 : i64} {
  func.func @_shift_pool_kernel(%arg0: i32, %arg1: memref<1x930x16xf32, #tpu.memory_space<vmem>>, %arg2: memref<1x840x16xf32, #tpu.memory_space<vmem>>) attributes {dimension_semantics = [#tpu.dimension_semantics<parallel>], iteration_bounds = array<i64: 2>, scalar_prefetch = 0 : i64, scratch_operands = 0 : i64, tpu.core_type = #tpu.core_type<tc>, window_params = [{transform_indices = @transform_0, window_bounds = array<i64: 1, 930, 16>}, {transform_indices = @transform_1, window_bounds = array<i64: 1, 840, 16>}]} {
    %c0 = arith.constant 0 : index
    %c0_0 = arith.constant 0 : index
    %c0_1 = arith.constant 0 : index
    %0 = vector.load %arg1[%c0, %c0_0, %c0_1] : memref<1x930x16xf32, #tpu.memory_space<vmem>>, vector<1x840x16xf32>
    %1 = vector.shape_cast %0 : vector<1x840x16xf32> to vector<840x16xf32>
    %c0_2 = arith.constant 0 : index
    %c1 = arith.constant 1 : index
    %c0_3 = arith.constant 0 : index
    %2 = vector.load %arg1[%c0_2, %c1, %c0_3] : memref<1x930x16xf32, #tpu.memory_space<vmem>>, vector<1x840x16xf32>
    %3 = vector.shape_cast %2 : vector<1x840x16xf32> to vector<840x16xf32>
    %4 = arith.maximumf %1, %3 : vector<840x16xf32>
    %c0_4 = arith.constant 0 : index
    %c2 = arith.constant 2 : index
    %c0_5 = arith.constant 0 : index
    %5 = vector.load %arg1[%c0_4, %c2, %c0_5] : memref<1x930x16xf32, #tpu.memory_space<vmem>>, vector<1x840x16xf32>
    %6 = vector.shape_cast %5 : vector<1x840x16xf32> to vector<840x16xf32>
    %7 = arith.maximumf %4, %6 : vector<840x16xf32>
    %c0_6 = arith.constant 0 : index
    %c30 = arith.constant 30 : index
    %c0_7 = arith.constant 0 : index
    %8 = vector.load %arg1[%c0_6, %c30, %c0_7] : memref<1x930x16xf32, #tpu.memory_space<vmem>>, vector<1x840x16xf32>
    %9 = vector.shape_cast %8 : vector<1x840x16xf32> to vector<840x16xf32>
    %10 = arith.maximumf %7, %9 : vector<840x16xf32>
    %c0_8 = arith.constant 0 : index
    %c31 = arith.constant 31 : index
    %c0_9 = arith.constant 0 : index
    %11 = vector.load %arg1[%c0_8, %c31, %c0_9] : memref<1x930x16xf32, #tpu.memory_space<vmem>>, vector<1x840x16xf32>
    %12 = vector.shape_cast %11 : vector<1x840x16xf32> to vector<840x16xf32>
    %13 = arith.maximumf %10, %12 : vector<840x16xf32>
    %c0_10 = arith.constant 0 : index
    %c32 = arith.constant 32 : index
    %c0_11 = arith.constant 0 : index
    %14 = vector.load %arg1[%c0_10, %c32, %c0_11] : memref<1x930x16xf32, #tpu.memory_space<vmem>>, vector<1x840x16xf32>
    %15 = vector.shape_cast %14 : vector<1x840x16xf32> to vector<840x16xf32>
    %16 = arith.maximumf %13, %15 : vector<840x16xf32>
    %c0_12 = arith.constant 0 : index
    %c60 = arith.constant 60 : index
    %c0_13 = arith.constant 0 : index
    %17 = vector.load %arg1[%c0_12, %c60, %c0_13] : memref<1x930x16xf32, #tpu.memory_space<vmem>>, vector<1x840x16xf32>
    %18 = vector.shape_cast %17 : vector<1x840x16xf32> to vector<840x16xf32>
    %19 = arith.maximumf %16, %18 : vector<840x16xf32>
    %c0_14 = arith.constant 0 : index
    %c61 = arith.constant 61 : index
    %c0_15 = arith.constant 0 : index
    %20 = vector.load %arg1[%c0_14, %c61, %c0_15] : memref<1x930x16xf32, #tpu.memory_space<vmem>>, vector<1x840x16xf32>
    %21 = vector.shape_cast %20 : vector<1x840x16xf32> to vector<840x16xf32>
    %22 = arith.maximumf %19, %21 : vector<840x16xf32>
    %c0_16 = arith.constant 0 : index
    %c62 = arith.constant 62 : index
    %c0_17 = arith.constant 0 : index
    %23 = vector.load %arg1[%c0_16, %c62, %c0_17] : memref<1x930x16xf32, #tpu.memory_space<vmem>>, vector<1x840x16xf32>
    %24 = vector.shape_cast %23 : vector<1x840x16xf32> to vector<840x16xf32>
    %25 = arith.maximumf %22, %24 : vector<840x16xf32>
    %c0_18 = arith.constant 0 : index
    %c0_19 = arith.constant 0 : index
    %c0_20 = arith.constant 0 : index
    %26 = vector.load %arg2[%c0_18, %c0_19, %c0_20] : memref<1x840x16xf32, #tpu.memory_space<vmem>>, vector<1x840x16xf32>
    %27 = vector.shape_cast %26 : vector<1x840x16xf32> to vector<840x16xf32>
    %28 = vector.shape_cast %25 : vector<840x16xf32> to vector<1x840x16xf32>
    tpu.vector_store %arg2[%c0_18, %c0_19, %c0_20], %28 {strides = array<i32>} : memref<1x840x16xf32, #tpu.memory_space<vmem>>, vector<1x840x16xf32>,
    return
  }
  func.func @transform_0(%arg0: i32) -> (i32, i32, i32) {
    %c0_i32 = arith.constant 0 : i32
    %c0_i32_0 = arith.constant 0 : i32
    %c0_i32_1 = arith.constant 0 : i32
    return %arg0, %c0_i32, %c0_i32_0 : i32, i32, i32
  }
  func.func @transform_1(%arg0: i32) -> (i32, i32, i32) {
    %c0_i32 = arith.constant 0 : i32
    %c0_i32_0 = arith.constant 0 : i32
    %c0_i32_1 = arith.constant 0 : i32
    return %arg0, %c0_i32, %c0_i32_0 : i32, i32, i32
  }
}

module attributes {stable_mosaic.version = 11 : i64} {
  func.func @_fused_mm_kernel(%arg0: i32, %arg1: memref<392x16xf32, #tpu.memory_space<vmem>>, %arg2: memref<16x16xbf16, #tpu.memory_space<vmem>>, %arg3: memref<1x16xf32, #tpu.memory_space<vmem>>, %arg4: memref<1x16xf32, #tpu.memory_space<vmem>>, %arg5: memref<1x16xf32, #tpu.memory_space<vmem>>, %arg6: memref<1x16xf32, #tpu.memory_space<vmem>>, %arg7: memref<392x16xf32, #tpu.memory_space<vmem>>) attributes {dimension_semantics = [#tpu.dimension_semantics<parallel>], iteration_bounds = array<i64: 1>, scalar_prefetch = 0 : i64, scratch_operands = 0 : i64, tpu.core_type = #tpu.core_type<tc>, window_params = [{transform_indices = @transform_0, window_bounds = array<i64: 392, 16>}, {pipeline_mode = #tpu.pipeline_mode<synchronous>, transform_indices = @transform_1, window_bounds = array<i64: 16, 16>}, {pipeline_mode = #tpu.pipeline_mode<synchronous>, transform_indices = @transform_2, window_bounds = array<i64: 1, 16>}, {pipeline_mode = #tpu.pipeline_mode<synchronous>, transform_indices = @transform_3, window_bounds = array<i64: 1, 16>}, {pipeline_mode = #tpu.pipeline_mode<synchronous>, transform_indices = @transform_4, window_bounds = array<i64: 1, 16>}, {pipeline_mode = #tpu.pipeline_mode<synchronous>, transform_indices = @transform_5, window_bounds = array<i64: 1, 16>}, {transform_indices = @transform_6, window_bounds = array<i64: 392, 16>}]} {
    %c0 = arith.constant 0 : index
    %c0_0 = arith.constant 0 : index
    %0 = vector.load %arg1[%c0, %c0_0] : memref<392x16xf32, #tpu.memory_space<vmem>>, vector<392x16xf32>
    %c0_1 = arith.constant 0 : index
    %c0_2 = arith.constant 0 : index
    %1 = vector.load %arg3[%c0_1, %c0_2] : memref<1x16xf32, #tpu.memory_space<vmem>>, vector<1x16xf32>
    %2 = vector.broadcast %1 : vector<1x16xf32> to vector<392x16xf32>
    %3 = arith.mulf %0, %2 : vector<392x16xf32>
    %c0_3 = arith.constant 0 : index
    %c0_4 = arith.constant 0 : index
    %4 = vector.load %arg4[%c0_3, %c0_4] : memref<1x16xf32, #tpu.memory_space<vmem>>, vector<1x16xf32>
    %5 = vector.broadcast %4 : vector<1x16xf32> to vector<392x16xf32>
    %6 = arith.addf %3, %5 : vector<392x16xf32>
    %cst = arith.constant 0.000000e+00 : f32
    %7 = vector.broadcast %cst : f32 to vector<392x16xf32>
    %8 = arith.maximumf %6, %7 : vector<392x16xf32>
    %9 = arith.truncf %8 : vector<392x16xf32> to vector<392x16xbf16>
    %c0_5 = arith.constant 0 : index
    %c0_6 = arith.constant 0 : index
    %10 = vector.load %arg2[%c0_5, %c0_6] : memref<16x16xbf16, #tpu.memory_space<vmem>>, vector<16x16xbf16>
    %cst_7 = arith.constant dense<0.000000e+00> : vector<392x16xf32>
    %11 = tpu.matmul %9, %10, %cst_7 {dimension_numbers = #tpu.dot_dimension_numbers<[1], [0], [0], [1], [0, 0, 1, 1], [], []>} : vector<392x16xbf16>, vector<16x16xbf16>, vector<392x16xf32> -> vector<392x16xf32>
    %c0_8 = arith.constant 0 : index
    %c0_9 = arith.constant 0 : index
    %12 = vector.load %arg5[%c0_8, %c0_9] : memref<1x16xf32, #tpu.memory_space<vmem>>, vector<1x16xf32>
    %13 = vector.broadcast %12 : vector<1x16xf32> to vector<392x16xf32>
    %14 = arith.mulf %11, %13 : vector<392x16xf32>
    %c0_10 = arith.constant 0 : index
    %c0_11 = arith.constant 0 : index
    %15 = vector.load %arg6[%c0_10, %c0_11] : memref<1x16xf32, #tpu.memory_space<vmem>>, vector<1x16xf32>
    %16 = vector.broadcast %15 : vector<1x16xf32> to vector<392x16xf32>
    %17 = arith.addf %14, %16 : vector<392x16xf32>
    %cst_12 = arith.constant 0.000000e+00 : f32
    %18 = vector.broadcast %cst_12 : f32 to vector<392x16xf32>
    %19 = arith.maximumf %17, %18 : vector<392x16xf32>
    %c0_13 = arith.constant 0 : index
    %c0_14 = arith.constant 0 : index
    %20 = vector.load %arg7[%c0_13, %c0_14] : memref<392x16xf32, #tpu.memory_space<vmem>>, vector<392x16xf32>
    tpu.vector_store %arg7[%c0_13, %c0_14], %19 {strides = array<i32>} : memref<392x16xf32, #tpu.memory_space<vmem>>, vector<392x16xf32>,
    return
  }
  func.func @transform_0(%arg0: i32) -> (i32, i32) {
    %c0_i32 = arith.constant 0 : i32
    %c0_i32_0 = arith.constant 0 : i32
    return %arg0, %c0_i32 : i32, i32
  }
  func.func @transform_1(%arg0: i32) -> (i32, i32) {
    %c0_i32 = arith.constant 0 : i32
    %c0_i32_0 = arith.constant 0 : i32
    %c0_i32_1 = arith.constant 0 : i32
    return %c0_i32, %c0_i32_0 : i32, i32
  }
  func.func @transform_2(%arg0: i32) -> (i32, i32) {
    %c0_i32 = arith.constant 0 : i32
    %c0_i32_0 = arith.constant 0 : i32
    %c0_i32_1 = arith.constant 0 : i32
    return %c0_i32, %c0_i32_0 : i32, i32
  }
  func.func @transform_3(%arg0: i32) -> (i32, i32) {
    %c0_i32 = arith.constant 0 : i32
    %c0_i32_0 = arith.constant 0 : i32
    %c0_i32_1 = arith.constant 0 : i32
    return %c0_i32, %c0_i32_0 : i32, i32
  }
  func.func @transform_4(%arg0: i32) -> (i32, i32) {
    %c0_i32 = arith.constant 0 : i32
    %c0_i32_0 = arith.constant 0 : i32
    %c0_i32_1 = arith.constant 0 : i32
    return %c0_i32, %c0_i32_0 : i32, i32
  }
  func.func @transform_5(%arg0: i32) -> (i32, i32) {
    %c0_i32 = arith.constant 0 : i32
    %c0_i32_0 = arith.constant 0 : i32
    %c0_i32_1 = arith.constant 0 : i32
    return %c0_i32, %c0_i32_0 : i32, i32
  }
  func.func @transform_6(%arg0: i32) -> (i32, i32) {
    %c0_i32 = arith.constant 0 : i32
    %c0_i32_0 = arith.constant 0 : i32
    return %arg0, %c0_i32 : i32, i32
  }
}

module attributes {stable_mosaic.version = 11 : i64} {
  func.func @_conv3x3_kernel(%arg0: i32, %arg1: memref<1x272x16xf32, #tpu.memory_space<vmem>>, %arg2: memref<9x16x8xbf16, #tpu.memory_space<vmem>>, %arg3: memref<1x224x8xf32, #tpu.memory_space<vmem>>) attributes {dimension_semantics = [#tpu.dimension_semantics<parallel>], iteration_bounds = array<i64: 2>, scalar_prefetch = 0 : i64, scratch_operands = 0 : i64, tpu.core_type = #tpu.core_type<tc>, window_params = [{transform_indices = @transform_0, window_bounds = array<i64: 1, 272, 16>}, {pipeline_mode = #tpu.pipeline_mode<synchronous>, transform_indices = @transform_1, window_bounds = array<i64: 9, 16, 8>}, {transform_indices = @transform_2, window_bounds = array<i64: 1, 224, 8>}]} {
    %c0 = arith.constant 0 : index
    %c0_0 = arith.constant 0 : index
    %c0_1 = arith.constant 0 : index
    %0 = vector.load %arg1[%c0, %c0_0, %c0_1] : memref<1x272x16xf32, #tpu.memory_space<vmem>>, vector<1x224x16xf32>
    %1 = vector.shape_cast %0 : vector<1x224x16xf32> to vector<224x16xf32>
    %2 = arith.truncf %1 : vector<224x16xf32> to vector<224x16xbf16>
    %c0_2 = arith.constant 0 : index
    %c0_3 = arith.constant 0 : index
    %c0_4 = arith.constant 0 : index
    %3 = vector.load %arg2[%c0_2, %c0_3, %c0_4] : memref<9x16x8xbf16, #tpu.memory_space<vmem>>, vector<1x16x8xbf16>
    %4 = vector.shape_cast %3 : vector<1x16x8xbf16> to vector<16x8xbf16>
    %cst = arith.constant dense<0.000000e+00> : vector<224x8xf32>
    %5 = tpu.matmul %2, %4, %cst {dimension_numbers = #tpu.dot_dimension_numbers<[1], [0], [0], [1], [0, 0, 1, 1], [], []>} : vector<224x16xbf16>, vector<16x8xbf16>, vector<224x8xf32> -> vector<224x8xf32>
    %c0_5 = arith.constant 0 : index
    %c1 = arith.constant 1 : index
    %c0_6 = arith.constant 0 : index
    %6 = vector.load %arg1[%c0_5, %c1, %c0_6] : memref<1x272x16xf32, #tpu.memory_space<vmem>>, vector<1x224x16xf32>
    %7 = vector.shape_cast %6 : vector<1x224x16xf32> to vector<224x16xf32>
    %8 = arith.truncf %7 : vector<224x16xf32> to vector<224x16xbf16>
    %c1_7 = arith.constant 1 : index
    %c0_8 = arith.constant 0 : index
    %c0_9 = arith.constant 0 : index
    %9 = vector.load %arg2[%c1_7, %c0_8, %c0_9] : memref<9x16x8xbf16, #tpu.memory_space<vmem>>, vector<1x16x8xbf16>
    %10 = vector.shape_cast %9 : vector<1x16x8xbf16> to vector<16x8xbf16>
    %cst_10 = arith.constant dense<0.000000e+00> : vector<224x8xf32>
    %11 = tpu.matmul %8, %10, %cst_10 {dimension_numbers = #tpu.dot_dimension_numbers<[1], [0], [0], [1], [0, 0, 1, 1], [], []>} : vector<224x16xbf16>, vector<16x8xbf16>, vector<224x8xf32> -> vector<224x8xf32>
    %12 = arith.addf %5, %11 : vector<224x8xf32>
    %c0_11 = arith.constant 0 : index
    %c2 = arith.constant 2 : index
    %c0_12 = arith.constant 0 : index
    %13 = vector.load %arg1[%c0_11, %c2, %c0_12] : memref<1x272x16xf32, #tpu.memory_space<vmem>>, vector<1x224x16xf32>
    %14 = vector.shape_cast %13 : vector<1x224x16xf32> to vector<224x16xf32>
    %15 = arith.truncf %14 : vector<224x16xf32> to vector<224x16xbf16>
    %c2_13 = arith.constant 2 : index
    %c0_14 = arith.constant 0 : index
    %c0_15 = arith.constant 0 : index
    %16 = vector.load %arg2[%c2_13, %c0_14, %c0_15] : memref<9x16x8xbf16, #tpu.memory_space<vmem>>, vector<1x16x8xbf16>
    %17 = vector.shape_cast %16 : vector<1x16x8xbf16> to vector<16x8xbf16>
    %cst_16 = arith.constant dense<0.000000e+00> : vector<224x8xf32>
    %18 = tpu.matmul %15, %17, %cst_16 {dimension_numbers = #tpu.dot_dimension_numbers<[1], [0], [0], [1], [0, 0, 1, 1], [], []>} : vector<224x16xbf16>, vector<16x8xbf16>, vector<224x8xf32> -> vector<224x8xf32>
    %19 = arith.addf %12, %18 : vector<224x8xf32>
    %c0_17 = arith.constant 0 : index
    %c16 = arith.constant 16 : index
    %c0_18 = arith.constant 0 : index
    %20 = vector.load %arg1[%c0_17, %c16, %c0_18] : memref<1x272x16xf32, #tpu.memory_space<vmem>>, vector<1x224x16xf32>
    %21 = vector.shape_cast %20 : vector<1x224x16xf32> to vector<224x16xf32>
    %22 = arith.truncf %21 : vector<224x16xf32> to vector<224x16xbf16>
    %c3 = arith.constant 3 : index
    %c0_19 = arith.constant 0 : index
    %c0_20 = arith.constant 0 : index
    %23 = vector.load %arg2[%c3, %c0_19, %c0_20] : memref<9x16x8xbf16, #tpu.memory_space<vmem>>, vector<1x16x8xbf16>
    %24 = vector.shape_cast %23 : vector<1x16x8xbf16> to vector<16x8xbf16>
    %cst_21 = arith.constant dense<0.000000e+00> : vector<224x8xf32>
    %25 = tpu.matmul %22, %24, %cst_21 {dimension_numbers = #tpu.dot_dimension_numbers<[1], [0], [0], [1], [0, 0, 1, 1], [], []>} : vector<224x16xbf16>, vector<16x8xbf16>, vector<224x8xf32> -> vector<224x8xf32>
    %26 = arith.addf %19, %25 : vector<224x8xf32>
    %c0_22 = arith.constant 0 : index
    %c17 = arith.constant 17 : index
    %c0_23 = arith.constant 0 : index
    %27 = vector.load %arg1[%c0_22, %c17, %c0_23] : memref<1x272x16xf32, #tpu.memory_space<vmem>>, vector<1x224x16xf32>
    %28 = vector.shape_cast %27 : vector<1x224x16xf32> to vector<224x16xf32>
    %29 = arith.truncf %28 : vector<224x16xf32> to vector<224x16xbf16>
    %c4 = arith.constant 4 : index
    %c0_24 = arith.constant 0 : index
    %c0_25 = arith.constant 0 : index
    %30 = vector.load %arg2[%c4, %c0_24, %c0_25] : memref<9x16x8xbf16, #tpu.memory_space<vmem>>, vector<1x16x8xbf16>
    %31 = vector.shape_cast %30 : vector<1x16x8xbf16> to vector<16x8xbf16>
    %cst_26 = arith.constant dense<0.000000e+00> : vector<224x8xf32>
    %32 = tpu.matmul %29, %31, %cst_26 {dimension_numbers = #tpu.dot_dimension_numbers<[1], [0], [0], [1], [0, 0, 1, 1], [], []>} : vector<224x16xbf16>, vector<16x8xbf16>, vector<224x8xf32> -> vector<224x8xf32>
    %33 = arith.addf %26, %32 : vector<224x8xf32>
    %c0_27 = arith.constant 0 : index
    %c18 = arith.constant 18 : index
    %c0_28 = arith.constant 0 : index
    %34 = vector.load %arg1[%c0_27, %c18, %c0_28] : memref<1x272x16xf32, #tpu.memory_space<vmem>>, vector<1x224x16xf32>
    %35 = vector.shape_cast %34 : vector<1x224x16xf32> to vector<224x16xf32>
    %36 = arith.truncf %35 : vector<224x16xf32> to vector<224x16xbf16>
    %c5 = arith.constant 5 : index
    %c0_29 = arith.constant 0 : index
    %c0_30 = arith.constant 0 : index
    %37 = vector.load %arg2[%c5, %c0_29, %c0_30] : memref<9x16x8xbf16, #tpu.memory_space<vmem>>, vector<1x16x8xbf16>
    %38 = vector.shape_cast %37 : vector<1x16x8xbf16> to vector<16x8xbf16>
    %cst_31 = arith.constant dense<0.000000e+00> : vector<224x8xf32>
    %39 = tpu.matmul %36, %38, %cst_31 {dimension_numbers = #tpu.dot_dimension_numbers<[1], [0], [0], [1], [0, 0, 1, 1], [], []>} : vector<224x16xbf16>, vector<16x8xbf16>, vector<224x8xf32> -> vector<224x8xf32>
    %40 = arith.addf %33, %39 : vector<224x8xf32>
    %c0_32 = arith.constant 0 : index
    %c32 = arith.constant 32 : index
    %c0_33 = arith.constant 0 : index
    %41 = vector.load %arg1[%c0_32, %c32, %c0_33] : memref<1x272x16xf32, #tpu.memory_space<vmem>>, vector<1x224x16xf32>
    %42 = vector.shape_cast %41 : vector<1x224x16xf32> to vector<224x16xf32>
    %43 = arith.truncf %42 : vector<224x16xf32> to vector<224x16xbf16>
    %c6 = arith.constant 6 : index
    %c0_34 = arith.constant 0 : index
    %c0_35 = arith.constant 0 : index
    %44 = vector.load %arg2[%c6, %c0_34, %c0_35] : memref<9x16x8xbf16, #tpu.memory_space<vmem>>, vector<1x16x8xbf16>
    %45 = vector.shape_cast %44 : vector<1x16x8xbf16> to vector<16x8xbf16>
    %cst_36 = arith.constant dense<0.000000e+00> : vector<224x8xf32>
    %46 = tpu.matmul %43, %45, %cst_36 {dimension_numbers = #tpu.dot_dimension_numbers<[1], [0], [0], [1], [0, 0, 1, 1], [], []>} : vector<224x16xbf16>, vector<16x8xbf16>, vector<224x8xf32> -> vector<224x8xf32>
    %47 = arith.addf %40, %46 : vector<224x8xf32>
    %c0_37 = arith.constant 0 : index
    %c33 = arith.constant 33 : index
    %c0_38 = arith.constant 0 : index
    %48 = vector.load %arg1[%c0_37, %c33, %c0_38] : memref<1x272x16xf32, #tpu.memory_space<vmem>>, vector<1x224x16xf32>
    %49 = vector.shape_cast %48 : vector<1x224x16xf32> to vector<224x16xf32>
    %50 = arith.truncf %49 : vector<224x16xf32> to vector<224x16xbf16>
    %c7 = arith.constant 7 : index
    %c0_39 = arith.constant 0 : index
    %c0_40 = arith.constant 0 : index
    %51 = vector.load %arg2[%c7, %c0_39, %c0_40] : memref<9x16x8xbf16, #tpu.memory_space<vmem>>, vector<1x16x8xbf16>
    %52 = vector.shape_cast %51 : vector<1x16x8xbf16> to vector<16x8xbf16>
    %cst_41 = arith.constant dense<0.000000e+00> : vector<224x8xf32>
    %53 = tpu.matmul %50, %52, %cst_41 {dimension_numbers = #tpu.dot_dimension_numbers<[1], [0], [0], [1], [0, 0, 1, 1], [], []>} : vector<224x16xbf16>, vector<16x8xbf16>, vector<224x8xf32> -> vector<224x8xf32>
    %54 = arith.addf %47, %53 : vector<224x8xf32>
    %c0_42 = arith.constant 0 : index
    %c34 = arith.constant 34 : index
    %c0_43 = arith.constant 0 : index
    %55 = vector.load %arg1[%c0_42, %c34, %c0_43] : memref<1x272x16xf32, #tpu.memory_space<vmem>>, vector<1x224x16xf32>
    %56 = vector.shape_cast %55 : vector<1x224x16xf32> to vector<224x16xf32>
    %57 = arith.truncf %56 : vector<224x16xf32> to vector<224x16xbf16>
    %c8 = arith.constant 8 : index
    %c0_44 = arith.constant 0 : index
    %c0_45 = arith.constant 0 : index
    %58 = vector.load %arg2[%c8, %c0_44, %c0_45] : memref<9x16x8xbf16, #tpu.memory_space<vmem>>, vector<1x16x8xbf16>
    %59 = vector.shape_cast %58 : vector<1x16x8xbf16> to vector<16x8xbf16>
    %cst_46 = arith.constant dense<0.000000e+00> : vector<224x8xf32>
    %60 = tpu.matmul %57, %59, %cst_46 {dimension_numbers = #tpu.dot_dimension_numbers<[1], [0], [0], [1], [0, 0, 1, 1], [], []>} : vector<224x16xbf16>, vector<16x8xbf16>, vector<224x8xf32> -> vector<224x8xf32>
    %61 = arith.addf %54, %60 : vector<224x8xf32>
    %c0_47 = arith.constant 0 : index
    %c0_48 = arith.constant 0 : index
    %c0_49 = arith.constant 0 : index
    %62 = vector.load %arg3[%c0_47, %c0_48, %c0_49] : memref<1x224x8xf32, #tpu.memory_space<vmem>>, vector<1x224x8xf32>
    %63 = vector.shape_cast %62 : vector<1x224x8xf32> to vector<224x8xf32>
    %64 = vector.shape_cast %61 : vector<224x8xf32> to vector<1x224x8xf32>
    tpu.vector_store %arg3[%c0_47, %c0_48, %c0_49], %64 {strides = array<i32>} : memref<1x224x8xf32, #tpu.memory_space<vmem>>, vector<1x224x8xf32>,
    return
  }
  func.func @transform_0(%arg0: i32) -> (i32, i32, i32) {
    %c0_i32 = arith.constant 0 : i32
    %c0_i32_0 = arith.constant 0 : i32
    %c0_i32_1 = arith.constant 0 : i32
    return %arg0, %c0_i32, %c0_i32_0 : i32, i32, i32
  }
  func.func @transform_1(%arg0: i32) -> (i32, i32, i32) {
    %c0_i32 = arith.constant 0 : i32
    %c0_i32_0 = arith.constant 0 : i32
    %c0_i32_1 = arith.constant 0 : i32
    %c0_i32_2 = arith.constant 0 : i32
    return %c0_i32, %c0_i32_0, %c0_i32_1 : i32, i32, i32
  }
  func.func @transform_2(%arg0: i32) -> (i32, i32, i32) {
    %c0_i32 = arith.constant 0 : i32
    %c0_i32_0 = arith.constant 0 : i32
    %c0_i32_1 = arith.constant 0 : i32
    return %arg0, %c0_i32, %c0_i32_0 : i32, i32, i32
  }
}

module attributes {stable_mosaic.version = 11 : i64} {
  func.func @_fused_mm_kernel(%arg0: i32, %arg1: memref<392x24xf32, #tpu.memory_space<vmem>>, %arg2: memref<24x16xbf16, #tpu.memory_space<vmem>>, %arg3: memref<1x24xf32, #tpu.memory_space<vmem>>, %arg4: memref<1x24xf32, #tpu.memory_space<vmem>>, %arg5: memref<1x16xf32, #tpu.memory_space<vmem>>, %arg6: memref<1x16xf32, #tpu.memory_space<vmem>>, %arg7: memref<392x16xf32, #tpu.memory_space<vmem>>) attributes {dimension_semantics = [#tpu.dimension_semantics<parallel>], iteration_bounds = array<i64: 1>, scalar_prefetch = 0 : i64, scratch_operands = 0 : i64, tpu.core_type = #tpu.core_type<tc>, window_params = [{transform_indices = @transform_0, window_bounds = array<i64: 392, 24>}, {pipeline_mode = #tpu.pipeline_mode<synchronous>, transform_indices = @transform_1, window_bounds = array<i64: 24, 16>}, {pipeline_mode = #tpu.pipeline_mode<synchronous>, transform_indices = @transform_2, window_bounds = array<i64: 1, 24>}, {pipeline_mode = #tpu.pipeline_mode<synchronous>, transform_indices = @transform_3, window_bounds = array<i64: 1, 24>}, {pipeline_mode = #tpu.pipeline_mode<synchronous>, transform_indices = @transform_4, window_bounds = array<i64: 1, 16>}, {pipeline_mode = #tpu.pipeline_mode<synchronous>, transform_indices = @transform_5, window_bounds = array<i64: 1, 16>}, {transform_indices = @transform_6, window_bounds = array<i64: 392, 16>}]} {
    %c0 = arith.constant 0 : index
    %c0_0 = arith.constant 0 : index
    %0 = vector.load %arg1[%c0, %c0_0] : memref<392x24xf32, #tpu.memory_space<vmem>>, vector<392x24xf32>
    %c0_1 = arith.constant 0 : index
    %c0_2 = arith.constant 0 : index
    %1 = vector.load %arg3[%c0_1, %c0_2] : memref<1x24xf32, #tpu.memory_space<vmem>>, vector<1x24xf32>
    %2 = vector.broadcast %1 : vector<1x24xf32> to vector<392x24xf32>
    %3 = arith.mulf %0, %2 : vector<392x24xf32>
    %c0_3 = arith.constant 0 : index
    %c0_4 = arith.constant 0 : index
    %4 = vector.load %arg4[%c0_3, %c0_4] : memref<1x24xf32, #tpu.memory_space<vmem>>, vector<1x24xf32>
    %5 = vector.broadcast %4 : vector<1x24xf32> to vector<392x24xf32>
    %6 = arith.addf %3, %5 : vector<392x24xf32>
    %cst = arith.constant 0.000000e+00 : f32
    %7 = vector.broadcast %cst : f32 to vector<392x24xf32>
    %8 = arith.maximumf %6, %7 : vector<392x24xf32>
    %9 = arith.truncf %8 : vector<392x24xf32> to vector<392x24xbf16>
    %c0_5 = arith.constant 0 : index
    %c0_6 = arith.constant 0 : index
    %10 = vector.load %arg2[%c0_5, %c0_6] : memref<24x16xbf16, #tpu.memory_space<vmem>>, vector<24x16xbf16>
    %cst_7 = arith.constant dense<0.000000e+00> : vector<392x16xf32>
    %11 = tpu.matmul %9, %10, %cst_7 {dimension_numbers = #tpu.dot_dimension_numbers<[1], [0], [0], [1], [0, 0, 1, 1], [], []>} : vector<392x24xbf16>, vector<24x16xbf16>, vector<392x16xf32> -> vector<392x16xf32>
    %c0_8 = arith.constant 0 : index
    %c0_9 = arith.constant 0 : index
    %12 = vector.load %arg5[%c0_8, %c0_9] : memref<1x16xf32, #tpu.memory_space<vmem>>, vector<1x16xf32>
    %13 = vector.broadcast %12 : vector<1x16xf32> to vector<392x16xf32>
    %14 = arith.mulf %11, %13 : vector<392x16xf32>
    %c0_10 = arith.constant 0 : index
    %c0_11 = arith.constant 0 : index
    %15 = vector.load %arg6[%c0_10, %c0_11] : memref<1x16xf32, #tpu.memory_space<vmem>>, vector<1x16xf32>
    %16 = vector.broadcast %15 : vector<1x16xf32> to vector<392x16xf32>
    %17 = arith.addf %14, %16 : vector<392x16xf32>
    %cst_12 = arith.constant 0.000000e+00 : f32
    %18 = vector.broadcast %cst_12 : f32 to vector<392x16xf32>
    %19 = arith.maximumf %17, %18 : vector<392x16xf32>
    %c0_13 = arith.constant 0 : index
    %c0_14 = arith.constant 0 : index
    %20 = vector.load %arg7[%c0_13, %c0_14] : memref<392x16xf32, #tpu.memory_space<vmem>>, vector<392x16xf32>
    tpu.vector_store %arg7[%c0_13, %c0_14], %19 {strides = array<i32>} : memref<392x16xf32, #tpu.memory_space<vmem>>, vector<392x16xf32>,
    return
  }
  func.func @transform_0(%arg0: i32) -> (i32, i32) {
    %c0_i32 = arith.constant 0 : i32
    %c0_i32_0 = arith.constant 0 : i32
    return %arg0, %c0_i32 : i32, i32
  }
  func.func @transform_1(%arg0: i32) -> (i32, i32) {
    %c0_i32 = arith.constant 0 : i32
    %c0_i32_0 = arith.constant 0 : i32
    %c0_i32_1 = arith.constant 0 : i32
    return %c0_i32, %c0_i32_0 : i32, i32
  }
  func.func @transform_2(%arg0: i32) -> (i32, i32) {
    %c0_i32 = arith.constant 0 : i32
    %c0_i32_0 = arith.constant 0 : i32
    %c0_i32_1 = arith.constant 0 : i32
    return %c0_i32, %c0_i32_0 : i32, i32
  }
  func.func @transform_3(%arg0: i32) -> (i32, i32) {
    %c0_i32 = arith.constant 0 : i32
    %c0_i32_0 = arith.constant 0 : i32
    %c0_i32_1 = arith.constant 0 : i32
    return %c0_i32, %c0_i32_0 : i32, i32
  }
  func.func @transform_4(%arg0: i32) -> (i32, i32) {
    %c0_i32 = arith.constant 0 : i32
    %c0_i32_0 = arith.constant 0 : i32
    %c0_i32_1 = arith.constant 0 : i32
    return %c0_i32, %c0_i32_0 : i32, i32
  }
  func.func @transform_5(%arg0: i32) -> (i32, i32) {
    %c0_i32 = arith.constant 0 : i32
    %c0_i32_0 = arith.constant 0 : i32
    %c0_i32_1 = arith.constant 0 : i32
    return %c0_i32, %c0_i32_0 : i32, i32
  }
  func.func @transform_6(%arg0: i32) -> (i32, i32) {
    %c0_i32 = arith.constant 0 : i32
    %c0_i32_0 = arith.constant 0 : i32
    return %arg0, %c0_i32 : i32, i32
  }
}

module attributes {stable_mosaic.version = 11 : i64} {
  func.func @_fused_mm_kernel(%arg0: i32, %arg1: memref<392x32xf32, #tpu.memory_space<vmem>>, %arg2: memref<32x16xbf16, #tpu.memory_space<vmem>>, %arg3: memref<1x32xf32, #tpu.memory_space<vmem>>, %arg4: memref<1x32xf32, #tpu.memory_space<vmem>>, %arg5: memref<1x16xf32, #tpu.memory_space<vmem>>, %arg6: memref<1x16xf32, #tpu.memory_space<vmem>>, %arg7: memref<392x16xf32, #tpu.memory_space<vmem>>) attributes {dimension_semantics = [#tpu.dimension_semantics<parallel>], iteration_bounds = array<i64: 1>, scalar_prefetch = 0 : i64, scratch_operands = 0 : i64, tpu.core_type = #tpu.core_type<tc>, window_params = [{transform_indices = @transform_0, window_bounds = array<i64: 392, 32>}, {pipeline_mode = #tpu.pipeline_mode<synchronous>, transform_indices = @transform_1, window_bounds = array<i64: 32, 16>}, {pipeline_mode = #tpu.pipeline_mode<synchronous>, transform_indices = @transform_2, window_bounds = array<i64: 1, 32>}, {pipeline_mode = #tpu.pipeline_mode<synchronous>, transform_indices = @transform_3, window_bounds = array<i64: 1, 32>}, {pipeline_mode = #tpu.pipeline_mode<synchronous>, transform_indices = @transform_4, window_bounds = array<i64: 1, 16>}, {pipeline_mode = #tpu.pipeline_mode<synchronous>, transform_indices = @transform_5, window_bounds = array<i64: 1, 16>}, {transform_indices = @transform_6, window_bounds = array<i64: 392, 16>}]} {
    %c0 = arith.constant 0 : index
    %c0_0 = arith.constant 0 : index
    %0 = vector.load %arg1[%c0, %c0_0] : memref<392x32xf32, #tpu.memory_space<vmem>>, vector<392x32xf32>
    %c0_1 = arith.constant 0 : index
    %c0_2 = arith.constant 0 : index
    %1 = vector.load %arg3[%c0_1, %c0_2] : memref<1x32xf32, #tpu.memory_space<vmem>>, vector<1x32xf32>
    %2 = vector.broadcast %1 : vector<1x32xf32> to vector<392x32xf32>
    %3 = arith.mulf %0, %2 : vector<392x32xf32>
    %c0_3 = arith.constant 0 : index
    %c0_4 = arith.constant 0 : index
    %4 = vector.load %arg4[%c0_3, %c0_4] : memref<1x32xf32, #tpu.memory_space<vmem>>, vector<1x32xf32>
    %5 = vector.broadcast %4 : vector<1x32xf32> to vector<392x32xf32>
    %6 = arith.addf %3, %5 : vector<392x32xf32>
    %cst = arith.constant 0.000000e+00 : f32
    %7 = vector.broadcast %cst : f32 to vector<392x32xf32>
    %8 = arith.maximumf %6, %7 : vector<392x32xf32>
    %9 = arith.truncf %8 : vector<392x32xf32> to vector<392x32xbf16>
    %c0_5 = arith.constant 0 : index
    %c0_6 = arith.constant 0 : index
    %10 = vector.load %arg2[%c0_5, %c0_6] : memref<32x16xbf16, #tpu.memory_space<vmem>>, vector<32x16xbf16>
    %cst_7 = arith.constant dense<0.000000e+00> : vector<392x16xf32>
    %11 = tpu.matmul %9, %10, %cst_7 {dimension_numbers = #tpu.dot_dimension_numbers<[1], [0], [0], [1], [0, 0, 1, 1], [], []>} : vector<392x32xbf16>, vector<32x16xbf16>, vector<392x16xf32> -> vector<392x16xf32>
    %c0_8 = arith.constant 0 : index
    %c0_9 = arith.constant 0 : index
    %12 = vector.load %arg5[%c0_8, %c0_9] : memref<1x16xf32, #tpu.memory_space<vmem>>, vector<1x16xf32>
    %13 = vector.broadcast %12 : vector<1x16xf32> to vector<392x16xf32>
    %14 = arith.mulf %11, %13 : vector<392x16xf32>
    %c0_10 = arith.constant 0 : index
    %c0_11 = arith.constant 0 : index
    %15 = vector.load %arg6[%c0_10, %c0_11] : memref<1x16xf32, #tpu.memory_space<vmem>>, vector<1x16xf32>
    %16 = vector.broadcast %15 : vector<1x16xf32> to vector<392x16xf32>
    %17 = arith.addf %14, %16 : vector<392x16xf32>
    %c0_12 = arith.constant 0 : index
    %c0_13 = arith.constant 0 : index
    %18 = vector.load %arg7[%c0_12, %c0_13] : memref<392x16xf32, #tpu.memory_space<vmem>>, vector<392x16xf32>
    tpu.vector_store %arg7[%c0_12, %c0_13], %17 {strides = array<i32>} : memref<392x16xf32, #tpu.memory_space<vmem>>, vector<392x16xf32>,
    return
  }
  func.func @transform_0(%arg0: i32) -> (i32, i32) {
    %c0_i32 = arith.constant 0 : i32
    %c0_i32_0 = arith.constant 0 : i32
    return %arg0, %c0_i32 : i32, i32
  }
  func.func @transform_1(%arg0: i32) -> (i32, i32) {
    %c0_i32 = arith.constant 0 : i32
    %c0_i32_0 = arith.constant 0 : i32
    %c0_i32_1 = arith.constant 0 : i32
    return %c0_i32, %c0_i32_0 : i32, i32
  }
  func.func @transform_2(%arg0: i32) -> (i32, i32) {
    %c0_i32 = arith.constant 0 : i32
    %c0_i32_0 = arith.constant 0 : i32
    %c0_i32_1 = arith.constant 0 : i32
    return %c0_i32, %c0_i32_0 : i32, i32
  }
  func.func @transform_3(%arg0: i32) -> (i32, i32) {
    %c0_i32 = arith.constant 0 : i32
    %c0_i32_0 = arith.constant 0 : i32
    %c0_i32_1 = arith.constant 0 : i32
    return %c0_i32, %c0_i32_0 : i32, i32
  }
  func.func @transform_4(%arg0: i32) -> (i32, i32) {
    %c0_i32 = arith.constant 0 : i32
    %c0_i32_0 = arith.constant 0 : i32
    %c0_i32_1 = arith.constant 0 : i32
    return %c0_i32, %c0_i32_0 : i32, i32
  }
  func.func @transform_5(%arg0: i32) -> (i32, i32) {
    %c0_i32 = arith.constant 0 : i32
    %c0_i32_0 = arith.constant 0 : i32
    %c0_i32_1 = arith.constant 0 : i32
    return %c0_i32, %c0_i32_0 : i32, i32
  }
  func.func @transform_6(%arg0: i32) -> (i32, i32) {
    %c0_i32 = arith.constant 0 : i32
    %c0_i32_0 = arith.constant 0 : i32
    return %arg0, %c0_i32 : i32, i32
  }
}

module attributes {stable_mosaic.version = 11 : i64} {
  func.func @_shift_pool_kernel(%arg0: i32, %arg1: memref<1x210x16xf32, #tpu.memory_space<vmem>>, %arg2: memref<1x182x16xf32, #tpu.memory_space<vmem>>) attributes {dimension_semantics = [#tpu.dimension_semantics<parallel>], iteration_bounds = array<i64: 2>, scalar_prefetch = 0 : i64, scratch_operands = 0 : i64, tpu.core_type = #tpu.core_type<tc>, window_params = [{transform_indices = @transform_0, window_bounds = array<i64: 1, 210, 16>}, {transform_indices = @transform_1, window_bounds = array<i64: 1, 182, 16>}]} {
    %c0 = arith.constant 0 : index
    %c0_0 = arith.constant 0 : index
    %c0_1 = arith.constant 0 : index
    %0 = vector.load %arg1[%c0, %c0_0, %c0_1] : memref<1x210x16xf32, #tpu.memory_space<vmem>>, vector<1x182x16xf32>
    %1 = vector.shape_cast %0 : vector<1x182x16xf32> to vector<182x16xf32>
    %c0_2 = arith.constant 0 : index
    %c1 = arith.constant 1 : index
    %c0_3 = arith.constant 0 : index
    %2 = vector.load %arg1[%c0_2, %c1, %c0_3] : memref<1x210x16xf32, #tpu.memory_space<vmem>>, vector<1x182x16xf32>
    %3 = vector.shape_cast %2 : vector<1x182x16xf32> to vector<182x16xf32>
    %4 = arith.addf %1, %3 : vector<182x16xf32>
    %c0_4 = arith.constant 0 : index
    %c14 = arith.constant 14 : index
    %c0_5 = arith.constant 0 : index
    %5 = vector.load %arg1[%c0_4, %c14, %c0_5] : memref<1x210x16xf32, #tpu.memory_space<vmem>>, vector<1x182x16xf32>
    %6 = vector.shape_cast %5 : vector<1x182x16xf32> to vector<182x16xf32>
    %7 = arith.addf %4, %6 : vector<182x16xf32>
    %c0_6 = arith.constant 0 : index
    %c15 = arith.constant 15 : index
    %c0_7 = arith.constant 0 : index
    %8 = vector.load %arg1[%c0_6, %c15, %c0_7] : memref<1x210x16xf32, #tpu.memory_space<vmem>>, vector<1x182x16xf32>
    %9 = vector.shape_cast %8 : vector<1x182x16xf32> to vector<182x16xf32>
    %10 = arith.addf %7, %9 : vector<182x16xf32>
    %cst = arith.constant 2.500000e-01 : f32
    %11 = vector.broadcast %cst : f32 to vector<182x16xf32>
    %12 = arith.mulf %10, %11 : vector<182x16xf32>
    %c0_8 = arith.constant 0 : index
    %c0_9 = arith.constant 0 : index
    %c0_10 = arith.constant 0 : index
    %13 = vector.load %arg2[%c0_8, %c0_9, %c0_10] : memref<1x182x16xf32, #tpu.memory_space<vmem>>, vector<1x182x16xf32>
    %14 = vector.shape_cast %13 : vector<1x182x16xf32> to vector<182x16xf32>
    %15 = vector.shape_cast %12 : vector<182x16xf32> to vector<1x182x16xf32>
    tpu.vector_store %arg2[%c0_8, %c0_9, %c0_10], %15 {strides = array<i32>} : memref<1x182x16xf32, #tpu.memory_space<vmem>>, vector<1x182x16xf32>,
    return
  }
  func.func @transform_0(%arg0: i32) -> (i32, i32, i32) {
    %c0_i32 = arith.constant 0 : i32
    %c0_i32_0 = arith.constant 0 : i32
    %c0_i32_1 = arith.constant 0 : i32
    return %arg0, %c0_i32, %c0_i32_0 : i32, i32, i32
  }
  func.func @transform_1(%arg0: i32) -> (i32, i32, i32) {
    %c0_i32 = arith.constant 0 : i32
    %c0_i32_0 = arith.constant 0 : i32
    %c0_i32_1 = arith.constant 0 : i32
    return %arg0, %c0_i32, %c0_i32_0 : i32, i32, i32
  }
}

module attributes {stable_mosaic.version = 11 : i64} {
  func.func @_fused_mm_kernel(%arg0: i32, %arg1: memref<104x16xf32, #tpu.memory_space<vmem>>, %arg2: memref<16x16xbf16, #tpu.memory_space<vmem>>, %arg3: memref<1x16xf32, #tpu.memory_space<vmem>>, %arg4: memref<1x16xf32, #tpu.memory_space<vmem>>, %arg5: memref<1x16xf32, #tpu.memory_space<vmem>>, %arg6: memref<1x16xf32, #tpu.memory_space<vmem>>, %arg7: memref<104x16xf32, #tpu.memory_space<vmem>>) attributes {dimension_semantics = [#tpu.dimension_semantics<parallel>], iteration_bounds = array<i64: 1>, scalar_prefetch = 0 : i64, scratch_operands = 0 : i64, tpu.core_type = #tpu.core_type<tc>, window_params = [{transform_indices = @transform_0, window_bounds = array<i64: 104, 16>}, {pipeline_mode = #tpu.pipeline_mode<synchronous>, transform_indices = @transform_1, window_bounds = array<i64: 16, 16>}, {pipeline_mode = #tpu.pipeline_mode<synchronous>, transform_indices = @transform_2, window_bounds = array<i64: 1, 16>}, {pipeline_mode = #tpu.pipeline_mode<synchronous>, transform_indices = @transform_3, window_bounds = array<i64: 1, 16>}, {pipeline_mode = #tpu.pipeline_mode<synchronous>, transform_indices = @transform_4, window_bounds = array<i64: 1, 16>}, {pipeline_mode = #tpu.pipeline_mode<synchronous>, transform_indices = @transform_5, window_bounds = array<i64: 1, 16>}, {transform_indices = @transform_6, window_bounds = array<i64: 104, 16>}]} {
    %c0 = arith.constant 0 : index
    %c0_0 = arith.constant 0 : index
    %0 = vector.load %arg1[%c0, %c0_0] : memref<104x16xf32, #tpu.memory_space<vmem>>, vector<104x16xf32>
    %c0_1 = arith.constant 0 : index
    %c0_2 = arith.constant 0 : index
    %1 = vector.load %arg3[%c0_1, %c0_2] : memref<1x16xf32, #tpu.memory_space<vmem>>, vector<1x16xf32>
    %2 = vector.broadcast %1 : vector<1x16xf32> to vector<104x16xf32>
    %3 = arith.mulf %0, %2 : vector<104x16xf32>
    %c0_3 = arith.constant 0 : index
    %c0_4 = arith.constant 0 : index
    %4 = vector.load %arg4[%c0_3, %c0_4] : memref<1x16xf32, #tpu.memory_space<vmem>>, vector<1x16xf32>
    %5 = vector.broadcast %4 : vector<1x16xf32> to vector<104x16xf32>
    %6 = arith.addf %3, %5 : vector<104x16xf32>
    %cst = arith.constant 0.000000e+00 : f32
    %7 = vector.broadcast %cst : f32 to vector<104x16xf32>
    %8 = arith.maximumf %6, %7 : vector<104x16xf32>
    %9 = arith.truncf %8 : vector<104x16xf32> to vector<104x16xbf16>
    %c0_5 = arith.constant 0 : index
    %c0_6 = arith.constant 0 : index
    %10 = vector.load %arg2[%c0_5, %c0_6] : memref<16x16xbf16, #tpu.memory_space<vmem>>, vector<16x16xbf16>
    %cst_7 = arith.constant dense<0.000000e+00> : vector<104x16xf32>
    %11 = tpu.matmul %9, %10, %cst_7 {dimension_numbers = #tpu.dot_dimension_numbers<[1], [0], [0], [1], [0, 0, 1, 1], [], []>} : vector<104x16xbf16>, vector<16x16xbf16>, vector<104x16xf32> -> vector<104x16xf32>
    %c0_8 = arith.constant 0 : index
    %c0_9 = arith.constant 0 : index
    %12 = vector.load %arg5[%c0_8, %c0_9] : memref<1x16xf32, #tpu.memory_space<vmem>>, vector<1x16xf32>
    %13 = vector.broadcast %12 : vector<1x16xf32> to vector<104x16xf32>
    %14 = arith.mulf %11, %13 : vector<104x16xf32>
    %c0_10 = arith.constant 0 : index
    %c0_11 = arith.constant 0 : index
    %15 = vector.load %arg6[%c0_10, %c0_11] : memref<1x16xf32, #tpu.memory_space<vmem>>, vector<1x16xf32>
    %16 = vector.broadcast %15 : vector<1x16xf32> to vector<104x16xf32>
    %17 = arith.addf %14, %16 : vector<104x16xf32>
    %cst_12 = arith.constant 0.000000e+00 : f32
    %18 = vector.broadcast %cst_12 : f32 to vector<104x16xf32>
    %19 = arith.maximumf %17, %18 : vector<104x16xf32>
    %c0_13 = arith.constant 0 : index
    %c0_14 = arith.constant 0 : index
    %20 = vector.load %arg7[%c0_13, %c0_14] : memref<104x16xf32, #tpu.memory_space<vmem>>, vector<104x16xf32>
    tpu.vector_store %arg7[%c0_13, %c0_14], %19 {strides = array<i32>} : memref<104x16xf32, #tpu.memory_space<vmem>>, vector<104x16xf32>,
    return
  }
  func.func @transform_0(%arg0: i32) -> (i32, i32) {
    %c0_i32 = arith.constant 0 : i32
    %c0_i32_0 = arith.constant 0 : i32
    return %arg0, %c0_i32 : i32, i32
  }
  func.func @transform_1(%arg0: i32) -> (i32, i32) {
    %c0_i32 = arith.constant 0 : i32
    %c0_i32_0 = arith.constant 0 : i32
    %c0_i32_1 = arith.constant 0 : i32
    return %c0_i32, %c0_i32_0 : i32, i32
  }
  func.func @transform_2(%arg0: i32) -> (i32, i32) {
    %c0_i32 = arith.constant 0 : i32
    %c0_i32_0 = arith.constant 0 : i32
    %c0_i32_1 = arith.constant 0 : i32
    return %c0_i32, %c0_i32_0 : i32, i32
  }
  func.func @transform_3(%arg0: i32) -> (i32, i32) {
    %c0_i32 = arith.constant 0 : i32
    %c0_i32_0 = arith.constant 0 : i32
    %c0_i32_1 = arith.constant 0 : i32
    return %c0_i32, %c0_i32_0 : i32, i32
  }
  func.func @transform_4(%arg0: i32) -> (i32, i32) {
    %c0_i32 = arith.constant 0 : i32
    %c0_i32_0 = arith.constant 0 : i32
    %c0_i32_1 = arith.constant 0 : i32
    return %c0_i32, %c0_i32_0 : i32, i32
  }
  func.func @transform_5(%arg0: i32) -> (i32, i32) {
    %c0_i32 = arith.constant 0 : i32
    %c0_i32_0 = arith.constant 0 : i32
    %c0_i32_1 = arith.constant 0 : i32
    return %c0_i32, %c0_i32_0 : i32, i32
  }
  func.func @transform_6(%arg0: i32) -> (i32, i32) {
    %c0_i32 = arith.constant 0 : i32
    %c0_i32_0 = arith.constant 0 : i32
    return %arg0, %c0_i32 : i32, i32
  }
}

module attributes {stable_mosaic.version = 11 : i64} {
  func.func @_conv3x3_kernel(%arg0: i32, %arg1: memref<1x90x16xf32, #tpu.memory_space<vmem>>, %arg2: memref<9x16x8xbf16, #tpu.memory_space<vmem>>, %arg3: memref<1x63x8xf32, #tpu.memory_space<vmem>>) attributes {dimension_semantics = [#tpu.dimension_semantics<parallel>], iteration_bounds = array<i64: 2>, scalar_prefetch = 0 : i64, scratch_operands = 0 : i64, tpu.core_type = #tpu.core_type<tc>, window_params = [{transform_indices = @transform_0, window_bounds = array<i64: 1, 90, 16>}, {pipeline_mode = #tpu.pipeline_mode<synchronous>, transform_indices = @transform_1, window_bounds = array<i64: 9, 16, 8>}, {transform_indices = @transform_2, window_bounds = array<i64: 1, 63, 8>}]} {
    %c0 = arith.constant 0 : index
    %c0_0 = arith.constant 0 : index
    %c0_1 = arith.constant 0 : index
    %0 = vector.load %arg1[%c0, %c0_0, %c0_1] : memref<1x90x16xf32, #tpu.memory_space<vmem>>, vector<1x63x16xf32>
    %1 = vector.shape_cast %0 : vector<1x63x16xf32> to vector<63x16xf32>
    %2 = arith.truncf %1 : vector<63x16xf32> to vector<63x16xbf16>
    %c0_2 = arith.constant 0 : index
    %c0_3 = arith.constant 0 : index
    %c0_4 = arith.constant 0 : index
    %3 = vector.load %arg2[%c0_2, %c0_3, %c0_4] : memref<9x16x8xbf16, #tpu.memory_space<vmem>>, vector<1x16x8xbf16>
    %4 = vector.shape_cast %3 : vector<1x16x8xbf16> to vector<16x8xbf16>
    %cst = arith.constant dense<0.000000e+00> : vector<63x8xf32>
    %5 = tpu.matmul %2, %4, %cst {dimension_numbers = #tpu.dot_dimension_numbers<[1], [0], [0], [1], [0, 0, 1, 1], [], []>} : vector<63x16xbf16>, vector<16x8xbf16>, vector<63x8xf32> -> vector<63x8xf32>
    %c0_5 = arith.constant 0 : index
    %c1 = arith.constant 1 : index
    %c0_6 = arith.constant 0 : index
    %6 = vector.load %arg1[%c0_5, %c1, %c0_6] : memref<1x90x16xf32, #tpu.memory_space<vmem>>, vector<1x63x16xf32>
    %7 = vector.shape_cast %6 : vector<1x63x16xf32> to vector<63x16xf32>
    %8 = arith.truncf %7 : vector<63x16xf32> to vector<63x16xbf16>
    %c1_7 = arith.constant 1 : index
    %c0_8 = arith.constant 0 : index
    %c0_9 = arith.constant 0 : index
    %9 = vector.load %arg2[%c1_7, %c0_8, %c0_9] : memref<9x16x8xbf16, #tpu.memory_space<vmem>>, vector<1x16x8xbf16>
    %10 = vector.shape_cast %9 : vector<1x16x8xbf16> to vector<16x8xbf16>
    %cst_10 = arith.constant dense<0.000000e+00> : vector<63x8xf32>
    %11 = tpu.matmul %8, %10, %cst_10 {dimension_numbers = #tpu.dot_dimension_numbers<[1], [0], [0], [1], [0, 0, 1, 1], [], []>} : vector<63x16xbf16>, vector<16x8xbf16>, vector<63x8xf32> -> vector<63x8xf32>
    %12 = arith.addf %5, %11 : vector<63x8xf32>
    %c0_11 = arith.constant 0 : index
    %c2 = arith.constant 2 : index
    %c0_12 = arith.constant 0 : index
    %13 = vector.load %arg1[%c0_11, %c2, %c0_12] : memref<1x90x16xf32, #tpu.memory_space<vmem>>, vector<1x63x16xf32>
    %14 = vector.shape_cast %13 : vector<1x63x16xf32> to vector<63x16xf32>
    %15 = arith.truncf %14 : vector<63x16xf32> to vector<63x16xbf16>
    %c2_13 = arith.constant 2 : index
    %c0_14 = arith.constant 0 : index
    %c0_15 = arith.constant 0 : index
    %16 = vector.load %arg2[%c2_13, %c0_14, %c0_15] : memref<9x16x8xbf16, #tpu.memory_space<vmem>>, vector<1x16x8xbf16>
    %17 = vector.shape_cast %16 : vector<1x16x8xbf16> to vector<16x8xbf16>
    %cst_16 = arith.constant dense<0.000000e+00> : vector<63x8xf32>
    %18 = tpu.matmul %15, %17, %cst_16 {dimension_numbers = #tpu.dot_dimension_numbers<[1], [0], [0], [1], [0, 0, 1, 1], [], []>} : vector<63x16xbf16>, vector<16x8xbf16>, vector<63x8xf32> -> vector<63x8xf32>
    %19 = arith.addf %12, %18 : vector<63x8xf32>
    %c0_17 = arith.constant 0 : index
    %c9 = arith.constant 9 : index
    %c0_18 = arith.constant 0 : index
    %20 = vector.load %arg1[%c0_17, %c9, %c0_18] : memref<1x90x16xf32, #tpu.memory_space<vmem>>, vector<1x63x16xf32>
    %21 = vector.shape_cast %20 : vector<1x63x16xf32> to vector<63x16xf32>
    %22 = arith.truncf %21 : vector<63x16xf32> to vector<63x16xbf16>
    %c3 = arith.constant 3 : index
    %c0_19 = arith.constant 0 : index
    %c0_20 = arith.constant 0 : index
    %23 = vector.load %arg2[%c3, %c0_19, %c0_20] : memref<9x16x8xbf16, #tpu.memory_space<vmem>>, vector<1x16x8xbf16>
    %24 = vector.shape_cast %23 : vector<1x16x8xbf16> to vector<16x8xbf16>
    %cst_21 = arith.constant dense<0.000000e+00> : vector<63x8xf32>
    %25 = tpu.matmul %22, %24, %cst_21 {dimension_numbers = #tpu.dot_dimension_numbers<[1], [0], [0], [1], [0, 0, 1, 1], [], []>} : vector<63x16xbf16>, vector<16x8xbf16>, vector<63x8xf32> -> vector<63x8xf32>
    %26 = arith.addf %19, %25 : vector<63x8xf32>
    %c0_22 = arith.constant 0 : index
    %c10 = arith.constant 10 : index
    %c0_23 = arith.constant 0 : index
    %27 = vector.load %arg1[%c0_22, %c10, %c0_23] : memref<1x90x16xf32, #tpu.memory_space<vmem>>, vector<1x63x16xf32>
    %28 = vector.shape_cast %27 : vector<1x63x16xf32> to vector<63x16xf32>
    %29 = arith.truncf %28 : vector<63x16xf32> to vector<63x16xbf16>
    %c4 = arith.constant 4 : index
    %c0_24 = arith.constant 0 : index
    %c0_25 = arith.constant 0 : index
    %30 = vector.load %arg2[%c4, %c0_24, %c0_25] : memref<9x16x8xbf16, #tpu.memory_space<vmem>>, vector<1x16x8xbf16>
    %31 = vector.shape_cast %30 : vector<1x16x8xbf16> to vector<16x8xbf16>
    %cst_26 = arith.constant dense<0.000000e+00> : vector<63x8xf32>
    %32 = tpu.matmul %29, %31, %cst_26 {dimension_numbers = #tpu.dot_dimension_numbers<[1], [0], [0], [1], [0, 0, 1, 1], [], []>} : vector<63x16xbf16>, vector<16x8xbf16>, vector<63x8xf32> -> vector<63x8xf32>
    %33 = arith.addf %26, %32 : vector<63x8xf32>
    %c0_27 = arith.constant 0 : index
    %c11 = arith.constant 11 : index
    %c0_28 = arith.constant 0 : index
    %34 = vector.load %arg1[%c0_27, %c11, %c0_28] : memref<1x90x16xf32, #tpu.memory_space<vmem>>, vector<1x63x16xf32>
    %35 = vector.shape_cast %34 : vector<1x63x16xf32> to vector<63x16xf32>
    %36 = arith.truncf %35 : vector<63x16xf32> to vector<63x16xbf16>
    %c5 = arith.constant 5 : index
    %c0_29 = arith.constant 0 : index
    %c0_30 = arith.constant 0 : index
    %37 = vector.load %arg2[%c5, %c0_29, %c0_30] : memref<9x16x8xbf16, #tpu.memory_space<vmem>>, vector<1x16x8xbf16>
    %38 = vector.shape_cast %37 : vector<1x16x8xbf16> to vector<16x8xbf16>
    %cst_31 = arith.constant dense<0.000000e+00> : vector<63x8xf32>
    %39 = tpu.matmul %36, %38, %cst_31 {dimension_numbers = #tpu.dot_dimension_numbers<[1], [0], [0], [1], [0, 0, 1, 1], [], []>} : vector<63x16xbf16>, vector<16x8xbf16>, vector<63x8xf32> -> vector<63x8xf32>
    %40 = arith.addf %33, %39 : vector<63x8xf32>
    %c0_32 = arith.constant 0 : index
    %c18 = arith.constant 18 : index
    %c0_33 = arith.constant 0 : index
    %41 = vector.load %arg1[%c0_32, %c18, %c0_33] : memref<1x90x16xf32, #tpu.memory_space<vmem>>, vector<1x63x16xf32>
    %42 = vector.shape_cast %41 : vector<1x63x16xf32> to vector<63x16xf32>
    %43 = arith.truncf %42 : vector<63x16xf32> to vector<63x16xbf16>
    %c6 = arith.constant 6 : index
    %c0_34 = arith.constant 0 : index
    %c0_35 = arith.constant 0 : index
    %44 = vector.load %arg2[%c6, %c0_34, %c0_35] : memref<9x16x8xbf16, #tpu.memory_space<vmem>>, vector<1x16x8xbf16>
    %45 = vector.shape_cast %44 : vector<1x16x8xbf16> to vector<16x8xbf16>
    %cst_36 = arith.constant dense<0.000000e+00> : vector<63x8xf32>
    %46 = tpu.matmul %43, %45, %cst_36 {dimension_numbers = #tpu.dot_dimension_numbers<[1], [0], [0], [1], [0, 0, 1, 1], [], []>} : vector<63x16xbf16>, vector<16x8xbf16>, vector<63x8xf32> -> vector<63x8xf32>
    %47 = arith.addf %40, %46 : vector<63x8xf32>
    %c0_37 = arith.constant 0 : index
    %c19 = arith.constant 19 : index
    %c0_38 = arith.constant 0 : index
    %48 = vector.load %arg1[%c0_37, %c19, %c0_38] : memref<1x90x16xf32, #tpu.memory_space<vmem>>, vector<1x63x16xf32>
    %49 = vector.shape_cast %48 : vector<1x63x16xf32> to vector<63x16xf32>
    %50 = arith.truncf %49 : vector<63x16xf32> to vector<63x16xbf16>
    %c7 = arith.constant 7 : index
    %c0_39 = arith.constant 0 : index
    %c0_40 = arith.constant 0 : index
    %51 = vector.load %arg2[%c7, %c0_39, %c0_40] : memref<9x16x8xbf16, #tpu.memory_space<vmem>>, vector<1x16x8xbf16>
    %52 = vector.shape_cast %51 : vector<1x16x8xbf16> to vector<16x8xbf16>
    %cst_41 = arith.constant dense<0.000000e+00> : vector<63x8xf32>
    %53 = tpu.matmul %50, %52, %cst_41 {dimension_numbers = #tpu.dot_dimension_numbers<[1], [0], [0], [1], [0, 0, 1, 1], [], []>} : vector<63x16xbf16>, vector<16x8xbf16>, vector<63x8xf32> -> vector<63x8xf32>
    %54 = arith.addf %47, %53 : vector<63x8xf32>
    %c0_42 = arith.constant 0 : index
    %c20 = arith.constant 20 : index
    %c0_43 = arith.constant 0 : index
    %55 = vector.load %arg1[%c0_42, %c20, %c0_43] : memref<1x90x16xf32, #tpu.memory_space<vmem>>, vector<1x63x16xf32>
    %56 = vector.shape_cast %55 : vector<1x63x16xf32> to vector<63x16xf32>
    %57 = arith.truncf %56 : vector<63x16xf32> to vector<63x16xbf16>
    %c8 = arith.constant 8 : index
    %c0_44 = arith.constant 0 : index
    %c0_45 = arith.constant 0 : index
    %58 = vector.load %arg2[%c8, %c0_44, %c0_45] : memref<9x16x8xbf16, #tpu.memory_space<vmem>>, vector<1x16x8xbf16>
    %59 = vector.shape_cast %58 : vector<1x16x8xbf16> to vector<16x8xbf16>
    %cst_46 = arith.constant dense<0.000000e+00> : vector<63x8xf32>
    %60 = tpu.matmul %57, %59, %cst_46 {dimension_numbers = #tpu.dot_dimension_numbers<[1], [0], [0], [1], [0, 0, 1, 1], [], []>} : vector<63x16xbf16>, vector<16x8xbf16>, vector<63x8xf32> -> vector<63x8xf32>
    %61 = arith.addf %54, %60 : vector<63x8xf32>
    %c0_47 = arith.constant 0 : index
    %c0_48 = arith.constant 0 : index
    %c0_49 = arith.constant 0 : index
    %62 = vector.load %arg3[%c0_47, %c0_48, %c0_49] : memref<1x63x8xf32, #tpu.memory_space<vmem>>, vector<1x63x8xf32>
    %63 = vector.shape_cast %62 : vector<1x63x8xf32> to vector<63x8xf32>
    %64 = vector.shape_cast %61 : vector<63x8xf32> to vector<1x63x8xf32>
    tpu.vector_store %arg3[%c0_47, %c0_48, %c0_49], %64 {strides = array<i32>} : memref<1x63x8xf32, #tpu.memory_space<vmem>>, vector<1x63x8xf32>,
    return
  }
  func.func @transform_0(%arg0: i32) -> (i32, i32, i32) {
    %c0_i32 = arith.constant 0 : i32
    %c0_i32_0 = arith.constant 0 : i32
    %c0_i32_1 = arith.constant 0 : i32
    return %arg0, %c0_i32, %c0_i32_0 : i32, i32, i32
  }
  func.func @transform_1(%arg0: i32) -> (i32, i32, i32) {
    %c0_i32 = arith.constant 0 : i32
    %c0_i32_0 = arith.constant 0 : i32
    %c0_i32_1 = arith.constant 0 : i32
    %c0_i32_2 = arith.constant 0 : i32
    return %c0_i32, %c0_i32_0, %c0_i32_1 : i32, i32, i32
  }
  func.func @transform_2(%arg0: i32) -> (i32, i32, i32) {
    %c0_i32 = arith.constant 0 : i32
    %c0_i32_0 = arith.constant 0 : i32
    %c0_i32_1 = arith.constant 0 : i32
    return %arg0, %c0_i32, %c0_i32_0 : i32, i32, i32
  }
}

module attributes {stable_mosaic.version = 11 : i64} {
  func.func @_fused_mm_kernel(%arg0: i32, %arg1: memref<104x24xf32, #tpu.memory_space<vmem>>, %arg2: memref<24x16xbf16, #tpu.memory_space<vmem>>, %arg3: memref<1x24xf32, #tpu.memory_space<vmem>>, %arg4: memref<1x24xf32, #tpu.memory_space<vmem>>, %arg5: memref<1x16xf32, #tpu.memory_space<vmem>>, %arg6: memref<1x16xf32, #tpu.memory_space<vmem>>, %arg7: memref<104x16xf32, #tpu.memory_space<vmem>>) attributes {dimension_semantics = [#tpu.dimension_semantics<parallel>], iteration_bounds = array<i64: 1>, scalar_prefetch = 0 : i64, scratch_operands = 0 : i64, tpu.core_type = #tpu.core_type<tc>, window_params = [{transform_indices = @transform_0, window_bounds = array<i64: 104, 24>}, {pipeline_mode = #tpu.pipeline_mode<synchronous>, transform_indices = @transform_1, window_bounds = array<i64: 24, 16>}, {pipeline_mode = #tpu.pipeline_mode<synchronous>, transform_indices = @transform_2, window_bounds = array<i64: 1, 24>}, {pipeline_mode = #tpu.pipeline_mode<synchronous>, transform_indices = @transform_3, window_bounds = array<i64: 1, 24>}, {pipeline_mode = #tpu.pipeline_mode<synchronous>, transform_indices = @transform_4, window_bounds = array<i64: 1, 16>}, {pipeline_mode = #tpu.pipeline_mode<synchronous>, transform_indices = @transform_5, window_bounds = array<i64: 1, 16>}, {transform_indices = @transform_6, window_bounds = array<i64: 104, 16>}]} {
    %c0 = arith.constant 0 : index
    %c0_0 = arith.constant 0 : index
    %0 = vector.load %arg1[%c0, %c0_0] : memref<104x24xf32, #tpu.memory_space<vmem>>, vector<104x24xf32>
    %c0_1 = arith.constant 0 : index
    %c0_2 = arith.constant 0 : index
    %1 = vector.load %arg3[%c0_1, %c0_2] : memref<1x24xf32, #tpu.memory_space<vmem>>, vector<1x24xf32>
    %2 = vector.broadcast %1 : vector<1x24xf32> to vector<104x24xf32>
    %3 = arith.mulf %0, %2 : vector<104x24xf32>
    %c0_3 = arith.constant 0 : index
    %c0_4 = arith.constant 0 : index
    %4 = vector.load %arg4[%c0_3, %c0_4] : memref<1x24xf32, #tpu.memory_space<vmem>>, vector<1x24xf32>
    %5 = vector.broadcast %4 : vector<1x24xf32> to vector<104x24xf32>
    %6 = arith.addf %3, %5 : vector<104x24xf32>
    %cst = arith.constant 0.000000e+00 : f32
    %7 = vector.broadcast %cst : f32 to vector<104x24xf32>
    %8 = arith.maximumf %6, %7 : vector<104x24xf32>
    %9 = arith.truncf %8 : vector<104x24xf32> to vector<104x24xbf16>
    %c0_5 = arith.constant 0 : index
    %c0_6 = arith.constant 0 : index
    %10 = vector.load %arg2[%c0_5, %c0_6] : memref<24x16xbf16, #tpu.memory_space<vmem>>, vector<24x16xbf16>
    %cst_7 = arith.constant dense<0.000000e+00> : vector<104x16xf32>
    %11 = tpu.matmul %9, %10, %cst_7 {dimension_numbers = #tpu.dot_dimension_numbers<[1], [0], [0], [1], [0, 0, 1, 1], [], []>} : vector<104x24xbf16>, vector<24x16xbf16>, vector<104x16xf32> -> vector<104x16xf32>
    %c0_8 = arith.constant 0 : index
    %c0_9 = arith.constant 0 : index
    %12 = vector.load %arg5[%c0_8, %c0_9] : memref<1x16xf32, #tpu.memory_space<vmem>>, vector<1x16xf32>
    %13 = vector.broadcast %12 : vector<1x16xf32> to vector<104x16xf32>
    %14 = arith.mulf %11, %13 : vector<104x16xf32>
    %c0_10 = arith.constant 0 : index
    %c0_11 = arith.constant 0 : index
    %15 = vector.load %arg6[%c0_10, %c0_11] : memref<1x16xf32, #tpu.memory_space<vmem>>, vector<1x16xf32>
    %16 = vector.broadcast %15 : vector<1x16xf32> to vector<104x16xf32>
    %17 = arith.addf %14, %16 : vector<104x16xf32>
    %cst_12 = arith.constant 0.000000e+00 : f32
    %18 = vector.broadcast %cst_12 : f32 to vector<104x16xf32>
    %19 = arith.maximumf %17, %18 : vector<104x16xf32>
    %c0_13 = arith.constant 0 : index
    %c0_14 = arith.constant 0 : index
    %20 = vector.load %arg7[%c0_13, %c0_14] : memref<104x16xf32, #tpu.memory_space<vmem>>, vector<104x16xf32>
    tpu.vector_store %arg7[%c0_13, %c0_14], %19 {strides = array<i32>} : memref<104x16xf32, #tpu.memory_space<vmem>>, vector<104x16xf32>,
    return
  }
  func.func @transform_0(%arg0: i32) -> (i32, i32) {
    %c0_i32 = arith.constant 0 : i32
    %c0_i32_0 = arith.constant 0 : i32
    return %arg0, %c0_i32 : i32, i32
  }
  func.func @transform_1(%arg0: i32) -> (i32, i32) {
    %c0_i32 = arith.constant 0 : i32
    %c0_i32_0 = arith.constant 0 : i32
    %c0_i32_1 = arith.constant 0 : i32
    return %c0_i32, %c0_i32_0 : i32, i32
  }
  func.func @transform_2(%arg0: i32) -> (i32, i32) {
    %c0_i32 = arith.constant 0 : i32
    %c0_i32_0 = arith.constant 0 : i32
    %c0_i32_1 = arith.constant 0 : i32
    return %c0_i32, %c0_i32_0 : i32, i32
  }
  func.func @transform_3(%arg0: i32) -> (i32, i32) {
    %c0_i32 = arith.constant 0 : i32
    %c0_i32_0 = arith.constant 0 : i32
    %c0_i32_1 = arith.constant 0 : i32
    return %c0_i32, %c0_i32_0 : i32, i32
  }
  func.func @transform_4(%arg0: i32) -> (i32, i32) {
    %c0_i32 = arith.constant 0 : i32
    %c0_i32_0 = arith.constant 0 : i32
    %c0_i32_1 = arith.constant 0 : i32
    return %c0_i32, %c0_i32_0 : i32, i32
  }
  func.func @transform_5(%arg0: i32) -> (i32, i32) {
    %c0_i32 = arith.constant 0 : i32
    %c0_i32_0 = arith.constant 0 : i32
    %c0_i32_1 = arith.constant 0 : i32
    return %c0_i32, %c0_i32_0 : i32, i32
  }
  func.func @transform_6(%arg0: i32) -> (i32, i32) {
    %c0_i32 = arith.constant 0 : i32
    %c0_i32_0 = arith.constant 0 : i32
    return %arg0, %c0_i32 : i32, i32
  }
}

module attributes {stable_mosaic.version = 11 : i64} {
  func.func @_bn_relu_pool_kernel(%arg0: i32, %arg1: memref<1x49x32xf32, #tpu.memory_space<vmem>>, %arg2: memref<1x32xf32, #tpu.memory_space<vmem>>, %arg3: memref<1x32xf32, #tpu.memory_space<vmem>>, %arg4: memref<1x49x32xf32, #tpu.memory_space<vmem>>, %arg5: memref<1x1x32xf32, #tpu.memory_space<vmem>>) attributes {dimension_semantics = [#tpu.dimension_semantics<parallel>], iteration_bounds = array<i64: 2>, scalar_prefetch = 0 : i64, scratch_operands = 0 : i64, tpu.core_type = #tpu.core_type<tc>, window_params = [{transform_indices = @transform_0, window_bounds = array<i64: 1, 49, 32>}, {pipeline_mode = #tpu.pipeline_mode<synchronous>, transform_indices = @transform_1, window_bounds = array<i64: 1, 32>}, {pipeline_mode = #tpu.pipeline_mode<synchronous>, transform_indices = @transform_2, window_bounds = array<i64: 1, 32>}, {transform_indices = @transform_3, window_bounds = array<i64: 1, 49, 32>}, {transform_indices = @transform_4, window_bounds = array<i64: 1, 1, 32>}]} {
    %c0 = arith.constant 0 : index
    %c0_0 = arith.constant 0 : index
    %c0_1 = arith.constant 0 : index
    %0 = vector.load %arg1[%c0, %c0_0, %c0_1] : memref<1x49x32xf32, #tpu.memory_space<vmem>>, vector<1x49x32xf32>
    %1 = vector.shape_cast %0 : vector<1x49x32xf32> to vector<49x32xf32>
    %c0_2 = arith.constant 0 : index
    %c0_3 = arith.constant 0 : index
    %2 = vector.load %arg2[%c0_2, %c0_3] : memref<1x32xf32, #tpu.memory_space<vmem>>, vector<1x32xf32>
    %3 = vector.broadcast %2 : vector<1x32xf32> to vector<49x32xf32>
    %4 = arith.mulf %1, %3 : vector<49x32xf32>
    %c0_4 = arith.constant 0 : index
    %c0_5 = arith.constant 0 : index
    %5 = vector.load %arg3[%c0_4, %c0_5] : memref<1x32xf32, #tpu.memory_space<vmem>>, vector<1x32xf32>
    %6 = vector.broadcast %5 : vector<1x32xf32> to vector<49x32xf32>
    %7 = arith.addf %4, %6 : vector<49x32xf32>
    %c0_6 = arith.constant 0 : index
    %c0_7 = arith.constant 0 : index
    %c0_8 = arith.constant 0 : index
    %8 = vector.load %arg4[%c0_6, %c0_7, %c0_8] : memref<1x49x32xf32, #tpu.memory_space<vmem>>, vector<1x49x32xf32>
    %9 = vector.shape_cast %8 : vector<1x49x32xf32> to vector<49x32xf32>
    %10 = vector.shape_cast %7 : vector<49x32xf32> to vector<1x49x32xf32>
    tpu.vector_store %arg4[%c0_6, %c0_7, %c0_8], %10 {strides = array<i32>} : memref<1x49x32xf32, #tpu.memory_space<vmem>>, vector<1x49x32xf32>,
    %cst = arith.constant 0.000000e+00 : f32
    %11 = vector.broadcast %cst : f32 to vector<49x32xf32>
    %12 = arith.maximumf %7, %11 : vector<49x32xf32>
    %cst_9 = arith.constant dense<0.000000e+00> : vector<32xf32>
    %13 = vector.multi_reduction <add>, %12, %cst_9 [0] : vector<49x32xf32> to vector<32xf32>
    %14 = vector.shape_cast %13 : vector<32xf32> to vector<1x32xf32>
    %cst_10 = arith.constant 4.900000e+01 : f32
    %15 = vector.broadcast %cst_10 : f32 to vector<1x32xf32>
    %16 = arith.divf %14, %15 : vector<1x32xf32>
    %c0_11 = arith.constant 0 : index
    %c0_12 = arith.constant 0 : index
    %c0_13 = arith.constant 0 : index
    %17 = vector.load %arg5[%c0_11, %c0_12, %c0_13] : memref<1x1x32xf32, #tpu.memory_space<vmem>>, vector<1x1x32xf32>
    %18 = vector.shape_cast %17 : vector<1x1x32xf32> to vector<1x32xf32>
    %19 = vector.shape_cast %16 : vector<1x32xf32> to vector<1x1x32xf32>
    tpu.vector_store %arg5[%c0_11, %c0_12, %c0_13], %19 {strides = array<i32>} : memref<1x1x32xf32, #tpu.memory_space<vmem>>, vector<1x1x32xf32>,
    return
  }
  func.func @transform_0(%arg0: i32) -> (i32, i32, i32) {
    %c0_i32 = arith.constant 0 : i32
    %c0_i32_0 = arith.constant 0 : i32
    %c0_i32_1 = arith.constant 0 : i32
    return %arg0, %c0_i32, %c0_i32_0 : i32, i32, i32
  }
  func.func @transform_1(%arg0: i32) -> (i32, i32) {
    %c0_i32 = arith.constant 0 : i32
    %c0_i32_0 = arith.constant 0 : i32
    %c0_i32_1 = arith.constant 0 : i32
    return %c0_i32, %c0_i32_0 : i32, i32
  }
  func.func @transform_2(%arg0: i32) -> (i32, i32) {
    %c0_i32 = arith.constant 0 : i32
    %c0_i32_0 = arith.constant 0 : i32
    %c0_i32_1 = arith.constant 0 : i32
    return %c0_i32, %c0_i32_0 : i32, i32
  }
  func.func @transform_3(%arg0: i32) -> (i32, i32, i32) {
    %c0_i32 = arith.constant 0 : i32
    %c0_i32_0 = arith.constant 0 : i32
    %c0_i32_1 = arith.constant 0 : i32
    return %arg0, %c0_i32, %c0_i32_0 : i32, i32, i32
  }
  func.func @transform_4(%arg0: i32) -> (i32, i32, i32) {
    %c0_i32 = arith.constant 0 : i32
    %c0_i32_0 = arith.constant 0 : i32
    %c0_i32_1 = arith.constant 0 : i32
    return %arg0, %c0_i32, %c0_i32_0 : i32, i32, i32
  }
}

module attributes {stable_mosaic.version = 11 : i64} {
  func.func @_linear_sigmoid_kernel(%arg0: memref<2x32xf32, #tpu.memory_space<vmem>>, %arg1: memref<32x10xf32, #tpu.memory_space<vmem>>, %arg2: memref<1x10xf32, #tpu.memory_space<vmem>>, %arg3: memref<2x10xf32, #tpu.memory_space<vmem>>) attributes {dimension_semantics = [], scalar_prefetch = 0 : i64, scratch_operands = 0 : i64, tpu.core_type = #tpu.core_type<tc>} {
    %c0 = arith.constant 0 : index
    %c0_0 = arith.constant 0 : index
    %0 = vector.load %arg0[%c0, %c0_0] : memref<2x32xf32, #tpu.memory_space<vmem>>, vector<2x32xf32>
    %c0_1 = arith.constant 0 : index
    %c0_2 = arith.constant 0 : index
    %1 = vector.load %arg1[%c0_1, %c0_2] : memref<32x10xf32, #tpu.memory_space<vmem>>, vector<32x10xf32>
    %cst = arith.constant dense<0.000000e+00> : vector<2x10xf32>
    %2 = tpu.matmul %0, %1, %cst {dimension_numbers = #tpu.dot_dimension_numbers<[1], [0], [0], [1], [0, 0, 1, 1], [], []>} : vector<2x32xf32>, vector<32x10xf32>, vector<2x10xf32> -> vector<2x10xf32>
    %c0_3 = arith.constant 0 : index
    %c0_4 = arith.constant 0 : index
    %3 = vector.load %arg2[%c0_3, %c0_4] : memref<1x10xf32, #tpu.memory_space<vmem>>, vector<1x10xf32>
    %4 = vector.broadcast %3 : vector<1x10xf32> to vector<2x10xf32>
    %5 = arith.addf %2, %4 : vector<2x10xf32>
    %6 = arith.negf %5 : vector<2x10xf32>
    %7 = math.exp %6 : vector<2x10xf32>
    %cst_5 = arith.constant 1.000000e+00 : f32
    %8 = vector.broadcast %cst_5 : f32 to vector<2x10xf32>
    %9 = arith.addf %8, %7 : vector<2x10xf32>
    %10 = arith.divf %8, %9 : vector<2x10xf32>
    %c0_6 = arith.constant 0 : index
    %c0_7 = arith.constant 0 : index
    %11 = vector.load %arg3[%c0_6, %c0_7] : memref<2x10xf32, #tpu.memory_space<vmem>>, vector<2x10xf32>
    tpu.vector_store %arg3[%c0_6, %c0_7], %10 {strides = array<i32>} : memref<2x10xf32, #tpu.memory_space<vmem>>, vector<2x10xf32>,
    return
  }
}

</mosaic_0001>

<bundles_post_ra>
// kernel: densenet_forward.14
= control target key start
LH: loop header
LB: loop body
LE: loop exit
PB: predicated region body
PF: predicated region fallthrough
CT: control target
= control target key end

     0   :  { %s2198_s21 = smov 0   ;;  %s2200_s22 = smov 0   ;;  %s3205_s0 = inlined_call_operand.vmem [shape: f32[1568,147], index: 0, kind: input, shape index: {}]   ;;  %s3206_s1 = inlined_call_operand.vmem [shape: bf16[147,16], index: 1, kind: input, shape index: {}]   ;;  %s3207_s2 = inlined_call_operand.vmem [shape: f32[1,147], index: 2, kind: input, shape index: {}]   ;;  %s3208_s3 = inlined_call_operand.vmem [shape: f32[1,147], index: 3, kind: input, shape index: {}]   ;;  %s3209_s4 = inlined_call_operand.vmem [shape: f32[1,16], index: 4, kind: input, shape index: {}]   ;;  %s3210_s5 = inlined_call_operand.vmem [shape: f32[1,16], index: 5, kind: input, shape index: {}]   ;;  %s3211_s6 = inlined_call_operand.vmem [shape: f32[1568,16], index: 6, kind: output, shape index: {}]  }
   0x1   :  { %s2202_s23 = smov 0  }
   0x2 LB: > { %s2211_s24 = sadd.s32 4294967295, %s2128_s23   ;;  %s2213_s25 = sadd.s32 1, %s2128_s23   ;;  %s2128_s23 = sphi %s2202_s23, %s3220_s23   ;;  %s2124_s22 = sphi %s2200_s22, %s3219_s22   ;;  %s2120_s21 = sphi %s2198_s21, %s3218_s21  }
   0x3   : > { %s151_s26 = ssub.s32 %s2128_s23, %s2213_s25  ;;  %s154_s27 = sadd.s32 1, %s2124_s22 }
   0x4   : > { %p152_p0 = scmp.eq.s32.totalorder %s151_s26, 0  ;;  %p164_p1 = scmp.ne.s32.totalorder %s2124_s22, %s2120_s21 }
   0x5   : > { %p165_p2 = scmp.eq.s32.totalorder %s2211_s24, 3  ;;  %p1868_p3 = scmp.ge.s32.totalorder %s2128_s23, 1 }
   0x6   : > { %s2221_s28 = scalar_select %p152_p0, %s2124_s22, %s154_s27  }
   0x7   : > { %p2223_p4 = por %p165_p2, %p164_p1  ;;  %p224_p5 = scmp.lt.s32.totalorder %s2128_s23, 5 }
   0x9   : > { %p225_p6 = pnand %p1868_p3, %p224_p5 }
   0xa   : > { %s2234_s10 = sshll.u32 (!%p225_p6), %s2211_s24, 6  ;;  %s256_s23 = sand.u32 (!%p225_p6), 1, %s2120_s21  }
   0xb   : > { %228 = sbr.rel (%p225_p6) target bundleno = 501 (0x1f5), region = 44  ;;  %p265_p7 = scmp.lt.s32.totalorder (!%p225_p6), %s2234_s10, 195 }
   0xc   : > { %s1869_s30 = sshll.u32 (!%p225_p6), %s256_s23, 9 }
   0xd   : > { %s2567_s21 = scalar_lea.vmem (!%p225_p6), [#allocation2], %s1869_s30  }
  0x10   : > { %v1966_v0 = vld [vmem:[%s3206_s1 + $0x38] sm:$0xff]  ;;  %v760_v1 = vld [vmem:[%s3206_s1 + $0x48] sm:$0x3]  ;;  %vm915_vm0 = vcmask 1040384   ;;  %vm916_vm1 = vcmask 1041408   ;;  %v1965_v3 = vld [vmem:[%s3206_s1 + $0x30] sm:$0xff] }
  0x11   : > { %v798_v2 = vunpack.c.l.b16 %v760_v1  ;;  %922 = vmatpush.bf16.msra.mxu0 %v1966_v0  ;;  %1971 = vmatpush.bf16.msra.mxu2 %v1966_v0  ;;  %v2162_v4 = vmov 65535   ;;  %v410_v6 = vld [vmem:[%s3207_s2] sm:$0x3]  ;;  %s266_s15 = scalar_select %p265_p7, %s2234_s10, 195  ;;  %v1964_v12 = vld [vmem:[%s3206_s1 + $0x28] sm:$0xff]  ;;  %vm818_vm2 = vcmask 154624  }
  0x12   : > { %v917_v5 = vsel %vm915_vm0, 4294967295, %v2162_v4  ;;  %v544_v9 = vld [vmem:[%s3208_s3] sm:$0x3]  ;;  %v2247_v11 = vperm.slane %v410_v6, 1  ;;  %v1962_v27 = vld [vmem:[%s3206_s1 + $0x18] sm:$0xff]  ;;  %v1961_v32 = vld [vmem:[%s3206_s1 + $0x10] sm:$0xff] }
  0x13   : > { %v808_v7 = vpack.c.b16 %v798_v2, %v798_v2  ;;  %v918_v8 = vsel %vm916_vm1, %v917_v5, 0  ;;  %s1958_s20 = sshll.u32 %s266_s15, 4  ;;  %v1967_v13 = vld [vmem:[%s3206_s1 + $0x40] sm:$0xff]  ;;  %v2260_v14 = vperm.slane %v544_v9, 1  ;;  %v2287_v34 = vperm.slane %v410_v6, 0  ;;  %v1960_v48 = vld [vmem:[%s3206_s1 + $0x8] sm:$0xff] }
  0x14   : > { %s2258_s7 = scalar_lea.vmem %s3205_s0, %s1958_s20  ;;  %v1963_v19 = vld [vmem:[%s3206_s1 + $0x20] sm:$0xff]  ;;  %v2295_v41 = vperm.slane %v544_v9, 0  ;;  %vm1460_vm3 = vcmask 130048   ;;  %s1533_s12 = ssub.s32 (%p2223_p4), 196, %s2234_s10 }
  0x15   : > { %v920_v10 = vand.u32 %v918_v8, %v808_v7  ;;  %923 = vmatpush.bf16.msra.mxu0 %v1965_v3  ;;  %1972 = vmatpush.bf16.msra.mxu2 %v1965_v3  ;;  %v283_v15 = vld [vmem:[%s2258_s7 + $0x8] sm:$0xff]  ;;  %v285_v16 = vld [vmem:[%s2258_s7 + $0x18] sm:$0xff]  ;;  %v282_v33 = vld [vmem:[%s2258_s7] sm:$0xff]  ;;  %s1968_s13 = sshll.u32 (%p2223_p4), %s2211_s24, 9  ;;  %p1534_p8 = scmp.lt.s32.totalorder (%p2223_p4), %s1533_s12, 64 }
  0x16   : > { %v417_v17 = vmul.f32 %v2247_v11, %v283_v15  ;;  %v419_v18 = vmul.f32 %v2247_v11, %v285_v16  ;;  %v351_v20 = vld [vmem:[%s2258_s7 + $0x228] sm:$0xff]  ;;  %v353_v23 = vld [vmem:[%s2258_s7 + $0x238] sm:$0xff]  ;;  %v284_v36 = vld [vmem:[%s2258_s7 + $0x10] sm:$0xff]  ;;  %v416_v44 = vmul.f32 %v2287_v34, %v282_v33  ;;  %s3070_s16 = scalar_lea.vmem (%p2223_p4), %s3211_s6, %s1968_s13  }
  0x17   : > { %1097 = vmatpush.bf16.msra.mxu1 %v920_v10  ;;  %1979 = vmatpush.bf16.msra.mxu3 %v920_v10  ;;  %v485_v25 = vmul.f32 %v2247_v11, %v351_v20  ;;  %v487_v26 = vmul.f32 %v2247_v11, %v353_v23  ;;  %v287_v30 = vld [vmem:[%s2258_s7 + $0x28] sm:$0xff]  ;;  %v289_v31 = vld [vmem:[%s2258_s7 + $0x38] sm:$0xff]  ;;  %v346_v37 = vld [vmem:[%s2258_s7 + $0x200] sm:$0xff]  ;;  %v418_v45 = vmul.f32 %v2287_v34, %v284_v36 }
  0x18   : > { %v551_v21 = vadd.f32 %v2260_v14, %v417_v17  ;;  %v553_v22 = vadd.f32 %v2260_v14, %v419_v18  ;;  %v348_v38 = vld [vmem:[%s2258_s7 + $0x210] sm:$0xff]  ;;  %v421_v39 = vmul.f32 %v2247_v11, %v287_v30  ;;  %v423_v40 = vmul.f32 %v2247_v11, %v289_v31  ;;  %v355_v42 = vld [vmem:[%s2258_s7 + $0x248] sm:$0xff]  ;;  %v357_v43 = vld [vmem:[%s2258_s7 + $0x258] sm:$0xff] }
  0x19   : > { %924 = vmatpush.bf16.msra.mxu0 %v1964_v12  ;;  %1973 = vmatpush.bf16.msra.mxu2 %v1964_v12  ;;  %v619_v28 = vadd.f32 %v2260_v14, %v485_v25  ;;  %v621_v29 = vadd.f32 %v2260_v14, %v487_v26  ;;  %v480_v46 = vmul.f32 %v2287_v34, %v346_v37  ;;  %v1959_v57 = vld [vmem:[%s3206_s1] sm:$0xff]  ;;  %v291_v0 = vld [vmem:[%s2258_s7 + $0x48] sm:$0xff]  ;;  %v293_v1 = vld [vmem:[%s2258_s7 + $0x58] sm:$0xff] }
  0x1a   : > { %v679_v24 = vpack.c.bf16 %v553_v22, %v551_v21  ;;  %v482_v47 = vmul.f32 %v2287_v34, %v348_v38  ;;  %v555_v49 = vadd.f32 %v2260_v14, %v421_v39  ;;  %v557_v50 = vadd.f32 %v2260_v14, %v423_v40  ;;  %v286_v2 = vld [vmem:[%s2258_s7 + $0x20] sm:$0xff]  ;;  %v288_v3 = vld [vmem:[%s2258_s7 + $0x30] sm:$0xff]  ;;  %v359_v8 = vld [vmem:[%s2258_s7 + $0x268] sm:$0xff] }
  0x1b   : > { %1098 = vmatpush.bf16.msra.mxu1 %v1967_v13  ;;  %1980 = vmatpush.bf16.msra.mxu3 %v1967_v13  ;;  %v713_v35 = vpack.c.bf16 %v621_v29, %v619_v28  ;;  %v489_v51 = vmul.f32 %v2247_v11, %v355_v42  ;;  %v491_v52 = vmul.f32 %v2247_v11, %v357_v43  ;;  %v350_v4 = vld [vmem:[%s2258_s7 + $0x220] sm:$0xff]  ;;  %v352_v5 = vld [vmem:[%s2258_s7 + $0x230] sm:$0xff]  ;;  %v361_v9 = vld [vmem:[%s2258_s7 + $0x278] sm:$0xff] }
  0x1c   : > { %v550_v53 = vadd.f32 %v2295_v41, %v416_v44  ;;  %v552_v54 = vadd.f32 %v2295_v41, %v418_v45  ;;  %v614_v55 = vadd.f32 %v2295_v41, %v480_v46  ;;  %v616_v56 = vadd.f32 %v2295_v41, %v482_v47  ;;  %v295_v30 = vld [vmem:[%s2258_s7 + $0x68] sm:$0xff]  ;;  %v297_v31 = vld [vmem:[%s2258_s7 + $0x78] sm:$0xff]  ;;  %v292_v33 = vld [vmem:[%s2258_s7 + $0x50] sm:$0xff] }
  0x1d   : > { %925 = vmatpush.bf16.msra.mxu0 %v1963_v19  ;;  %1974 = vmatpush.bf16.msra.mxu2 %v1963_v19  ;;  %v681_v58 = vpack.c.bf16 %v557_v50, %v555_v49  ;;  %v623_v59 = vadd.f32 %v2260_v14, %v489_v51  ;;  %v625_v60 = vadd.f32 %v2260_v14, %v491_v52  ;;  %v356_v36 = vld [vmem:[%s2258_s7 + $0x250] sm:$0xff]  ;;  %v363_v39 = vld [vmem:[%s2258_s7 + $0x288] sm:$0xff]  ;;  %v365_v40 = vld [vmem:[%s2258_s7 + $0x298] sm:$0xff] }
  0x1e   : > { %1909 = vmatmul.msk.bf16.vlgmr.msra.gmra.mxu1 %vm818_vm2, %v679_v24  ;;  %1926 = vmatmul.msk.bf16.vlgmr.msra.gmra.mxu3 %vm818_vm2, %v713_v35  ;;  %v678_v61 = vpack.c.bf16 %v552_v54, %v550_v53  ;;  %v710_v62 = vpack.c.bf16 %v616_v56, %v614_v55  ;;  %v425_v6 = vmul.f32 %v2247_v11, %v291_v0  ;;  %v354_v35 = vld [vmem:[%s2258_s7 + $0x240] sm:$0xff] }
  0x1f   : > { %v715_v63 = vpack.c.bf16 %v625_v60, %v623_v59  ;;  %v427_v7 = vmul.f32 %v2247_v11, %v293_v1  ;;  %v420_v10 = vmul.f32 %v2287_v34, %v286_v2  ;;  %v422_v12 = vmul.f32 %v2287_v34, %v288_v3  ;;  %v299_v60 = vld [vmem:[%s2258_s7 + $0x88] sm:$0xff]  ;;  %v358_v0 = vld [vmem:[%s2258_s7 + $0x260] sm:$0xff]  ;;  %v360_v1 = vld [vmem:[%s2258_s7 + $0x270] sm:$0xff] }
  0x20   : > { %v484_v13 = vmul.f32 %v2287_v34, %v350_v4  ;;  %v486_v15 = vmul.f32 %v2287_v34, %v352_v5  ;;  %v559_v16 = vadd.f32 %v2260_v14, %v425_v6  ;;  %v493_v18 = vmul.f32 %v2247_v11, %v359_v8  ;;  %v367_v4 = vld [vmem:[%s2258_s7 + $0x2a8] sm:$0xff]  ;;  %v369_v5 = vld [vmem:[%s2258_s7 + $0x2b8] sm:$0xff] }
  0x21   : > { %926 = vmatpush.bf16.msra.mxu0 %v1962_v27  ;;  %1975 = vmatpush.bf16.msra.mxu2 %v1962_v27  ;;  %v561_v17 = vadd.f32 %v2260_v14, %v427_v7  ;;  %v495_v19 = vmul.f32 %v2247_v11, %v361_v9  ;;  %v554_v20 = vadd.f32 %v2295_v41, %v420_v10 }
  0x22   : > { %v556_v21 = vadd.f32 %v2295_v41, %v422_v12  ;;  %v618_v22 = vadd.f32 %v2295_v41, %v484_v13  ;;  %v620_v23 = vadd.f32 %v2295_v41, %v486_v15  ;;  %v627_v25 = vadd.f32 %v2260_v14, %v493_v18 }
  0x23   : > { %v683_v24 = vpack.c.bf16 %v561_v17, %v559_v16  ;;  %v629_v26 = vadd.f32 %v2260_v14, %v495_v19  ;;  %v429_v37 = vmul.f32 %v2247_v11, %v295_v30  ;;  %v431_v38 = vmul.f32 %v2247_v11, %v297_v31  ;;  %v362_v30 = vld [vmem:[%s2258_s7 + $0x280] sm:$0xff]  ;;  %v364_v31 = vld [vmem:[%s2258_s7 + $0x290] sm:$0xff] }
  0x24   : > { %v680_v27 = vpack.c.bf16 %v556_v21, %v554_v20  ;;  %v712_v28 = vpack.c.bf16 %v620_v23, %v618_v22  ;;  %v426_v43 = vmul.f32 %v2287_v34, %v292_v33  ;;  %v488_v44 = vmul.f32 %v2287_v34, %v354_v35  ;;  %v371_v35 = vld [vmem:[%s2258_s7 + $0x2c8] sm:$0xff] }
  0x25   : > { %927 = vmatpush.bf16.msra.mxu0 %v1961_v32  ;;  %1976 = vmatpush.bf16.msra.mxu2 %v1961_v32  ;;  %v717_v29 = vpack.c.bf16 %v629_v26, %v627_v25  ;;  %v290_v32 = vld [vmem:[%s2258_s7 + $0x40] sm:$0xff]  ;;  %v490_v45 = vmul.f32 %v2287_v34, %v356_v36  ;;  %v563_v46 = vadd.f32 %v2260_v14, %v429_v37  ;;  %v303_v26 = vld [vmem:[%s2258_s7 + $0xa8] sm:$0xff]  ;;  %v373_v36 = vld [vmem:[%s2258_s7 + $0x2d8] sm:$0xff] }
  0x26   : > { %v424_v42 = vmul.f32 %v2287_v34, %v290_v32  ;;  %v565_v47 = vadd.f32 %v2260_v14, %v431_v38  ;;  %v499_v49 = vmul.f32 %v2247_v11, %v365_v40  ;;  %v560_v51 = vadd.f32 %v2295_v41, %v426_v43 }
  0x27   : > { %v622_v52 = vadd.f32 %v2295_v41, %v488_v44  ;;  %v624_v53 = vadd.f32 %v2295_v41, %v490_v45  ;;  %v433_v2 = vmul.f32 %v2247_v11, %v299_v60  ;;  %v492_v8 = vmul.f32 %v2287_v34, %v358_v0  ;;  %v366_v60 = vld [vmem:[%s2258_s7 + $0x2a0] sm:$0xff]  ;;  %v375_v0 = vld [vmem:[%s2258_s7 + $0x2e8] sm:$0xff] }
  0x28   : > { %v558_v50 = vadd.f32 %v2295_v41, %v424_v42  ;;  %v685_v54 = vpack.c.bf16 %v565_v47, %v563_v46  ;;  %v633_v56 = vadd.f32 %v2260_v14, %v499_v49  ;;  %v494_v9 = vmul.f32 %v2287_v34, %v360_v1  ;;  %v377_v1 = vld [vmem:[%s2258_s7 + $0x2f8] sm:$0xff] }
  0x29   : > { %928 = vmatpush.bf16.msra.mxu0 %v1960_v48  ;;  %1977 = vmatpush.bf16.msra.mxu2 %v1960_v48  ;;  %v497_v48 = vmul.f32 %v2247_v11, %v363_v39  ;;  %v567_v10 = vadd.f32 %v2260_v14, %v433_v2  ;;  %v501_v13 = vmul.f32 %v2247_v11, %v367_v4 }
  0x2a   : > { %v503_v15 = vmul.f32 %v2247_v11, %v369_v5  ;;  %v626_v18 = vadd.f32 %v2295_v41, %v492_v8  ;;  %v628_v19 = vadd.f32 %v2295_v41, %v494_v9  ;;  %v437_v32 = vmul.f32 %v2247_v11, %v303_v26  ;;  %v370_v26 = vld [vmem:[%s2258_s7 + $0x2c0] sm:$0xff] }
  0x2b   : > { %v631_v55 = vadd.f32 %v2260_v14, %v497_v48  ;;  %v635_v21 = vadd.f32 %v2260_v14, %v501_v13  ;;  %v496_v39 = vmul.f32 %v2287_v34, %v362_v30  ;;  %v498_v40 = vmul.f32 %v2287_v34, %v364_v31  ;;  %v379_v30 = vld [vmem:[%s2258_s7 + $0x308] sm:$0xff]  ;;  %v381_v31 = vld [vmem:[%s2258_s7 + $0x318] sm:$0xff] }
  0x2c   : > { %v637_v22 = vadd.f32 %v2260_v14, %v503_v15  ;;  %v571_v42 = vadd.f32 %v2260_v14, %v437_v32  ;;  %v505_v44 = vmul.f32 %v2247_v11, %v371_v35  ;;  %v507_v45 = vmul.f32 %v2247_v11, %v373_v36 }
  0x2d   : > { %929 = vmatpush.bf16.msra.mxu0 %v1959_v57  ;;  %1978 = vmatpush.bf16.msra.mxu2 %v1959_v57  ;;  %v682_v57 = vpack.c.bf16 %v560_v51, %v558_v50  ;;  %v719_v59 = vpack.c.bf16 %v633_v56, %v631_v55  ;;  %v630_v48 = vadd.f32 %v2295_v41, %v496_v39  ;;  %v307_v56 = vld [vmem:[%s2258_s7 + $0xc8] sm:$0xff] }
  0x2e   : > { %1910 = vmatmul.msk.bf16.gmra.mxu1 %vm818_vm2, %v681_v58  ;;  %1927 = vmatmul.msk.bf16.gmra.mxu3 %vm818_vm2, %v715_v63  ;;  %v714_v58 = vpack.c.bf16 %v624_v53, %v622_v52  ;;  %v296_v63 = vld [vmem:[%s2258_s7 + $0x70] sm:$0xff]  ;;  %v721_v25 = vpack.c.bf16 %v637_v22, %v635_v21  ;;  %v632_v49 = vadd.f32 %v2295_v41, %v498_v40  ;;  %v311_v22 = vld [vmem:[%s2258_s7 + $0xe8] sm:$0xff] }
  0x2f   : > { %v430_v7 = vmul.f32 %v2287_v34, %v296_v63  ;;  %v639_v51 = vadd.f32 %v2260_v14, %v505_v44  ;;  %v641_v52 = vadd.f32 %v2260_v14, %v507_v45  ;;  %v500_v4 = vmul.f32 %v2287_v34, %v366_v60  ;;  %v383_v60 = vld [vmem:[%s2258_s7 + $0x328] sm:$0xff] }
  0x30   : > { %930 = vmatmul.bf16.vlgmr.msra.gmra.mxu0 %v678_v61  ;;  %1010 = vmatmul.bf16.vlgmr.msra.gmra.mxu2 %v710_v62  ;;  %v301_v61 = vld [vmem:[%s2258_s7 + $0x98] sm:$0xff]  ;;  %v294_v62 = vld [vmem:[%s2258_s7 + $0x60] sm:$0xff]  ;;  %v509_v8 = vmul.f32 %v2247_v11, %v375_v0  ;;  %v511_v9 = vmul.f32 %v2247_v11, %v377_v1  ;;  %v504_v35 = vmul.f32 %v2287_v34, %v370_v26 }
  0x31   : > { %v435_v3 = vmul.f32 %v2247_v11, %v301_v61  ;;  %v428_v6 = vmul.f32 %v2287_v34, %v294_v62  ;;  %v564_v17 = vadd.f32 %v2295_v41, %v430_v7  ;;  %v723_v55 = vpack.c.bf16 %v641_v52, %v639_v51  ;;  %v368_v61 = vld [vmem:[%s2258_s7 + $0x2b0] sm:$0xff]  ;;  %v315_v52 = vld [vmem:[%s2258_s7 + $0x108] sm:$0xff] }
  0x32   : > { %v441_v62 = vmul.f32 %v2247_v11, %v307_v56  ;;  %v502_v5 = vmul.f32 %v2287_v34, %v368_v61  ;;  %v634_v13 = vadd.f32 %v2295_v41, %v500_v4  ;;  %v513_v39 = vmul.f32 %v2247_v11, %v379_v30  ;;  %v374_v56 = vld [vmem:[%s2258_s7 + $0x2e0] sm:$0xff]  ;;  %v385_v61 = vld [vmem:[%s2258_s7 + $0x338] sm:$0xff] }
  0x33   : > { %v569_v12 = vadd.f32 %v2260_v14, %v435_v3  ;;  %v562_v16 = vadd.f32 %v2295_v41, %v428_v6  ;;  %v515_v40 = vmul.f32 %v2247_v11, %v381_v31  ;;  %v638_v44 = vadd.f32 %v2295_v41, %v504_v35 }
  0x34   : > { %v575_v6 = vadd.f32 %v2260_v14, %v441_v62  ;;  %v636_v15 = vadd.f32 %v2295_v41, %v502_v5  ;;  %v508_v0 = vmul.f32 %v2287_v34, %v374_v56  ;;  %v517_v4 = vmul.f32 %v2247_v11, %v383_v60  ;;  %v323_v56 = vld [vmem:[%s2258_s7 + $0x148] sm:$0xff]  ;;  %v318_v60 = vld [vmem:[%s2258_s7 + $0x120] sm:$0xff] }
  0x35   : > { %v687_v20 = vpack.c.bf16 %v569_v12, %v567_v10  ;;  %v684_v23 = vpack.c.bf16 %v564_v17, %v562_v16  ;;  %v643_v17 = vadd.f32 %v2260_v14, %v509_v8  ;;  %v519_v5 = vmul.f32 %v2247_v11, %v385_v61 }
  0x36   : > { %v642_v8 = vadd.f32 %v2295_v41, %v508_v0  ;;  %v457_v61 = vmul.f32 %v2247_v11, %v323_v56  ;;  %v384_v0 = vld [vmem:[%s2258_s7 + $0x330] sm:$0xff] }
  0x3e   : > { %1911 = vmatmul.msk.bf16.gmra.mxu1 %vm818_vm2, %v683_v24  ;;  %1928 = vmatmul.msk.bf16.gmra.mxu3 %vm818_vm2, %v717_v29  ;;  %v716_v24 = vpack.c.bf16 %v628_v19, %v626_v18  ;;  %v300_v29 = vld [vmem:[%s2258_s7 + $0x90] sm:$0xff]  ;;  %v645_v18 = vadd.f32 %v2260_v14, %v511_v9 }
  0x3f   : > { %v434_v38 = vmul.f32 %v2287_v34, %v300_v29 }
  0x40   : > { %935 = vmatmul.bf16.gmra.mxu0 %v680_v27  ;;  %1015 = vmatmul.bf16.gmra.mxu2 %v712_v28  ;;  %v305_v27 = vld [vmem:[%s2258_s7 + $0xb8] sm:$0xff]  ;;  %v298_v28 = vld [vmem:[%s2258_s7 + $0x80] sm:$0xff]  ;;  %v725_v21 = vpack.c.bf16 %v645_v18, %v643_v17 }
  0x41   : > { %v439_v33 = vmul.f32 %v2247_v11, %v305_v27  ;;  %v432_v37 = vmul.f32 %v2287_v34, %v298_v28  ;;  %v568_v47 = vadd.f32 %v2295_v41, %v434_v38  ;;  %v372_v27 = vld [vmem:[%s2258_s7 + $0x2d0] sm:$0xff]  ;;  %v445_v28 = vmul.f32 %v2247_v11, %v311_v22 }
  0x42   : > { %v506_v36 = vmul.f32 %v2287_v34, %v372_v27  ;;  %v316_v22 = vld [vmem:[%s2258_s7 + $0x110] sm:$0xff] }
  0x43   : > { %v573_v43 = vadd.f32 %v2260_v14, %v439_v33  ;;  %v566_v46 = vadd.f32 %v2295_v41, %v432_v37  ;;  %v579_v37 = vadd.f32 %v2260_v14, %v445_v28  ;;  %v387_v28 = vld [vmem:[%s2258_s7 + $0x348] sm:$0xff]  ;;  %v450_v31 = vmul.f32 %v2287_v34, %v316_v22 }
  0x44   : > { %v640_v45 = vadd.f32 %v2295_v41, %v506_v36 }
  0x45   : > { %v689_v50 = vpack.c.bf16 %v573_v43, %v571_v42  ;;  %v686_v53 = vpack.c.bf16 %v568_v47, %v566_v46  ;;  %v647_v47 = vadd.f32 %v2260_v14, %v513_v39 }
  0x4e   : > { %1912 = vmatmul.msk.bf16.gmra.mxu1 %vm818_vm2, %v685_v54  ;;  %1929 = vmatmul.msk.bf16.gmra.mxu3 %vm818_vm2, %v719_v59  ;;  %v718_v54 = vpack.c.bf16 %v632_v49, %v630_v48  ;;  %v304_v59 = vld [vmem:[%s2258_s7 + $0xb0] sm:$0xff]  ;;  %v649_v48 = vadd.f32 %v2260_v14, %v515_v40 }
  0x4f   : > { %v438_v3 = vmul.f32 %v2287_v34, %v304_v59 }
  0x50   : > { %940 = vmatmul.bf16.gmra.mxu0 %v682_v57  ;;  %1020 = vmatmul.bf16.gmra.mxu2 %v714_v58  ;;  %v309_v57 = vld [vmem:[%s2258_s7 + $0xd8] sm:$0xff]  ;;  %v302_v58 = vld [vmem:[%s2258_s7 + $0xa0] sm:$0xff]  ;;  %v727_v51 = vpack.c.bf16 %v649_v48, %v647_v47 }
  0x51   : > { %v443_v63 = vmul.f32 %v2247_v11, %v309_v57  ;;  %v436_v2 = vmul.f32 %v2287_v34, %v302_v58  ;;  %v572_v12 = vadd.f32 %v2295_v41, %v438_v3  ;;  %v376_v57 = vld [vmem:[%s2258_s7 + $0x2f0] sm:$0xff]  ;;  %v449_v58 = vmul.f32 %v2247_v11, %v315_v52 }
  0x52   : > { %v510_v1 = vmul.f32 %v2287_v34, %v376_v57 }
  0x53   : > { %v577_v7 = vadd.f32 %v2260_v14, %v443_v63  ;;  %v570_v10 = vadd.f32 %v2295_v41, %v436_v2  ;;  %v583_v2 = vadd.f32 %v2260_v14, %v449_v58  ;;  %v325_v58 = vld [vmem:[%s2258_s7 + $0x158] sm:$0xff] }
  0x54   : > { %v644_v9 = vadd.f32 %v2295_v41, %v510_v1 }
  0x55   : > { %v691_v16 = vpack.c.bf16 %v577_v7, %v575_v6  ;;  %v688_v19 = vpack.c.bf16 %v572_v12, %v570_v10  ;;  %v651_v12 = vadd.f32 %v2260_v14, %v517_v4 }
  0x56   : > { %v724_v17 = vpack.c.bf16 %v644_v9, %v642_v8 }
  0x5e   : > { %1913 = vmatmul.msk.bf16.gmra.mxu1 %vm818_vm2, %v687_v20  ;;  %1930 = vmatmul.msk.bf16.gmra.mxu3 %vm818_vm2, %v721_v25  ;;  %v720_v20 = vpack.c.bf16 %v636_v15, %v634_v13  ;;  %v308_v25 = vld [vmem:[%s2258_s7 + $0xd0] sm:$0xff]  ;;  %v653_v13 = vadd.f32 %v2260_v14, %v519_v5  ;;  %v452_v5 = vmul.f32 %v2287_v34, %v318_v60  ;;  %v397_v60 = vld [vmem:[%s2258_s7 + $0x398] sm:$0xff] }
  0x5f   : > { %v442_v33 = vmul.f32 %v2287_v34, %v308_v25 }
  0x60   : > { %945 = vmatmul.bf16.gmra.mxu0 %v684_v23  ;;  %1025 = vmatmul.bf16.gmra.mxu2 %v716_v24  ;;  %v313_v23 = vld [vmem:[%s2258_s7 + $0xf8] sm:$0xff]  ;;  %v306_v24 = vld [vmem:[%s2258_s7 + $0xc0] sm:$0xff]  ;;  %v729_v18 = vpack.c.bf16 %v653_v13, %v651_v12  ;;  %v518_v12 = vmul.f32 %v2287_v34, %v384_v0 }
  0x61   : > { %v447_v29 = vmul.f32 %v2247_v11, %v313_v23  ;;  %v440_v32 = vmul.f32 %v2287_v34, %v306_v24  ;;  %v576_v43 = vadd.f32 %v2295_v41, %v442_v33  ;;  %v378_v23 = vld [vmem:[%s2258_s7 + $0x300] sm:$0xff]  ;;  %v380_v24 = vld [vmem:[%s2258_s7 + $0x310] sm:$0xff] }
  0x62   : > { %v514_v33 = vmul.f32 %v2287_v34, %v380_v24 }
  0x63   : > { %v581_v38 = vadd.f32 %v2260_v14, %v447_v29  ;;  %v574_v42 = vadd.f32 %v2295_v41, %v440_v32  ;;  %v389_v29 = vld [vmem:[%s2258_s7 + $0x358] sm:$0xff]  ;;  %v512_v32 = vmul.f32 %v2287_v34, %v378_v23 }
  0x64   : > { %v523_v39 = vmul.f32 %v2247_v11, %v389_v29 }
  0x65   : > { %v693_v46 = vpack.c.bf16 %v581_v38, %v579_v37  ;;  %v690_v49 = vpack.c.bf16 %v576_v43, %v574_v42  ;;  %v521_v38 = vmul.f32 %v2247_v11, %v387_v28  ;;  %v584_v42 = vadd.f32 %v2295_v41, %v450_v31 }
  0x66   : > { %v646_v43 = vadd.f32 %v2295_v41, %v512_v32  ;;  %v657_v47 = vadd.f32 %v2260_v14, %v523_v39 }
  0x6e   : > { %1914 = vmatmul.msk.bf16.gmra.mxu1 %vm818_vm2, %v689_v50  ;;  %1931 = vmatmul.msk.bf16.gmra.mxu3 %vm818_vm2, %v723_v55  ;;  %v722_v50 = vpack.c.bf16 %v640_v45, %v638_v44  ;;  %v312_v55 = vld [vmem:[%s2258_s7 + $0xf0] sm:$0xff]  ;;  %v648_v44 = vadd.f32 %v2295_v41, %v514_v33 }
  0x6f   : > { %v446_v63 = vmul.f32 %v2287_v34, %v312_v55  ;;  %v2541_v55 = vld [vmem:[%s3210_s5] ss:$0 sm:$0xff] }
  0x70   : > { %950 = vmatmul.bf16.gmra.mxu0 %v686_v53  ;;  %1030 = vmatmul.bf16.gmra.mxu2 %v718_v54  ;;  %v317_v53 = vld [vmem:[%s2258_s7 + $0x118] sm:$0xff]  ;;  %v310_v54 = vld [vmem:[%s2258_s7 + $0xe0] sm:$0xff] }
  0x71   : > { %v451_v59 = vmul.f32 %v2247_v11, %v317_v53  ;;  %v444_v62 = vmul.f32 %v2287_v34, %v310_v54  ;;  %v580_v7 = vadd.f32 %v2295_v41, %v446_v63  ;;  %v382_v63 = vld [vmem:[%s2258_s7 + $0x320] sm:$0xff] }
  0x73   : > { %v585_v3 = vadd.f32 %v2260_v14, %v451_v59  ;;  %v578_v6 = vadd.f32 %v2295_v41, %v444_v62  ;;  %v320_v62 = vld [vmem:[%s2258_s7 + $0x130] sm:$0xff] }
  0x74   : > { %v454_v9 = vmul.f32 %v2287_v34, %v320_v62 }
  0x75   : > { %v695_v10 = vpack.c.bf16 %v585_v3, %v583_v2  ;;  %v459_v2 = vmul.f32 %v2247_v11, %v325_v58 }
  0x76   : > { %v588_v23 = vadd.f32 %v2295_v41, %v454_v9  ;;  %v531_v9 = vmul.f32 %v2247_v11, %v397_v60 }
  0x7e   : > { %1915 = vmatmul.msk.bf16.gmra.mxu1 %vm818_vm2, %v691_v16  ;;  %1932 = vmatmul.msk.bf16.gmra.mxu3 %vm818_vm2, %v725_v21  ;;  %v692_v16 = vpack.c.bf16 %v580_v7, %v578_v6  ;;  %v314_v21 = vld [vmem:[%s2258_s7 + $0x100] sm:$0xff]  ;;  %v391_v6 = vld [vmem:[%s2258_s7 + $0x368] sm:$0xff]  ;;  %v393_v7 = vld [vmem:[%s2258_s7 + $0x378] sm:$0xff] }
  0x7f   : > { %v448_v30 = vmul.f32 %v2287_v34, %v314_v21  ;;  %v586_v21 = vadd.f32 %v2295_v41, %v452_v5 }
  0x80   : > { %955 = vmatmul.bf16.gmra.mxu0 %v688_v19  ;;  %1035 = vmatmul.bf16.gmra.mxu2 %v720_v20  ;;  %v319_v19 = vld [vmem:[%s2258_s7 + $0x128] sm:$0xff]  ;;  %v321_v20 = vld [vmem:[%s2258_s7 + $0x138] sm:$0xff] }
  0x81   : > { %v453_v25 = vmul.f32 %v2247_v11, %v319_v19  ;;  %v455_v26 = vmul.f32 %v2247_v11, %v321_v20  ;;  %v582_v40 = vadd.f32 %v2295_v41, %v448_v30  ;;  %v525_v19 = vmul.f32 %v2247_v11, %v391_v6 }
  0x82   : > { %v527_v20 = vmul.f32 %v2247_v11, %v393_v7  ;;  %v696_v33 = vpack.c.bf16 %v588_v23, %v586_v21 }
  0x83   : > { %v587_v36 = vadd.f32 %v2260_v14, %v453_v25  ;;  %v589_v37 = vadd.f32 %v2260_v14, %v455_v26  ;;  %v652_v25 = vadd.f32 %v2295_v41, %v518_v12  ;;  %v659_v28 = vadd.f32 %v2260_v14, %v525_v19 }
  0x84   : > { %v661_v29 = vadd.f32 %v2260_v14, %v527_v20 }
  0x85   : > { %v697_v45 = vpack.c.bf16 %v589_v37, %v587_v36 }
  0x8e   : > { %1916 = vmatmul.msk.bf16.gmra.mxu1 %vm818_vm2, %v693_v46  ;;  %1933 = vmatmul.msk.bf16.gmra.mxu3 %vm818_vm2, %v727_v51  ;;  %v655_v46 = vadd.f32 %v2260_v14, %v521_v38  ;;  %v726_v51 = vpack.c.bf16 %v648_v44, %v646_v43  ;;  %v733_v43 = vpack.c.bf16 %v661_v29, %v659_v28 }
  0x90   : > { %960 = vmatmul.bf16.gmra.mxu0 %v690_v49  ;;  %1040 = vmatmul.bf16.gmra.mxu2 %v722_v50  ;;  %v2532_v49 = vld [vmem:[%s3209_s4] ss:$0 sm:$0xff]  ;;  %v694_v50 = vpack.c.bf16 %v584_v42, %v582_v40  ;;  %v731_v57 = vpack.c.bf16 %v657_v47, %v655_v46  ;;  %v327_v40 = vld [vmem:[%s2258_s7 + $0x168] sm:$0xff]  ;;  %v329_v42 = vld [vmem:[%s2258_s7 + $0x178] sm:$0xff] }
  0x91   : > { %v324_v46 = vld [vmem:[%s2258_s7 + $0x150] sm:$0xff]  ;;  %v461_v47 = vmul.f32 %v2247_v11, %v327_v40 }
  0x92   : > { %v458_v58 = vmul.f32 %v2287_v34, %v324_v46 }
  0x94   : > { %v592_v12 = vadd.f32 %v2295_v41, %v458_v58  ;;  %v399_v58 = vld [vmem:[%s2258_s7 + $0x3a8] sm:$0xff] }
  0x9b   : > { %v1100_v15 = vpop.f32.mrf.mxu1 }
  0x9e   : > { %1917 = vmatmul.msk.bf16.gmra.mxu1 %vm818_vm2, %v695_v10  ;;  %1934 = vmatmul.msk.bf16.gmra.mxu3 %vm818_vm2, %v729_v18  ;;  %v516_v10 = vmul.f32 %v2287_v34, %v382_v63  ;;  %v593_v18 = vadd.f32 %v2260_v14, %v459_v2  ;;  %v595_v2 = vadd.f32 %v2260_v14, %v461_v47  ;;  %v390_v47 = vld [vmem:[%s2258_s7 + $0x360] sm:$0xff] }
  0xa0   : > { %965 = vmatmul.bf16.gmra.mxu0 %v692_v16  ;;  %1045 = vmatmul.bf16.gmra.mxu2 %v724_v17  ;;  %v650_v24 = vadd.f32 %v2295_v41, %v516_v10 }
  0xa1   : > { %v2517_v35 = vpop.f32.mrf.mxu3 }
  0xa2   : > { %v728_v36 = vpack.c.bf16 %v652_v25, %v650_v24 }
  0xa3   : > { %v1102_v27 = vpop.f32.mrf.mxu1 }
  0xa9   : > { %v2535_v53 = vpop.f32.mrf.mxu3 }
  0xab   : > { %v1105_v48 = vpop.f32.mrf.mxu1 }
  0xad   : > { %v931_v52 = vpop.f32.mrf.mxu0 }
  0xae   : > { %1918 = vmatmul.msk.bf16.gmra.mxu1 %vm818_vm2, %v697_v45  ;;  %v1101_v54 = vadd.f32 %v1100_v15, %v931_v52  ;;  %1935 = vmatmul.msk.bf16.gmra.mxu3 %vm818_vm2, %v731_v57  ;;  %v591_v15 = vadd.f32 %v2260_v14, %v457_v61  ;;  %v322_v45 = vld [vmem:[%s2258_s7 + $0x140] sm:$0xff]  ;;  %v388_v52 = vld [vmem:[%s2258_s7 + $0x350] sm:$0xff] }
  0xaf   : > { %v456_v57 = vmul.f32 %v2287_v34, %v322_v45  ;;  %v522_v0 = vmul.f32 %v2287_v34, %v388_v52 }
  0xb0   : > { %v1264_v59 = vmul.f32 %v2532_v49, %v1101_v54  ;;  %970 = vmatmul.bf16.gmra.mxu0 %v694_v50  ;;  %1050 = vmatmul.bf16.gmra.mxu2 %v726_v51  ;;  %v463_v50 = vmul.f32 %v2247_v11, %v329_v42  ;;  %v386_v51 = vld [vmem:[%s2258_s7 + $0x340] sm:$0xff] }
  0xb1   : > { %v2565_v16 = vpop.f32.mrf.mxu3  ;;  %v520_v63 = vmul.f32 %v2287_v34, %v386_v51  ;;  %v590_v10 = vadd.f32 %v2295_v41, %v456_v57 }
  0xb2   : > { %v1332_v1 = vadd.f32 %v2541_v55, %v1264_v59  ;;  %v395_v59 = vld [vmem:[%s2258_s7 + $0x388] sm:$0xff]  ;;  %v597_v5 = vadd.f32 %v2260_v14, %v463_v50 }
  0xb3   : > { %v2554_v3 = vpop.f32.mrf.mxu1  ;;  %v2556_v4 = vpop.f32.mrf.mxu2 }
  0xb4   : > { %v1396_v8 = vmax.f32 %v1332_v1, 0.0  ;;  %v701_v19 = vpack.c.bf16 %v597_v5, %v595_v2 }
  0xb5   : > { %v933_v13 = vpop.f32.mrf.mxu0 }
  0xb6   : > { %1461 = vst.msk [vmem:[%s2567_s21] sm:$0xff] %vm1460_vm3, %v1396_v8  ;;  %v1103_v17 = vadd.f32 %v1102_v27, %v933_v13  ;;  %v699_v27 = vpack.c.bf16 %v593_v18, %v591_v15  ;;  %v656_v18 = vadd.f32 %v2295_v41, %v522_v0 }
  0xb8   : > { %v1265_v22 = vmul.f32 %v2532_v49, %v1103_v17  ;;  %v654_v17 = vadd.f32 %v2295_v41, %v520_v63 }
  0xb9   : > { %v2586_v38 = vpop.f32.mrf.mxu3 }
  0xba   : > { %v1333_v26 = vadd.f32 %v2541_v55, %v1265_v22  ;;  %v665_v22 = vadd.f32 %v2260_v14, %v531_v9  ;;  %v730_v28 = vpack.c.bf16 %v656_v18, %v654_v17 }
  0xbb   : > { %v2582_v30 = vpop.f32.mrf.mxu1  ;;  %v2584_v31 = vpop.f32.mrf.mxu2 }
  0xbc   : > { %v1397_v32 = vmax.f32 %v1333_v26, 0.0 }
  0xbd   : > { %v936_v37 = vpop.f32.mrf.mxu0 }
  0xbe   : > { %1462 = vst.msk [vmem:[%s2567_s21 + $0x8] sm:$0xff] %vm1460_vm3, %v1397_v32  ;;  %1919 = vmatmul.msk.bf16.gmra.mxu1 %vm818_vm2, %v699_v27  ;;  %v1106_v39 = vadd.f32 %v1105_v48, %v936_v37  ;;  %1936 = vmatmul.msk.bf16.gmra.mxu3 %vm818_vm2, %v733_v43  ;;  %v698_v27 = vpack.c.bf16 %v592_v12, %v590_v10  ;;  %v331_v37 = vld [vmem:[%s2258_s7 + $0x188] sm:$0xff]  ;;  %v326_v43 = vld [vmem:[%s2258_s7 + $0x160] sm:$0xff] }
  0xbf   : > { %v465_v45 = vmul.f32 %v2247_v11, %v331_v37  ;;  %v335_v37 = vld [vmem:[%s2258_s7 + $0x1a8] sm:$0xff] }
  0xc0   : > { %v1266_v44 = vmul.f32 %v2532_v49, %v1106_v39  ;;  %975 = vmatmul.bf16.gmra.mxu0 %v696_v33  ;;  %1055 = vmatmul.bf16.gmra.mxu2 %v728_v36  ;;  %v333_v39 = vld [vmem:[%s2258_s7 + $0x198] sm:$0xff] }
  0xc1   : > { %v2613_v6 = vpop.f32.mrf.mxu3  ;;  %v467_v46 = vmul.f32 %v2247_v11, %v333_v39  ;;  %v337_v39 = vld [vmem:[%s2258_s7 + $0x1b8] sm:$0xff] }
  0xc2   : > { %v1334_v54 = vadd.f32 %v2541_v55, %v1266_v44  ;;  %v328_v44 = vld [vmem:[%s2258_s7 + $0x170] sm:$0xff] }
  0xc3   : > { %v2602_v48 = vpop.f32.mrf.mxu1  ;;  %v1016_v56 = vpop.f32.mrf.mxu2  ;;  %v462_v57 = vmul.f32 %v2287_v34, %v328_v44  ;;  %v601_v2 = vadd.f32 %v2260_v14, %v467_v46  ;;  %v469_v44 = vmul.f32 %v2247_v11, %v335_v37  ;;  %v394_v46 = vld [vmem:[%s2258_s7 + $0x380] sm:$0xff]  ;;  %v339_v37 = vld [vmem:[%s2258_s7 + $0x1c8] sm:$0xff] }
  0xc4   : > { %v1398_v61 = vmax.f32 %v1334_v54, 0.0  ;;  %v1186_v62 = vadd.f32 %v2517_v35, %v1016_v56  ;;  %v529_v35 = vmul.f32 %v2247_v11, %v395_v59  ;;  %v460_v56 = vmul.f32 %v2287_v34, %v326_v43  ;;  %v401_v59 = vld [vmem:[%s2258_s7 + $0x3b8] sm:$0xff]  ;;  %v332_v43 = vld [vmem:[%s2258_s7 + $0x190] sm:$0xff] }
  0xc5   : > { %v938_v1 = vpop.f32.mrf.mxu0  ;;  %v596_v10 = vadd.f32 %v2295_v41, %v462_v57  ;;  %v403_v57 = vld [vmem:[%s2258_s7 + $0x3c8] sm:$0xff] }
  0xc6   : > { %1463 = vst.msk [vmem:[%s2567_s21 + $0x10] sm:$0xff] %vm1460_vm3, %v1398_v61  ;;  %v1298_v7 = vmul.f32 %v2532_v49, %v1186_v62  ;;  %v1108_v8 = vadd.f32 %v2554_v3, %v938_v1  ;;  %v663_v21 = vadd.f32 %v2260_v14, %v529_v35  ;;  %v524_v62 = vmul.f32 %v2287_v34, %v390_v47 }
  0xc7   : > { %v599_v1 = vadd.f32 %v2260_v14, %v465_v45  ;;  %v535_v35 = vmul.f32 %v2247_v11, %v401_v59  ;;  %v594_v9 = vadd.f32 %v2295_v41, %v460_v56  ;;  %v471_v45 = vmul.f32 %v2247_v11, %v337_v39  ;;  %v341_v39 = vld [vmem:[%s2258_s7 + $0x1d8] sm:$0xff] }
  0xc8   : > { %v1366_v13 = vadd.f32 %v2541_v55, %v1298_v7  ;;  %v1267_v15 = vmul.f32 %v2532_v49, %v1108_v8  ;;  %v466_v56 = vmul.f32 %v2287_v34, %v332_v43  ;;  %v473_v43 = vmul.f32 %v2247_v11, %v339_v37 }
  0xc9   : > { %v2635_v32 = vpop.f32.mrf.mxu3  ;;  %v703_v18 = vpack.c.bf16 %v601_v2, %v599_v1  ;;  %v605_v1 = vadd.f32 %v2260_v14, %v471_v45  ;;  %v398_v45 = vld [vmem:[%s2258_s7 + $0x3a0] sm:$0xff] }
  0xca   : > { %v1430_v3 = vmax.f32 %v1366_v13, 0.0  ;;  %v1335_v20 = vadd.f32 %v2541_v55, %v1267_v15  ;;  %v658_v15 = vadd.f32 %v2295_v41, %v524_v62 }
  0xcb   : > { %v2630_v23 = vpop.f32.mrf.mxu1  ;;  %v1018_v24 = vpop.f32.mrf.mxu2 }
  0xcc   : > { %1495 = vst.msk [vmem:[%s2567_s21 + $0x110] sm:$0xff] %vm1460_vm3, %v1430_v3  ;;  %v1399_v25 = vmax.f32 %v1335_v20, 0.0  ;;  %v1188_v26 = vadd.f32 %v2535_v53, %v1018_v24  ;;  %v735_v53 = vpack.c.bf16 %v665_v22, %v663_v21  ;;  %v669_v20 = vadd.f32 %v2260_v14, %v535_v35 }
  0xcd   : > { %v941_v29 = vpop.f32.mrf.mxu0 }
  0xce   : > { %1464 = vst.msk [vmem:[%s2567_s21 + $0x18] sm:$0xff] %vm1460_vm3, %v1399_v25  ;;  %v1299_v33 = vmul.f32 %v2532_v49, %v1188_v26  ;;  %1920 = vmatmul.msk.bf16.gmra.mxu1 %vm818_vm2, %v701_v19  ;;  %v1111_v36 = vadd.f32 %v2582_v30, %v941_v29  ;;  %v392_v30 = vld [vmem:[%s2258_s7 + $0x370] sm:$0xff]  ;;  %1937 = vmatmul.msk.bf16.gmra.mxu3 %vm818_vm2, %v735_v53 }
  0xcf   : > { %v526_v63 = vmul.f32 %v2287_v34, %v392_v30  ;;  %v700_v26 = vpack.c.bf16 %v596_v10, %v594_v9  ;;  %v600_v9 = vadd.f32 %v2295_v41, %v466_v56  ;;  %v407_v56 = vld [vmem:[%s2258_s7 + $0x3e8] sm:$0xff] }
  0xd0   : > { %v1367_v40 = vadd.f32 %v2541_v55, %v1299_v33  ;;  %v1268_v42 = vmul.f32 %v2532_v49, %v1111_v36  ;;  %980 = vmatmul.bf16.gmra.mxu0 %v698_v27  ;;  %1060 = vmatmul.bf16.gmra.mxu2 %v730_v28 }
  0xd1   : > { %v2667_v5 = vpop.f32.mrf.mxu3  ;;  %v660_v17 = vadd.f32 %v2295_v41, %v526_v63 }
  0xd2   : > { %v1431_v50 = vmax.f32 %v1367_v40, 0.0  ;;  %v1336_v51 = vadd.f32 %v2541_v55, %v1268_v42  ;;  %v330_v42 = vld [vmem:[%s2258_s7 + $0x180] sm:$0xff] }
  0xd3   : > { %v2654_v52 = vpop.f32.mrf.mxu1  ;;  %v1021_v54 = vpop.f32.mrf.mxu2  ;;  %v732_v27 = vpack.c.bf16 %v660_v17, %v658_v15 }
  0xd4   : > { %1496 = vst.msk [vmem:[%s2567_s21 + $0x118] sm:$0xff] %vm1460_vm3, %v1431_v50  ;;  %v1400_v60 = vmax.f32 %v1336_v51, 0.0  ;;  %v1191_v61 = vadd.f32 %v2565_v16, %v1021_v54  ;;  %v533_v16 = vmul.f32 %v2247_v11, %v399_v58  ;;  %v464_v54 = vmul.f32 %v2287_v34, %v330_v42  ;;  %v405_v58 = vld [vmem:[%s2258_s7 + $0x3d8] sm:$0xff]  ;;  %v336_v42 = vld [vmem:[%s2258_s7 + $0x1b0] sm:$0xff] }
  0xd5   : > { %v943_v0 = vpop.f32.mrf.mxu0 }
  0xd6   : > { %1465 = vst.msk [vmem:[%s2567_s21 + $0x20] sm:$0xff] %vm1460_vm3, %v1400_v60  ;;  %v1300_v7 = vmul.f32 %v2532_v49, %v1191_v61  ;;  %v1113_v8 = vadd.f32 %v2602_v48, %v943_v0  ;;  %v667_v3 = vadd.f32 %v2260_v14, %v533_v16  ;;  %v528_v61 = vmul.f32 %v2287_v34, %v394_v46 }
  0xd7   : > { %v603_v0 = vadd.f32 %v2260_v14, %v469_v44  ;;  %v539_v16 = vmul.f32 %v2247_v11, %v405_v58  ;;  %v598_v35 = vadd.f32 %v2295_v41, %v464_v54  ;;  %v475_v44 = vmul.f32 %v2247_v11, %v341_v39  ;;  %v343_v39 = vld [vmem:[%s2258_s7 + $0x1e8] sm:$0xff] }
  0xd8   : > { %v1368_v12 = vadd.f32 %v2541_v55, %v1300_v7  ;;  %v1269_v13 = vmul.f32 %v2532_v49, %v1113_v8  ;;  %v470_v54 = vmul.f32 %v2287_v34, %v336_v42  ;;  %v402_v42 = vld [vmem:[%s2258_s7 + $0x3c0] sm:$0xff] }
  0xd9   : > { %v2689_v29 = vpop.f32.mrf.mxu3  ;;  %v705_v17 = vpack.c.bf16 %v605_v1, %v603_v0  ;;  %v609_v0 = vadd.f32 %v2260_v14, %v475_v44 }
  0xda   : > { %v1432_v48 = vmax.f32 %v1368_v12, 0.0  ;;  %v1337_v19 = vadd.f32 %v2541_v55, %v1269_v13  ;;  %v662_v13 = vadd.f32 %v2295_v41, %v528_v61 }
  0xdb   : > { %v2684_v21 = vpop.f32.mrf.mxu1  ;;  %v1023_v22 = vpop.f32.mrf.mxu2 }
  0xdc   : > { %1497 = vst.msk [vmem:[%s2567_s21 + $0x120] sm:$0xff] %vm1460_vm3, %v1432_v48  ;;  %v1401_v24 = vmax.f32 %v1337_v19, 0.0  ;;  %v1193_v25 = vadd.f32 %v2586_v38, %v1023_v22  ;;  %v737_v38 = vpack.c.bf16 %v669_v20, %v667_v3  ;;  %v673_v19 = vadd.f32 %v2260_v14, %v539_v16 }
  0xdd   : > { %v946_v28 = vpop.f32.mrf.mxu0 }
  0xde   : > { %1466 = vst.msk [vmem:[%s2567_s21 + $0x28] sm:$0xff] %vm1460_vm3, %v1401_v24  ;;  %v1301_v33 = vmul.f32 %v2532_v49, %v1193_v25  ;;  %1921 = vmatmul.msk.bf16.gmra.mxu1 %vm818_vm2, %v703_v18  ;;  %v1116_v36 = vadd.f32 %v2630_v23, %v946_v28  ;;  %v396_v23 = vld [vmem:[%s2258_s7 + $0x390] sm:$0xff]  ;;  %1938 = vmatmul.msk.bf16.gmra.mxu3 %vm818_vm2, %v737_v38 }
  0xdf   : > { %v530_v62 = vmul.f32 %v2287_v34, %v396_v23  ;;  %v702_v25 = vpack.c.bf16 %v600_v9, %v598_v35  ;;  %v604_v35 = vadd.f32 %v2295_v41, %v470_v54 }
  0xe0   : > { %v1369_v53 = vadd.f32 %v2541_v55, %v1301_v33  ;;  %v1270_v40 = vmul.f32 %v2532_v49, %v1116_v36  ;;  %985 = vmatmul.bf16.gmra.mxu0 %v700_v26  ;;  %1065 = vmatmul.bf16.gmra.mxu2 %v732_v27 }
  0xe1   : > { %v2721_v2 = vpop.f32.mrf.mxu3  ;;  %v664_v15 = vadd.f32 %v2295_v41, %v530_v62 }
  0xe2   : > { %v1433_v47 = vmax.f32 %v1369_v53, 0.0  ;;  %v1338_v30 = vadd.f32 %v2541_v55, %v1270_v40  ;;  %v334_v40 = vld [vmem:[%s2258_s7 + $0x1a0] sm:$0xff] }
  0xe3   : > { %v2708_v50 = vpop.f32.mrf.mxu1  ;;  %v1026_v51 = vpop.f32.mrf.mxu2  ;;  %v734_v26 = vpack.c.bf16 %v664_v15, %v662_v13 }
  0xe4   : > { %1498 = vst.msk [vmem:[%s2567_s21 + $0x128] sm:$0xff] %vm1460_vm3, %v1433_v47  ;;  %v1402_v59 = vmax.f32 %v1338_v30, 0.0  ;;  %v1196_v60 = vadd.f32 %v2613_v6, %v1026_v51  ;;  %v537_v6 = vmul.f32 %v2247_v11, %v403_v57  ;;  %v468_v51 = vmul.f32 %v2287_v34, %v334_v40  ;;  %v409_v57 = vld [vmem:[%s2258_s7 + $0x3f8] sm:$0xff]  ;;  %v340_v40 = vld [vmem:[%s2258_s7 + $0x1d0] sm:$0xff] }
  0xe5   : > { %v948_v63 = vpop.f32.mrf.mxu0 }
  0xe6   : > { %1467 = vst.msk [vmem:[%s2567_s21 + $0x30] sm:$0xff] %vm1460_vm3, %v1402_v59  ;;  %v1302_v7 = vmul.f32 %v2532_v49, %v1196_v60  ;;  %v1118_v8 = vadd.f32 %v2654_v52, %v948_v63  ;;  %v671_v48 = vadd.f32 %v2260_v14, %v537_v6  ;;  %v532_v60 = vmul.f32 %v2287_v34, %v398_v45 }
  0xe7   : > { %v607_v63 = vadd.f32 %v2260_v14, %v473_v43  ;;  %v543_v6 = vmul.f32 %v2247_v11, %v409_v57  ;;  %v602_v16 = vadd.f32 %v2295_v41, %v468_v51  ;;  %v404_v43 = vld [vmem:[%s2258_s7 + $0x3d0] sm:$0xff]  ;;  %v474_v51 = vmul.f32 %v2287_v34, %v340_v40 }
  0xe8   : > { %v1370_v10 = vadd.f32 %v2541_v55, %v1302_v7  ;;  %v1271_v12 = vmul.f32 %v2532_v49, %v1118_v8  ;;  %v536_v57 = vmul.f32 %v2287_v34, %v402_v42 }
  0xe9   : > { %v2743_v28 = vpop.f32.mrf.mxu3  ;;  %v707_v15 = vpack.c.bf16 %v609_v0, %v607_v63 }
  0xea   : > { %v1434_v52 = vmax.f32 %v1370_v10, 0.0  ;;  %v1339_v18 = vadd.f32 %v2541_v55, %v1271_v12  ;;  %v666_v12 = vadd.f32 %v2295_v41, %v532_v60 }
  0xeb   : > { %v2738_v3 = vpop.f32.mrf.mxu1  ;;  %v1028_v20 = vpop.f32.mrf.mxu2 }
  0xec   : > { %1499 = vst.msk [vmem:[%s2567_s21 + $0x130] sm:$0xff] %vm1460_vm3, %v1434_v52  ;;  %v1403_v22 = vmax.f32 %v1339_v18, 0.0  ;;  %v1198_v24 = vadd.f32 %v2635_v32, %v1028_v20  ;;  %v739_v32 = vpack.c.bf16 %v673_v19, %v671_v48  ;;  %v677_v18 = vadd.f32 %v2260_v14, %v543_v6 }
  0xed   : > { %v951_v27 = vpop.f32.mrf.mxu0  ;;  %v670_v6 = vadd.f32 %v2295_v41, %v536_v57 }
  0xee   : > { %1468 = vst.msk [vmem:[%s2567_s21 + $0x38] sm:$0xff] %vm1460_vm3, %v1403_v22  ;;  %v1303_v33 = vmul.f32 %v2532_v49, %v1198_v24  ;;  %1922 = vmatmul.msk.bf16.gmra.mxu1 %vm818_vm2, %v705_v17  ;;  %v1121_v36 = vadd.f32 %v2684_v21, %v951_v27  ;;  %v400_v21 = vld [vmem:[%s2258_s7 + $0x3b0] sm:$0xff]  ;;  %1939 = vmatmul.msk.bf16.gmra.mxu3 %vm818_vm2, %v739_v32 }
  0xef   : > { %v534_v61 = vmul.f32 %v2287_v34, %v400_v21  ;;  %v704_v24 = vpack.c.bf16 %v604_v35, %v602_v16 }
  0xf0   : > { %v1371_v38 = vadd.f32 %v2541_v55, %v1303_v33  ;;  %v1272_v53 = vmul.f32 %v2532_v49, %v1121_v36  ;;  %990 = vmatmul.bf16.gmra.mxu0 %v702_v25  ;;  %1070 = vmatmul.bf16.gmra.mxu2 %v734_v26 }
  0xf1   : > { %v2775_v1 = vpop.f32.mrf.mxu3  ;;  %v668_v13 = vadd.f32 %v2295_v41, %v534_v61 }
  0xf2   : > { %v1435_v46 = vmax.f32 %v1371_v38, 0.0  ;;  %v1340_v23 = vadd.f32 %v2541_v55, %v1272_v53  ;;  %v338_v53 = vld [vmem:[%s2258_s7 + $0x1c0] sm:$0xff] }
  0xf3   : > { %v2762_v47 = vpop.f32.mrf.mxu1  ;;  %v1031_v30 = vpop.f32.mrf.mxu2  ;;  %v736_v25 = vpack.c.bf16 %v668_v13, %v666_v12 }
  0xf4   : > { %1500 = vst.msk [vmem:[%s2567_s21 + $0x138] sm:$0xff] %vm1460_vm3, %v1435_v46  ;;  %v1404_v58 = vmax.f32 %v1340_v23, 0.0  ;;  %v1201_v59 = vadd.f32 %v2667_v5, %v1031_v30  ;;  %v541_v5 = vmul.f32 %v2247_v11, %v407_v56  ;;  %v472_v30 = vmul.f32 %v2287_v34, %v338_v53 }
  0xf5   : > { %v953_v62 = vpop.f32.mrf.mxu0 }
  0xf6   : > { %1469 = vst.msk [vmem:[%s2567_s21 + $0x40] sm:$0xff] %vm1460_vm3, %v1404_v58  ;;  %v1304_v7 = vmul.f32 %v2532_v49, %v1201_v59  ;;  %v1123_v8 = vadd.f32 %v2708_v50, %v953_v62  ;;  %v675_v52 = vadd.f32 %v2260_v14, %v541_v5  ;;  %v538_v58 = vmul.f32 %v2287_v34, %v404_v43 }
  0xf8   : > { %v1372_v9 = vadd.f32 %v2541_v55, %v1304_v7  ;;  %v1273_v10 = vmul.f32 %v2532_v49, %v1123_v8  ;;  %v741_v37 = vpack.c.bf16 %v677_v18, %v675_v52  ;;  %v608_v7 = vadd.f32 %v2295_v41, %v474_v51 }
  0xf9   : > { %v2797_v27 = vpop.f32.mrf.mxu3  ;;  %v672_v16 = vadd.f32 %v2295_v41, %v538_v58 }
  0xfa   : > { %v1436_v50 = vmax.f32 %v1372_v9, 0.0  ;;  %v1341_v17 = vadd.f32 %v2541_v55, %v1273_v10 }
  0xfb   : > { %v2792_v48 = vpop.f32.mrf.mxu1  ;;  %v1033_v19 = vpop.f32.mrf.mxu2 }
  0xfc   : > { %1501 = vst.msk [vmem:[%s2567_s21 + $0x140] sm:$0xff] %vm1460_vm3, %v1436_v50  ;;  %v1405_v20 = vmax.f32 %v1341_v17, 0.0  ;;  %v1203_v22 = vadd.f32 %v2689_v29, %v1033_v19  ;;  %v345_v29 = vld [vmem:[%s2258_s7 + $0x1f8] sm:$0xff]  ;;  %v738_v17 = vpack.c.bf16 %v672_v16, %v670_v6 }
  0xfd   : > { %v956_v26 = vpop.f32.mrf.mxu0  ;;  %v479_v21 = vmul.f32 %v2247_v11, %v345_v29 }
  0xfe   : > { %1470 = vst.msk [vmem:[%s2567_s21 + $0x48] sm:$0xff] %vm1460_vm3, %v1405_v20  ;;  %v1305_v33 = vmul.f32 %v2532_v49, %v1203_v22  ;;  %1923 = vmatmul.msk.bf16.gmra.mxu1 %vm818_vm2, %v707_v15  ;;  %v1126_v36 = vadd.f32 %v2738_v3, %v956_v26  ;;  %v477_v3 = vmul.f32 %v2247_v11, %v343_v39  ;;  %v347_v22 = vld [vmem:[%s2258_s7 + $0x208] sm:$0xff]  ;;  %v342_v26 = vld [vmem:[%s2258_s7 + $0x1e0] sm:$0xff] }
  0xff   : > { %1940 = vmatmul.msk.bf16.gmra.mxu3 %vm818_vm2, %v741_v37  ;;  %v613_v0 = vadd.f32 %v2260_v14, %v479_v21  ;;  %v408_v37 = vld [vmem:[%s2258_s7 + $0x3f0] sm:$0xff]  ;;  %v476_v40 = vmul.f32 %v2287_v34, %v342_v26 }
 0x100   : > { %v1373_v32 = vadd.f32 %v2541_v55, %v1305_v33  ;;  %v1274_v38 = vmul.f32 %v2532_v49, %v1126_v36  ;;  %995 = vmatmul.bf16.gmra.mxu0 %v704_v24  ;;  %1075 = vmatmul.bf16.gmra.mxu2 %v736_v25  ;;  %v611_v63 = vadd.f32 %v2260_v14, %v477_v3  ;;  %v349_v24 = vld [vmem:[%s2258_s7 + $0x218] sm:$0xff]  ;;  %v344_v33 = vld [vmem:[%s2258_s7 + $0x1f0] sm:$0xff]  ;;  %v406_v36 = vld [vmem:[%s2258_s7 + $0x3e0] sm:$0xff] }
 0x101   : > { %v2825_v60 = vpop.f32.mrf.mxu3  ;;  %v478_v42 = vmul.f32 %v2287_v34, %v344_v33  ;;  %v542_v3 = vmul.f32 %v2287_v34, %v408_v37 }
 0x102   : > { %v1437_v44 = vmax.f32 %v1373_v32, 0.0  ;;  %v1342_v45 = vadd.f32 %v2541_v55, %v1274_v38  ;;  %v709_v9 = vpack.c.bf16 %v613_v0, %v611_v63  ;;  %v481_v32 = vmul.f32 %v2247_v11, %v347_v22 }
 0x103   : > { %v2816_v46 = vpop.f32.mrf.mxu1  ;;  %v1036_v23 = vpop.f32.mrf.mxu2 }
 0x104   : > { %1502 = vst.msk [vmem:[%s2567_s21 + $0x148] sm:$0xff] %vm1460_vm3, %v1437_v44  ;;  %v1406_v54 = vmax.f32 %v1342_v45, 0.0  ;;  %v1206_v56 = vadd.f32 %v2721_v2, %v1036_v23  ;;  %v606_v2 = vadd.f32 %v2295_v41, %v472_v30  ;;  %v540_v45 = vmul.f32 %v2287_v34, %v406_v36 }
 0x105   : > { %v958_v59 = vpop.f32.mrf.mxu0  ;;  %v615_v51 = vadd.f32 %v2260_v14, %v481_v32 }
 0x106   : > { %1471 = vst.msk [vmem:[%s2567_s21 + $0x50] sm:$0xff] %vm1460_vm3, %v1406_v54  ;;  %v1306_v61 = vmul.f32 %v2532_v49, %v1206_v56  ;;  %v1128_v62 = vadd.f32 %v2762_v47, %v958_v59  ;;  %v706_v50 = vpack.c.bf16 %v608_v7, %v606_v2  ;;  %v612_v56 = vadd.f32 %v2295_v41, %v478_v42 }
 0x107   : > { %v674_v58 = vadd.f32 %v2295_v41, %v540_v45  ;;  %v676_v59 = vadd.f32 %v2295_v41, %v542_v3 }
 0x108   : > { %v1374_v8 = vadd.f32 %v2541_v55, %v1306_v61  ;;  %v1275_v5 = vmul.f32 %v2532_v49, %v1128_v62 }
 0x109   : > { %v2845_v18 = vpop.f32.mrf.mxu3 }
 0x10a   : > { %v1438_v35 = vmax.f32 %v1374_v8, 0.0  ;;  %v1343_v47 = vadd.f32 %v2541_v55, %v1275_v5  ;;  %v740_v8 = vpack.c.bf16 %v676_v59, %v674_v58 }
 0x10b   : > { %v2840_v10 = vpop.f32.mrf.mxu1  ;;  %v1038_v12 = vpop.f32.mrf.mxu2 }
 0x10c   : > { %1503 = vst.msk [vmem:[%s2567_s21 + $0x150] sm:$0xff] %vm1460_vm3, %v1438_v35  ;;  %v1407_v13 = vmax.f32 %v1343_v47, 0.0  ;;  %v1208_v15 = vadd.f32 %v2743_v28, %v1038_v12 }
 0x10d   : > { %v961_v52 = vpop.f32.mrf.mxu0 }
 0x10e   : > { %1472 = vst.msk [vmem:[%s2567_s21 + $0x58] sm:$0xff] %vm1460_vm3, %v1407_v13  ;;  %v1307_v19 = vmul.f32 %v2532_v49, %v1208_v15  ;;  %1924 = vmatmul.msk.bf16.gmra.mxu1 %vm818_vm2, %v709_v9  ;;  %v1131_v20 = vadd.f32 %v2792_v48, %v961_v52  ;;  %v483_v48 = vmul.f32 %v2247_v11, %v349_v24 }
 0x110   : > { %v1375_v28 = vadd.f32 %v2541_v55, %v1307_v19  ;;  %v1276_v25 = vmul.f32 %v2532_v49, %v1131_v20  ;;  %1000 = vmatmul.bf16.gmra.mxu0 %v706_v50  ;;  %1080 = vmatmul.bf16.gmra.mxu2 %v738_v17  ;;  %v617_v54 = vadd.f32 %v2260_v14, %v483_v48 }
 0x111   : > { %v2870_v23 = vpop.f32.mrf.mxu3 }
 0x112   : > { %v1439_v39 = vmax.f32 %v1375_v28, 0.0  ;;  %v1344_v29 = vadd.f32 %v2541_v55, %v1276_v25  ;;  %v711_v62 = vpack.c.bf16 %v617_v54, %v615_v51 }
 0x113   : > { %v1137_v38 = vpop.f32.mrf.mxu1  ;;  %v1041_v53 = vpop.f32.mrf.mxu2 }
 0x114   : > { %1504 = vst.msk [vmem:[%s2567_s21 + $0x158] sm:$0xff] %vm1460_vm3, %v1439_v39  ;;  %v1408_v43 = vmax.f32 %v1344_v29, 0.0  ;;  %v1211_v44 = vadd.f32 %v2775_v1, %v1041_v53  ;;  %v610_v1 = vadd.f32 %v2295_v41, %v476_v40 }
 0x115   : > { %v963_v21 = vpop.f32.mrf.mxu0 }
 0x116   : > { %1473 = vst.msk [vmem:[%s2567_s21 + $0x60] sm:$0xff] %vm1460_vm3, %v1408_v43  ;;  %v1308_v11 = vmul.f32 %v2532_v49, %v1211_v44  ;;  %v1133_v30 = vadd.f32 %v2816_v46, %v963_v21  ;;  %v708_v7 = vpack.c.bf16 %v612_v56, %v610_v1 }
 0x118   : > { %v1376_v34 = vadd.f32 %v2541_v55, %v1308_v11  ;;  %v1277_v57 = vmul.f32 %v2532_v49, %v1133_v30 }
 0x119   : > { %v1222_v16 = vpop.f32.mrf.mxu3 }
 0x11a   : > { %v1440_v61 = vmax.f32 %v1376_v34, 0.0  ;;  %v1345_v46 = vadd.f32 %v2541_v55, %v1277_v57 }
 0x11b   : > { %v1140_v63 = vpop.f32.mrf.mxu1  ;;  %v1043_v0 = vpop.f32.mrf.mxu2 }
 0x11c   : > { %1505 = vst.msk [vmem:[%s2567_s21 + $0x160] sm:$0xff] %vm1460_vm3, %v1440_v61  ;;  %v1409_v14 = vmax.f32 %v1345_v46, 0.0  ;;  %v1213_v2 = vadd.f32 %v2797_v27, %v1043_v0 }
 0x11d   : > { %v966_v5 = vpop.f32.mrf.mxu0 }
 0x11e   : > { %1474 = vst.msk [vmem:[%s2567_s21 + $0x68] sm:$0xff] %vm1460_vm3, %v1409_v14  ;;  %v1309_v6 = vmul.f32 %v2532_v49, %v1213_v2  ;;  %1925 = vmatmul.msk.bf16.gmra.mxu1 %vm818_vm2, %v711_v62  ;;  %v1136_v41 = vadd.f32 %v2840_v10, %v966_v5 }
 0x120   : > { %v1377_v35 = vadd.f32 %v2541_v55, %v1309_v6  ;;  %v1278_v47 = vmul.f32 %v2532_v49, %v1136_v41  ;;  %1005 = vmatmul.bf16.gmra.mxu0 %v708_v7  ;;  %1085 = vmatmul.bf16.gmra.mxu2 %v740_v8 }
 0x121   : > { %v1225_v22 = vpop.f32.mrf.mxu3 }
 0x122   : > { %v1441_v27 = vmax.f32 %v1377_v35, 0.0  ;;  %v1346_v9 = vadd.f32 %v2541_v55, %v1278_v47 }
 0x123   : > { %v1142_v12 = vpop.f32.mrf.mxu1  ;;  %v1046_v13 = vpop.f32.mrf.mxu2 }
 0x124   : > { %1506 = vst.msk [vmem:[%s2567_s21 + $0x168] sm:$0xff] %vm1460_vm3, %v1441_v27  ;;  %v1410_v15 = vmax.f32 %v1346_v9, 0.0  ;;  %v1216_v50 = vadd.f32 %v2825_v60, %v1046_v13 }
 0x125   : > { %v968_v10 = vpop.f32.mrf.mxu0 }
 0x126   : > { %1475 = vst.msk [vmem:[%s2567_s21 + $0x70] sm:$0xff] %vm1460_vm3, %v1410_v15  ;;  %v1310_v17 = vmul.f32 %v2532_v49, %v1216_v50  ;;  %v1138_v52 = vadd.f32 %v1137_v38, %v968_v10 }
 0x128   : > { %v1378_v19 = vadd.f32 %v2541_v55, %v1310_v17  ;;  %v1279_v20 = vmul.f32 %v2532_v49, %v1138_v52 }
 0x129   : > { %v1227_v53 = vpop.f32.mrf.mxu3 }
 0x12a   : > { %v1442_v24 = vmax.f32 %v1378_v19, 0.0  ;;  %v1347_v28 = vadd.f32 %v2541_v55, %v1279_v20 }
 0x12b   : > { %v1145_v25 = vpop.f32.mrf.mxu1  ;;  %v1048_v26 = vpop.f32.mrf.mxu2 }
 0x12c   : > { %1507 = vst.msk [vmem:[%s2567_s21 + $0x170] sm:$0xff] %vm1460_vm3, %v1442_v24  ;;  %v1411_v60 = vmax.f32 %v1347_v28, 0.0  ;;  %v1218_v33 = vadd.f32 %v2845_v18, %v1048_v26 }
 0x12d   : > { %v971_v36 = vpop.f32.mrf.mxu0 }
 0x12e   : > { %1476 = vst.msk [vmem:[%s2567_s21 + $0x78] sm:$0xff] %vm1460_vm3, %v1411_v60  ;;  %v1311_v37 = vmul.f32 %v2532_v49, %v1218_v33  ;;  %v1141_v39 = vadd.f32 %v1140_v63, %v971_v36 }
 0x130   : > { %v1379_v29 = vadd.f32 %v2541_v55, %v1311_v37  ;;  %v1280_v32 = vmul.f32 %v2532_v49, %v1141_v39 }
 0x131   : > { %v1230_v34 = vpop.f32.mrf.mxu3 }
 0x132   : > { %v1443_v48 = vmax.f32 %v1379_v29, 0.0  ;;  %v1348_v38 = vadd.f32 %v2541_v55, %v1280_v32 }
 0x133   : > { %v1147_v40 = vpop.f32.mrf.mxu1  ;;  %v1051_v42 = vpop.f32.mrf.mxu2 }
 0x134   : > { %1508 = vst.msk [vmem:[%s2567_s21 + $0x178] sm:$0xff] %vm1460_vm3, %v1443_v48  ;;  %v1412_v18 = vmax.f32 %v1348_v38, 0.0  ;;  %v1221_v43 = vadd.f32 %v2870_v23, %v1051_v42 }
 0x135   : > { %v973_v44 = vpop.f32.mrf.mxu0 }
 0x136   : > { %1477 = vst.msk [vmem:[%s2567_s21 + $0x80] sm:$0xff] %vm1460_vm3, %v1412_v18  ;;  %v1312_v45 = vmul.f32 %v2532_v49, %v1221_v43  ;;  %v1143_v3 = vadd.f32 %v1142_v12, %v973_v44  ;;  %v2962_v44 = vld [vmem:[%s3209_s4] ss:$0 sm:$0xff] }
 0x138   : > { %v1380_v21 = vadd.f32 %v2541_v55, %v1312_v45  ;;  %v1281_v11 = vmul.f32 %v2532_v49, %v1143_v3 }
 0x139   : > { %v1232_v41 = vpop.f32.mrf.mxu3 }
 0x13a   : > { %v1444_v30 = vmax.f32 %v1380_v21, 0.0  ;;  %v1349_v51 = vadd.f32 %v2541_v55, %v1281_v11 }
 0x13b   : > { %v1150_v54 = vpop.f32.mrf.mxu1  ;;  %v1053_v1 = vpop.f32.mrf.mxu2 }
 0x13c   : > { %1509 = vst.msk [vmem:[%s2567_s21 + $0x180] sm:$0xff] %vm1460_vm3, %v1444_v30  ;;  %v1413_v23 = vmax.f32 %v1349_v51, 0.0  ;;  %v1223_v56 = vadd.f32 %v1222_v16, %v1053_v1  ;;  %v2970_v30 = vld [vmem:[%s3210_s5] ss:$0 sm:$0xff] }
 0x13d   : > { %v976_v57 = vpop.f32.mrf.mxu0 }
 0x13e   : > { %1478 = vst.msk [vmem:[%s2567_s21 + $0x88] sm:$0xff] %vm1460_vm3, %v1413_v23  ;;  %v1313_v58 = vmul.f32 %v2532_v49, %v1223_v56  ;;  %v1146_v59 = vadd.f32 %v1145_v25, %v976_v57 }
 0x140   : > { %v1381_v61 = vadd.f32 %v2541_v55, %v1313_v58  ;;  %v1282_v46 = vmul.f32 %v2532_v49, %v1146_v59 }
 0x141   : > { %v1235_v20 = vpop.f32.mrf.mxu3 }
 0x142   : > { %v1445_v62 = vmax.f32 %v1381_v61, 0.0  ;;  %v1350_v63 = vadd.f32 %v2541_v55, %v1282_v46 }
 0x143   : > { %v1152_v0 = vpop.f32.mrf.mxu1  ;;  %v1056_v14 = vpop.f32.mrf.mxu2 }
 0x144   : > { %1510 = vst.msk [vmem:[%s2567_s21 + $0x188] sm:$0xff] %vm1460_vm3, %v1445_v62  ;;  %v1414_v2 = vmax.f32 %v1350_v63, 0.0  ;;  %v1226_v7 = vadd.f32 %v1225_v22, %v1056_v14 }
 0x145   : > { %v978_v8 = vpop.f32.mrf.mxu0 }
 0x146   : > { %1479 = vst.msk [vmem:[%s2567_s21 + $0x90] sm:$0xff] %vm1460_vm3, %v1414_v2  ;;  %v1314_v5 = vmul.f32 %v2532_v49, %v1226_v7  ;;  %v1148_v6 = vadd.f32 %v1147_v40, %v978_v8 }
 0x148   : > { %v1382_v16 = vadd.f32 %v2541_v55, %v1314_v5  ;;  %v1283_v35 = vmul.f32 %v2532_v49, %v1148_v6 }
 0x149   : > { %v1237_v38 = vpop.f32.mrf.mxu3 }
 0x14a   : > { %v1446_v47 = vmax.f32 %v1382_v16, 0.0  ;;  %v1351_v27 = vadd.f32 %v2541_v55, %v1283_v35 }
 0x14b   : > { %v1155_v9 = vpop.f32.mrf.mxu1  ;;  %v1058_v12 = vpop.f32.mrf.mxu2 }
 0x14c   : > { %1511 = vst.msk [vmem:[%s2567_s21 + $0x190] sm:$0xff] %vm1460_vm3, %v1446_v47  ;;  %v1415_v13 = vmax.f32 %v1351_v27, 0.0  ;;  %v1228_v15 = vadd.f32 %v1227_v53, %v1058_v12 }
 0x14d   : > { %v981_v50 = vpop.f32.mrf.mxu0 }
 0x14e   : > { %1480 = vst.msk [vmem:[%s2567_s21 + $0x98] sm:$0xff] %vm1460_vm3, %v1415_v13  ;;  %v1315_v10 = vmul.f32 %v2532_v49, %v1228_v15  ;;  %v1151_v17 = vadd.f32 %v1150_v54, %v981_v50 }
 0x150   : > { %v1383_v52 = vadd.f32 %v2541_v55, %v1315_v10  ;;  %v1284_v19 = vmul.f32 %v2532_v49, %v1151_v17 }
 0x152   : > { %v1447_v22 = vmax.f32 %v1383_v52, 0.0  ;;  %v1352_v24 = vadd.f32 %v2541_v55, %v1284_v19 }
 0x153   : > { %v1157_v28 = vpop.f32.mrf.mxu1  ;;  %v1061_v25 = vpop.f32.mrf.mxu2 }
 0x154   : > { %1512 = vst.msk [vmem:[%s2567_s21 + $0x198] sm:$0xff] %vm1460_vm3, %v1447_v22  ;;  %v1416_v26 = vmax.f32 %v1352_v24, 0.0  ;;  %v1231_v60 = vadd.f32 %v1230_v34, %v1061_v25  ;;  %v1240_v34 = vpop.f32.mrf.mxu3 }
 0x155   : > { %v983_v33 = vpop.f32.mrf.mxu0 }
 0x156   : > { %1481 = vst.msk [vmem:[%s2567_s21 + $0xa0] sm:$0xff] %vm1460_vm3, %v1416_v26  ;;  %v1316_v36 = vmul.f32 %v2532_v49, %v1231_v60  ;;  %v1153_v37 = vadd.f32 %v1152_v0, %v983_v33 }
 0x158   : > { %v1384_v39 = vadd.f32 %v2541_v55, %v1316_v36  ;;  %v1285_v29 = vmul.f32 %v2532_v49, %v1153_v37 }
 0x15a   : > { %v1448_v32 = vmax.f32 %v1384_v39, 0.0  ;;  %v1353_v48 = vadd.f32 %v2541_v55, %v1285_v29 }
 0x15b   : > { %v1160_v53 = vpop.f32.mrf.mxu1  ;;  %v1063_v40 = vpop.f32.mrf.mxu2 }
 0x15c   : > { %1513 = vst.msk [vmem:[%s2567_s21 + $0x1a0] sm:$0xff] %vm1460_vm3, %v1448_v32  ;;  %v1417_v42 = vmax.f32 %v1353_v48, 0.0  ;;  %v1233_v18 = vadd.f32 %v1232_v41, %v1063_v40  ;;  %v1242_v6 = vpop.f32.mrf.mxu3 }
 0x15d   : > { %v986_v43 = vpop.f32.mrf.mxu0 }
 0x15e   : > { %1482 = vst.msk [vmem:[%s2567_s21 + $0xa8] sm:$0xff] %vm1460_vm3, %v1417_v42  ;;  %v1317_v49 = vmul.f32 %v2962_v44, %v1233_v18  ;;  %v1156_v45 = vadd.f32 %v1155_v9, %v986_v43 }
 0x160   : > { %v1385_v3 = vadd.f32 %v2541_v55, %v1317_v49  ;;  %v1286_v21 = vmul.f32 %v2962_v44, %v1156_v45 }
 0x162   : > { %v1449_v11 = vmax.f32 %v1385_v3, 0.0  ;;  %v1354_v51 = vadd.f32 %v2970_v30, %v1286_v21 }
 0x163   : > { %v1162_v54 = vpop.f32.mrf.mxu1  ;;  %v1066_v1 = vpop.f32.mrf.mxu2 }
 0x164   : > { %1514 = vst.msk [vmem:[%s2567_s21 + $0x1a8] sm:$0xff] %vm1460_vm3, %v1449_v11  ;;  %v1418_v23 = vmax.f32 %v1354_v51, 0.0  ;;  %v1236_v56 = vadd.f32 %v1235_v20, %v1066_v1  ;;  %v1245_v19 = vpop.f32.mrf.mxu3 }
 0x165   : > { %v988_v55 = vpop.f32.mrf.mxu0 }
 0x166   : > { %1483 = vst.msk [vmem:[%s2567_s21 + $0xb0] sm:$0xff] %vm1460_vm3, %v1418_v23  ;;  %v1318_v57 = vmul.f32 %v2962_v44, %v1236_v56  ;;  %v1158_v58 = vadd.f32 %v1157_v28, %v988_v55 }
 0x168   : > { %v1386_v59 = vadd.f32 %v2970_v30, %v1318_v57  ;;  %v1287_v61 = vmul.f32 %v2962_v44, %v1158_v58 }
 0x16a   : > { %v1450_v46 = vmax.f32 %v1386_v59, 0.0  ;;  %v1355_v62 = vadd.f32 %v2970_v30, %v1287_v61 }
 0x16b   : > { %v1165_v63 = vpop.f32.mrf.mxu1  ;;  %v1068_v0 = vpop.f32.mrf.mxu2 }
 0x16c   : > { %1515 = vst.msk [vmem:[%s2567_s21 + $0x1b0] sm:$0xff] %vm1460_vm3, %v1450_v46  ;;  %v1419_v14 = vmax.f32 %v1355_v62, 0.0  ;;  %v1238_v2 = vadd.f32 %v1237_v38, %v1068_v0  ;;  %v1247_v48 = vpop.f32.mrf.mxu3 }
 0x16d   : > { %v991_v7 = vpop.f32.mrf.mxu0 }
 0x16e   : > { %1484 = vst.msk [vmem:[%s2567_s21 + $0xb8] sm:$0xff] %vm1460_vm3, %v1419_v14  ;;  %v1319_v8 = vmul.f32 %v2962_v44, %v1238_v2  ;;  %v1161_v5 = vadd.f32 %v1160_v53, %v991_v7 }
 0x170   : > { %v1387_v41 = vadd.f32 %v2970_v30, %v1319_v8  ;;  %v1288_v16 = vmul.f32 %v2962_v44, %v1161_v5 }
 0x172   : > { %v1451_v35 = vmax.f32 %v1387_v41, 0.0  ;;  %v1356_v47 = vadd.f32 %v2970_v30, %v1288_v16 }
 0x173   : > { %v1167_v27 = vpop.f32.mrf.mxu1  ;;  %v1071_v9 = vpop.f32.mrf.mxu2 }
 0x174   : > { %1516 = vst.msk [vmem:[%s2567_s21 + $0x1b8] sm:$0xff] %vm1460_vm3, %v1451_v35  ;;  %v1420_v12 = vmax.f32 %v1356_v47, 0.0  ;;  %v1241_v13 = vadd.f32 %v1240_v34, %v1071_v9  ;;  %v1250_v56 = vpop.f32.mrf.mxu3 }
 0x175   : > { %v993_v15 = vpop.f32.mrf.mxu0 }
 0x176   : > { %1485 = vst.msk [vmem:[%s2567_s21 + $0xc0] sm:$0xff] %vm1460_vm3, %v1420_v12  ;;  %v1320_v50 = vmul.f32 %v2962_v44, %v1241_v13  ;;  %v1163_v10 = vadd.f32 %v1162_v54, %v993_v15 }
 0x178   : > { %v1388_v17 = vadd.f32 %v2970_v30, %v1320_v50  ;;  %v1289_v52 = vmul.f32 %v2962_v44, %v1163_v10 }
 0x17a   : > { %v1452_v20 = vmax.f32 %v1388_v17, 0.0  ;;  %v1357_v22 = vadd.f32 %v2970_v30, %v1289_v52 }
 0x17b   : > { %v1170_v24 = vpop.f32.mrf.mxu1  ;;  %v1073_v28 = vpop.f32.mrf.mxu2 }
 0x17c   : > { %1517 = vst.msk [vmem:[%s2567_s21 + $0x1c0] sm:$0xff] %vm1460_vm3, %v1452_v20  ;;  %v1421_v25 = vmax.f32 %v1357_v22, 0.0  ;;  %v1243_v26 = vadd.f32 %v1242_v6, %v1073_v28  ;;  %v1252_v5 = vpop.f32.mrf.mxu3 }
 0x17d   : > { %v996_v60 = vpop.f32.mrf.mxu0 }
 0x17e   : > { %1486 = vst.msk [vmem:[%s2567_s21 + $0xc8] sm:$0xff] %vm1460_vm3, %v1421_v25  ;;  %v1321_v33 = vmul.f32 %v2962_v44, %v1243_v26  ;;  %v1166_v36 = vadd.f32 %v1165_v63, %v996_v60 }
 0x180   : > { %v1389_v37 = vadd.f32 %v2970_v30, %v1321_v33  ;;  %v1290_v39 = vmul.f32 %v2962_v44, %v1166_v36 }
 0x182   : > { %v1453_v29 = vmax.f32 %v1389_v37, 0.0  ;;  %v1358_v32 = vadd.f32 %v2970_v30, %v1290_v39 }
 0x183   : > { %v1172_v38 = vpop.f32.mrf.mxu1  ;;  %v1076_v53 = vpop.f32.mrf.mxu2 }
 0x184   : > { %1518 = vst.msk [vmem:[%s2567_s21 + $0x1c8] sm:$0xff] %vm1460_vm3, %v1453_v29  ;;  %v1422_v40 = vmax.f32 %v1358_v32, 0.0  ;;  %v1246_v42 = vadd.f32 %v1245_v19, %v1076_v53  ;;  %v1255_v22 = vpop.f32.mrf.mxu3 }
 0x185   : > { %v998_v18 = vpop.f32.mrf.mxu0 }
 0x186   : > { %1487 = vst.msk [vmem:[%s2567_s21 + $0xd0] sm:$0xff] %vm1460_vm3, %v1422_v40  ;;  %v1322_v43 = vmul.f32 %v2962_v44, %v1246_v42  ;;  %v1168_v49 = vadd.f32 %v1167_v27, %v998_v18 }
 0x188   : > { %v1390_v45 = vadd.f32 %v2970_v30, %v1322_v43  ;;  %v1291_v3 = vmul.f32 %v2962_v44, %v1168_v49 }
 0x18a   : > { %v1454_v21 = vmax.f32 %v1390_v45, 0.0  ;;  %v1359_v11 = vadd.f32 %v2970_v30, %v1291_v3 }
 0x18b   : > { %v1175_v51 = vpop.f32.mrf.mxu1  ;;  %v1078_v54 = vpop.f32.mrf.mxu2 }
 0x18c   : > { %1519 = vst.msk [vmem:[%s2567_s21 + $0x1d0] sm:$0xff] %vm1460_vm3, %v1454_v21  ;;  %v1423_v1 = vmax.f32 %v1359_v11, 0.0  ;;  %v1248_v23 = vadd.f32 %v1247_v48, %v1078_v54  ;;  %v1257_v18 = vpop.f32.mrf.mxu3 }
 0x18d   : > { %v1001_v34 = vpop.f32.mrf.mxu0 }
 0x18e   : > { %1488 = vst.msk [vmem:[%s2567_s21 + $0xd8] sm:$0xff] %vm1460_vm3, %v1423_v1  ;;  %v1323_v55 = vmul.f32 %v2962_v44, %v1248_v23  ;;  %v1171_v57 = vadd.f32 %v1170_v24, %v1001_v34 }
 0x190   : > { %v1391_v58 = vadd.f32 %v2970_v30, %v1323_v55  ;;  %v1292_v59 = vmul.f32 %v2962_v44, %v1171_v57 }
 0x192   : > { %v1455_v61 = vmax.f32 %v1391_v58, 0.0  ;;  %v1360_v46 = vadd.f32 %v2970_v30, %v1292_v59 }
 0x193   : > { %v1177_v62 = vpop.f32.mrf.mxu1  ;;  %v1081_v63 = vpop.f32.mrf.mxu2 }
 0x194   : > { %1520 = vst.msk [vmem:[%s2567_s21 + $0x1d8] sm:$0xff] %vm1460_vm3, %v1455_v61  ;;  %v1424_v0 = vmax.f32 %v1360_v46, 0.0  ;;  %v1251_v14 = vadd.f32 %v1250_v56, %v1081_v63 }
 0x195   : > { %v1003_v2 = vpop.f32.mrf.mxu0 }
 0x196   : > { %1489 = vst.msk [vmem:[%s2567_s21 + $0xe0] sm:$0xff] %vm1460_vm3, %v1424_v0  ;;  %v1324_v7 = vmul.f32 %v2962_v44, %v1251_v14  ;;  %v1173_v8 = vadd.f32 %v1172_v38, %v1003_v2 }
 0x198   : > { %v1392_v6 = vadd.f32 %v2970_v30, %v1324_v7  ;;  %v1293_v41 = vmul.f32 %v2962_v44, %v1173_v8 }
 0x19a   : > { %v1456_v16 = vmax.f32 %v1392_v6, 0.0  ;;  %v1361_v35 = vadd.f32 %v2970_v30, %v1293_v41 }
 0x19b   : > { %v1180_v47 = vpop.f32.mrf.mxu1  ;;  %v1083_v27 = vpop.f32.mrf.mxu2 }
 0x19c   : > { %1521 = vst.msk [vmem:[%s2567_s21 + $0x1e0] sm:$0xff] %vm1460_vm3, %v1456_v16  ;;  %v1425_v9 = vmax.f32 %v1361_v35, 0.0  ;;  %v1181_v12 = vadd.f32 %v1180_v47, %v2556_v4  ;;  %v1253_v13 = vadd.f32 %v1252_v5, %v1083_v27 }
 0x19d   : > { %v1006_v15 = vpop.f32.mrf.mxu0 }
 0x19e   : > { %1490 = vst.msk [vmem:[%s2567_s21 + $0xe8] sm:$0xff] %vm1460_vm3, %v1425_v9  ;;  %v1296_v50 = vmul.f32 %v2962_v44, %v1181_v12  ;;  %v1325_v10 = vmul.f32 %v2962_v44, %v1253_v13  ;;  %v1176_v17 = vadd.f32 %v1175_v51, %v1006_v15 }
 0x1a0   : > { %v1364_v52 = vadd.f32 %v2970_v30, %v1296_v50  ;;  %v1393_v19 = vadd.f32 %v2970_v30, %v1325_v10  ;;  %v1294_v20 = vmul.f32 %v2962_v44, %v1176_v17 }
 0x1a2   : > { %v1428_v4 = vmax.f32 %v1364_v52, 0.0  ;;  %v1457_v24 = vmax.f32 %v1393_v19, 0.0  ;;  %v1362_v28 = vadd.f32 %v2970_v30, %v1294_v20 }
 0x1a3   : > { %v1182_v25 = vpop.f32.mrf.mxu1  ;;  %v1086_v26 = vpop.f32.mrf.mxu2 }
 0x1a4   : > { %1493 = vst.msk [vmem:[%s2567_s21 + $0x100] sm:$0xff] %vm1460_vm3, %v1428_v4  ;;  %v1426_v60 = vmax.f32 %v1362_v28, 0.0  ;;  %v1183_v33 = vadd.f32 %v1182_v25, %v2584_v31  ;;  %v1256_v36 = vadd.f32 %v1255_v22, %v1086_v26 }
 0x1a5   : > { %1522 = vst.msk [vmem:[%s2567_s21 + $0x1e8] sm:$0xff] %vm1460_vm3, %v1457_v24  ;;  %v1008_v37 = vpop.f32.mrf.mxu0 }
 0x1a6   : > { %1491 = vst.msk [vmem:[%s2567_s21 + $0xf0] sm:$0xff] %vm1460_vm3, %v1426_v60  ;;  %v1297_v39 = vmul.f32 %v2962_v44, %v1183_v33  ;;  %v1326_v29 = vmul.f32 %v2962_v44, %v1256_v36  ;;  %v1178_v32 = vadd.f32 %v1177_v62, %v1008_v37 }
 0x1a8   : > { %v1365_v48 = vadd.f32 %v2970_v30, %v1297_v39  ;;  %v1394_v38 = vadd.f32 %v2970_v30, %v1326_v29  ;;  %v1295_v31 = vmul.f32 %v2962_v44, %v1178_v32 }
 0x1aa   : > { %v1429_v53 = vmax.f32 %v1365_v48, 0.0  ;;  %v1458_v40 = vmax.f32 %v1394_v38, 0.0  ;;  %v1363_v42 = vadd.f32 %v2970_v30, %v1295_v31 }
 0x1ab   : > { %v1088_v43 = vpop.f32.mrf.mxu2 }
 0x1ac   : > { %1494 = vst.msk [vmem:[%s2567_s21 + $0x108] sm:$0xff] %vm1460_vm3, %v1429_v53  ;;  %v1427_v49 = vmax.f32 %v1363_v42, 0.0  ;;  %v1258_v45 = vadd.f32 %v1257_v18, %v1088_v43 }
 0x1ad   : > { %1523 = vst.msk [vmem:[%s2567_s21 + $0x1f0] sm:$0xff] %vm1460_vm3, %v1458_v40 }
 0x1ae   : > { %1492 = vst.msk [vmem:[%s2567_s21 + $0xf8] sm:$0xff] %vm1460_vm3, %v1427_v49  ;;  %v1327_v3 = vmul.f32 %v2962_v44, %v1258_v45 }
 0x1b0   : > { %v1395_v21 = vadd.f32 %v2970_v30, %v1327_v3  ;;  %1531 = sbr.rel (!%p2223_p4) target bundleno = 501 (0x1f5), region = 48 }
 0x1b2   : > { %v1459_v11 = vmax.f32 %v1395_v21, 0.0 }
 0x1b4   : > { %1524 = vst.msk [vmem:[%s2567_s21 + $0x1f8] sm:$0xff] %vm1460_vm3, %v1459_v11 }
 0x1b5   : > { %s3222_s12 = smov (!%p1534_p8, %s1533_s12), 64 }
 0x1b6   : > { %s1943_s17 = sshll.u32 %s3222_s12, 3 }
 0x1b7   : > { %p1946_p9 = scmp.eq.s32.totalorder %s1943_s17, 0 }
 0x1b8   : > { %s3076_s18 = sshrl.u32 (!%p1946_p9), %s3222_s12, 5 }
 0x1b9   : > { %1542 = sbr.rel (%p1946_p9) target bundleno = 501 (0x1f5), region = 52  ;;  %p1947_p10 = scmp.le.s32.totalorder (!%p1946_p9), %s3076_s18, 0 }
 0x1be   : > { %1821 = sbr.rel (%p1947_p10) target bundleno = 484 (0x1e4), region = 128  ;;  %s3213_s24 = smov (!%p1947_p10), %s3070_s16 }
 0x1bf   : > { %s3214_s29 = smov (!%p1947_p10), %s2567_s21  ;;  %s3085_s10 = smov (!%p1947_p10), 0  }
 0x1c0   : > { %s3087_s19 = smov (!%p1947_p10), 0  }
 0x1c3 LB: >> { %v1667_v44 = vld [vmem:[%s2136_s29] sm:$0xff]  ;;  %v1669_v30 = vld [vmem:[%s2136_s29 + $0x8] sm:$0xff]  ;;  %v1671_v51 = vld [vmem:[%s2136_s29 + $0x10] sm:$0xff]  ;;  %s1731_s20 = sadd.s32 1, %s2140_s10  ;;  %s1661_s19 = sadd.s32 1, %s2144_s19   ;;  %s2144_s19 = sphi %s3087_s19, %s1661_s19   ;;  %s2140_s10 = sphi %s3085_s10, %s3217_s10   ;;  %s2136_s29 = sphi %s3214_s29, %s3216_s29   ;;  %s2132_s24 = sphi %s3213_s24, %s3215_s24  }
 0x1c4   : >> { %1668 = vst [vmem:[%s2132_s24] sm:$0xff] %v1667_v44  ;;  %v1673_v54 = vld [vmem:[%s2136_s29 + $0x18] sm:$0xff]  ;;  %p1732_p11 = scmp.ge.s32.totalorder %s1731_s20, %s3076_s18  ;;  %v1675_v1 = vld [vmem:[%s2136_s29 + $0x20] sm:$0xff]  ;;  %v1677_v23 = vld [vmem:[%s2136_s29 + $0x28] sm:$0xff]  ;;  %p1660_p12 = scmp.ge.s32.totalorder %s1661_s19, %s3076_s18 }
 0x1c5   : >> { %1670 = vst [vmem:[%s2132_s24 + $0x8] sm:$0xff] %v1669_v30  ;;  %v1679_v56 = vld [vmem:[%s2136_s29 + $0x30] sm:$0xff]  ;;  %v1681_v34 = vld [vmem:[%s2136_s29 + $0x38] sm:$0xff]  ;;  %v1683_v55 = vld [vmem:[%s2136_s29 + $0x40] sm:$0xff] }
 0x1c6   : >> { %1672 = vst [vmem:[%s2132_s24 + $0x10] sm:$0xff] %v1671_v51  ;;  %s3224_s20 = smov (%p1732_p11, %s1731_s20), 0  ;;  %v1685_v57 = vld [vmem:[%s2136_s29 + $0x48] sm:$0xff]  ;;  %v1687_v58 = vld [vmem:[%s2136_s29 + $0x50] sm:$0xff]  ;;  %v1689_v59 = vld [vmem:[%s2136_s29 + $0x58] sm:$0xff] }
 0x1c7   : >> { %1674 = vst [vmem:[%s2132_s24 + $0x18] sm:$0xff] %v1673_v54  ;;  %s1948_s23 = sshll.u32 %s3224_s20, 8  ;;  %v1691_v61 = vld [vmem:[%s2136_s29 + $0x60] sm:$0xff]  ;;  %v1693_v46 = vld [vmem:[%s2136_s29 + $0x68] sm:$0xff]  ;;  %v1695_v62 = vld [vmem:[%s2136_s29 + $0x70] sm:$0xff]  ;;  %s3217_s10 = smov %s3224_s20 }
 0x1c8   : >> { %1676 = vst [vmem:[%s2132_s24 + $0x20] sm:$0xff] %v1675_v1  ;;  %s3119_s26 = scalar_lea.vmem %s2567_s21, %s1948_s23 [#allocation2]   ;;  %s3122_s27 = scalar_lea.vmem %s3070_s16, %s1948_s23   ;;  %v1697_v63 = vld [vmem:[%s2136_s29 + $0x78] sm:$0xff]  ;;  %v1699_v0 = vld [vmem:[%s2136_s29 + $0x80] sm:$0xff]  ;;  %v1701_v14 = vld [vmem:[%s2136_s29 + $0x88] sm:$0xff] }
 0x1c9   : >> { %1678 = vst [vmem:[%s2132_s24 + $0x28] sm:$0xff] %v1677_v23  ;;  %v1703_v2 = vld [vmem:[%s2136_s29 + $0x90] sm:$0xff]  ;;  %v1705_v7 = vld [vmem:[%s2136_s29 + $0x98] sm:$0xff]  ;;  %v1707_v8 = vld [vmem:[%s2136_s29 + $0xa0] sm:$0xff] }
 0x1ca   : >> { %1680 = vst [vmem:[%s2132_s24 + $0x30] sm:$0xff] %v1679_v56  ;;  %v1709_v5 = vld [vmem:[%s2136_s29 + $0xa8] sm:$0xff]  ;;  %v1711_v6 = vld [vmem:[%s2136_s29 + $0xb0] sm:$0xff]  ;;  %v1713_v41 = vld [vmem:[%s2136_s29 + $0xb8] sm:$0xff] }
 0x1cb   : >> { %1682 = vst [vmem:[%s2132_s24 + $0x38] sm:$0xff] %v1681_v34  ;;  %v1715_v16 = vld [vmem:[%s2136_s29 + $0xc0] sm:$0xff]  ;;  %v1717_v35 = vld [vmem:[%s2136_s29 + $0xc8] sm:$0xff]  ;;  %v1719_v47 = vld [vmem:[%s2136_s29 + $0xd0] sm:$0xff] }
 0x1cc   : >> { %1684 = vst [vmem:[%s2132_s24 + $0x40] sm:$0xff] %v1683_v55  ;;  %v1721_v27 = vld [vmem:[%s2136_s29 + $0xd8] sm:$0xff]  ;;  %v1723_v9 = vld [vmem:[%s2136_s29 + $0xe0] sm:$0xff]  ;;  %v1725_v12 = vld [vmem:[%s2136_s29 + $0xe8] sm:$0xff] }
 0x1cd   : >> { %1686 = vst [vmem:[%s2132_s24 + $0x48] sm:$0xff] %v1685_v57  ;;  %v1727_v13 = vld [vmem:[%s2136_s29 + $0xf0] sm:$0xff]  ;;  %v1729_v15 = vld [vmem:[%s2136_s29 + $0xf8] sm:$0xff]  ;;  %s3216_s29 = smov %s3119_s26 }
 0x1ce   : >> { %1688 = vst [vmem:[%s2132_s24 + $0x50] sm:$0xff] %v1687_v58 }
 0x1cf   : >> { %1690 = vst [vmem:[%s2132_s24 + $0x58] sm:$0xff] %v1689_v59 }
 0x1d0   : >> { %1692 = vst [vmem:[%s2132_s24 + $0x60] sm:$0xff] %v1691_v61 }
 0x1d1   : >> { %1694 = vst [vmem:[%s2132_s24 + $0x68] sm:$0xff] %v1693_v46 }
 0x1d2   : >> { %1696 = vst [vmem:[%s2132_s24 + $0x70] sm:$0xff] %v1695_v62 }
 0x1d3   : >> { %1698 = vst [vmem:[%s2132_s24 + $0x78] sm:$0xff] %v1697_v63 }
 0x1d4   : >> { %1700 = vst [vmem:[%s2132_s24 + $0x80] sm:$0xff] %v1699_v0 }
 0x1d5   : >> { %1702 = vst [vmem:[%s2132_s24 + $0x88] sm:$0xff] %v1701_v14 }
 0x1d6   : >> { %1704 = vst [vmem:[%s2132_s24 + $0x90] sm:$0xff] %v1703_v2 }
 0x1d7   : >> { %1706 = vst [vmem:[%s2132_s24 + $0x98] sm:$0xff] %v1705_v7 }
 0x1d8   : >> { %1708 = vst [vmem:[%s2132_s24 + $0xa0] sm:$0xff] %v1707_v8 }
 0x1d9   : >> { %1710 = vst [vmem:[%s2132_s24 + $0xa8] sm:$0xff] %v1709_v5 }
 0x1da   : >> { %1712 = vst [vmem:[%s2132_s24 + $0xb0] sm:$0xff] %v1711_v6 }
 0x1db   : >> { %1714 = vst [vmem:[%s2132_s24 + $0xb8] sm:$0xff] %v1713_v41 }
 0x1dc   : >> { %1716 = vst [vmem:[%s2132_s24 + $0xc0] sm:$0xff] %v1715_v16 }
 0x1dd   : >> { %1718 = vst [vmem:[%s2132_s24 + $0xc8] sm:$0xff] %v1717_v35 }
 0x1de   : >> { %1720 = vst [vmem:[%s2132_s24 + $0xd0] sm:$0xff] %v1719_v47 }
 0x1df   : >> { %1722 = vst [vmem:[%s2132_s24 + $0xd8] sm:$0xff] %v1721_v27  ;;  %1663 = sbr.rel (!%p1660_p12) target bundleno = 451 (0x1c3), region = 134 }
 0x1e0   : >> { %1724 = vst [vmem:[%s2132_s24 + $0xe0] sm:$0xff] %v1723_v9 }
 0x1e1   : >> { %1726 = vst [vmem:[%s2132_s24 + $0xe8] sm:$0xff] %v1725_v12 }
 0x1e2   : >> { %1728 = vst [vmem:[%s2132_s24 + $0xf0] sm:$0xff] %v1727_v13 }
 0x1e3   : >> { %1730 = vst [vmem:[%s2132_s24 + $0xf8] sm:$0xff] %v1729_v15  ;;  %s3215_s24 = smov %s3122_s27 }
 0x1e4 PF: > { %s3187_s30 = sand.u32 31, %s3222_s12   ;;  %s1969_s7 = sshll.u32 %s3076_s18, 8 }
 0x1e5   : > { %s1742_s8 = scalar_lea.vmem %s2567_s21, %s1969_s7 [#allocation2]   ;;  %s1744_s9 = scalar_lea.vmem %s3070_s16, %s1969_s7  }
 0x1e6   : > { %p1953_p13 = scmp.le.s32.totalorder %s3187_s30, 0 }
 0x1e7   : > { %s2146_s11 = smov (!%p1953_p13), %s1744_s9   ;;  %s2150_s13 = smov (!%p1953_p13), %s1742_s8  }
 0x1e8   : > { %1835 = sbr.rel (%p1953_p13) target bundleno = 501 (0x1f5), region = 139  ;;  %s2154_s14 = smov (!%p1953_p13), 0  }
 0x1e9   : > { %s2158_s15 = smov (!%p1953_p13), 0  }
 0x1ed LB: >> { %v1754_v50 = vld [vmem:[%s2152_s13] sm:$0xff]  ;;  %s1756_s12 = sadd.s32 1, %s2156_s14  ;;  %s1748_s15 = sadd.s32 1, %s2160_s15   ;;  %s2160_s15 = sphi %s2158_s15, %s1748_s15   ;;  %s2156_s14 = sphi %s2154_s14, %s2155_s14   ;;  %s2152_s13 = sphi %s2150_s13, %s1761_s13   ;;  %s2148_s11 = sphi %s2146_s11, %s1762_s11  }
 0x1ee   : >> { %1755 = vst [vmem:[%s2148_s11] sm:$0xff] %v1754_v50  ;;  %p1757_p0 = scmp.ge.s32.totalorder %s1756_s12, %s3187_s30  ;;  %p1747_p1 = scmp.ge.s32.totalorder %s1748_s15, %s3187_s30 }
 0x1f0   : >> { %s3226_s12 = smov (%p1757_p0, %s1756_s12), 0  ;;  %1750 = sbr.rel (!%p1747_p1) target bundleno = 493 (0x1ed), region = 145 }
 0x1f1   : >> { %s1954_s21 = sshll.u32 %s3226_s12, 3  ;;  %s2155_s14 = smov %s3226_s12  }
 0x1f2   : >> { %s1761_s13 = scalar_lea.vmem %s1742_s8, %s1954_s21 [#allocation2]   ;;  %s1762_s11 = scalar_lea.vmem %s1744_s9, %s1954_s21  }
 0x1f5 PF: > { %p13_p2 = scmp.ge.s32.totalorder %s2213_s25, 6   ;;  %s3218_s21 = smov %s2124_s22 }
 0x1f6   : > { %s3219_s22 = smov %s2221_s28  ;;  %s3220_s23 = smov %s2213_s25 }
 0x1f7   :  { %15 = sbr.rel (!%p13_p2) target bundleno = 2 (0x2), region = 156 }

// kernel: densenet_forward.15
= control target key start
LH: loop header
LB: loop body
LE: loop exit
PB: predicated region body
PF: predicated region fallthrough
CT: control target
= control target key end

     0   :  { %s1898_s6 = smov 0   ;;  %s2896_s0 = inlined_call_operand.vmem [shape: f32[2,930,16], index: 0, kind: input, shape index: {}]   ;;  %s2897_s1 = inlined_call_operand.vmem [shape: f32[2,840,16], index: 1, kind: output, shape index: {}]  }
   0x1 LB: > { %s1861_s7 = sadd.s32 4294967295, %s1886_s6   ;;  %p1865_p0 = scmp.ge.s32.totalorder %s1886_s6, 1  ;;  %s1886_s6 = sphi %s1898_s6, %s11_s6  }
   0x2   : > { %p87_p1 = scmp.lt.s32.totalorder %s1886_s6, 3 }
   0x4   : > { %p88_p2 = pnand %p1865_p0, %p87_p1 }
   0x5   : > { %p107_p3 = scmp.lt.s32.totalorder (!%p88_p2), %s1861_s7, 1 }
   0x6   : > { %91 = sbr.rel (%p88_p2) target bundleno = 273 (0x111), region = 24 }
   0xb   : > { %s2899_s7 = smov (!%p107_p3, %s1861_s7), 1  ;;  %vm1700_vm0 = vcmask 130048  }
   0xc   : > { %s1870_s8 = smul.u32 936, %s2899_s7 }
   0xd   : > { %s1871_s12 = smul.u32 840, %s2899_s7 }
   0xe   : > { %s1912_s11 = scalar_lea.vmem %s2896_s0, %s1870_s8 }
   0xf   : > { %v117_v0 = vld [vmem:[%s1912_s11] sm:$0xff]  ;;  %v118_v11 = vld [vmem:[%s1912_s11 + $0x8] sm:$0xff]  ;;  %v119_v29 = vld [vmem:[%s1912_s11 + $0x10] sm:$0xff]  ;;  %s1967_s15 = scalar_lea.vmem %s2897_s1, %s1871_s12 }
  0x10   : > { %v121_v1 = vld [vmem:[%s1912_s11 + $0x20] sm:$0xff]  ;;  %v122_v12 = vld [vmem:[%s1912_s11 + $0x28] sm:$0xff]  ;;  %v1937_v30 = vld [vmem:[%s1912_s11 + $0x30] sm:$0xff] }
  0x11   : > { %v222_v2 = vld [vmem:[%s1912_s11 + $0x1] sm:$0xff]  ;;  %v223_v13 = vld [vmem:[%s1912_s11 + $0x9] sm:$0xff]  ;;  %v224_v31 = vld [vmem:[%s1912_s11 + $0x11] sm:$0xff] }
  0x12   : > { %v226_v3 = vld [vmem:[%s1912_s11 + $0x21] sm:$0xff]  ;;  %v327_v4 = vmax.f32 %v117_v0, %v222_v2  ;;  %v227_v15 = vld [vmem:[%s1912_s11 + $0x29] sm:$0xff]  ;;  %v328_v16 = vmax.f32 %v118_v11, %v223_v13  ;;  %v228_v35 = vld [vmem:[%s1912_s11 + $0x31] sm:$0xff]  ;;  %v329_v36 = vmax.f32 %v119_v29, %v224_v31 }
  0x13   : > { %v432_v5 = vld [vmem:[%s1912_s11 + $0x2] sm:$0xff]  ;;  %v331_v6 = vmax.f32 %v121_v1, %v226_v3  ;;  %v433_v17 = vld [vmem:[%s1912_s11 + $0xa] sm:$0xff]  ;;  %v332_v21 = vmax.f32 %v122_v12, %v227_v15  ;;  %v434_v37 = vld [vmem:[%s1912_s11 + $0x12] sm:$0xff]  ;;  %v333_v42 = vmax.f32 %v1937_v30, %v228_v35 }
  0x14   : > { %v642_v7 = vld [vmem:[%s1912_s11 + $0x1e] sm:$0xff]  ;;  %v537_v9 = vmax.f32 %v327_v4, %v432_v5  ;;  %v437_v18 = vld [vmem:[%s1912_s11 + $0x2a] sm:$0xff]  ;;  %v538_v25 = vmax.f32 %v328_v16, %v433_v17  ;;  %v438_v38 = vld [vmem:[%s1912_s11 + $0x32] sm:$0xff]  ;;  %v539_v47 = vmax.f32 %v329_v36, %v434_v37 }
  0x15   : > { %v436_v8 = vld [vmem:[%s1912_s11 + $0x22] sm:$0xff]  ;;  %v542_v28 = vmax.f32 %v332_v21, %v437_v18  ;;  %v644_v43 = vld [vmem:[%s1912_s11 + $0x2e] sm:$0xff]  ;;  %v543_v52 = vmax.f32 %v333_v42, %v438_v38  ;;  %v120_v53 = vld [vmem:[%s1912_s11 + $0x18] sm:$0xff] }
  0x16   : > { %v852_v10 = vld [vmem:[%s1912_s11 + $0x1f] sm:$0xff]  ;;  %v747_v14 = vmax.f32 %v537_v9, %v642_v7  ;;  %v541_v19 = vmax.f32 %v331_v6, %v436_v8  ;;  %v853_v27 = vld [vmem:[%s1912_s11 + $0x27] sm:$0xff]  ;;  %v854_v49 = vld [vmem:[%s1912_s11 + $0x2f] sm:$0xff]  ;;  %v749_v58 = vmax.f32 %v539_v47, %v644_v43 }
  0x17   : > { %v646_v20 = vld [vmem:[%s1912_s11 + $0x3e] sm:$0xff]  ;;  %v643_v22 = vld [vmem:[%s1912_s11 + $0x26] sm:$0xff]  ;;  %v1951_v48 = vld [vmem:[%s1912_s11 + $0x4e] sm:$0xff] }
  0x18   : > { %v957_v23 = vmax.f32 %v747_v14, %v852_v10  ;;  %v1171_v24 = vld [vmem:[%s1912_s11 + $0x3c] sm:$0xff]  ;;  %v1932_v26 = vld [vmem:[%s1912_s11 + $0x46] sm:$0xff]  ;;  %v748_v34 = vmax.f32 %v538_v25, %v643_v22  ;;  %v751_v39 = vmax.f32 %v541_v19, %v646_v20  ;;  %v858_v50 = vld [vmem:[%s1912_s11 + $0x4f] sm:$0xff]  ;;  %v959_v6 = vmax.f32 %v749_v58, %v854_v49 }
  0x19   : > { %v856_v32 = vld [vmem:[%s1912_s11 + $0x3f] sm:$0xff]  ;;  %v857_v45 = vld [vmem:[%s1912_s11 + $0x47] sm:$0xff]  ;;  %v752_v51 = vmax.f32 %v542_v28, %v1932_v26  ;;  %v645_v3 = vld [vmem:[%s1912_s11 + $0x36] sm:$0xff] }
  0x1a   : > { %v1066_v33 = vmax.f32 %v957_v23, %v121_v1  ;;  %v1381_v40 = vld [vmem:[%s1912_s11 + $0x3d] sm:$0xff]  ;;  %v958_v46 = vmax.f32 %v748_v34, %v853_v27  ;;  %v961_v63 = vmax.f32 %v751_v39, %v856_v32  ;;  %v1382_v0 = vld [vmem:[%s1912_s11 + $0x45] sm:$0xff]  ;;  %v753_v1 = vmax.f32 %v543_v52, %v1951_v48  ;;  %v1383_v19 = vld [vmem:[%s1912_s11 + $0x4d] sm:$0xff] }
  0x1b   : > { %v1172_v41 = vld [vmem:[%s1912_s11 + $0x44] sm:$0xff]  ;;  %v1958_v54 = vld [vmem:[%s1912_s11 + $0x38] sm:$0xff]  ;;  %v1173_v7 = vld [vmem:[%s1912_s11 + $0x4c] sm:$0xff]  ;;  %v962_v11 = vmax.f32 %v752_v51, %v857_v45  ;;  %v1068_v18 = vmax.f32 %v959_v6, %v1937_v30 }
  0x1c   : > { %v1276_v44 = vmax.f32 %v1066_v33, %v1171_v24  ;;  %v225_v55 = vld [vmem:[%s1912_s11 + $0x19] sm:$0xff]  ;;  %v1067_v57 = vmax.f32 %v958_v46, %v122_v12  ;;  %v963_v12 = vmax.f32 %v753_v1, %v858_v50  ;;  %v230_v15 = vld [vmem:[%s1912_s11 + $0x41] sm:$0xff]  ;;  %v231_v31 = vld [vmem:[%s1912_s11 + $0x49] sm:$0xff] }
  0x1d   : > { %v229_v59 = vld [vmem:[%s1912_s11 + $0x39] sm:$0xff]  ;;  %v330_v60 = vmax.f32 %v120_v53, %v225_v55  ;;  %v440_v16 = vld [vmem:[%s1912_s11 + $0x42] sm:$0xff]  ;;  %v1278_v32 = vmax.f32 %v1068_v18, %v1173_v7  ;;  %v441_v37 = vld [vmem:[%s1912_s11 + $0x4a] sm:$0xff] }
  0x1e   : > { %v1486_v56 = vmax.f32 %v1276_v44, %v1381_v40  ;;  %v435_v61 = vld [vmem:[%s1912_s11 + $0x1a] sm:$0xff]  ;;  %v334_v2 = vmax.f32 %v1958_v54, %v229_v59  ;;  %v1277_v5 = vmax.f32 %v1067_v57, %v1172_v41  ;;  %v126_v29 = vld [vmem:[%s1912_s11 + $0x48] sm:$0xff]  ;;  %v232_v50 = vld [vmem:[%s1912_s11 + $0x51] sm:$0xff] }
  0x1f   : > { %v439_v62 = vld [vmem:[%s1912_s11 + $0x3a] sm:$0xff]  ;;  %v540_v8 = vmax.f32 %v330_v60, %v435_v61  ;;  %v336_v41 = vmax.f32 %v126_v29, %v231_v31  ;;  %v651_v42 = vld [vmem:[%s1912_s11 + $0x66] sm:$0xff]  ;;  %v1071_v43 = vmax.f32 %v962_v11, %v126_v29  ;;  %v1488_v45 = vmax.f32 %v1278_v32, %v1383_v19  ;;  %v442_v51 = vld [vmem:[%s1912_s11 + $0x52] sm:$0xff] }
  0x20   : > { %v1595_v4 = vmax.f32 %v1486_v56, %v646_v20  ;;  %v1975_v9 = vld [vmem:[%s1912_s11 + $0x56] sm:$0xff]  ;;  %v544_v13 = vmax.f32 %v334_v2, %v439_v62  ;;  %v125_v14 = vld [vmem:[%s1912_s11 + $0x40] sm:$0xff]  ;;  %v1487_v17 = vmax.f32 %v1277_v5, %v1382_v0  ;;  %v1177_v59 = vld [vmem:[%s1912_s11 + $0x6c] sm:$0xff] }
  0x21   : > { %v855_v10 = vld [vmem:[%s1912_s11 + $0x37] sm:$0xff]  ;;  %v750_v20 = vmax.f32 %v540_v8, %v645_v3  ;;  %v335_v22 = vmax.f32 %v125_v14, %v230_v15  ;;  %v1070_v28 = vmax.f32 %v961_v63, %v125_v14  ;;  %v860_v35 = vld [vmem:[%s1912_s11 + $0x5f] sm:$0xff]  ;;  %v546_v55 = vmax.f32 %v336_v41, %v441_v37  ;;  %v861_v56 = vld [vmem:[%s1912_s11 + $0x67] sm:$0xff] }
  0x22   : > { %1701 = vst.msk [vmem:[%s1967_s15] sm:$0xff] %vm1700_vm0, %v1595_v4  ;;  %v859_v21 = vld [vmem:[%s1912_s11 + $0x57] sm:$0xff]  ;;  %v754_v24 = vmax.f32 %v544_v13, %v1975_v9  ;;  %v1596_v30 = vmax.f32 %v1487_v17, %v1932_v26  ;;  %v1176_v44 = vld [vmem:[%s1912_s11 + $0x64] sm:$0xff]  ;;  %v1387_v60 = vld [vmem:[%s1912_s11 + $0x6d] sm:$0xff] }
  0x23   : > { %v1175_v23 = vld [vmem:[%s1912_s11 + $0x5c] sm:$0xff]  ;;  %v1174_v25 = vld [vmem:[%s1912_s11 + $0x54] sm:$0xff]  ;;  %v960_v33 = vmax.f32 %v750_v20, %v855_v10  ;;  %v545_v34 = vmax.f32 %v335_v22, %v440_v16  ;;  %v1386_v49 = vld [vmem:[%s1912_s11 + $0x65] sm:$0xff]  ;;  %v1281_v57 = vmax.f32 %v1071_v43, %v1176_v44  ;;  %v756_v4 = vmax.f32 %v546_v55, %v651_v42 }
  0x24   : > { %v650_v27 = vld [vmem:[%s1912_s11 + $0x5e] sm:$0xff]  ;;  %v964_v38 = vmax.f32 %v754_v24, %v859_v21  ;;  %v1384_v39 = vld [vmem:[%s1912_s11 + $0x55] sm:$0xff]  ;;  %v1280_v40 = vmax.f32 %v1070_v28, %v1175_v23  ;;  %1702 = vst.msk [vmem:[%s1967_s15 + $0x8] sm:$0xff] %vm1700_vm0, %v1596_v30  ;;  %v130_v32 = vld [vmem:[%s1912_s11 + $0x68] sm:$0xff] }
  0x25   : > { %v1385_v36 = vld [vmem:[%s1912_s11 + $0x5d] sm:$0xff]  ;;  %v127_v26 = vld [vmem:[%s1912_s11 + $0x50] sm:$0xff]  ;;  %v1069_v46 = vmax.f32 %v960_v33, %v1958_v54  ;;  %v755_v47 = vmax.f32 %v545_v34, %v650_v27  ;;  %v1597_v54 = vmax.f32 %v1488_v45, %v1951_v48  ;;  %v1491_v5 = vmax.f32 %v1281_v57, %v1386_v49  ;;  %v1390_v44 = vld [vmem:[%s1912_s11 + $0x85] sm:$0xff] }
  0x26   : > { %v1072_v52 = vmax.f32 %v963_v12, %v127_v26  ;;  %v1490_v53 = vmax.f32 %v1280_v40, %v1385_v36  ;;  %v337_v58 = vmax.f32 %v127_v26, %v232_v50  ;;  %v652_v63 = vld [vmem:[%s1912_s11 + $0x6e] sm:$0xff]  ;;  %v128_v1 = vld [vmem:[%s1912_s11 + $0x58] sm:$0xff]  ;;  %v129_v15 = vld [vmem:[%s1912_s11 + $0x60] sm:$0xff]  ;;  %v966_v17 = vmax.f32 %v756_v4, %v861_v56 }
  0x27   : > { %v1279_v61 = vmax.f32 %v1069_v46, %v1174_v25  ;;  %v965_v62 = vmax.f32 %v755_v47, %v860_v35  ;;  %v233_v2 = vld [vmem:[%s1912_s11 + $0x59] sm:$0xff]  ;;  %v862_v7 = vld [vmem:[%s1912_s11 + $0x6f] sm:$0xff]  ;;  %1703 = vst.msk [vmem:[%s1967_s15 + $0x10] sm:$0xff] %vm1700_vm0, %v1597_v54  ;;  %v1073_v14 = vmax.f32 %v964_v38, %v128_v1  ;;  %v234_v16 = vld [vmem:[%s1912_s11 + $0x61] sm:$0xff]  ;;  %v1600_v18 = vmax.f32 %v1491_v5, %v651_v42 }
  0x28   : > { %v1282_v0 = vmax.f32 %v1072_v52, %v1177_v59  ;;  %v1599_v3 = vmax.f32 %v1490_v53, %v650_v27  ;;  %v547_v6 = vmax.f32 %v337_v58, %v442_v51  ;;  %v443_v8 = vld [vmem:[%s1912_s11 + $0x5a] sm:$0xff]  ;;  %v338_v12 = vmax.f32 %v128_v1, %v233_v2  ;;  %v444_v23 = vld [vmem:[%s1912_s11 + $0x62] sm:$0xff]  ;;  %v131_v47 = vld [vmem:[%s1912_s11 + $0x70] sm:$0xff] }
  0x29   : > { %v1178_v10 = vld [vmem:[%s1912_s11 + $0x74] sm:$0xff]  ;;  %v1489_v48 = vmax.f32 %v1279_v61, %v1384_v39  ;;  %v339_v22 = vmax.f32 %v129_v15, %v234_v16  ;;  %v654_v24 = vld [vmem:[%s1912_s11 + $0x7e] sm:$0xff]  ;;  %1706 = vst.msk [vmem:[%s1967_s15 + $0x28] sm:$0xff] %vm1700_vm0, %v1600_v18  ;;  %v1074_v35 = vmax.f32 %v965_v62, %v129_v15  ;;  %v235_v37 = vld [vmem:[%s1912_s11 + $0x69] sm:$0xff]  ;;  %v1075_v38 = vmax.f32 %v966_v17, %v130_v32 }
  0x2a   : > { %v1492_v11 = vmax.f32 %v1282_v0, %v1387_v60  ;;  %v653_v13 = vld [vmem:[%s1912_s11 + $0x76] sm:$0xff]  ;;  %1705 = vst.msk [vmem:[%s1967_s15 + $0x20] sm:$0xff] %vm1700_vm0, %v1599_v3  ;;  %v757_v19 = vmax.f32 %v547_v6, %v652_v63  ;;  %v548_v28 = vmax.f32 %v338_v12, %v443_v8  ;;  %v1283_v29 = vmax.f32 %v1073_v14, %v1178_v10  ;;  %v864_v31 = vld [vmem:[%s1912_s11 + $0x7f] sm:$0xff]  ;;  %v865_v55 = vld [vmem:[%s1912_s11 + $0x87] sm:$0xff] }
  0x2b   : > { %v863_v20 = vld [vmem:[%s1912_s11 + $0x77] sm:$0xff]  ;;  %v1598_v25 = vmax.f32 %v1489_v48, %v1975_v9  ;;  %v549_v34 = vmax.f32 %v339_v22, %v444_v23  ;;  %v445_v9 = vld [vmem:[%s1912_s11 + $0x6a] sm:$0xff]  ;;  %v340_v41 = vmax.f32 %v130_v32, %v235_v37 }
  0x2c   : > { %v1388_v21 = vld [vmem:[%s1912_s11 + $0x75] sm:$0xff]  ;;  %v1601_v27 = vmax.f32 %v1492_v11, %v652_v63  ;;  %v967_v33 = vmax.f32 %v757_v19, %v862_v7  ;;  %v1389_v36 = vld [vmem:[%s1912_s11 + $0x7d] sm:$0xff]  ;;  %v758_v39 = vmax.f32 %v548_v28, %v653_v13  ;;  %v655_v42 = vld [vmem:[%s1912_s11 + $0x86] sm:$0xff] }
  0x2d   : > { %v1179_v30 = vld [vmem:[%s1912_s11 + $0x7c] sm:$0xff]  ;;  %1704 = vst.msk [vmem:[%s1967_s15 + $0x18] sm:$0xff] %vm1700_vm0, %v1598_v25  ;;  %v1493_v40 = vmax.f32 %v1283_v29, %v1388_v21  ;;  %v1180_v43 = vld [vmem:[%s1912_s11 + $0x84] sm:$0xff]  ;;  %v759_v26 = vmax.f32 %v549_v34, %v654_v24  ;;  %v236_v49 = vld [vmem:[%s1912_s11 + $0x71] sm:$0xff]  ;;  %v550_v53 = vmax.f32 %v340_v41, %v445_v9 }
  0x2e   : > { %1707 = vst.msk [vmem:[%s1967_s15 + $0x30] sm:$0xff] %vm1700_vm0, %v1601_v27  ;;  %v1284_v45 = vmax.f32 %v1074_v35, %v1179_v30  ;;  %v1285_v46 = vmax.f32 %v1075_v38, %v1180_v43  ;;  %v446_v50 = vld [vmem:[%s1912_s11 + $0x72] sm:$0xff]  ;;  %v968_v51 = vmax.f32 %v758_v39, %v863_v20  ;;  %v341_v56 = vmax.f32 %v131_v47, %v236_v49  ;;  %v447_v5 = vld [vmem:[%s1912_s11 + $0x7a] sm:$0xff]  ;;  %v448_v20 = vld [vmem:[%s1912_s11 + $0x82] sm:$0xff] }
  0x2f   : > { %v1602_v52 = vmax.f32 %v1493_v40, %v653_v13  ;;  %v656_v57 = vld [vmem:[%s1912_s11 + $0x8e] sm:$0xff]  ;;  %v969_v59 = vmax.f32 %v759_v26, %v864_v31  ;;  %v1076_v62 = vmax.f32 %v967_v33, %v131_v47  ;;  %v132_v63 = vld [vmem:[%s1912_s11 + $0x78] sm:$0xff]  ;;  %v760_v1 = vmax.f32 %v550_v53, %v655_v42  ;;  %v133_v13 = vld [vmem:[%s1912_s11 + $0x80] sm:$0xff] }
  0x30   : > { %v1181_v58 = vld [vmem:[%s1912_s11 + $0x8c] sm:$0xff]  ;;  %v1494_v60 = vmax.f32 %v1284_v45, %v1389_v36  ;;  %v1495_v54 = vmax.f32 %v1285_v46, %v1390_v44  ;;  %v237_v0 = vld [vmem:[%s1912_s11 + $0x79] sm:$0xff]  ;;  %v551_v2 = vmax.f32 %v341_v56, %v446_v50  ;;  %v1077_v7 = vmax.f32 %v968_v51, %v132_v63  ;;  %v238_v19 = vld [vmem:[%s1912_s11 + $0x81] sm:$0xff] }
  0x31   : > { %v866_v61 = vld [vmem:[%s1912_s11 + $0x8f] sm:$0xff]  ;;  %1708 = vst.msk [vmem:[%s1967_s15 + $0x38] sm:$0xff] %vm1700_vm0, %v1602_v52  ;;  %v342_v4 = vmax.f32 %v132_v63, %v237_v0  ;;  %v1286_v48 = vmax.f32 %v1076_v62, %v1181_v58  ;;  %v970_v14 = vmax.f32 %v760_v1, %v865_v55  ;;  %v867_v17 = vld [vmem:[%s1912_s11 + $0x97] sm:$0xff]  ;;  %v343_v22 = vmax.f32 %v133_v13, %v238_v19  ;;  %v868_v36 = vld [vmem:[%s1912_s11 + $0x9f] sm:$0xff] }
  0x32   : > { %v1391_v3 = vld [vmem:[%s1912_s11 + $0x8d] sm:$0xff]  ;;  %v657_v6 = vld [vmem:[%s1912_s11 + $0x96] sm:$0xff]  ;;  %v1603_v8 = vmax.f32 %v1494_v60, %v654_v24  ;;  %v1604_v10 = vmax.f32 %v1495_v54, %v655_v42  ;;  %v761_v15 = vmax.f32 %v551_v2, %v656_v57  ;;  %v658_v23 = vld [vmem:[%s1912_s11 + $0x9e] sm:$0xff]  ;;  %v1078_v24 = vmax.f32 %v969_v59, %v133_v13 }
  0x33   : > { %v1182_v11 = vld [vmem:[%s1912_s11 + $0x94] sm:$0xff]  ;;  %v552_v16 = vmax.f32 %v342_v4, %v447_v5  ;;  %v1496_v21 = vmax.f32 %v1286_v48, %v1391_v3  ;;  %v1183_v25 = vld [vmem:[%s1912_s11 + $0x9c] sm:$0xff]  ;;  %v134_v30 = vld [vmem:[%s1912_s11 + $0x88] sm:$0xff]  ;;  %v553_v35 = vmax.f32 %v343_v22, %v448_v20 }
  0x34   : > { %v1392_v12 = vld [vmem:[%s1912_s11 + $0x95] sm:$0xff]  ;;  %v1287_v18 = vmax.f32 %v1077_v7, %v1182_v11  ;;  %1709 = vst.msk [vmem:[%s1967_s15 + $0x40] sm:$0xff] %vm1700_vm0, %v1603_v8  ;;  %v1393_v27 = vld [vmem:[%s1912_s11 + $0x9d] sm:$0xff]  ;;  %v971_v28 = vmax.f32 %v761_v15, %v866_v61  ;;  %v239_v32 = vld [vmem:[%s1912_s11 + $0x89] sm:$0xff]  ;;  %v1288_v37 = vmax.f32 %v1078_v24, %v1183_v25  ;;  %v1079_v42 = vmax.f32 %v970_v14, %v134_v30 }
  0x35   : > { %1710 = vst.msk [vmem:[%s1967_s15 + $0x48] sm:$0xff] %vm1700_vm0, %v1604_v10  ;;  %v762_v29 = vmax.f32 %v552_v16, %v657_v6  ;;  %v449_v33 = vld [vmem:[%s1912_s11 + $0x8a] sm:$0xff]  ;;  %v1605_v34 = vmax.f32 %v1496_v21, %v656_v57  ;;  %v344_v9 = vmax.f32 %v134_v30, %v239_v32  ;;  %v763_v26 = vmax.f32 %v553_v35, %v658_v23  ;;  %v450_v51 = vld [vmem:[%s1912_s11 + $0x92] sm:$0xff]  ;;  %v451_v63 = vld [vmem:[%s1912_s11 + $0x9a] sm:$0xff] }
  0x36   : > { %v1497_v31 = vmax.f32 %v1287_v18, %v1392_v12  ;;  %v1184_v38 = vld [vmem:[%s1912_s11 + $0xa4] sm:$0xff]  ;;  %v135_v43 = vld [vmem:[%s1912_s11 + $0x90] sm:$0xff]  ;;  %v1498_v45 = vmax.f32 %v1288_v37, %v1393_v27  ;;  %v136_v57 = vld [vmem:[%s1912_s11 + $0x98] sm:$0xff] }
  0x37   : > { %v972_v39 = vmax.f32 %v762_v29, %v867_v17  ;;  %v659_v41 = vld [vmem:[%s1912_s11 + $0xa6] sm:$0xff]  ;;  %v240_v44 = vld [vmem:[%s1912_s11 + $0x91] sm:$0xff]  ;;  %1711 = vst.msk [vmem:[%s1967_s15 + $0x50] sm:$0xff] %vm1700_vm0, %v1605_v34  ;;  %v554_v46 = vmax.f32 %v344_v9, %v449_v33  ;;  %v1289_v52 = vmax.f32 %v1079_v42, %v1184_v38  ;;  %v1080_v55 = vmax.f32 %v971_v28, %v135_v43  ;;  %v241_v62 = vld [vmem:[%s1912_s11 + $0x99] sm:$0xff] }
  0x38   : > { %v1606_v40 = vmax.f32 %v1497_v31, %v657_v6  ;;  %v869_v47 = vld [vmem:[%s1912_s11 + $0xa7] sm:$0xff]  ;;  %v345_v50 = vmax.f32 %v135_v43, %v240_v44  ;;  %v973_v58 = vmax.f32 %v763_v26, %v868_v36  ;;  %v1607_v59 = vmax.f32 %v1498_v45, %v658_v23  ;;  %v870_v1 = vld [vmem:[%s1912_s11 + $0xaf] sm:$0xff]  ;;  %v871_v15 = vld [vmem:[%s1912_s11 + $0xb7] sm:$0xff] }
  0x39   : > { %v1394_v49 = vld [vmem:[%s1912_s11 + $0xa5] sm:$0xff]  ;;  %v660_v53 = vld [vmem:[%s1912_s11 + $0xae] sm:$0xff]  ;;  %v764_v60 = vmax.f32 %v554_v46, %v659_v41  ;;  %v346_v3 = vmax.f32 %v136_v57, %v241_v62  ;;  %v661_v4 = vld [vmem:[%s1912_s11 + $0xb6] sm:$0xff]  ;;  %v1081_v5 = vmax.f32 %v972_v39, %v136_v57 }
  0x3a   : > { %1712 = vst.msk [vmem:[%s1967_s15 + $0x58] sm:$0xff] %vm1700_vm0, %v1606_v40  ;;  %v1185_v56 = vld [vmem:[%s1912_s11 + $0xac] sm:$0xff]  ;;  %v555_v54 = vmax.f32 %v345_v50, %v450_v51  ;;  %v1499_v0 = vmax.f32 %v1289_v52, %v1394_v49  ;;  %v1186_v6 = vld [vmem:[%s1912_s11 + $0xb4] sm:$0xff]  ;;  %v137_v48 = vld [vmem:[%s1912_s11 + $0xa0] sm:$0xff] }
  0x3b   : > { %v1395_v61 = vld [vmem:[%s1912_s11 + $0xad] sm:$0xff]  ;;  %v1290_v2 = vmax.f32 %v1080_v55, %v1185_v56  ;;  %1713 = vst.msk [vmem:[%s1967_s15 + $0x60] sm:$0xff] %vm1700_vm0, %v1607_v59  ;;  %v974_v7 = vmax.f32 %v764_v60, %v869_v47  ;;  %v1396_v10 = vld [vmem:[%s1912_s11 + $0xb5] sm:$0xff]  ;;  %v242_v11 = vld [vmem:[%s1912_s11 + $0xa1] sm:$0xff]  ;;  %v556_v14 = vmax.f32 %v346_v3, %v451_v63  ;;  %v1291_v16 = vmax.f32 %v1081_v5, %v1186_v6 }
  0x3c   : > { %v765_v8 = vmax.f32 %v555_v54, %v660_v53  ;;  %v1608_v12 = vmax.f32 %v1499_v0, %v659_v41  ;;  %v452_v17 = vld [vmem:[%s1912_s11 + $0xa2] sm:$0xff]  ;;  %v347_v20 = vmax.f32 %v137_v48, %v242_v11  ;;  %v1082_v22 = vmax.f32 %v973_v58, %v137_v48  ;;  %v453_v32 = vld [vmem:[%s1912_s11 + $0xaa] sm:$0xff]  ;;  %v454_v43 = vld [vmem:[%s1912_s11 + $0xb2] sm:$0xff] }
  0x3d   : > { %v1500_v13 = vmax.f32 %v1290_v2, %v1395_v61  ;;  %v1187_v18 = vld [vmem:[%s1912_s11 + $0xbc] sm:$0xff]  ;;  %v138_v23 = vld [vmem:[%s1912_s11 + $0xa8] sm:$0xff]  ;;  %v766_v27 = vmax.f32 %v556_v14, %v661_v4  ;;  %v1501_v28 = vmax.f32 %v1291_v16, %v1396_v10  ;;  %v139_v9 = vld [vmem:[%s1912_s11 + $0xb0] sm:$0xff] }
  0x3e   : > { %v975_v19 = vmax.f32 %v765_v8, %v870_v1  ;;  %v662_v21 = vld [vmem:[%s1912_s11 + $0xbe] sm:$0xff]  ;;  %v243_v24 = vld [vmem:[%s1912_s11 + $0xa9] sm:$0xff]  ;;  %1714 = vst.msk [vmem:[%s1967_s15 + $0x68] sm:$0xff] %vm1700_vm0, %v1608_v12  ;;  %v557_v33 = vmax.f32 %v347_v20, %v452_v17  ;;  %v1292_v34 = vmax.f32 %v1082_v22, %v1187_v18  ;;  %v1083_v36 = vmax.f32 %v974_v7, %v138_v23  ;;  %v244_v42 = vld [vmem:[%s1912_s11 + $0xb1] sm:$0xff] }
  0x3f   : > { %v1609_v25 = vmax.f32 %v1500_v13, %v660_v53  ;;  %v872_v29 = vld [vmem:[%s1912_s11 + $0xbf] sm:$0xff]  ;;  %v348_v30 = vmax.f32 %v138_v23, %v243_v24  ;;  %v976_v38 = vmax.f32 %v766_v27, %v871_v15  ;;  %v1610_v39 = vmax.f32 %v1501_v28, %v661_v4  ;;  %v873_v46 = vld [vmem:[%s1912_s11 + $0xc7] sm:$0xff]  ;;  %v874_v61 = vld [vmem:[%s1912_s11 + $0xcf] sm:$0xff] }
  0x40   : > { %v1397_v31 = vld [vmem:[%s1912_s11 + $0xbd] sm:$0xff]  ;;  %v663_v35 = vld [vmem:[%s1912_s11 + $0xc6] sm:$0xff]  ;;  %v1084_v44 = vmax.f32 %v975_v19, %v139_v9  ;;  %v767_v26 = vmax.f32 %v557_v33, %v662_v21  ;;  %v349_v49 = vmax.f32 %v139_v9, %v244_v42  ;;  %v664_v53 = vld [vmem:[%s1912_s11 + $0xce] sm:$0xff] }
  0x41   : > { %v1188_v37 = vld [vmem:[%s1912_s11 + $0xc4] sm:$0xff]  ;;  %1715 = vst.msk [vmem:[%s1967_s15 + $0x70] sm:$0xff] %vm1700_vm0, %v1609_v25  ;;  %v558_v40 = vmax.f32 %v348_v30, %v453_v32  ;;  %v1502_v45 = vmax.f32 %v1292_v34, %v1397_v31  ;;  %v1189_v50 = vld [vmem:[%s1912_s11 + $0xcc] sm:$0xff]  ;;  %v140_v56 = vld [vmem:[%s1912_s11 + $0xb8] sm:$0xff] }
  0x42   : > { %v1398_v41 = vld [vmem:[%s1912_s11 + $0xc5] sm:$0xff]  ;;  %v1293_v47 = vmax.f32 %v1083_v36, %v1188_v37  ;;  %v1399_v51 = vld [vmem:[%s1912_s11 + $0xcd] sm:$0xff]  ;;  %1716 = vst.msk [vmem:[%s1967_s15 + $0x78] sm:$0xff] %vm1700_vm0, %v1610_v39  ;;  %v1294_v55 = vmax.f32 %v1084_v44, %v1189_v50  ;;  %v245_v57 = vld [vmem:[%s1912_s11 + $0xb9] sm:$0xff]  ;;  %v977_v58 = vmax.f32 %v767_v26, %v872_v29  ;;  %v559_v54 = vmax.f32 %v349_v49, %v454_v43 }
  0x43   : > { %v768_v52 = vmax.f32 %v558_v40, %v663_v35  ;;  %v1611_v59 = vmax.f32 %v1502_v45, %v662_v21  ;;  %v455_v62 = vld [vmem:[%s1912_s11 + $0xba] sm:$0xff]  ;;  %v350_v2 = vmax.f32 %v140_v56, %v245_v57  ;;  %v1085_v4 = vmax.f32 %v976_v38, %v140_v56  ;;  %v456_v12 = vld [vmem:[%s1912_s11 + $0xc2] sm:$0xff]  ;;  %v457_v27 = vld [vmem:[%s1912_s11 + $0xca] sm:$0xff] }
  0x44   : > { %v1503_v60 = vmax.f32 %v1293_v47, %v1398_v41  ;;  %v1190_v63 = vld [vmem:[%s1912_s11 + $0xd4] sm:$0xff]  ;;  %v1504_v1 = vmax.f32 %v1294_v55, %v1399_v51  ;;  %v141_v5 = vld [vmem:[%s1912_s11 + $0xc0] sm:$0xff]  ;;  %v769_v8 = vmax.f32 %v559_v54, %v664_v53  ;;  %v142_v20 = vld [vmem:[%s1912_s11 + $0xc8] sm:$0xff] }
  0x45   : > { %v978_v0 = vmax.f32 %v768_v52, %v873_v46  ;;  %v665_v3 = vld [vmem:[%s1912_s11 + $0xd6] sm:$0xff]  ;;  %v246_v6 = vld [vmem:[%s1912_s11 + $0xc1] sm:$0xff]  ;;  %1717 = vst.msk [vmem:[%s1967_s15 + $0x80] sm:$0xff] %vm1700_vm0, %v1611_v59  ;;  %v1086_v14 = vmax.f32 %v977_v58, %v141_v5  ;;  %v560_v16 = vmax.f32 %v350_v2, %v455_v62  ;;  %v1295_v17 = vmax.f32 %v1085_v4, %v1190_v63  ;;  %v247_v25 = vld [vmem:[%s1912_s11 + $0xc9] sm:$0xff] }
  0x46   : > { %v1612_v7 = vmax.f32 %v1503_v60, %v663_v35  ;;  %v875_v10 = vld [vmem:[%s1912_s11 + $0xd7] sm:$0xff]  ;;  %v351_v11 = vmax.f32 %v141_v5, %v246_v6  ;;  %v1613_v15 = vmax.f32 %v1504_v1, %v664_v53  ;;  %v979_v21 = vmax.f32 %v769_v8, %v874_v61  ;;  %v876_v23 = vld [vmem:[%s1912_s11 + $0xdf] sm:$0xff]  ;;  %v877_v43 = vld [vmem:[%s1912_s11 + $0xe7] sm:$0xff] }
  0x47   : > { %v1400_v48 = vld [vmem:[%s1912_s11 + $0xd5] sm:$0xff]  ;;  %v666_v13 = vld [vmem:[%s1912_s11 + $0xde] sm:$0xff]  ;;  %v1087_v28 = vmax.f32 %v978_v0, %v142_v20  ;;  %v770_v29 = vmax.f32 %v560_v16, %v665_v3  ;;  %v352_v30 = vmax.f32 %v142_v20, %v247_v25  ;;  %v667_v32 = vld [vmem:[%s1912_s11 + $0xe6] sm:$0xff] }
  0x48   : > { %v1191_v18 = vld [vmem:[%s1912_s11 + $0xdc] sm:$0xff]  ;;  %1718 = vst.msk [vmem:[%s1967_s15 + $0x88] sm:$0xff] %vm1700_vm0, %v1612_v7  ;;  %v561_v22 = vmax.f32 %v351_v11, %v456_v12  ;;  %v1505_v31 = vmax.f32 %v1295_v17, %v1400_v48  ;;  %v1192_v33 = vld [vmem:[%s1912_s11 + $0xe4] sm:$0xff]  ;;  %v143_v9 = vld [vmem:[%s1912_s11 + $0xd0] sm:$0xff] }
  0x49   : > { %v1401_v19 = vld [vmem:[%s1912_s11 + $0xdd] sm:$0xff]  ;;  %v1296_v24 = vmax.f32 %v1086_v14, %v1191_v18  ;;  %1719 = vst.msk [vmem:[%s1967_s15 + $0x90] sm:$0xff] %vm1700_vm0, %v1613_v15  ;;  %v1402_v34 = vld [vmem:[%s1912_s11 + $0xe5] sm:$0xff]  ;;  %v1297_v37 = vmax.f32 %v1087_v28, %v1192_v33  ;;  %v248_v38 = vld [vmem:[%s1912_s11 + $0xd1] sm:$0xff]  ;;  %v980_v40 = vmax.f32 %v770_v29, %v875_v10  ;;  %v562_v42 = vmax.f32 %v352_v30, %v457_v27 }
  0x4a   : > { %v771_v35 = vmax.f32 %v561_v22, %v666_v13  ;;  %v458_v39 = vld [vmem:[%s1912_s11 + $0xd2] sm:$0xff]  ;;  %v1614_v41 = vmax.f32 %v1505_v31, %v665_v3  ;;  %v353_v44 = vmax.f32 %v143_v9, %v248_v38  ;;  %v1088_v51 = vmax.f32 %v979_v21, %v143_v9  ;;  %v459_v59 = vld [vmem:[%s1912_s11 + $0xda] sm:$0xff]  ;;  %v460_v8 = vld [vmem:[%s1912_s11 + $0xe2] sm:$0xff] }
  0x4b   : > { %v1506_v36 = vmax.f32 %v1296_v24, %v1401_v19  ;;  %v668_v26 = vld [vmem:[%s1912_s11 + $0xee] sm:$0xff]  ;;  %v1507_v49 = vmax.f32 %v1297_v37, %v1402_v34  ;;  %v144_v52 = vld [vmem:[%s1912_s11 + $0xd8] sm:$0xff]  ;;  %v772_v55 = vmax.f32 %v562_v42, %v667_v32  ;;  %v145_v1 = vld [vmem:[%s1912_s11 + $0xe0] sm:$0xff] }
  0x4c   : > { %v1193_v45 = vld [vmem:[%s1912_s11 + $0xec] sm:$0xff]  ;;  %v981_v46 = vmax.f32 %v771_v35, %v876_v23  ;;  %v249_v53 = vld [vmem:[%s1912_s11 + $0xd9] sm:$0xff]  ;;  %1720 = vst.msk [vmem:[%s1967_s15 + $0x98] sm:$0xff] %vm1700_vm0, %v1614_v41  ;;  %v563_v56 = vmax.f32 %v353_v44, %v458_v39  ;;  %v1089_v54 = vmax.f32 %v980_v40, %v144_v52  ;;  %v250_v7 = vld [vmem:[%s1912_s11 + $0xe1] sm:$0xff] }
  0x4d   : > { %v1615_v47 = vmax.f32 %v1506_v36, %v666_v13  ;;  %v878_v50 = vld [vmem:[%s1912_s11 + $0xef] sm:$0xff]  ;;  %v354_v58 = vmax.f32 %v144_v52, %v249_v53  ;;  %v1616_v61 = vmax.f32 %v1507_v49, %v667_v32  ;;  %v1298_v62 = vmax.f32 %v1088_v51, %v1193_v45  ;;  %v879_v5 = vld [vmem:[%s1912_s11 + $0xf7] sm:$0xff]  ;;  %v880_v23 = vld [vmem:[%s1912_s11 + $0xff] sm:$0xff] }
  0x4e   : > { %v1403_v57 = vld [vmem:[%s1912_s11 + $0xed] sm:$0xff]  ;;  %v669_v60 = vld [vmem:[%s1912_s11 + $0xf6] sm:$0xff]  ;;  %v982_v2 = vmax.f32 %v772_v55, %v877_v43  ;;  %v773_v3 = vmax.f32 %v563_v56, %v668_v26  ;;  %v355_v48 = vmax.f32 %v145_v1, %v250_v7  ;;  %v670_v11 = vld [vmem:[%s1912_s11 + $0xfe] sm:$0xff]  ;;  %v1090_v12 = vmax.f32 %v981_v46, %v145_v1 }
  0x4f   : > { %1721 = vst.msk [vmem:[%s1967_s15 + $0xa0] sm:$0xff] %vm1700_vm0, %v1615_v47  ;;  %v1194_v63 = vld [vmem:[%s1912_s11 + $0xf4] sm:$0xff]  ;;  %v564_v4 = vmax.f32 %v354_v58, %v459_v59  ;;  %v1508_v10 = vmax.f32 %v1298_v62, %v1403_v57  ;;  %v1195_v13 = vld [vmem:[%s1912_s11 + $0xfc] sm:$0xff]  ;;  %v146_v18 = vld [vmem:[%s1912_s11 + $0xe8] sm:$0xff] }
  0x50   : > { %v1404_v0 = vld [vmem:[%s1912_s11 + $0xf5] sm:$0xff]  ;;  %v1299_v6 = vmax.f32 %v1089_v54, %v1194_v63  ;;  %1722 = vst.msk [vmem:[%s1967_s15 + $0xa8] sm:$0xff] %vm1700_vm0, %v1616_v61  ;;  %v1405_v14 = vld [vmem:[%s1912_s11 + $0xfd] sm:$0xff]  ;;  %v983_v15 = vmax.f32 %v773_v3, %v878_v50  ;;  %v251_v19 = vld [vmem:[%s1912_s11 + $0xe9] sm:$0xff]  ;;  %v565_v22 = vmax.f32 %v355_v48, %v460_v8  ;;  %v1300_v24 = vmax.f32 %v1090_v12, %v1195_v13 }
  0x51   : > { %v774_v16 = vmax.f32 %v564_v4, %v669_v60  ;;  %v461_v20 = vld [vmem:[%s1912_s11 + $0xea] sm:$0xff]  ;;  %v1617_v21 = vmax.f32 %v1508_v10, %v668_v26  ;;  %v356_v25 = vmax.f32 %v146_v18, %v251_v19  ;;  %v1091_v30 = vmax.f32 %v982_v2, %v146_v18  ;;  %v462_v39 = vld [vmem:[%s1912_s11 + $0xf2] sm:$0xff]  ;;  %v463_v51 = vld [vmem:[%s1912_s11 + $0xfa] sm:$0xff] }
  0x52   : > { %v1509_v17 = vmax.f32 %v1299_v6, %v1404_v0  ;;  %v1196_v27 = vld [vmem:[%s1912_s11 + $0x104] sm:$0xff]  ;;  %v147_v32 = vld [vmem:[%s1912_s11 + $0xf0] sm:$0xff]  ;;  %v775_v34 = vmax.f32 %v565_v22, %v670_v11  ;;  %v1510_v35 = vmax.f32 %v1300_v24, %v1405_v14  ;;  %v148_v44 = vld [vmem:[%s1912_s11 + $0xf8] sm:$0xff] }
  0x53   : > { %v984_v28 = vmax.f32 %v774_v16, %v879_v5  ;;  %v671_v31 = vld [vmem:[%s1912_s11 + $0x106] sm:$0xff]  ;;  %v252_v33 = vld [vmem:[%s1912_s11 + $0xf1] sm:$0xff]  ;;  %1723 = vst.msk [vmem:[%s1967_s15 + $0xb0] sm:$0xff] %vm1700_vm0, %v1617_v21  ;;  %v566_v36 = vmax.f32 %v356_v25, %v461_v20  ;;  %v1301_v40 = vmax.f32 %v1091_v30, %v1196_v27  ;;  %v1092_v42 = vmax.f32 %v983_v15, %v147_v32  ;;  %v253_v50 = vld [vmem:[%s1912_s11 + $0xf9] sm:$0xff] }
  0x54   : > { %v1618_v29 = vmax.f32 %v1509_v17, %v669_v60  ;;  %v881_v37 = vld [vmem:[%s1912_s11 + $0x107] sm:$0xff]  ;;  %v357_v38 = vmax.f32 %v147_v32, %v252_v33  ;;  %v985_v26 = vmax.f32 %v775_v34, %v880_v23  ;;  %v1619_v45 = vmax.f32 %v1510_v35, %v670_v11  ;;  %v882_v53 = vld [vmem:[%s1912_s11 + $0x10f] sm:$0xff]  ;;  %v883_v3 = vld [vmem:[%s1912_s11 + $0x117] sm:$0xff] }
  0x55   : > { %v1406_v9 = vld [vmem:[%s1912_s11 + $0x105] sm:$0xff]  ;;  %v672_v41 = vld [vmem:[%s1912_s11 + $0x10e] sm:$0xff]  ;;  %v776_v46 = vmax.f32 %v566_v36, %v671_v31  ;;  %v358_v56 = vmax.f32 %v148_v44, %v253_v50  ;;  %v673_v57 = vld [vmem:[%s1912_s11 + $0x116] sm:$0xff]  ;;  %v1093_v58 = vmax.f32 %v984_v28, %v148_v44 }
  0x56   : > { %1724 = vst.msk [vmem:[%s1967_s15 + $0xb8] sm:$0xff] %vm1700_vm0, %v1618_v29  ;;  %v1197_v43 = vld [vmem:[%s1912_s11 + $0x10c] sm:$0xff]  ;;  %v567_v47 = vmax.f32 %v357_v38, %v462_v39  ;;  %v1511_v52 = vmax.f32 %v1301_v40, %v1406_v9  ;;  %v1198_v59 = vld [vmem:[%s1912_s11 + $0x114] sm:$0xff]  ;;  %v149_v62 = vld [vmem:[%s1912_s11 + $0x100] sm:$0xff] }
  0x57   : > { %v1407_v49 = vld [vmem:[%s1912_s11 + $0x10d] sm:$0xff]  ;;  %v1302_v55 = vmax.f32 %v1092_v42, %v1197_v43  ;;  %1725 = vst.msk [vmem:[%s1967_s15 + $0xc0] sm:$0xff] %vm1700_vm0, %v1619_v45  ;;  %v986_v60 = vmax.f32 %v776_v46, %v881_v37  ;;  %v1408_v61 = vld [vmem:[%s1912_s11 + $0x115] sm:$0xff]  ;;  %v254_v63 = vld [vmem:[%s1912_s11 + $0x101] sm:$0xff]  ;;  %v568_v2 = vmax.f32 %v358_v56, %v463_v51  ;;  %v1303_v4 = vmax.f32 %v1093_v58, %v1198_v59 }
  0x58   : > { %v777_v54 = vmax.f32 %v567_v47, %v672_v41  ;;  %v1620_v0 = vmax.f32 %v1511_v52, %v671_v31  ;;  %v464_v5 = vld [vmem:[%s1912_s11 + $0x102] sm:$0xff]  ;;  %v359_v8 = vmax.f32 %v149_v62, %v254_v63  ;;  %v1094_v48 = vmax.f32 %v985_v26, %v149_v62  ;;  %v465_v19 = vld [vmem:[%s1912_s11 + $0x10a] sm:$0xff]  ;;  %v466_v32 = vld [vmem:[%s1912_s11 + $0x112] sm:$0xff] }
  0x59   : > { %v1512_v1 = vmax.f32 %v1302_v55, %v1407_v49  ;;  %v1199_v6 = vld [vmem:[%s1912_s11 + $0x11c] sm:$0xff]  ;;  %v150_v11 = vld [vmem:[%s1912_s11 + $0x108] sm:$0xff]  ;;  %v778_v14 = vmax.f32 %v568_v2, %v673_v57  ;;  %v1513_v15 = vmax.f32 %v1303_v4, %v1408_v61  ;;  %v151_v25 = vld [vmem:[%s1912_s11 + $0x110] sm:$0xff] }
  0x5a   : > { %v987_v7 = vmax.f32 %v777_v54, %v882_v53  ;;  %v674_v10 = vld [vmem:[%s1912_s11 + $0x11e] sm:$0xff]  ;;  %v255_v12 = vld [vmem:[%s1912_s11 + $0x109] sm:$0xff]  ;;  %1726 = vst.msk [vmem:[%s1967_s15 + $0xc8] sm:$0xff] %vm1700_vm0, %v1620_v0  ;;  %v569_v20 = vmax.f32 %v359_v8, %v464_v5  ;;  %v1304_v21 = vmax.f32 %v1094_v48, %v1199_v6  ;;  %v1095_v23 = vmax.f32 %v986_v60, %v150_v11  ;;  %v256_v30 = vld [vmem:[%s1912_s11 + $0x111] sm:$0xff] }
  0x5b   : > { %v1621_v13 = vmax.f32 %v1512_v1, %v672_v41  ;;  %v884_v16 = vld [vmem:[%s1912_s11 + $0x11f] sm:$0xff]  ;;  %v360_v18 = vmax.f32 %v150_v11, %v255_v12  ;;  %v988_v27 = vmax.f32 %v778_v14, %v883_v3  ;;  %v1622_v28 = vmax.f32 %v1513_v15, %v673_v57  ;;  %v885_v36 = vld [vmem:[%s1912_s11 + $0x127] sm:$0xff]  ;;  %v886_v49 = vld [vmem:[%s1912_s11 + $0x12f] sm:$0xff] }
  0x5c   : > { %v1409_v17 = vld [vmem:[%s1912_s11 + $0x11d] sm:$0xff]  ;;  %v675_v22 = vld [vmem:[%s1912_s11 + $0x126] sm:$0xff]  ;;  %v1096_v33 = vmax.f32 %v987_v7, %v151_v25  ;;  %v779_v34 = vmax.f32 %v569_v20, %v674_v10  ;;  %v361_v9 = vmax.f32 %v151_v25, %v256_v30  ;;  %v676_v41 = vld [vmem:[%s1912_s11 + $0x12e] sm:$0xff] }
  0x5d   : > { %v1200_v24 = vld [vmem:[%s1912_s11 + $0x124] sm:$0xff]  ;;  %1727 = vst.msk [vmem:[%s1967_s15 + $0xd0] sm:$0xff] %vm1700_vm0, %v1621_v13  ;;  %v570_v29 = vmax.f32 %v360_v18, %v465_v19  ;;  %v1514_v35 = vmax.f32 %v1304_v21, %v1409_v17  ;;  %v1201_v38 = vld [vmem:[%s1912_s11 + $0x12c] sm:$0xff]  ;;  %v152_v43 = vld [vmem:[%s1912_s11 + $0x118] sm:$0xff] }
  0x5e   : > { %v1410_v31 = vld [vmem:[%s1912_s11 + $0x125] sm:$0xff]  ;;  %v1305_v37 = vmax.f32 %v1095_v23, %v1200_v24  ;;  %v1411_v39 = vld [vmem:[%s1912_s11 + $0x12d] sm:$0xff]  ;;  %1728 = vst.msk [vmem:[%s1967_s15 + $0xd8] sm:$0xff] %vm1700_vm0, %v1622_v28  ;;  %v1306_v42 = vmax.f32 %v1096_v33, %v1201_v38  ;;  %v257_v44 = vld [vmem:[%s1912_s11 + $0x119] sm:$0xff]  ;;  %v989_v26 = vmax.f32 %v779_v34, %v884_v16  ;;  %v571_v47 = vmax.f32 %v361_v9, %v466_v32 }
  0x5f   : > { %v780_v40 = vmax.f32 %v570_v29, %v675_v22  ;;  %v1623_v45 = vmax.f32 %v1514_v35, %v674_v10  ;;  %v467_v50 = vld [vmem:[%s1912_s11 + $0x11a] sm:$0xff]  ;;  %v362_v55 = vmax.f32 %v152_v43, %v257_v44  ;;  %v1097_v57 = vmax.f32 %v988_v27, %v152_v43  ;;  %v468_v0 = vld [vmem:[%s1912_s11 + $0x122] sm:$0xff]  ;;  %v469_v14 = vld [vmem:[%s1912_s11 + $0x12a] sm:$0xff] }
  0x60   : > { %v1515_v46 = vmax.f32 %v1305_v37, %v1410_v31  ;;  %v1202_v51 = vld [vmem:[%s1912_s11 + $0x134] sm:$0xff]  ;;  %v1516_v53 = vmax.f32 %v1306_v42, %v1411_v39  ;;  %v153_v58 = vld [vmem:[%s1912_s11 + $0x120] sm:$0xff]  ;;  %v781_v54 = vmax.f32 %v571_v47, %v676_v41  ;;  %v154_v8 = vld [vmem:[%s1912_s11 + $0x128] sm:$0xff] }
  0x61   : > { %v990_v52 = vmax.f32 %v780_v40, %v885_v36  ;;  %v677_v56 = vld [vmem:[%s1912_s11 + $0x136] sm:$0xff]  ;;  %v258_v59 = vld [vmem:[%s1912_s11 + $0x121] sm:$0xff]  ;;  %1729 = vst.msk [vmem:[%s1967_s15 + $0xe0] sm:$0xff] %vm1700_vm0, %v1623_v45  ;;  %v1098_v2 = vmax.f32 %v989_v26, %v153_v58  ;;  %v572_v4 = vmax.f32 %v362_v55, %v467_v50  ;;  %v1307_v5 = vmax.f32 %v1097_v57, %v1202_v51  ;;  %v259_v13 = vld [vmem:[%s1912_s11 + $0x129] sm:$0xff] }
  0x62   : > { %v1624_v60 = vmax.f32 %v1515_v46, %v675_v22  ;;  %v887_v61 = vld [vmem:[%s1912_s11 + $0x137] sm:$0xff]  ;;  %v363_v63 = vmax.f32 %v153_v58, %v258_v59  ;;  %v1625_v3 = vmax.f32 %v1516_v53, %v676_v41  ;;  %v991_v10 = vmax.f32 %v781_v54, %v886_v49  ;;  %v888_v11 = vld [vmem:[%s1912_s11 + $0x13f] sm:$0xff]  ;;  %v889_v32 = vld [vmem:[%s1912_s11 + $0x147] sm:$0xff] }
  0x63   : > { %v1412_v62 = vld [vmem:[%s1912_s11 + $0x135] sm:$0xff]  ;;  %v678_v1 = vld [vmem:[%s1912_s11 + $0x13e] sm:$0xff]  ;;  %v1099_v15 = vmax.f32 %v990_v52, %v154_v8  ;;  %v782_v16 = vmax.f32 %v572_v4, %v677_v56  ;;  %v364_v18 = vmax.f32 %v154_v8, %v259_v13  ;;  %v679_v19 = vld [vmem:[%s1912_s11 + $0x146] sm:$0xff] }
  0x64   : > { %v1203_v6 = vld [vmem:[%s1912_s11 + $0x13c] sm:$0xff]  ;;  %1730 = vst.msk [vmem:[%s1967_s15 + $0xe8] sm:$0xff] %vm1700_vm0, %v1624_v60  ;;  %v573_v48 = vmax.f32 %v363_v63, %v468_v0  ;;  %v1517_v17 = vmax.f32 %v1307_v5, %v1412_v62  ;;  %v1204_v20 = vld [vmem:[%s1912_s11 + $0x144] sm:$0xff]  ;;  %v155_v25 = vld [vmem:[%s1912_s11 + $0x130] sm:$0xff] }
  0x65   : > { %v1413_v7 = vld [vmem:[%s1912_s11 + $0x13d] sm:$0xff]  ;;  %v1308_v12 = vmax.f32 %v1098_v2, %v1203_v6  ;;  %1731 = vst.msk [vmem:[%s1967_s15 + $0xf0] sm:$0xff] %vm1700_vm0, %v1625_v3  ;;  %v1414_v21 = vld [vmem:[%s1912_s11 + $0x145] sm:$0xff]  ;;  %v1309_v24 = vmax.f32 %v1099_v15, %v1204_v20  ;;  %v260_v27 = vld [vmem:[%s1912_s11 + $0x131] sm:$0xff]  ;;  %v992_v29 = vmax.f32 %v782_v16, %v887_v61  ;;  %v574_v30 = vmax.f32 %v364_v18, %v469_v14 }
  0x66   : > { %v783_v22 = vmax.f32 %v573_v48, %v678_v1  ;;  %v470_v28 = vld [vmem:[%s1912_s11 + $0x132] sm:$0xff]  ;;  %v1626_v31 = vmax.f32 %v1517_v17, %v677_v56  ;;  %v365_v33 = vmax.f32 %v155_v25, %v260_v27  ;;  %v1100_v39 = vmax.f32 %v991_v10, %v155_v25  ;;  %v471_v45 = vld [vmem:[%s1912_s11 + $0x13a] sm:$0xff]  ;;  %v472_v54 = vld [vmem:[%s1912_s11 + $0x142] sm:$0xff] }
  0x67   : > { %v1518_v23 = vmax.f32 %v1308_v12, %v1413_v7  ;;  %v680_v34 = vld [vmem:[%s1912_s11 + $0x14e] sm:$0xff]  ;;  %v1519_v9 = vmax.f32 %v1309_v24, %v1414_v21  ;;  %v156_v40 = vld [vmem:[%s1912_s11 + $0x138] sm:$0xff]  ;;  %v784_v42 = vmax.f32 %v574_v30, %v679_v19  ;;  %v157_v53 = vld [vmem:[%s1912_s11 + $0x140] sm:$0xff] }
  0x68   : > { %v1205_v35 = vld [vmem:[%s1912_s11 + $0x14c] sm:$0xff]  ;;  %v993_v36 = vmax.f32 %v783_v22, %v888_v11  ;;  %v261_v41 = vld [vmem:[%s1912_s11 + $0x139] sm:$0xff]  ;;  %1732 = vst.msk [vmem:[%s1967_s15 + $0xf8] sm:$0xff] %vm1700_vm0, %v1626_v31  ;;  %v575_v43 = vmax.f32 %v365_v33, %v470_v28  ;;  %v1101_v47 = vmax.f32 %v992_v29, %v156_v40  ;;  %v262_v60 = vld [vmem:[%s1912_s11 + $0x141] sm:$0xff] }
  0x69   : > { %v1627_v37 = vmax.f32 %v1518_v23, %v678_v1  ;;  %v890_v38 = vld [vmem:[%s1912_s11 + $0x14f] sm:$0xff]  ;;  %v366_v26 = vmax.f32 %v156_v40, %v261_v41  ;;  %v1628_v49 = vmax.f32 %v1519_v9, %v679_v19  ;;  %v1310_v50 = vmax.f32 %v1100_v39, %v1205_v35  ;;  %v891_v58 = vld [vmem:[%s1912_s11 + $0x157] sm:$0xff]  ;;  %v892_v11 = vld [vmem:[%s1912_s11 + $0x15f] sm:$0xff] }
  0x6a   : > { %v1415_v44 = vld [vmem:[%s1912_s11 + $0x14d] sm:$0xff]  ;;  %v681_v46 = vld [vmem:[%s1912_s11 + $0x156] sm:$0xff]  ;;  %v994_v55 = vmax.f32 %v784_v42, %v889_v32  ;;  %v785_v56 = vmax.f32 %v575_v43, %v680_v34  ;;  %v367_v62 = vmax.f32 %v157_v53, %v262_v60  ;;  %v682_v63 = vld [vmem:[%s1912_s11 + $0x15e] sm:$0xff]  ;;  %v1102_v0 = vmax.f32 %v993_v36, %v157_v53 }
  0x6b   : > { %1733 = vst.msk [vmem:[%s1967_s15 + $0x100] sm:$0xff] %vm1700_vm0, %v1627_v37  ;;  %v1206_v51 = vld [vmem:[%s1912_s11 + $0x154] sm:$0xff]  ;;  %v576_v57 = vmax.f32 %v366_v26, %v471_v45  ;;  %v1520_v61 = vmax.f32 %v1310_v50, %v1415_v44  ;;  %v1207_v1 = vld [vmem:[%s1912_s11 + $0x15c] sm:$0xff]  ;;  %v158_v6 = vld [vmem:[%s1912_s11 + $0x148] sm:$0xff] }
  0x6c   : > { %v1416_v52 = vld [vmem:[%s1912_s11 + $0x155] sm:$0xff]  ;;  %v1311_v59 = vmax.f32 %v1101_v47, %v1206_v51  ;;  %1734 = vst.msk [vmem:[%s1967_s15 + $0x108] sm:$0xff] %vm1700_vm0, %v1628_v49  ;;  %v1417_v2 = vld [vmem:[%s1912_s11 + $0x15d] sm:$0xff]  ;;  %v995_v3 = vmax.f32 %v785_v56, %v890_v38  ;;  %v263_v7 = vld [vmem:[%s1912_s11 + $0x149] sm:$0xff]  ;;  %v577_v48 = vmax.f32 %v367_v62, %v472_v54  ;;  %v1312_v12 = vmax.f32 %v1102_v0, %v1207_v1 }
  0x6d   : > { %v786_v4 = vmax.f32 %v576_v57, %v681_v46  ;;  %v473_v8 = vld [vmem:[%s1912_s11 + $0x14a] sm:$0xff]  ;;  %v1629_v10 = vmax.f32 %v1520_v61, %v680_v34  ;;  %v368_v13 = vmax.f32 %v158_v6, %v263_v7  ;;  %v1103_v18 = vmax.f32 %v994_v55, %v158_v6  ;;  %v474_v28 = vld [vmem:[%s1912_s11 + $0x152] sm:$0xff]  ;;  %v475_v39 = vld [vmem:[%s1912_s11 + $0x15a] sm:$0xff] }
  0x6e   : > { %v1521_v5 = vmax.f32 %v1311_v59, %v1416_v52  ;;  %v1208_v14 = vld [vmem:[%s1912_s11 + $0x164] sm:$0xff]  ;;  %v159_v19 = vld [vmem:[%s1912_s11 + $0x150] sm:$0xff]  ;;  %v787_v21 = vmax.f32 %v577_v48, %v682_v63  ;;  %v1522_v22 = vmax.f32 %v1312_v12, %v1417_v2  ;;  %v160_v33 = vld [vmem:[%s1912_s11 + $0x158] sm:$0xff] }
  0x6f   : > { %v996_v15 = vmax.f32 %v786_v4, %v891_v58  ;;  %v683_v17 = vld [vmem:[%s1912_s11 + $0x166] sm:$0xff]  ;;  %v264_v20 = vld [vmem:[%s1912_s11 + $0x151] sm:$0xff]  ;;  %1735 = vst.msk [vmem:[%s1967_s15 + $0x110] sm:$0xff] %vm1700_vm0, %v1629_v10  ;;  %v578_v23 = vmax.f32 %v368_v13, %v473_v8  ;;  %v1313_v29 = vmax.f32 %v1103_v18, %v1208_v14  ;;  %v1104_v30 = vmax.f32 %v995_v3, %v159_v19  ;;  %v265_v38 = vld [vmem:[%s1912_s11 + $0x159] sm:$0xff] }
  0x70   : > { %v1630_v16 = vmax.f32 %v1521_v5, %v681_v46  ;;  %v893_v24 = vld [vmem:[%s1912_s11 + $0x167] sm:$0xff]  ;;  %v369_v27 = vmax.f32 %v159_v19, %v264_v20  ;;  %v997_v34 = vmax.f32 %v787_v21, %v892_v11  ;;  %v1631_v35 = vmax.f32 %v1522_v22, %v682_v63  ;;  %v894_v41 = vld [vmem:[%s1912_s11 + $0x16f] sm:$0xff]  ;;  %v895_v56 = vld [vmem:[%s1912_s11 + $0x177] sm:$0xff] }
  0x71   : > { %v1418_v25 = vld [vmem:[%s1912_s11 + $0x165] sm:$0xff]  ;;  %v684_v31 = vld [vmem:[%s1912_s11 + $0x16e] sm:$0xff]  ;;  %v788_v36 = vmax.f32 %v578_v23, %v683_v17  ;;  %v370_v43 = vmax.f32 %v160_v33, %v265_v38  ;;  %v685_v44 = vld [vmem:[%s1912_s11 + $0x176] sm:$0xff]  ;;  %v1105_v26 = vmax.f32 %v996_v15, %v160_v33 }
  0x72   : > { %1736 = vst.msk [vmem:[%s1967_s15 + $0x118] sm:$0xff] %vm1700_vm0, %v1630_v16  ;;  %v1209_v32 = vld [vmem:[%s1912_s11 + $0x16c] sm:$0xff]  ;;  %v579_v37 = vmax.f32 %v369_v27, %v474_v28  ;;  %v1523_v40 = vmax.f32 %v1313_v29, %v1418_v25  ;;  %v1210_v45 = vld [vmem:[%s1912_s11 + $0x174] sm:$0xff]  ;;  %v161_v50 = vld [vmem:[%s1912_s11 + $0x160] sm:$0xff] }
  0x73   : > { %v1419_v9 = vld [vmem:[%s1912_s11 + $0x16d] sm:$0xff]  ;;  %v1314_v42 = vmax.f32 %v1104_v30, %v1209_v32  ;;  %1737 = vst.msk [vmem:[%s1967_s15 + $0x120] sm:$0xff] %vm1700_vm0, %v1631_v35  ;;  %v998_v46 = vmax.f32 %v788_v36, %v893_v24  ;;  %v1420_v49 = vld [vmem:[%s1912_s11 + $0x175] sm:$0xff]  ;;  %v266_v51 = vld [vmem:[%s1912_s11 + $0x161] sm:$0xff]  ;;  %v580_v55 = vmax.f32 %v370_v43, %v475_v39  ;;  %v1315_v57 = vmax.f32 %v1105_v26, %v1210_v45 }
  0x74   : > { %v789_v47 = vmax.f32 %v579_v37, %v684_v31  ;;  %v1632_v52 = vmax.f32 %v1523_v40, %v683_v17  ;;  %v476_v58 = vld [vmem:[%s1912_s11 + $0x162] sm:$0xff]  ;;  %v371_v54 = vmax.f32 %v161_v50, %v266_v51  ;;  %v1106_v62 = vmax.f32 %v997_v34, %v161_v50  ;;  %v477_v7 = vld [vmem:[%s1912_s11 + $0x16a] sm:$0xff]  ;;  %v478_v19 = vld [vmem:[%s1912_s11 + $0x172] sm:$0xff] }
  0x75   : > { %v1524_v53 = vmax.f32 %v1314_v42, %v1419_v9  ;;  %v1211_v59 = vld [vmem:[%s1912_s11 + $0x17c] sm:$0xff]  ;;  %v162_v63 = vld [vmem:[%s1912_s11 + $0x168] sm:$0xff]  ;;  %v790_v2 = vmax.f32 %v580_v55, %v685_v44  ;;  %v1525_v3 = vmax.f32 %v1315_v57, %v1420_v49  ;;  %v163_v13 = vld [vmem:[%s1912_s11 + $0x170] sm:$0xff] }
  0x76   : > { %v999_v60 = vmax.f32 %v789_v47, %v894_v41  ;;  %v686_v61 = vld [vmem:[%s1912_s11 + $0x17e] sm:$0xff]  ;;  %v267_v0 = vld [vmem:[%s1912_s11 + $0x169] sm:$0xff]  ;;  %1738 = vst.msk [vmem:[%s1967_s15 + $0x128] sm:$0xff] %vm1700_vm0, %v1632_v52  ;;  %v581_v8 = vmax.f32 %v371_v54, %v476_v58  ;;  %v1316_v10 = vmax.f32 %v1106_v62, %v1211_v59  ;;  %v1107_v11 = vmax.f32 %v998_v46, %v162_v63  ;;  %v268_v18 = vld [vmem:[%s1912_s11 + $0x171] sm:$0xff] }
  0x77   : > { %v1633_v1 = vmax.f32 %v1524_v53, %v684_v31  ;;  %v896_v4 = vld [vmem:[%s1912_s11 + $0x17f] sm:$0xff]  ;;  %v372_v6 = vmax.f32 %v162_v63, %v267_v0  ;;  %v1000_v14 = vmax.f32 %v790_v2, %v895_v56  ;;  %v1634_v15 = vmax.f32 %v1525_v3, %v685_v44  ;;  %v897_v23 = vld [vmem:[%s1912_s11 + $0x187] sm:$0xff]  ;;  %v898_v9 = vld [vmem:[%s1912_s11 + $0x18f] sm:$0xff] }
  0x78   : > { %v1421_v5 = vld [vmem:[%s1912_s11 + $0x17d] sm:$0xff]  ;;  %v687_v48 = vld [vmem:[%s1912_s11 + $0x186] sm:$0xff]  ;;  %v1108_v20 = vmax.f32 %v999_v60, %v163_v13  ;;  %v791_v21 = vmax.f32 %v581_v8, %v686_v61  ;;  %v373_v25 = vmax.f32 %v163_v13, %v268_v18  ;;  %v688_v31 = vld [vmem:[%s1912_s11 + $0x18e] sm:$0xff] }
  0x79   : > { %v1212_v12 = vld [vmem:[%s1912_s11 + $0x184] sm:$0xff]  ;;  %1739 = vst.msk [vmem:[%s1967_s15 + $0x130] sm:$0xff] %vm1700_vm0, %v1633_v1  ;;  %v582_v16 = vmax.f32 %v372_v6, %v477_v7  ;;  %v1526_v22 = vmax.f32 %v1316_v10, %v1421_v5  ;;  %v1213_v27 = vld [vmem:[%s1912_s11 + $0x18c] sm:$0xff]  ;;  %v164_v32 = vld [vmem:[%s1912_s11 + $0x178] sm:$0xff] }
  0x7a   : > { %v1422_v17 = vld [vmem:[%s1912_s11 + $0x185] sm:$0xff]  ;;  %v1317_v24 = vmax.f32 %v1107_v11, %v1212_v12  ;;  %v1423_v28 = vld [vmem:[%s1912_s11 + $0x18d] sm:$0xff]  ;;  %1740 = vst.msk [vmem:[%s1967_s15 + $0x138] sm:$0xff] %vm1700_vm0, %v1634_v15  ;;  %v1318_v30 = vmax.f32 %v1108_v20, %v1213_v27  ;;  %v269_v33 = vld [vmem:[%s1912_s11 + $0x179] sm:$0xff]  ;;  %v1001_v34 = vmax.f32 %v791_v21, %v896_v4  ;;  %v583_v37 = vmax.f32 %v373_v25, %v478_v19 }
  0x7b   : > { %v792_v29 = vmax.f32 %v582_v16, %v687_v48  ;;  %v1635_v35 = vmax.f32 %v1526_v22, %v686_v61  ;;  %v479_v38 = vld [vmem:[%s1912_s11 + $0x17a] sm:$0xff]  ;;  %v374_v42 = vmax.f32 %v164_v32, %v269_v33  ;;  %v1109_v44 = vmax.f32 %v1000_v14, %v164_v32  ;;  %v480_v52 = vld [vmem:[%s1912_s11 + $0x182] sm:$0xff]  ;;  %v481_v2 = vld [vmem:[%s1912_s11 + $0x18a] sm:$0xff] }
  0x7c   : > { %v1527_v36 = vmax.f32 %v1317_v24, %v1422_v17  ;;  %v1214_v39 = vld [vmem:[%s1912_s11 + $0x194] sm:$0xff]  ;;  %v1528_v41 = vmax.f32 %v1318_v30, %v1423_v28  ;;  %v165_v26 = vld [vmem:[%s1912_s11 + $0x180] sm:$0xff]  ;;  %v793_v47 = vmax.f32 %v583_v37, %v688_v31  ;;  %v166_v54 = vld [vmem:[%s1912_s11 + $0x188] sm:$0xff] }
  0x7d   : > { %v1002_v40 = vmax.f32 %v792_v29, %v897_v23  ;;  %v689_v43 = vld [vmem:[%s1912_s11 + $0x196] sm:$0xff]  ;;  %v270_v45 = vld [vmem:[%s1912_s11 + $0x181] sm:$0xff]  ;;  %1741 = vst.msk [vmem:[%s1967_s15 + $0x140] sm:$0xff] %vm1700_vm0, %v1635_v35  ;;  %v1110_v55 = vmax.f32 %v1001_v34, %v165_v26  ;;  %v584_v57 = vmax.f32 %v374_v42, %v479_v38  ;;  %v1319_v58 = vmax.f32 %v1109_v44, %v1214_v39  ;;  %v271_v1 = vld [vmem:[%s1912_s11 + $0x189] sm:$0xff] }
  0x7e   : > { %v1636_v46 = vmax.f32 %v1527_v36, %v687_v48  ;;  %v899_v49 = vld [vmem:[%s1912_s11 + $0x197] sm:$0xff]  ;;  %v375_v51 = vmax.f32 %v165_v26, %v270_v45  ;;  %v1637_v56 = vmax.f32 %v1528_v41, %v688_v31  ;;  %v1003_v61 = vmax.f32 %v793_v47, %v898_v9  ;;  %v900_v63 = vld [vmem:[%s1912_s11 + $0x19f] sm:$0xff]  ;;  %v901_v19 = vld [vmem:[%s1912_s11 + $0x1a7] sm:$0xff] }
  0x7f   : > { %v1424_v50 = vld [vmem:[%s1912_s11 + $0x195] sm:$0xff]  ;;  %v690_v53 = vld [vmem:[%s1912_s11 + $0x19e] sm:$0xff]  ;;  %v1111_v3 = vmax.f32 %v1002_v40, %v166_v54  ;;  %v794_v4 = vmax.f32 %v584_v57, %v689_v43  ;;  %v376_v6 = vmax.f32 %v166_v54, %v271_v1  ;;  %v691_v7 = vld [vmem:[%s1912_s11 + $0x1a6] sm:$0xff] }
  0x80   : > { %v1215_v59 = vld [vmem:[%s1912_s11 + $0x19c] sm:$0xff]  ;;  %1742 = vst.msk [vmem:[%s1967_s15 + $0x148] sm:$0xff] %vm1700_vm0, %v1636_v46  ;;  %v585_v62 = vmax.f32 %v375_v51, %v480_v52  ;;  %v1529_v5 = vmax.f32 %v1319_v58, %v1424_v50  ;;  %v1216_v8 = vld [vmem:[%s1912_s11 + $0x1a4] sm:$0xff]  ;;  %v167_v13 = vld [vmem:[%s1912_s11 + $0x190] sm:$0xff] }
  0x81   : > { %v1425_v60 = vld [vmem:[%s1912_s11 + $0x19d] sm:$0xff]  ;;  %v1320_v0 = vmax.f32 %v1110_v55, %v1215_v59  ;;  %1743 = vst.msk [vmem:[%s1967_s15 + $0x150] sm:$0xff] %vm1700_vm0, %v1637_v56  ;;  %v1426_v10 = vld [vmem:[%s1912_s11 + $0x1a5] sm:$0xff]  ;;  %v1321_v12 = vmax.f32 %v1111_v3, %v1216_v8  ;;  %v272_v14 = vld [vmem:[%s1912_s11 + $0x191] sm:$0xff]  ;;  %v1004_v16 = vmax.f32 %v794_v4, %v899_v49  ;;  %v586_v18 = vmax.f32 %v376_v6, %v481_v2 }
  0x82   : > { %v795_v48 = vmax.f32 %v585_v62, %v690_v53  ;;  %v482_v15 = vld [vmem:[%s1912_s11 + $0x192] sm:$0xff]  ;;  %v1638_v17 = vmax.f32 %v1529_v5, %v689_v43  ;;  %v377_v20 = vmax.f32 %v167_v13, %v272_v14  ;;  %v1112_v28 = vmax.f32 %v1003_v61, %v167_v13  ;;  %v483_v35 = vld [vmem:[%s1912_s11 + $0x19a] sm:$0xff]  ;;  %v484_v47 = vld [vmem:[%s1912_s11 + $0x1a2] sm:$0xff] }
  0x83   : > { %v1530_v11 = vmax.f32 %v1320_v0, %v1425_v60  ;;  %v692_v21 = vld [vmem:[%s1912_s11 + $0x1ae] sm:$0xff]  ;;  %v1531_v25 = vmax.f32 %v1321_v12, %v1426_v10  ;;  %v168_v29 = vld [vmem:[%s1912_s11 + $0x198] sm:$0xff]  ;;  %v796_v30 = vmax.f32 %v586_v18, %v691_v7  ;;  %v169_v41 = vld [vmem:[%s1912_s11 + $0x1a0] sm:$0xff] }
  0x84   : > { %v1217_v22 = vld [vmem:[%s1912_s11 + $0x1ac] sm:$0xff]  ;;  %v1005_v23 = vmax.f32 %v795_v48, %v900_v63  ;;  %v273_v31 = vld [vmem:[%s1912_s11 + $0x199] sm:$0xff]  ;;  %1744 = vst.msk [vmem:[%s1967_s15 + $0x158] sm:$0xff] %vm1700_vm0, %v1638_v17  ;;  %v587_v32 = vmax.f32 %v377_v20, %v482_v15  ;;  %v1113_v37 = vmax.f32 %v1004_v16, %v168_v29  ;;  %v274_v46 = vld [vmem:[%s1912_s11 + $0x1a1] sm:$0xff] }
  0x85   : > { %v1639_v24 = vmax.f32 %v1530_v11, %v690_v53  ;;  %v902_v27 = vld [vmem:[%s1912_s11 + $0x1af] sm:$0xff]  ;;  %v378_v34 = vmax.f32 %v168_v29, %v273_v31  ;;  %v1640_v9 = vmax.f32 %v1531_v25, %v691_v7  ;;  %v1322_v38 = vmax.f32 %v1112_v28, %v1217_v22  ;;  %v903_v26 = vld [vmem:[%s1912_s11 + $0x1b7] sm:$0xff]  ;;  %v904_v63 = vld [vmem:[%s1912_s11 + $0x1bf] sm:$0xff] }
  0x86   : > { %v1427_v33 = vld [vmem:[%s1912_s11 + $0x1ad] sm:$0xff]  ;;  %v693_v36 = vld [vmem:[%s1912_s11 + $0x1b6] sm:$0xff]  ;;  %v1006_v42 = vmax.f32 %v796_v30, %v901_v19  ;;  %v797_v43 = vmax.f32 %v587_v32, %v692_v21  ;;  %v379_v50 = vmax.f32 %v169_v41, %v274_v46  ;;  %v694_v51 = vld [vmem:[%s1912_s11 + $0x1be] sm:$0xff]  ;;  %v1114_v52 = vmax.f32 %v1005_v23, %v169_v41 }
  0x87   : > { %1745 = vst.msk [vmem:[%s1967_s15 + $0x160] sm:$0xff] %vm1700_vm0, %v1639_v24  ;;  %v1218_v39 = vld [vmem:[%s1912_s11 + $0x1b4] sm:$0xff]  ;;  %v588_v44 = vmax.f32 %v378_v34, %v483_v35  ;;  %v1532_v49 = vmax.f32 %v1322_v38, %v1427_v33  ;;  %v1219_v53 = vld [vmem:[%s1912_s11 + $0x1bc] sm:$0xff]  ;;  %v170_v59 = vld [vmem:[%s1912_s11 + $0x1a8] sm:$0xff] }
  0x88   : > { %v1428_v40 = vld [vmem:[%s1912_s11 + $0x1b5] sm:$0xff]  ;;  %v1323_v45 = vmax.f32 %v1113_v37, %v1218_v39  ;;  %1746 = vst.msk [vmem:[%s1967_s15 + $0x168] sm:$0xff] %vm1700_vm0, %v1640_v9  ;;  %v1429_v55 = vld [vmem:[%s1912_s11 + $0x1bd] sm:$0xff]  ;;  %v1007_v56 = vmax.f32 %v797_v43, %v902_v27  ;;  %v275_v60 = vld [vmem:[%s1912_s11 + $0x1a9] sm:$0xff]  ;;  %v589_v62 = vmax.f32 %v379_v50, %v484_v47  ;;  %v1324_v0 = vmax.f32 %v1114_v52, %v1219_v53 }
  0x89   : > { %v798_v57 = vmax.f32 %v588_v44, %v693_v36  ;;  %v485_v54 = vld [vmem:[%s1912_s11 + $0x1aa] sm:$0xff]  ;;  %v1641_v61 = vmax.f32 %v1532_v49, %v692_v21  ;;  %v380_v1 = vmax.f32 %v170_v59, %v275_v60  ;;  %v1115_v6 = vmax.f32 %v1006_v42, %v170_v59  ;;  %v486_v15 = vld [vmem:[%s1912_s11 + $0x1b2] sm:$0xff]  ;;  %v487_v28 = vld [vmem:[%s1912_s11 + $0x1ba] sm:$0xff] }
  0x8a   : > { %v1533_v58 = vmax.f32 %v1323_v45, %v1428_v40  ;;  %v1220_v2 = vld [vmem:[%s1912_s11 + $0x1c4] sm:$0xff]  ;;  %v171_v7 = vld [vmem:[%s1912_s11 + $0x1b0] sm:$0xff]  ;;  %v799_v10 = vmax.f32 %v589_v62, %v694_v51  ;;  %v1534_v48 = vmax.f32 %v1324_v0, %v1429_v55  ;;  %v172_v20 = vld [vmem:[%s1912_s11 + $0x1b8] sm:$0xff] }
  0x8b   : > { %v1008_v3 = vmax.f32 %v798_v57, %v903_v26  ;;  %v695_v5 = vld [vmem:[%s1912_s11 + $0x1c6] sm:$0xff]  ;;  %v276_v8 = vld [vmem:[%s1912_s11 + $0x1b1] sm:$0xff]  ;;  %1747 = vst.msk [vmem:[%s1967_s15 + $0x170] sm:$0xff] %vm1700_vm0, %v1641_v61  ;;  %v590_v11 = vmax.f32 %v380_v1, %v485_v54  ;;  %v1325_v16 = vmax.f32 %v1115_v6, %v1220_v2  ;;  %v1116_v18 = vmax.f32 %v1007_v56, %v171_v7  ;;  %v277_v27 = vld [vmem:[%s1912_s11 + $0x1b9] sm:$0xff] }
  0x8c   : > { %v1642_v4 = vmax.f32 %v1533_v58, %v693_v36  ;;  %v905_v12 = vld [vmem:[%s1912_s11 + $0x1c7] sm:$0xff]  ;;  %v381_v14 = vmax.f32 %v171_v7, %v276_v8  ;;  %v1009_v21 = vmax.f32 %v799_v10, %v904_v63  ;;  %v1643_v22 = vmax.f32 %v1534_v48, %v694_v51  ;;  %v906_v31 = vld [vmem:[%s1912_s11 + $0x1cf] sm:$0xff]  ;;  %v907_v43 = vld [vmem:[%s1912_s11 + $0x1d7] sm:$0xff] }
  0x8d   : > { %v1430_v13 = vld [vmem:[%s1912_s11 + $0x1c5] sm:$0xff]  ;;  %v696_v17 = vld [vmem:[%s1912_s11 + $0x1ce] sm:$0xff]  ;;  %v800_v23 = vmax.f32 %v590_v11, %v695_v5  ;;  %v382_v32 = vmax.f32 %v172_v20, %v277_v27  ;;  %v697_v33 = vld [vmem:[%s1912_s11 + $0x1d6] sm:$0xff]  ;;  %v1117_v34 = vmax.f32 %v1008_v3, %v172_v20 }
  0x8e   : > { %1748 = vst.msk [vmem:[%s1967_s15 + $0x178] sm:$0xff] %vm1700_vm0, %v1642_v4  ;;  %v1221_v19 = vld [vmem:[%s1912_s11 + $0x1cc] sm:$0xff]  ;;  %v591_v24 = vmax.f32 %v381_v14, %v486_v15  ;;  %v1535_v29 = vmax.f32 %v1325_v16, %v1430_v13  ;;  %v1222_v35 = vld [vmem:[%s1912_s11 + $0x1d4] sm:$0xff]  ;;  %v173_v38 = vld [vmem:[%s1912_s11 + $0x1c0] sm:$0xff] }
  0x8f   : > { %v1431_v25 = vld [vmem:[%s1912_s11 + $0x1cd] sm:$0xff]  ;;  %v1326_v30 = vmax.f32 %v1116_v18, %v1221_v19  ;;  %1749 = vst.msk [vmem:[%s1967_s15 + $0x180] sm:$0xff] %vm1700_vm0, %v1643_v22  ;;  %v1010_v36 = vmax.f32 %v800_v23, %v905_v12  ;;  %v1432_v9 = vld [vmem:[%s1912_s11 + $0x1d5] sm:$0xff]  ;;  %v278_v39 = vld [vmem:[%s1912_s11 + $0x1c1] sm:$0xff]  ;;  %v592_v42 = vmax.f32 %v382_v32, %v487_v28  ;;  %v1327_v44 = vmax.f32 %v1117_v34, %v1222_v35 }
  0x90   : > { %v801_v37 = vmax.f32 %v591_v24, %v696_v17  ;;  %v1644_v40 = vmax.f32 %v1535_v29, %v695_v5  ;;  %v488_v26 = vld [vmem:[%s1912_s11 + $0x1c2] sm:$0xff]  ;;  %v383_v47 = vmax.f32 %v173_v38, %v278_v39  ;;  %v1118_v50 = vmax.f32 %v1009_v21, %v173_v38  ;;  %v489_v60 = vld [vmem:[%s1912_s11 + $0x1ca] sm:$0xff]  ;;  %v490_v7 = vld [vmem:[%s1912_s11 + $0x1d2] sm:$0xff] }
  0x91   : > { %v1536_v41 = vmax.f32 %v1326_v30, %v1431_v25  ;;  %v1223_v45 = vld [vmem:[%s1912_s11 + $0x1dc] sm:$0xff]  ;;  %v174_v51 = vld [vmem:[%s1912_s11 + $0x1c8] sm:$0xff]  ;;  %v802_v55 = vmax.f32 %v592_v42, %v697_v33  ;;  %v1537_v56 = vmax.f32 %v1327_v44, %v1432_v9  ;;  %v175_v1 = vld [vmem:[%s1912_s11 + $0x1d0] sm:$0xff] }
  0x92   : > { %v1011_v46 = vmax.f32 %v801_v37, %v906_v31  ;;  %v698_v49 = vld [vmem:[%s1912_s11 + $0x1de] sm:$0xff]  ;;  %v279_v52 = vld [vmem:[%s1912_s11 + $0x1c9] sm:$0xff]  ;;  %1750 = vst.msk [vmem:[%s1967_s15 + $0x188] sm:$0xff] %vm1700_vm0, %v1644_v40  ;;  %v593_v54 = vmax.f32 %v383_v47, %v488_v26  ;;  %v1328_v61 = vmax.f32 %v1118_v50, %v1223_v45  ;;  %v1119_v63 = vmax.f32 %v1010_v36, %v174_v51  ;;  %v280_v6 = vld [vmem:[%s1912_s11 + $0x1d1] sm:$0xff] }
  0x93   : > { %v1645_v53 = vmax.f32 %v1536_v41, %v696_v17  ;;  %v908_v57 = vld [vmem:[%s1912_s11 + $0x1df] sm:$0xff]  ;;  %v384_v59 = vmax.f32 %v174_v51, %v279_v52  ;;  %v1012_v2 = vmax.f32 %v802_v55, %v907_v43  ;;  %v1646_v3 = vmax.f32 %v1537_v56, %v697_v33  ;;  %v909_v11 = vld [vmem:[%s1912_s11 + $0x1e7] sm:$0xff]  ;;  %v910_v25 = vld [vmem:[%s1912_s11 + $0x1ef] sm:$0xff] }
  0x94   : > { %v1433_v58 = vld [vmem:[%s1912_s11 + $0x1dd] sm:$0xff]  ;;  %v699_v62 = vld [vmem:[%s1912_s11 + $0x1e6] sm:$0xff]  ;;  %v1120_v8 = vmax.f32 %v1011_v46, %v175_v1  ;;  %v803_v10 = vmax.f32 %v593_v54, %v698_v49  ;;  %v385_v13 = vmax.f32 %v175_v1, %v280_v6  ;;  %v700_v17 = vld [vmem:[%s1912_s11 + $0x1ee] sm:$0xff] }
  0x95   : > { %v1224_v0 = vld [vmem:[%s1912_s11 + $0x1e4] sm:$0xff]  ;;  %1751 = vst.msk [vmem:[%s1967_s15 + $0x190] sm:$0xff] %vm1700_vm0, %v1645_v53  ;;  %v594_v4 = vmax.f32 %v384_v59, %v489_v60  ;;  %v1538_v48 = vmax.f32 %v1328_v61, %v1433_v58  ;;  %v1225_v14 = vld [vmem:[%s1912_s11 + $0x1ec] sm:$0xff]  ;;  %v176_v19 = vld [vmem:[%s1912_s11 + $0x1d8] sm:$0xff] }
  0x96   : > { %v1434_v5 = vld [vmem:[%s1912_s11 + $0x1e5] sm:$0xff]  ;;  %v1329_v12 = vmax.f32 %v1119_v63, %v1224_v0  ;;  %v1435_v15 = vld [vmem:[%s1912_s11 + $0x1ed] sm:$0xff]  ;;  %1752 = vst.msk [vmem:[%s1967_s15 + $0x198] sm:$0xff] %vm1700_vm0, %v1646_v3  ;;  %v1330_v18 = vmax.f32 %v1120_v8, %v1225_v14  ;;  %v281_v20 = vld [vmem:[%s1912_s11 + $0x1d9] sm:$0xff]  ;;  %v1013_v21 = vmax.f32 %v803_v10, %v908_v57  ;;  %v595_v24 = vmax.f32 %v385_v13, %v490_v7 }
  0x97   : > { %v804_v16 = vmax.f32 %v594_v4, %v699_v62  ;;  %v1647_v22 = vmax.f32 %v1538_v48, %v698_v49  ;;  %v491_v27 = vld [vmem:[%s1912_s11 + $0x1da] sm:$0xff]  ;;  %v386_v30 = vmax.f32 %v176_v19, %v281_v20  ;;  %v1121_v33 = vmax.f32 %v1012_v2, %v176_v19  ;;  %v492_v40 = vld [vmem:[%s1912_s11 + $0x1e2] sm:$0xff]  ;;  %v493_v55 = vld [vmem:[%s1912_s11 + $0x1ea] sm:$0xff] }
  0x98   : > { %v1539_v23 = vmax.f32 %v1329_v12, %v1434_v5  ;;  %v1226_v28 = vld [vmem:[%s1912_s11 + $0x1f4] sm:$0xff]  ;;  %v1540_v31 = vmax.f32 %v1330_v18, %v1435_v15  ;;  %v177_v34 = vld [vmem:[%s1912_s11 + $0x1e0] sm:$0xff]  ;;  %v805_v37 = vmax.f32 %v595_v24, %v700_v17  ;;  %v178_v47 = vld [vmem:[%s1912_s11 + $0x1e8] sm:$0xff] }
  0x99   : > { %v1014_v29 = vmax.f32 %v804_v16, %v909_v11  ;;  %v701_v32 = vld [vmem:[%s1912_s11 + $0x1f6] sm:$0xff]  ;;  %v282_v35 = vld [vmem:[%s1912_s11 + $0x1e1] sm:$0xff]  ;;  %1753 = vst.msk [vmem:[%s1967_s15 + $0x1a0] sm:$0xff] %vm1700_vm0, %v1647_v22  ;;  %v1122_v42 = vmax.f32 %v1013_v21, %v177_v34  ;;  %v596_v44 = vmax.f32 %v386_v30, %v491_v27  ;;  %v1331_v26 = vmax.f32 %v1121_v33, %v1226_v28  ;;  %v283_v53 = vld [vmem:[%s1912_s11 + $0x1e9] sm:$0xff] }
  0x9a   : > { %v1648_v36 = vmax.f32 %v1539_v23, %v699_v62  ;;  %v911_v9 = vld [vmem:[%s1912_s11 + $0x1f7] sm:$0xff]  ;;  %v387_v39 = vmax.f32 %v177_v34, %v282_v35  ;;  %v1649_v43 = vmax.f32 %v1540_v31, %v700_v17  ;;  %v1015_v49 = vmax.f32 %v805_v37, %v910_v25  ;;  %v912_v51 = vld [vmem:[%s1912_s11 + $0x1ff] sm:$0xff]  ;;  %v913_v7 = vld [vmem:[%s1912_s11 + $0x207] sm:$0xff] }
  0x9b   : > { %v1436_v38 = vld [vmem:[%s1912_s11 + $0x1f5] sm:$0xff]  ;;  %v702_v41 = vld [vmem:[%s1912_s11 + $0x1fe] sm:$0xff]  ;;  %v1123_v56 = vmax.f32 %v1014_v29, %v178_v47  ;;  %v806_v57 = vmax.f32 %v596_v44, %v701_v32  ;;  %v388_v59 = vmax.f32 %v178_v47, %v283_v53  ;;  %v703_v60 = vld [vmem:[%s1912_s11 + $0x206] sm:$0xff] }
  0x9c   : > { %v1227_v45 = vld [vmem:[%s1912_s11 + $0x1fc] sm:$0xff]  ;;  %1754 = vst.msk [vmem:[%s1967_s15 + $0x1a8] sm:$0xff] %vm1700_vm0, %v1648_v36  ;;  %v597_v50 = vmax.f32 %v387_v39, %v492_v40  ;;  %v1541_v58 = vmax.f32 %v1331_v26, %v1436_v38  ;;  %v1228_v54 = vld [vmem:[%s1912_s11 + $0x204] sm:$0xff]  ;;  %v179_v1 = vld [vmem:[%s1912_s11 + $0x1f0] sm:$0xff] }
  0x9d   : > { %v1437_v46 = vld [vmem:[%s1912_s11 + $0x1fd] sm:$0xff]  ;;  %v1332_v52 = vmax.f32 %v1122_v42, %v1227_v45  ;;  %1755 = vst.msk [vmem:[%s1967_s15 + $0x1b0] sm:$0xff] %vm1700_vm0, %v1649_v43  ;;  %v1438_v61 = vld [vmem:[%s1912_s11 + $0x205] sm:$0xff]  ;;  %v1333_v0 = vmax.f32 %v1123_v56, %v1228_v54  ;;  %v284_v2 = vld [vmem:[%s1912_s11 + $0x1f1] sm:$0xff]  ;;  %v1016_v4 = vmax.f32 %v806_v57, %v911_v9  ;;  %v598_v6 = vmax.f32 %v388_v59, %v493_v55 }
  0x9e   : > { %v807_v62 = vmax.f32 %v597_v50, %v702_v41  ;;  %v494_v3 = vld [vmem:[%s1912_s11 + $0x1f2] sm:$0xff]  ;;  %v1650_v5 = vmax.f32 %v1541_v58, %v701_v32  ;;  %v389_v8 = vmax.f32 %v179_v1, %v284_v2  ;;  %v1124_v15 = vmax.f32 %v1015_v49, %v179_v1  ;;  %v495_v22 = vld [vmem:[%s1912_s11 + $0x1fa] sm:$0xff]  ;;  %v496_v37 = vld [vmem:[%s1912_s11 + $0x202] sm:$0xff] }
  0x9f   : > { %v1542_v63 = vmax.f32 %v1332_v52, %v1437_v46  ;;  %v704_v10 = vld [vmem:[%s1912_s11 + $0x20e] sm:$0xff]  ;;  %v1543_v13 = vmax.f32 %v1333_v0, %v1438_v61  ;;  %v180_v16 = vld [vmem:[%s1912_s11 + $0x1f8] sm:$0xff]  ;;  %v808_v18 = vmax.f32 %v598_v6, %v703_v60  ;;  %v181_v31 = vld [vmem:[%s1912_s11 + $0x200] sm:$0xff] }
  0xa0   : > { %v1229_v48 = vld [vmem:[%s1912_s11 + $0x20c] sm:$0xff]  ;;  %v1017_v11 = vmax.f32 %v807_v62, %v912_v51  ;;  %v285_v17 = vld [vmem:[%s1912_s11 + $0x1f9] sm:$0xff]  ;;  %1756 = vst.msk [vmem:[%s1967_s15 + $0x1b8] sm:$0xff] %vm1700_vm0, %v1650_v5  ;;  %v599_v19 = vmax.f32 %v389_v8, %v494_v3  ;;  %v1125_v24 = vmax.f32 %v1016_v4, %v180_v16  ;;  %v286_v36 = vld [vmem:[%s1912_s11 + $0x201] sm:$0xff] }
  0xa1   : > { %v1651_v12 = vmax.f32 %v1542_v63, %v702_v41  ;;  %v914_v14 = vld [vmem:[%s1912_s11 + $0x20f] sm:$0xff]  ;;  %v390_v21 = vmax.f32 %v180_v16, %v285_v17  ;;  %v1652_v25 = vmax.f32 %v1543_v13, %v703_v60  ;;  %v1334_v27 = vmax.f32 %v1124_v15, %v1229_v48  ;;  %v915_v34 = vld [vmem:[%s1912_s11 + $0x217] sm:$0xff]  ;;  %v916_v51 = vld [vmem:[%s1912_s11 + $0x21f] sm:$0xff] }
  0xa2   : > { %v1439_v20 = vld [vmem:[%s1912_s11 + $0x20d] sm:$0xff]  ;;  %v705_v23 = vld [vmem:[%s1912_s11 + $0x216] sm:$0xff]  ;;  %v1018_v30 = vmax.f32 %v808_v18, %v913_v7  ;;  %v809_v32 = vmax.f32 %v599_v19, %v704_v10  ;;  %v391_v38 = vmax.f32 %v181_v31, %v286_v36  ;;  %v706_v39 = vld [vmem:[%s1912_s11 + $0x21e] sm:$0xff]  ;;  %v1126_v40 = vmax.f32 %v1017_v11, %v181_v31 }
  0xa3   : > { %1757 = vst.msk [vmem:[%s1967_s15 + $0x1c0] sm:$0xff] %vm1700_vm0, %v1651_v12  ;;  %v1230_v28 = vld [vmem:[%s1912_s11 + $0x214] sm:$0xff]  ;;  %v600_v33 = vmax.f32 %v390_v21, %v495_v22  ;;  %v1544_v9 = vmax.f32 %v1334_v27, %v1439_v20  ;;  %v1231_v41 = vld [vmem:[%s1912_s11 + $0x21c] sm:$0xff]  ;;  %v182_v45 = vld [vmem:[%s1912_s11 + $0x208] sm:$0xff] }
  0xa4   : > { %v1440_v29 = vld [vmem:[%s1912_s11 + $0x215] sm:$0xff]  ;;  %v1335_v35 = vmax.f32 %v1125_v24, %v1230_v28  ;;  %1758 = vst.msk [vmem:[%s1967_s15 + $0x1c8] sm:$0xff] %vm1700_vm0, %v1652_v25  ;;  %v1441_v42 = vld [vmem:[%s1912_s11 + $0x21d] sm:$0xff]  ;;  %v1019_v43 = vmax.f32 %v809_v32, %v914_v14  ;;  %v287_v46 = vld [vmem:[%s1912_s11 + $0x209] sm:$0xff]  ;;  %v601_v50 = vmax.f32 %v391_v38, %v496_v37  ;;  %v1336_v52 = vmax.f32 %v1126_v40, %v1231_v41 }
  0xa5   : > { %v810_v44 = vmax.f32 %v600_v33, %v705_v23  ;;  %v497_v47 = vld [vmem:[%s1912_s11 + $0x20a] sm:$0xff]  ;;  %v1653_v49 = vmax.f32 %v1544_v9, %v704_v10  ;;  %v392_v53 = vmax.f32 %v182_v45, %v287_v46  ;;  %v1127_v59 = vmax.f32 %v1018_v30, %v182_v45  ;;  %v498_v3 = vld [vmem:[%s1912_s11 + $0x212] sm:$0xff]  ;;  %v499_v15 = vld [vmem:[%s1912_s11 + $0x21a] sm:$0xff] }
  0xa6   : > { %v1545_v26 = vmax.f32 %v1335_v35, %v1440_v29  ;;  %v1232_v55 = vld [vmem:[%s1912_s11 + $0x224] sm:$0xff]  ;;  %v183_v60 = vld [vmem:[%s1912_s11 + $0x210] sm:$0xff]  ;;  %v811_v61 = vmax.f32 %v601_v50, %v706_v39  ;;  %v1546_v62 = vmax.f32 %v1336_v52, %v1441_v42  ;;  %v184_v8 = vld [vmem:[%s1912_s11 + $0x218] sm:$0xff] }
  0xa7   : > { %v1020_v56 = vmax.f32 %v810_v44, %v915_v34  ;;  %v707_v58 = vld [vmem:[%s1912_s11 + $0x226] sm:$0xff]  ;;  %v288_v54 = vld [vmem:[%s1912_s11 + $0x211] sm:$0xff]  ;;  %1759 = vst.msk [vmem:[%s1967_s15 + $0x1d0] sm:$0xff] %vm1700_vm0, %v1653_v49  ;;  %v602_v63 = vmax.f32 %v392_v53, %v497_v47  ;;  %v1337_v4 = vmax.f32 %v1127_v59, %v1232_v55  ;;  %v1128_v6 = vmax.f32 %v1019_v43, %v183_v60  ;;  %v289_v14 = vld [vmem:[%s1912_s11 + $0x219] sm:$0xff] }
  0xa8   : > { %v1654_v57 = vmax.f32 %v1545_v26, %v705_v23  ;;  %v917_v0 = vld [vmem:[%s1912_s11 + $0x227] sm:$0xff]  ;;  %v393_v2 = vmax.f32 %v183_v60, %v288_v54  ;;  %v1021_v10 = vmax.f32 %v811_v61, %v916_v51  ;;  %v1655_v48 = vmax.f32 %v1546_v62, %v706_v39  ;;  %v918_v17 = vld [vmem:[%s1912_s11 + $0x22f] sm:$0xff]  ;;  %v919_v32 = vld [vmem:[%s1912_s11 + $0x237] sm:$0xff] }
  0xa9   : > { %v1442_v1 = vld [vmem:[%s1912_s11 + $0x225] sm:$0xff]  ;;  %v708_v5 = vld [vmem:[%s1912_s11 + $0x22e] sm:$0xff]  ;;  %v812_v11 = vmax.f32 %v602_v63, %v707_v58  ;;  %v394_v19 = vmax.f32 %v184_v8, %v289_v14  ;;  %v709_v20 = vld [vmem:[%s1912_s11 + $0x236] sm:$0xff]  ;;  %v1129_v21 = vmax.f32 %v1020_v56, %v184_v8 }
  0xaa   : > { %1760 = vst.msk [vmem:[%s1967_s15 + $0x1d8] sm:$0xff] %vm1700_vm0, %v1654_v57  ;;  %v1233_v7 = vld [vmem:[%s1912_s11 + $0x22c] sm:$0xff]  ;;  %v603_v12 = vmax.f32 %v393_v2, %v498_v3  ;;  %v1547_v16 = vmax.f32 %v1337_v4, %v1442_v1  ;;  %v1234_v22 = vld [vmem:[%s1912_s11 + $0x234] sm:$0xff]  ;;  %v185_v27 = vld [vmem:[%s1912_s11 + $0x220] sm:$0xff] }
  0xab   : > { %v1443_v13 = vld [vmem:[%s1912_s11 + $0x22d] sm:$0xff]  ;;  %v1338_v18 = vmax.f32 %v1128_v6, %v1233_v7  ;;  %1761 = vst.msk [vmem:[%s1967_s15 + $0x1e0] sm:$0xff] %vm1700_vm0, %v1655_v48  ;;  %v1022_v23 = vmax.f32 %v812_v11, %v917_v0  ;;  %v1444_v25 = vld [vmem:[%s1912_s11 + $0x235] sm:$0xff]  ;;  %v290_v28 = vld [vmem:[%s1912_s11 + $0x221] sm:$0xff]  ;;  %v604_v30 = vmax.f32 %v394_v19, %v499_v15  ;;  %v1339_v33 = vmax.f32 %v1129_v21, %v1234_v22 }
  0xac   : > { %v813_v24 = vmax.f32 %v603_v12, %v708_v5  ;;  %v1656_v29 = vmax.f32 %v1547_v16, %v707_v58  ;;  %v500_v34 = vld [vmem:[%s1912_s11 + $0x222] sm:$0xff]  ;;  %v395_v37 = vmax.f32 %v185_v27, %v290_v28  ;;  %v1130_v38 = vmax.f32 %v1021_v10, %v185_v27  ;;  %v501_v46 = vld [vmem:[%s1912_s11 + $0x22a] sm:$0xff]  ;;  %v502_v60 = vld [vmem:[%s1912_s11 + $0x232] sm:$0xff] }
  0xad   : > { %v1548_v31 = vmax.f32 %v1338_v18, %v1443_v13  ;;  %v1235_v35 = vld [vmem:[%s1912_s11 + $0x23c] sm:$0xff]  ;;  %v186_v39 = vld [vmem:[%s1912_s11 + $0x228] sm:$0xff]  ;;  %v814_v42 = vmax.f32 %v604_v30, %v709_v20  ;;  %v1549_v43 = vmax.f32 %v1339_v33, %v1444_v25  ;;  %v187_v53 = vld [vmem:[%s1912_s11 + $0x230] sm:$0xff] }
  0xae   : > { %v1023_v36 = vmax.f32 %v813_v24, %v918_v17  ;;  %v710_v9 = vld [vmem:[%s1912_s11 + $0x23e] sm:$0xff]  ;;  %v291_v40 = vld [vmem:[%s1912_s11 + $0x229] sm:$0xff]  ;;  %1762 = vst.msk [vmem:[%s1967_s15 + $0x1e8] sm:$0xff] %vm1700_vm0, %v1656_v29  ;;  %v605_v47 = vmax.f32 %v395_v37, %v500_v34  ;;  %v1340_v49 = vmax.f32 %v1130_v38, %v1235_v35  ;;  %v1131_v51 = vmax.f32 %v1022_v23, %v186_v39  ;;  %v292_v59 = vld [vmem:[%s1912_s11 + $0x231] sm:$0xff] }
  0xaf   : > { %v1657_v41 = vmax.f32 %v1548_v31, %v708_v5  ;;  %v920_v44 = vld [vmem:[%s1912_s11 + $0x23f] sm:$0xff]  ;;  %v396_v45 = vmax.f32 %v186_v39, %v291_v40  ;;  %v1024_v55 = vmax.f32 %v814_v42, %v919_v32  ;;  %v1658_v56 = vmax.f32 %v1549_v43, %v709_v20  ;;  %v921_v63 = vld [vmem:[%s1912_s11 + $0x247] sm:$0xff]  ;;  %v922_v13 = vld [vmem:[%s1912_s11 + $0x24f] sm:$0xff] }
  0xb0   : > { %v1445_v26 = vld [vmem:[%s1912_s11 + $0x23d] sm:$0xff]  ;;  %v711_v50 = vld [vmem:[%s1912_s11 + $0x246] sm:$0xff]  ;;  %v1132_v54 = vmax.f32 %v1023_v36, %v187_v53  ;;  %v815_v61 = vmax.f32 %v605_v47, %v710_v9  ;;  %v397_v1 = vmax.f32 %v187_v53, %v292_v59  ;;  %v712_v5 = vld [vmem:[%s1912_s11 + $0x24e] sm:$0xff] }
  0xb1   : > { %v1236_v52 = vld [vmem:[%s1912_s11 + $0x244] sm:$0xff]  ;;  %1763 = vst.msk [vmem:[%s1967_s15 + $0x1f0] sm:$0xff] %vm1700_vm0, %v1657_v41  ;;  %v606_v57 = vmax.f32 %v396_v45, %v501_v46  ;;  %v1550_v62 = vmax.f32 %v1340_v49, %v1445_v26  ;;  %v1237_v2 = vld [vmem:[%s1912_s11 + $0x24c] sm:$0xff]  ;;  %v188_v7 = vld [vmem:[%s1912_s11 + $0x238] sm:$0xff] }
  0xb2   : > { %v1446_v58 = vld [vmem:[%s1912_s11 + $0x245] sm:$0xff]  ;;  %v1341_v0 = vmax.f32 %v1131_v51, %v1236_v52  ;;  %v1447_v3 = vld [vmem:[%s1912_s11 + $0x24d] sm:$0xff]  ;;  %1764 = vst.msk [vmem:[%s1967_s15 + $0x1f8] sm:$0xff] %vm1700_vm0, %v1658_v56  ;;  %v1342_v6 = vmax.f32 %v1132_v54, %v1237_v2  ;;  %v293_v8 = vld [vmem:[%s1912_s11 + $0x239] sm:$0xff]  ;;  %v1025_v10 = vmax.f32 %v815_v61, %v920_v44  ;;  %v607_v12 = vmax.f32 %v397_v1, %v502_v60 }
  0xb3   : > { %v816_v4 = vmax.f32 %v606_v57, %v711_v50  ;;  %v1659_v48 = vmax.f32 %v1550_v62, %v710_v9  ;;  %v503_v14 = vld [vmem:[%s1912_s11 + $0x23a] sm:$0xff]  ;;  %v398_v18 = vmax.f32 %v188_v7, %v293_v8  ;;  %v1133_v20 = vmax.f32 %v1024_v55, %v188_v7  ;;  %v504_v29 = vld [vmem:[%s1912_s11 + $0x242] sm:$0xff]  ;;  %v505_v42 = vld [vmem:[%s1912_s11 + $0x24a] sm:$0xff] }
  0xb4   : > { %v1551_v11 = vmax.f32 %v1341_v0, %v1446_v58  ;;  %v1238_v15 = vld [vmem:[%s1912_s11 + $0x254] sm:$0xff]  ;;  %v1552_v17 = vmax.f32 %v1342_v6, %v1447_v3  ;;  %v189_v21 = vld [vmem:[%s1912_s11 + $0x240] sm:$0xff]  ;;  %v817_v24 = vmax.f32 %v607_v12, %v712_v5  ;;  %v190_v37 = vld [vmem:[%s1912_s11 + $0x248] sm:$0xff] }
  0xb5   : > { %v1026_v16 = vmax.f32 %v816_v4, %v921_v63  ;;  %v713_v19 = vld [vmem:[%s1912_s11 + $0x256] sm:$0xff]  ;;  %v294_v22 = vld [vmem:[%s1912_s11 + $0x241] sm:$0xff]  ;;  %1765 = vst.msk [vmem:[%s1967_s15 + $0x200] sm:$0xff] %vm1700_vm0, %v1659_v48  ;;  %v1134_v30 = vmax.f32 %v1025_v10, %v189_v21  ;;  %v608_v33 = vmax.f32 %v398_v18, %v503_v14  ;;  %v1343_v34 = vmax.f32 %v1133_v20, %v1238_v15  ;;  %v295_v41 = vld [vmem:[%s1912_s11 + $0x249] sm:$0xff] }
  0xb6   : > { %v1660_v23 = vmax.f32 %v1551_v11, %v711_v50  ;;  %v923_v25 = vld [vmem:[%s1912_s11 + $0x257] sm:$0xff]  ;;  %v399_v28 = vmax.f32 %v189_v21, %v294_v22  ;;  %v1661_v32 = vmax.f32 %v1552_v17, %v712_v5  ;;  %v1027_v9 = vmax.f32 %v817_v24, %v922_v13  ;;  %v924_v39 = vld [vmem:[%s1912_s11 + $0x25f] sm:$0xff]  ;;  %v925_v60 = vld [vmem:[%s1912_s11 + $0x267] sm:$0xff] }
  0xb7   : > { %v1448_v27 = vld [vmem:[%s1912_s11 + $0x255] sm:$0xff]  ;;  %v714_v31 = vld [vmem:[%s1912_s11 + $0x25e] sm:$0xff]  ;;  %v1135_v43 = vmax.f32 %v1026_v16, %v190_v37  ;;  %v818_v44 = vmax.f32 %v608_v33, %v713_v19  ;;  %v400_v45 = vmax.f32 %v190_v37, %v295_v41  ;;  %v715_v46 = vld [vmem:[%s1912_s11 + $0x266] sm:$0xff] }
  0xb8   : > { %v1239_v35 = vld [vmem:[%s1912_s11 + $0x25c] sm:$0xff]  ;;  %1766 = vst.msk [vmem:[%s1967_s15 + $0x208] sm:$0xff] %vm1700_vm0, %v1660_v23  ;;  %v609_v38 = vmax.f32 %v399_v28, %v504_v29  ;;  %v1553_v26 = vmax.f32 %v1343_v34, %v1448_v27  ;;  %v1240_v47 = vld [vmem:[%s1912_s11 + $0x264] sm:$0xff]  ;;  %v191_v53 = vld [vmem:[%s1912_s11 + $0x250] sm:$0xff] }
  0xb9   : > { %v1449_v36 = vld [vmem:[%s1912_s11 + $0x25d] sm:$0xff]  ;;  %v1344_v40 = vmax.f32 %v1134_v30, %v1239_v35  ;;  %1767 = vst.msk [vmem:[%s1967_s15 + $0x210] sm:$0xff] %vm1700_vm0, %v1661_v32  ;;  %v1450_v49 = vld [vmem:[%s1912_s11 + $0x265] sm:$0xff]  ;;  %v1345_v52 = vmax.f32 %v1135_v43, %v1240_v47  ;;  %v296_v55 = vld [vmem:[%s1912_s11 + $0x251] sm:$0xff]  ;;  %v1028_v57 = vmax.f32 %v818_v44, %v923_v25  ;;  %v610_v59 = vmax.f32 %v400_v45, %v505_v42 }
  0xba   : > { %v819_v50 = vmax.f32 %v609_v38, %v714_v31  ;;  %v506_v56 = vld [vmem:[%s1912_s11 + $0x252] sm:$0xff]  ;;  %v1662_v58 = vmax.f32 %v1553_v26, %v713_v19  ;;  %v401_v54 = vmax.f32 %v191_v53, %v296_v55  ;;  %v1136_v3 = vmax.f32 %v1027_v9, %v191_v53  ;;  %v507_v48 = vld [vmem:[%s1912_s11 + $0x25a] sm:$0xff]  ;;  %v508_v24 = vld [vmem:[%s1912_s11 + $0x262] sm:$0xff] }
  0xbb   : > { %v1554_v51 = vmax.f32 %v1344_v40, %v1449_v36  ;;  %v716_v61 = vld [vmem:[%s1912_s11 + $0x26e] sm:$0xff]  ;;  %v1555_v1 = vmax.f32 %v1345_v52, %v1450_v49  ;;  %v192_v4 = vld [vmem:[%s1912_s11 + $0x258] sm:$0xff]  ;;  %v820_v6 = vmax.f32 %v610_v59, %v715_v46  ;;  %v193_v17 = vld [vmem:[%s1912_s11 + $0x260] sm:$0xff] }
  0xbc   : > { %v1241_v62 = vld [vmem:[%s1912_s11 + $0x26c] sm:$0xff]  ;;  %v1029_v63 = vmax.f32 %v819_v50, %v924_v39  ;;  %v297_v5 = vld [vmem:[%s1912_s11 + $0x259] sm:$0xff]  ;;  %1768 = vst.msk [vmem:[%s1967_s15 + $0x218] sm:$0xff] %vm1700_vm0, %v1662_v58  ;;  %v611_v7 = vmax.f32 %v401_v54, %v506_v56  ;;  %v1137_v12 = vmax.f32 %v1028_v57, %v192_v4  ;;  %v298_v23 = vld [vmem:[%s1912_s11 + $0x261] sm:$0xff] }
  0xbd   : > { %v1663_v0 = vmax.f32 %v1554_v51, %v714_v31  ;;  %v926_v2 = vld [vmem:[%s1912_s11 + $0x26f] sm:$0xff]  ;;  %v402_v10 = vmax.f32 %v192_v4, %v297_v5  ;;  %v1664_v13 = vmax.f32 %v1555_v1, %v715_v46  ;;  %v1346_v14 = vmax.f32 %v1136_v3, %v1241_v62  ;;  %v927_v21 = vld [vmem:[%s1912_s11 + $0x277] sm:$0xff]  ;;  %v928_v39 = vld [vmem:[%s1912_s11 + $0x27f] sm:$0xff] }
  0xbe   : > { %v1451_v8 = vld [vmem:[%s1912_s11 + $0x26d] sm:$0xff]  ;;  %v717_v11 = vld [vmem:[%s1912_s11 + $0x276] sm:$0xff]  ;;  %v1030_v18 = vmax.f32 %v820_v6, %v925_v60  ;;  %v821_v19 = vmax.f32 %v611_v7, %v716_v61  ;;  %v403_v27 = vmax.f32 %v193_v17, %v298_v23  ;;  %v718_v28 = vld [vmem:[%s1912_s11 + $0x27e] sm:$0xff]  ;;  %v1138_v29 = vmax.f32 %v1029_v63, %v193_v17 }
  0xbf   : > { %1769 = vst.msk [vmem:[%s1967_s15 + $0x220] sm:$0xff] %vm1700_vm0, %v1663_v0  ;;  %v1242_v15 = vld [vmem:[%s1912_s11 + $0x274] sm:$0xff]  ;;  %v612_v20 = vmax.f32 %v402_v10, %v507_v48  ;;  %v1556_v25 = vmax.f32 %v1346_v14, %v1451_v8  ;;  %v1243_v31 = vld [vmem:[%s1912_s11 + $0x27c] sm:$0xff]  ;;  %v194_v35 = vld [vmem:[%s1912_s11 + $0x268] sm:$0xff] }
  0xc0   : > { %v1452_v16 = vld [vmem:[%s1912_s11 + $0x275] sm:$0xff]  ;;  %v1347_v22 = vmax.f32 %v1137_v12, %v1242_v15  ;;  %1770 = vst.msk [vmem:[%s1967_s15 + $0x228] sm:$0xff] %vm1700_vm0, %v1664_v13  ;;  %v1453_v30 = vld [vmem:[%s1912_s11 + $0x27d] sm:$0xff]  ;;  %v1031_v32 = vmax.f32 %v821_v19, %v926_v2  ;;  %v299_v36 = vld [vmem:[%s1912_s11 + $0x269] sm:$0xff]  ;;  %v613_v38 = vmax.f32 %v403_v27, %v508_v24  ;;  %v1348_v40 = vmax.f32 %v1138_v29, %v1243_v31 }
  0xc1   : > { %v822_v33 = vmax.f32 %v612_v20, %v717_v11  ;;  %v509_v37 = vld [vmem:[%s1912_s11 + $0x26a] sm:$0xff]  ;;  %v1665_v9 = vmax.f32 %v1556_v25, %v716_v61  ;;  %v404_v41 = vmax.f32 %v194_v35, %v299_v36  ;;  %v1139_v45 = vmax.f32 %v1030_v18, %v194_v35  ;;  %v510_v56 = vld [vmem:[%s1912_s11 + $0x272] sm:$0xff]  ;;  %v511_v3 = vld [vmem:[%s1912_s11 + $0x27a] sm:$0xff] }
  0xc2   : > { %v1557_v34 = vmax.f32 %v1347_v22, %v1452_v16  ;;  %v1244_v42 = vld [vmem:[%s1912_s11 + $0x284] sm:$0xff]  ;;  %v195_v46 = vld [vmem:[%s1912_s11 + $0x270] sm:$0xff]  ;;  %v823_v49 = vmax.f32 %v613_v38, %v718_v28  ;;  %v1558_v50 = vmax.f32 %v1348_v40, %v1453_v30  ;;  %v196_v54 = vld [vmem:[%s1912_s11 + $0x278] sm:$0xff] }
  0xc3   : > { %v1032_v43 = vmax.f32 %v822_v33, %v927_v21  ;;  %v719_v26 = vld [vmem:[%s1912_s11 + $0x286] sm:$0xff]  ;;  %v300_v47 = vld [vmem:[%s1912_s11 + $0x271] sm:$0xff]  ;;  %1771 = vst.msk [vmem:[%s1967_s15 + $0x230] sm:$0xff] %vm1700_vm0, %v1665_v9  ;;  %v614_v51 = vmax.f32 %v404_v41, %v509_v37  ;;  %v1349_v57 = vmax.f32 %v1139_v45, %v1244_v42  ;;  %v1140_v59 = vmax.f32 %v1031_v32, %v195_v46  ;;  %v301_v2 = vld [vmem:[%s1912_s11 + $0x279] sm:$0xff] }
  0xc4   : > { %v1666_v44 = vmax.f32 %v1557_v34, %v717_v11  ;;  %v929_v52 = vld [vmem:[%s1912_s11 + $0x287] sm:$0xff]  ;;  %v405_v55 = vmax.f32 %v195_v46, %v300_v47  ;;  %v1033_v61 = vmax.f32 %v823_v49, %v928_v39  ;;  %v1667_v62 = vmax.f32 %v1558_v50, %v718_v28  ;;  %v930_v5 = vld [vmem:[%s1912_s11 + $0x28f] sm:$0xff]  ;;  %v931_v19 = vld [vmem:[%s1912_s11 + $0x297] sm:$0xff] }
  0xc5   : > { %v1454_v53 = vld [vmem:[%s1912_s11 + $0x285] sm:$0xff]  ;;  %v720_v58 = vld [vmem:[%s1912_s11 + $0x28e] sm:$0xff]  ;;  %v824_v63 = vmax.f32 %v614_v51, %v719_v26  ;;  %v406_v7 = vmax.f32 %v196_v54, %v301_v2  ;;  %v721_v8 = vld [vmem:[%s1912_s11 + $0x296] sm:$0xff]  ;;  %v1141_v10 = vmax.f32 %v1032_v43, %v196_v54 }
  0xc6   : > { %1772 = vst.msk [vmem:[%s1967_s15 + $0x238] sm:$0xff] %vm1700_vm0, %v1666_v44  ;;  %v1245_v60 = vld [vmem:[%s1912_s11 + $0x28c] sm:$0xff]  ;;  %v615_v0 = vmax.f32 %v405_v55, %v510_v56  ;;  %v1559_v4 = vmax.f32 %v1349_v57, %v1454_v53  ;;  %v1246_v48 = vld [vmem:[%s1912_s11 + $0x294] sm:$0xff]  ;;  %v197_v14 = vld [vmem:[%s1912_s11 + $0x280] sm:$0xff] }
  0xc7   : > { %v1455_v1 = vld [vmem:[%s1912_s11 + $0x28d] sm:$0xff]  ;;  %v1350_v6 = vmax.f32 %v1140_v59, %v1245_v60  ;;  %1773 = vst.msk [vmem:[%s1967_s15 + $0x240] sm:$0xff] %vm1700_vm0, %v1667_v62  ;;  %v1034_v11 = vmax.f32 %v824_v63, %v929_v52  ;;  %v1456_v13 = vld [vmem:[%s1912_s11 + $0x295] sm:$0xff]  ;;  %v302_v15 = vld [vmem:[%s1912_s11 + $0x281] sm:$0xff]  ;;  %v616_v18 = vmax.f32 %v406_v7, %v511_v3  ;;  %v1351_v20 = vmax.f32 %v1141_v10, %v1246_v48 }
  0xc8   : > { %v825_v12 = vmax.f32 %v615_v0, %v720_v58  ;;  %v1668_v16 = vmax.f32 %v1559_v4, %v719_v26  ;;  %v512_v21 = vld [vmem:[%s1912_s11 + $0x282] sm:$0xff]  ;;  %v407_v24 = vmax.f32 %v197_v14, %v302_v15  ;;  %v1142_v27 = vmax.f32 %v1033_v61, %v197_v14  ;;  %v513_v36 = vld [vmem:[%s1912_s11 + $0x28a] sm:$0xff]  ;;  %v514_v46 = vld [vmem:[%s1912_s11 + $0x292] sm:$0xff] }
  0xc9   : > { %v1560_v17 = vmax.f32 %v1350_v6, %v1455_v1  ;;  %v1247_v22 = vld [vmem:[%s1912_s11 + $0x29c] sm:$0xff]  ;;  %v198_v28 = vld [vmem:[%s1912_s11 + $0x288] sm:$0xff]  ;;  %v826_v30 = vmax.f32 %v616_v18, %v721_v8  ;;  %v1561_v32 = vmax.f32 %v1351_v20, %v1456_v13  ;;  %v199_v41 = vld [vmem:[%s1912_s11 + $0x290] sm:$0xff] }
  0xca   : > { %v1035_v23 = vmax.f32 %v825_v12, %v930_v5  ;;  %v722_v25 = vld [vmem:[%s1912_s11 + $0x29e] sm:$0xff]  ;;  %v303_v29 = vld [vmem:[%s1912_s11 + $0x289] sm:$0xff]  ;;  %1774 = vst.msk [vmem:[%s1967_s15 + $0x248] sm:$0xff] %vm1700_vm0, %v1668_v16  ;;  %v617_v37 = vmax.f32 %v407_v24, %v512_v21  ;;  %v1352_v9 = vmax.f32 %v1142_v27, %v1247_v22  ;;  %v1143_v39 = vmax.f32 %v1034_v11, %v198_v28  ;;  %v304_v45 = vld [vmem:[%s1912_s11 + $0x291] sm:$0xff] }
  0xcb   : > { %v1669_v31 = vmax.f32 %v1560_v17, %v720_v58  ;;  %v932_v33 = vld [vmem:[%s1912_s11 + $0x29f] sm:$0xff]  ;;  %v408_v35 = vmax.f32 %v198_v28, %v303_v29  ;;  %v1036_v42 = vmax.f32 %v826_v30, %v931_v19  ;;  %v1670_v43 = vmax.f32 %v1561_v32, %v721_v8  ;;  %v933_v51 = vld [vmem:[%s1912_s11 + $0x2a7] sm:$0xff]  ;;  %v934_v1 = vld [vmem:[%s1912_s11 + $0x2af] sm:$0xff] }
  0xcc   : > { %v1457_v34 = vld [vmem:[%s1912_s11 + $0x29d] sm:$0xff]  ;;  %v723_v38 = vld [vmem:[%s1912_s11 + $0x2a6] sm:$0xff]  ;;  %v1144_v47 = vmax.f32 %v1035_v23, %v199_v41  ;;  %v827_v49 = vmax.f32 %v617_v37, %v722_v25  ;;  %v409_v53 = vmax.f32 %v199_v41, %v304_v45  ;;  %v724_v58 = vld [vmem:[%s1912_s11 + $0x2ae] sm:$0xff] }
  0xcd   : > { %v1248_v40 = vld [vmem:[%s1912_s11 + $0x2a4] sm:$0xff]  ;;  %1775 = vst.msk [vmem:[%s1967_s15 + $0x250] sm:$0xff] %vm1700_vm0, %v1669_v31  ;;  %v618_v44 = vmax.f32 %v408_v35, %v513_v36  ;;  %v1562_v50 = vmax.f32 %v1352_v9, %v1457_v34  ;;  %v1249_v55 = vld [vmem:[%s1912_s11 + $0x2ac] sm:$0xff]  ;;  %v200_v60 = vld [vmem:[%s1912_s11 + $0x298] sm:$0xff] }
  0xce   : > { %v1458_v26 = vld [vmem:[%s1912_s11 + $0x2a5] sm:$0xff]  ;;  %v1353_v52 = vmax.f32 %v1143_v39, %v1248_v40  ;;  %v1459_v56 = vld [vmem:[%s1912_s11 + $0x2ad] sm:$0xff]  ;;  %1776 = vst.msk [vmem:[%s1967_s15 + $0x258] sm:$0xff] %vm1700_vm0, %v1670_v43  ;;  %v1354_v59 = vmax.f32 %v1144_v47, %v1249_v55  ;;  %v305_v54 = vld [vmem:[%s1912_s11 + $0x299] sm:$0xff]  ;;  %v1037_v61 = vmax.f32 %v827_v49, %v932_v33  ;;  %v619_v0 = vmax.f32 %v409_v53, %v514_v46 }
  0xcf   : > { %v828_v57 = vmax.f32 %v618_v44, %v723_v38  ;;  %v1671_v62 = vmax.f32 %v1562_v50, %v722_v25  ;;  %v515_v2 = vld [vmem:[%s1912_s11 + $0x29a] sm:$0xff]  ;;  %v410_v6 = vmax.f32 %v200_v60, %v305_v54  ;;  %v1145_v8 = vmax.f32 %v1036_v42, %v200_v60  ;;  %v516_v16 = vld [vmem:[%s1912_s11 + $0x2a2] sm:$0xff]  ;;  %v517_v30 = vld [vmem:[%s1912_s11 + $0x2aa] sm:$0xff] }
  0xd0   : > { %v1563_v63 = vmax.f32 %v1353_v52, %v1458_v26  ;;  %v1250_v3 = vld [vmem:[%s1912_s11 + $0x2b4] sm:$0xff]  ;;  %v1564_v5 = vmax.f32 %v1354_v59, %v1459_v56  ;;  %v201_v10 = vld [vmem:[%s1912_s11 + $0x2a0] sm:$0xff]  ;;  %v829_v12 = vmax.f32 %v619_v0, %v724_v58  ;;  %v202_v24 = vld [vmem:[%s1912_s11 + $0x2a8] sm:$0xff] }
  0xd1   : > { %v1038_v4 = vmax.f32 %v828_v57, %v933_v51  ;;  %v725_v7 = vld [vmem:[%s1912_s11 + $0x2b6] sm:$0xff]  ;;  %v306_v48 = vld [vmem:[%s1912_s11 + $0x2a1] sm:$0xff]  ;;  %1777 = vst.msk [vmem:[%s1967_s15 + $0x260] sm:$0xff] %vm1700_vm0, %v1671_v62  ;;  %v1146_v18 = vmax.f32 %v1037_v61, %v201_v10  ;;  %v620_v20 = vmax.f32 %v410_v6, %v515_v2  ;;  %v1355_v21 = vmax.f32 %v1145_v8, %v1250_v3  ;;  %v307_v31 = vld [vmem:[%s1912_s11 + $0x2a9] sm:$0xff] }
  0xd2   : > { %v1672_v11 = vmax.f32 %v1563_v63, %v723_v38  ;;  %v935_v13 = vld [vmem:[%s1912_s11 + $0x2b7] sm:$0xff]  ;;  %v411_v15 = vmax.f32 %v201_v10, %v306_v48  ;;  %v1673_v19 = vmax.f32 %v1564_v5, %v724_v58  ;;  %v1039_v25 = vmax.f32 %v829_v12, %v934_v1  ;;  %v936_v28 = vld [vmem:[%s1912_s11 + $0x2bf] sm:$0xff]  ;;  %v937_v46 = vld [vmem:[%s1912_s11 + $0x2c7] sm:$0xff] }
  0xd3   : > { %v1460_v14 = vld [vmem:[%s1912_s11 + $0x2b5] sm:$0xff]  ;;  %v726_v17 = vld [vmem:[%s1912_s11 + $0x2be] sm:$0xff]  ;;  %v1147_v32 = vmax.f32 %v1038_v4, %v202_v24  ;;  %v830_v33 = vmax.f32 %v620_v20, %v725_v7  ;;  %v412_v35 = vmax.f32 %v202_v24, %v307_v31  ;;  %v727_v36 = vld [vmem:[%s1912_s11 + $0x2c6] sm:$0xff] }
  0xd4   : > { %v1251_v22 = vld [vmem:[%s1912_s11 + $0x2bc] sm:$0xff]  ;;  %1778 = vst.msk [vmem:[%s1967_s15 + $0x268] sm:$0xff] %vm1700_vm0, %v1672_v11  ;;  %v621_v27 = vmax.f32 %v411_v15, %v516_v16  ;;  %v1565_v34 = vmax.f32 %v1355_v21, %v1460_v14  ;;  %v1252_v37 = vld [vmem:[%s1912_s11 + $0x2c4] sm:$0xff]  ;;  %v203_v41 = vld [vmem:[%s1912_s11 + $0x2b0] sm:$0xff] }
  0xd5   : > { %v1461_v23 = vld [vmem:[%s1912_s11 + $0x2bd] sm:$0xff]  ;;  %v1356_v29 = vmax.f32 %v1146_v18, %v1251_v22  ;;  %1779 = vst.msk [vmem:[%s1967_s15 + $0x270] sm:$0xff] %vm1700_vm0, %v1673_v19  ;;  %v1462_v9 = vld [vmem:[%s1912_s11 + $0x2c5] sm:$0xff]  ;;  %v1357_v40 = vmax.f32 %v1147_v32, %v1252_v37  ;;  %v308_v42 = vld [vmem:[%s1912_s11 + $0x2b1] sm:$0xff]  ;;  %v1040_v44 = vmax.f32 %v830_v33, %v935_v13  ;;  %v622_v45 = vmax.f32 %v412_v35, %v517_v30 }
  0xd6   : > { %v831_v38 = vmax.f32 %v621_v27, %v726_v17  ;;  %v518_v43 = vld [vmem:[%s1912_s11 + $0x2b2] sm:$0xff]  ;;  %v1674_v26 = vmax.f32 %v1565_v34, %v725_v7  ;;  %v413_v47 = vmax.f32 %v203_v41, %v308_v42  ;;  %v1148_v56 = vmax.f32 %v1039_v25, %v203_v41  ;;  %v519_v62 = vld [vmem:[%s1912_s11 + $0x2ba] sm:$0xff]  ;;  %v520_v12 = vld [vmem:[%s1912_s11 + $0x2c2] sm:$0xff] }
  0xd7   : > { %v1566_v39 = vmax.f32 %v1356_v29, %v1461_v23  ;;  %v728_v49 = vld [vmem:[%s1912_s11 + $0x2ce] sm:$0xff]  ;;  %v1567_v53 = vmax.f32 %v1357_v40, %v1462_v9  ;;  %v204_v57 = vld [vmem:[%s1912_s11 + $0x2b8] sm:$0xff]  ;;  %v832_v59 = vmax.f32 %v622_v45, %v727_v36  ;;  %v205_v5 = vld [vmem:[%s1912_s11 + $0x2c0] sm:$0xff] }
  0xd8   : > { %v1253_v50 = vld [vmem:[%s1912_s11 + $0x2cc] sm:$0xff]  ;;  %v1041_v51 = vmax.f32 %v831_v38, %v936_v28  ;;  %v309_v58 = vld [vmem:[%s1912_s11 + $0x2b9] sm:$0xff]  ;;  %1780 = vst.msk [vmem:[%s1967_s15 + $0x278] sm:$0xff] %vm1700_vm0, %v1674_v26  ;;  %v623_v60 = vmax.f32 %v413_v47, %v518_v43  ;;  %v1149_v0 = vmax.f32 %v1040_v44, %v204_v57  ;;  %v310_v11 = vld [vmem:[%s1912_s11 + $0x2c1] sm:$0xff] }
  0xd9   : > { %v1675_v52 = vmax.f32 %v1566_v39, %v726_v17  ;;  %v938_v55 = vld [vmem:[%s1912_s11 + $0x2cf] sm:$0xff]  ;;  %v414_v61 = vmax.f32 %v204_v57, %v309_v58  ;;  %v1676_v1 = vmax.f32 %v1567_v53, %v727_v36  ;;  %v1358_v2 = vmax.f32 %v1148_v56, %v1253_v50  ;;  %v939_v10 = vld [vmem:[%s1912_s11 + $0x2d7] sm:$0xff]  ;;  %v940_v28 = vld [vmem:[%s1912_s11 + $0x2df] sm:$0xff] }
  0xda   : > { %v1463_v54 = vld [vmem:[%s1912_s11 + $0x2cd] sm:$0xff]  ;;  %v729_v63 = vld [vmem:[%s1912_s11 + $0x2d6] sm:$0xff]  ;;  %v1042_v6 = vmax.f32 %v832_v59, %v937_v46  ;;  %v833_v7 = vmax.f32 %v623_v60, %v728_v49  ;;  %v415_v14 = vmax.f32 %v205_v5, %v310_v11  ;;  %v730_v15 = vld [vmem:[%s1912_s11 + $0x2de] sm:$0xff]  ;;  %v1150_v16 = vmax.f32 %v1041_v51, %v205_v5 }
  0xdb   : > { %1781 = vst.msk [vmem:[%s1967_s15 + $0x280] sm:$0xff] %vm1700_vm0, %v1675_v52  ;;  %v1254_v3 = vld [vmem:[%s1912_s11 + $0x2d4] sm:$0xff]  ;;  %v624_v8 = vmax.f32 %v414_v61, %v519_v62  ;;  %v1568_v13 = vmax.f32 %v1358_v2, %v1463_v54  ;;  %v1255_v17 = vld [vmem:[%s1912_s11 + $0x2dc] sm:$0xff]  ;;  %v206_v22 = vld [vmem:[%s1912_s11 + $0x2c8] sm:$0xff] }
  0xdc   : > { %v1464_v4 = vld [vmem:[%s1912_s11 + $0x2d5] sm:$0xff]  ;;  %v1359_v48 = vmax.f32 %v1149_v0, %v1254_v3  ;;  %1782 = vst.msk [vmem:[%s1967_s15 + $0x288] sm:$0xff] %vm1700_vm0, %v1676_v1  ;;  %v1465_v18 = vld [vmem:[%s1912_s11 + $0x2dd] sm:$0xff]  ;;  %v1043_v19 = vmax.f32 %v833_v7, %v938_v55  ;;  %v311_v23 = vld [vmem:[%s1912_s11 + $0x2c9] sm:$0xff]  ;;  %v625_v27 = vmax.f32 %v415_v14, %v520_v12  ;;  %v1360_v29 = vmax.f32 %v1150_v16, %v1255_v17 }
  0xdd   : > { %v834_v20 = vmax.f32 %v624_v8, %v729_v63  ;;  %v521_v24 = vld [vmem:[%s1912_s11 + $0x2ca] sm:$0xff]  ;;  %v1677_v25 = vmax.f32 %v1568_v13, %v728_v49  ;;  %v416_v31 = vmax.f32 %v206_v22, %v311_v23  ;;  %v1151_v35 = vmax.f32 %v1042_v6, %v206_v22  ;;  %v522_v43 = vld [vmem:[%s1912_s11 + $0x2d2] sm:$0xff]  ;;  %v523_v56 = vld [vmem:[%s1912_s11 + $0x2da] sm:$0xff] }
  0xde   : > { %v1569_v21 = vmax.f32 %v1359_v48, %v1464_v4  ;;  %v1256_v30 = vld [vmem:[%s1912_s11 + $0x2e4] sm:$0xff]  ;;  %v207_v36 = vld [vmem:[%s1912_s11 + $0x2d0] sm:$0xff]  ;;  %v835_v9 = vmax.f32 %v625_v27, %v730_v15  ;;  %v1570_v38 = vmax.f32 %v1360_v29, %v1465_v18  ;;  %v208_v47 = vld [vmem:[%s1912_s11 + $0x2d8] sm:$0xff] }
  0xdf   : > { %v1044_v32 = vmax.f32 %v834_v20, %v939_v10  ;;  %v731_v34 = vld [vmem:[%s1912_s11 + $0x2e6] sm:$0xff]  ;;  %v312_v37 = vld [vmem:[%s1912_s11 + $0x2d1] sm:$0xff]  ;;  %1783 = vst.msk [vmem:[%s1967_s15 + $0x290] sm:$0xff] %vm1700_vm0, %v1677_v25  ;;  %v626_v39 = vmax.f32 %v416_v31, %v521_v24  ;;  %v1361_v44 = vmax.f32 %v1151_v35, %v1256_v30  ;;  %v1152_v45 = vmax.f32 %v1043_v19, %v207_v36  ;;  %v313_v55 = vld [vmem:[%s1912_s11 + $0x2d9] sm:$0xff] }
  0xe0   : > { %v1678_v33 = vmax.f32 %v1569_v21, %v729_v63  ;;  %v941_v40 = vld [vmem:[%s1912_s11 + $0x2e7] sm:$0xff]  ;;  %v417_v42 = vmax.f32 %v207_v36, %v312_v37  ;;  %v1045_v49 = vmax.f32 %v835_v9, %v940_v28  ;;  %v1679_v50 = vmax.f32 %v1570_v38, %v730_v15  ;;  %v942_v58 = vld [vmem:[%s1912_s11 + $0x2ef] sm:$0xff]  ;;  %v943_v7 = vld [vmem:[%s1912_s11 + $0x2f7] sm:$0xff] }
  0xe1   : > { %v1466_v41 = vld [vmem:[%s1912_s11 + $0x2e5] sm:$0xff]  ;;  %v732_v26 = vld [vmem:[%s1912_s11 + $0x2ee] sm:$0xff]  ;;  %v836_v51 = vmax.f32 %v626_v39, %v731_v34  ;;  %v418_v60 = vmax.f32 %v208_v47, %v313_v55  ;;  %v733_v54 = vld [vmem:[%s1912_s11 + $0x2f6] sm:$0xff]  ;;  %v1153_v61 = vmax.f32 %v1044_v32, %v208_v47 }
  0xe2   : > { %1784 = vst.msk [vmem:[%s1967_s15 + $0x298] sm:$0xff] %vm1700_vm0, %v1678_v33  ;;  %v1257_v46 = vld [vmem:[%s1912_s11 + $0x2ec] sm:$0xff]  ;;  %v627_v52 = vmax.f32 %v417_v42, %v522_v43  ;;  %v1571_v57 = vmax.f32 %v1361_v44, %v1466_v41  ;;  %v1258_v62 = vld [vmem:[%s1912_s11 + $0x2f4] sm:$0xff]  ;;  %v209_v2 = vld [vmem:[%s1912_s11 + $0x2e0] sm:$0xff] }
  0xe3   : > { %v1467_v53 = vld [vmem:[%s1912_s11 + $0x2ed] sm:$0xff]  ;;  %v1362_v59 = vmax.f32 %v1152_v45, %v1257_v46  ;;  %1785 = vst.msk [vmem:[%s1967_s15 + $0x2a0] sm:$0xff] %vm1700_vm0, %v1679_v50  ;;  %v1046_v63 = vmax.f32 %v836_v51, %v941_v40  ;;  %v1468_v1 = vld [vmem:[%s1912_s11 + $0x2f5] sm:$0xff]  ;;  %v314_v3 = vld [vmem:[%s1912_s11 + $0x2e1] sm:$0xff]  ;;  %v628_v6 = vmax.f32 %v418_v60, %v523_v56  ;;  %v1363_v8 = vmax.f32 %v1153_v61, %v1258_v62 }
  0xe4   : > { %v837_v0 = vmax.f32 %v627_v52, %v732_v26  ;;  %v1680_v4 = vmax.f32 %v1571_v57, %v731_v34  ;;  %v524_v10 = vld [vmem:[%s1912_s11 + $0x2e2] sm:$0xff]  ;;  %v419_v12 = vmax.f32 %v209_v2, %v314_v3  ;;  %v1154_v14 = vmax.f32 %v1045_v49, %v209_v2  ;;  %v525_v23 = vld [vmem:[%s1912_s11 + $0x2ea] sm:$0xff]  ;;  %v526_v36 = vld [vmem:[%s1912_s11 + $0x2f2] sm:$0xff] }
  0xe5   : > { %v1572_v5 = vmax.f32 %v1362_v59, %v1467_v53  ;;  %v1259_v48 = vld [vmem:[%s1912_s11 + $0x2fc] sm:$0xff]  ;;  %v210_v15 = vld [vmem:[%s1912_s11 + $0x2e8] sm:$0xff]  ;;  %v838_v18 = vmax.f32 %v628_v6, %v733_v54  ;;  %v1573_v19 = vmax.f32 %v1363_v8, %v1468_v1  ;;  %v211_v31 = vld [vmem:[%s1912_s11 + $0x2f0] sm:$0xff] }
  0xe6   : > { %v1047_v11 = vmax.f32 %v837_v0, %v942_v58  ;;  %v734_v13 = vld [vmem:[%s1912_s11 + $0x2fe] sm:$0xff]  ;;  %v315_v16 = vld [vmem:[%s1912_s11 + $0x2e9] sm:$0xff]  ;;  %1786 = vst.msk [vmem:[%s1967_s15 + $0x2a8] sm:$0xff] %vm1700_vm0, %v1680_v4  ;;  %v629_v24 = vmax.f32 %v419_v12, %v524_v10  ;;  %v1364_v25 = vmax.f32 %v1154_v14, %v1259_v48  ;;  %v1155_v28 = vmax.f32 %v1046_v63, %v210_v15  ;;  %v316_v35 = vld [vmem:[%s1912_s11 + $0x2f1] sm:$0xff] }
  0xe7   : > { %v1681_v17 = vmax.f32 %v1572_v5, %v732_v26  ;;  %v944_v20 = vld [vmem:[%s1912_s11 + $0x2ff] sm:$0xff]  ;;  %v420_v22 = vmax.f32 %v210_v15, %v315_v16  ;;  %v1048_v30 = vmax.f32 %v838_v18, %v943_v7  ;;  %v1682_v32 = vmax.f32 %v1573_v19, %v733_v54  ;;  %v945_v39 = vld [vmem:[%s1912_s11 + $0x307] sm:$0xff]  ;;  %v946_v53 = vld [vmem:[%s1912_s11 + $0x30f] sm:$0xff] }
  0xe8   : > { %v1469_v21 = vld [vmem:[%s1912_s11 + $0x2fd] sm:$0xff]  ;;  %v735_v27 = vld [vmem:[%s1912_s11 + $0x306] sm:$0xff]  ;;  %v1156_v37 = vmax.f32 %v1047_v11, %v211_v31  ;;  %v839_v9 = vmax.f32 %v629_v24, %v734_v13  ;;  %v421_v41 = vmax.f32 %v211_v31, %v316_v35  ;;  %v736_v26 = vld [vmem:[%s1912_s11 + $0x30e] sm:$0xff] }
  0xe9   : > { %v1260_v29 = vld [vmem:[%s1912_s11 + $0x304] sm:$0xff]  ;;  %1787 = vst.msk [vmem:[%s1967_s15 + $0x2b0] sm:$0xff] %vm1700_vm0, %v1681_v17  ;;  %v630_v33 = vmax.f32 %v420_v22, %v525_v23  ;;  %v1574_v38 = vmax.f32 %v1364_v25, %v1469_v21  ;;  %v1261_v42 = vld [vmem:[%s1912_s11 + $0x30c] sm:$0xff]  ;;  %v212_v46 = vld [vmem:[%s1912_s11 + $0x2f8] sm:$0xff] }
  0xea   : > { %v1470_v34 = vld [vmem:[%s1912_s11 + $0x305] sm:$0xff]  ;;  %v1365_v40 = vmax.f32 %v1155_v28, %v1260_v29  ;;  %v1471_v43 = vld [vmem:[%s1912_s11 + $0x30d] sm:$0xff]  ;;  %1788 = vst.msk [vmem:[%s1967_s15 + $0x2b8] sm:$0xff] %vm1700_vm0, %v1682_v32  ;;  %v1366_v45 = vmax.f32 %v1156_v37, %v1261_v42  ;;  %v317_v47 = vld [vmem:[%s1912_s11 + $0x2f9] sm:$0xff]  ;;  %v1049_v49 = vmax.f32 %v839_v9, %v944_v20  ;;  %v631_v52 = vmax.f32 %v421_v41, %v526_v36 }
  0xeb   : > { %v840_v44 = vmax.f32 %v630_v33, %v735_v27  ;;  %v1683_v50 = vmax.f32 %v1574_v38, %v734_v13  ;;  %v527_v55 = vld [vmem:[%s1912_s11 + $0x2fa] sm:$0xff]  ;;  %v422_v59 = vmax.f32 %v212_v46, %v317_v47  ;;  %v1157_v54 = vmax.f32 %v1048_v30, %v212_v46  ;;  %v528_v4 = vld [vmem:[%s1912_s11 + $0x302] sm:$0xff]  ;;  %v529_v18 = vld [vmem:[%s1912_s11 + $0x30a] sm:$0xff] }
  0xec   : > { %v1575_v51 = vmax.f32 %v1365_v40, %v1470_v34  ;;  %v1262_v56 = vld [vmem:[%s1912_s11 + $0x314] sm:$0xff]  ;;  %v1576_v58 = vmax.f32 %v1366_v45, %v1471_v43  ;;  %v213_v61 = vld [vmem:[%s1912_s11 + $0x300] sm:$0xff]  ;;  %v841_v0 = vmax.f32 %v631_v52, %v736_v26  ;;  %v214_v12 = vld [vmem:[%s1912_s11 + $0x308] sm:$0xff] }
  0xed   : > { %v1050_v57 = vmax.f32 %v840_v44, %v945_v39  ;;  %v737_v60 = vld [vmem:[%s1912_s11 + $0x316] sm:$0xff]  ;;  %v318_v62 = vld [vmem:[%s1912_s11 + $0x301] sm:$0xff]  ;;  %1789 = vst.msk [vmem:[%s1967_s15 + $0x2c0] sm:$0xff] %vm1700_vm0, %v1683_v50  ;;  %v1158_v6 = vmax.f32 %v1049_v49, %v213_v61  ;;  %v632_v8 = vmax.f32 %v422_v59, %v527_v55  ;;  %v1367_v10 = vmax.f32 %v1157_v54, %v1262_v56  ;;  %v319_v17 = vld [vmem:[%s1912_s11 + $0x309] sm:$0xff] }
  0xee   : > { %v1684_v63 = vmax.f32 %v1575_v51, %v735_v27  ;;  %v947_v1 = vld [vmem:[%s1912_s11 + $0x317] sm:$0xff]  ;;  %v423_v3 = vmax.f32 %v213_v61, %v318_v62  ;;  %v1685_v7 = vmax.f32 %v1576_v58, %v736_v26  ;;  %v1051_v13 = vmax.f32 %v841_v0, %v946_v53  ;;  %v948_v15 = vld [vmem:[%s1912_s11 + $0x31f] sm:$0xff]  ;;  %v949_v36 = vld [vmem:[%s1912_s11 + $0x327] sm:$0xff] }
  0xef   : > { %v1472_v2 = vld [vmem:[%s1912_s11 + $0x315] sm:$0xff]  ;;  %v738_v5 = vld [vmem:[%s1912_s11 + $0x31e] sm:$0xff]  ;;  %v1159_v19 = vmax.f32 %v1050_v57, %v214_v12  ;;  %v842_v20 = vmax.f32 %v632_v8, %v737_v60  ;;  %v424_v22 = vmax.f32 %v214_v12, %v319_v17  ;;  %v739_v23 = vld [vmem:[%s1912_s11 + $0x326] sm:$0xff] }
  0xf0   : > { %v1263_v48 = vld [vmem:[%s1912_s11 + $0x31c] sm:$0xff]  ;;  %1790 = vst.msk [vmem:[%s1967_s15 + $0x2c8] sm:$0xff] %vm1700_vm0, %v1684_v63  ;;  %v633_v14 = vmax.f32 %v423_v3, %v528_v4  ;;  %v1577_v21 = vmax.f32 %v1367_v10, %v1472_v2  ;;  %v1264_v24 = vld [vmem:[%s1912_s11 + $0x324] sm:$0xff]  ;;  %v215_v31 = vld [vmem:[%s1912_s11 + $0x310] sm:$0xff] }
  0xf1   : > { %v1473_v11 = vld [vmem:[%s1912_s11 + $0x31d] sm:$0xff]  ;;  %v1368_v16 = vmax.f32 %v1158_v6, %v1263_v48  ;;  %1791 = vst.msk [vmem:[%s1967_s15 + $0x2d0] sm:$0xff] %vm1700_vm0, %v1685_v7  ;;  %v1474_v25 = vld [vmem:[%s1912_s11 + $0x325] sm:$0xff]  ;;  %v1369_v29 = vmax.f32 %v1159_v19, %v1264_v24  ;;  %v320_v30 = vld [vmem:[%s1912_s11 + $0x311] sm:$0xff]  ;;  %v1052_v33 = vmax.f32 %v842_v20, %v947_v1  ;;  %v634_v35 = vmax.f32 %v424_v22, %v529_v18 }
  0xf2   : > { %v843_v27 = vmax.f32 %v633_v14, %v738_v5  ;;  %v530_v32 = vld [vmem:[%s1912_s11 + $0x312] sm:$0xff]  ;;  %v1686_v34 = vmax.f32 %v1577_v21, %v737_v60  ;;  %v425_v37 = vmax.f32 %v215_v31, %v320_v30  ;;  %v1160_v43 = vmax.f32 %v1051_v13, %v215_v31  ;;  %v531_v50 = vld [vmem:[%s1912_s11 + $0x31a] sm:$0xff]  ;;  %v532_v0 = vld [vmem:[%s1912_s11 + $0x322] sm:$0xff] }
  0xf3   : > { %v1578_v28 = vmax.f32 %v1368_v16, %v1473_v11  ;;  %v740_v9 = vld [vmem:[%s1912_s11 + $0x32e] sm:$0xff]  ;;  %v1579_v41 = vmax.f32 %v1369_v29, %v1474_v25  ;;  %v216_v44 = vld [vmem:[%s1912_s11 + $0x318] sm:$0xff]  ;;  %v844_v45 = vmax.f32 %v634_v35, %v739_v23  ;;  %v217_v58 = vld [vmem:[%s1912_s11 + $0x320] sm:$0xff] }
  0xf4   : > { %v1265_v38 = vld [vmem:[%s1912_s11 + $0x32c] sm:$0xff]  ;;  %v1053_v39 = vmax.f32 %v843_v27, %v948_v15  ;;  %v321_v26 = vld [vmem:[%s1912_s11 + $0x319] sm:$0xff]  ;;  %1792 = vst.msk [vmem:[%s1967_s15 + $0x2d8] sm:$0xff] %vm1700_vm0, %v1686_v34  ;;  %v635_v46 = vmax.f32 %v425_v37, %v530_v32  ;;  %v1161_v52 = vmax.f32 %v1052_v33, %v216_v44  ;;  %v322_v63 = vld [vmem:[%s1912_s11 + $0x321] sm:$0xff] }
  0xf5   : > { %v1687_v40 = vmax.f32 %v1578_v28, %v738_v5  ;;  %v950_v42 = vld [vmem:[%s1912_s11 + $0x32f] sm:$0xff]  ;;  %v426_v49 = vmax.f32 %v216_v44, %v321_v26  ;;  %v1688_v53 = vmax.f32 %v1579_v41, %v739_v23  ;;  %v1370_v55 = vmax.f32 %v1160_v43, %v1265_v38  ;;  %v951_v61 = vld [vmem:[%s1912_s11 + $0x337] sm:$0xff]  ;;  %v952_v15 = vld [vmem:[%s1912_s11 + $0x33f] sm:$0xff] }
  0xf6   : > { %v1475_v47 = vld [vmem:[%s1912_s11 + $0x32d] sm:$0xff]  ;;  %v741_v51 = vld [vmem:[%s1912_s11 + $0x336] sm:$0xff]  ;;  %v1054_v59 = vmax.f32 %v844_v45, %v949_v36  ;;  %v845_v60 = vmax.f32 %v635_v46, %v740_v9  ;;  %v427_v2 = vmax.f32 %v217_v58, %v322_v63  ;;  %v742_v3 = vld [vmem:[%s1912_s11 + $0x33e] sm:$0xff]  ;;  %v1162_v4 = vmax.f32 %v1053_v39, %v217_v58 }
  0xf7   : > { %1793 = vst.msk [vmem:[%s1967_s15 + $0x2e0] sm:$0xff] %vm1700_vm0, %v1687_v40  ;;  %v1266_v56 = vld [vmem:[%s1912_s11 + $0x334] sm:$0xff]  ;;  %v636_v54 = vmax.f32 %v426_v49, %v531_v50  ;;  %v1580_v1 = vmax.f32 %v1370_v55, %v1475_v47  ;;  %v1267_v5 = vld [vmem:[%s1912_s11 + $0x33c] sm:$0xff]  ;;  %v218_v48 = vld [vmem:[%s1912_s11 + $0x328] sm:$0xff] }
  0xf8   : > { %v1476_v57 = vld [vmem:[%s1912_s11 + $0x335] sm:$0xff]  ;;  %v1371_v62 = vmax.f32 %v1161_v52, %v1266_v56  ;;  %1794 = vst.msk [vmem:[%s1967_s15 + $0x2e8] sm:$0xff] %vm1700_vm0, %v1688_v53  ;;  %v1477_v6 = vld [vmem:[%s1912_s11 + $0x33d] sm:$0xff]  ;;  %v1055_v7 = vmax.f32 %v845_v60, %v950_v42  ;;  %v323_v11 = vld [vmem:[%s1912_s11 + $0x329] sm:$0xff]  ;;  %v637_v14 = vmax.f32 %v427_v2, %v532_v0  ;;  %v1372_v16 = vmax.f32 %v1162_v4, %v1267_v5 }
  0xf9   : > { %v846_v8 = vmax.f32 %v636_v54, %v741_v51  ;;  %v533_v12 = vld [vmem:[%s1912_s11 + $0x32a] sm:$0xff]  ;;  %v1689_v13 = vmax.f32 %v1580_v1, %v740_v9  ;;  %v428_v17 = vmax.f32 %v218_v48, %v323_v11  ;;  %v1163_v22 = vmax.f32 %v1054_v59, %v218_v48  ;;  %v534_v32 = vld [vmem:[%s1912_s11 + $0x332] sm:$0xff]  ;;  %v535_v43 = vld [vmem:[%s1912_s11 + $0x33a] sm:$0xff] }
  0xfa   : > { %v1581_v10 = vmax.f32 %v1371_v62, %v1476_v57  ;;  %v1268_v18 = vld [vmem:[%s1912_s11 + $0x344] sm:$0xff]  ;;  %v219_v23 = vld [vmem:[%s1912_s11 + $0x330] sm:$0xff]  ;;  %v847_v25 = vmax.f32 %v637_v14, %v742_v3  ;;  %v1582_v27 = vmax.f32 %v1372_v16, %v1477_v6  ;;  %v220_v37 = vld [vmem:[%s1912_s11 + $0x338] sm:$0xff] }
  0xfb   : > { %v1056_v19 = vmax.f32 %v846_v8, %v951_v61  ;;  %v743_v21 = vld [vmem:[%s1912_s11 + $0x346] sm:$0xff]  ;;  %v324_v24 = vld [vmem:[%s1912_s11 + $0x331] sm:$0xff]  ;;  %1795 = vst.msk [vmem:[%s1967_s15 + $0x2f0] sm:$0xff] %vm1700_vm0, %v1689_v13  ;;  %v638_v28 = vmax.f32 %v428_v17, %v533_v12  ;;  %v1373_v33 = vmax.f32 %v1163_v22, %v1268_v18  ;;  %v1164_v35 = vmax.f32 %v1055_v7, %v219_v23  ;;  %v325_v42 = vld [vmem:[%s1912_s11 + $0x339] sm:$0xff] }
  0xfc   : > { %v1690_v20 = vmax.f32 %v1581_v10, %v741_v51  ;;  %v953_v29 = vld [vmem:[%s1912_s11 + $0x347] sm:$0xff]  ;;  %v429_v30 = vmax.f32 %v219_v23, %v324_v24  ;;  %v1057_v9 = vmax.f32 %v847_v25, %v952_v15  ;;  %v1691_v38 = vmax.f32 %v1582_v27, %v742_v3  ;;  %v954_v26 = vld [vmem:[%s1912_s11 + $0x34f] sm:$0xff]  ;;  %v1271_v61 = vld [vmem:[%s1912_s11 + $0x35c] sm:$0xff] }
  0xfd   : > { %v1478_v31 = vld [vmem:[%s1912_s11 + $0x345] sm:$0xff]  ;;  %v744_v34 = vld [vmem:[%s1912_s11 + $0x34e] sm:$0xff]  ;;  %v848_v39 = vmax.f32 %v638_v28, %v743_v21  ;;  %v430_v46 = vmax.f32 %v220_v37, %v325_v42  ;;  %v745_v47 = vld [vmem:[%s1912_s11 + $0x356] sm:$0xff]  ;;  %v1165_v49 = vmax.f32 %v1056_v19, %v220_v37 }
  0xfe   : > { %1796 = vst.msk [vmem:[%s1967_s15 + $0x2f8] sm:$0xff] %vm1700_vm0, %v1690_v20  ;;  %v1269_v36 = vld [vmem:[%s1912_s11 + $0x34c] sm:$0xff]  ;;  %v639_v40 = vmax.f32 %v429_v30, %v534_v32  ;;  %v1583_v44 = vmax.f32 %v1373_v33, %v1478_v31  ;;  %v1270_v50 = vld [vmem:[%s1912_s11 + $0x354] sm:$0xff]  ;;  %v221_v55 = vld [vmem:[%s1912_s11 + $0x340] sm:$0xff] }
  0xff   : > { %v1479_v41 = vld [vmem:[%s1912_s11 + $0x34d] sm:$0xff]  ;;  %v1374_v45 = vmax.f32 %v1164_v35, %v1269_v36  ;;  %1797 = vst.msk [vmem:[%s1967_s15 + $0x300] sm:$0xff] %vm1700_vm0, %v1691_v38  ;;  %v1058_v51 = vmax.f32 %v848_v39, %v953_v29  ;;  %v1480_v53 = vld [vmem:[%s1912_s11 + $0x355] sm:$0xff]  ;;  %v326_v56 = vld [vmem:[%s1912_s11 + $0x341] sm:$0xff]  ;;  %v640_v59 = vmax.f32 %v430_v46, %v535_v43  ;;  %v1375_v60 = vmax.f32 %v1165_v49, %v1270_v50 }
 0x100   : > { %v849_v52 = vmax.f32 %v639_v40, %v744_v34  ;;  %v1692_v57 = vmax.f32 %v1583_v44, %v743_v21  ;;  %v536_v54 = vld [vmem:[%s1912_s11 + $0x342] sm:$0xff]  ;;  %v955_v63 = vld [vmem:[%s1912_s11 + $0x357] sm:$0xff]  ;;  %v431_v0 = vmax.f32 %v221_v55, %v326_v56  ;;  %v1166_v1 = vmax.f32 %v1057_v9, %v221_v55  ;;  %v1273_v15 = vld [vmem:[%s1912_s11 + $0x36c] sm:$0xff] }
 0x101   : > { %v1584_v58 = vmax.f32 %v1374_v45, %v1479_v41  ;;  %v1062_v2 = vld [vmem:[%s1912_s11 + $0x348] sm:$0xff]  ;;  %v850_v5 = vmax.f32 %v640_v59, %v745_v47  ;;  %v1585_v6 = vmax.f32 %v1375_v60, %v1480_v53  ;;  %v746_v7 = vld [vmem:[%s1912_s11 + $0x35e] sm:$0xff]  ;;  %v1063_v48 = vld [vmem:[%s1912_s11 + $0x350] sm:$0xff] }
 0x102   : > { %v1059_v62 = vmax.f32 %v849_v52, %v954_v26  ;;  %v1272_v3 = vld [vmem:[%s1912_s11 + $0x364] sm:$0xff]  ;;  %1798 = vst.msk [vmem:[%s1967_s15 + $0x308] sm:$0xff] %vm1700_vm0, %v1692_v57  ;;  %v1167_v10 = vmax.f32 %v1058_v51, %v1062_v2  ;;  %v641_v11 = vmax.f32 %v431_v0, %v536_v54  ;;  %v1376_v12 = vmax.f32 %v1166_v1, %v1271_v61  ;;  %v1483_v20 = vld [vmem:[%s1912_s11 + $0x36d] sm:$0xff]  ;;  %v1064_v21 = vld [vmem:[%s1912_s11 + $0x358] sm:$0xff] }
 0x103   : > { %v1693_v4 = vmax.f32 %v1584_v58, %v744_v34  ;;  %v1481_v8 = vld [vmem:[%s1912_s11 + $0x35d] sm:$0xff]  ;;  %v1482_v13 = vld [vmem:[%s1912_s11 + $0x365] sm:$0xff]  ;;  %v1060_v16 = vmax.f32 %v850_v5, %v955_v63  ;;  %v1694_v17 = vmax.f32 %v1585_v6, %v745_v47  ;;  %v1274_v27 = vld [vmem:[%s1912_s11 + $0x374] sm:$0xff] }
 0x104   : > { %v1168_v14 = vmax.f32 %v1059_v62, %v1063_v48  ;;  %v956_v18 = vld [vmem:[%s1912_s11 + $0x35f] sm:$0xff]  ;;  %v1377_v19 = vmax.f32 %v1167_v10, %v1272_v3  ;;  %v851_v22 = vmax.f32 %v641_v11, %v746_v7  ;;  %v1586_v23 = vmax.f32 %v1376_v12, %v1481_v8  ;;  %v1592_v29 = vld [vmem:[%s1912_s11 + $0x36e] sm:$0xff]  ;;  %v1593_v39 = vld [vmem:[%s1912_s11 + $0x376] sm:$0xff] }
 0x105   : > { %1799 = vst.msk [vmem:[%s1967_s15 + $0x310] sm:$0xff] %vm1700_vm0, %v1693_v4  ;;  %v1591_v24 = vld [vmem:[%s1912_s11 + $0x366] sm:$0xff]  ;;  %v1169_v31 = vmax.f32 %v1060_v16, %v1064_v21  ;;  %v1484_v35 = vld [vmem:[%s1912_s11 + $0x375] sm:$0xff]  ;;  %v1485_v42 = vld [vmem:[%s1912_s11 + $0x37d] sm:$0xff] }
 0x106   : > { %v1378_v25 = vmax.f32 %v1168_v14, %v1273_v15  ;;  %1800 = vst.msk [vmem:[%s1967_s15 + $0x318] sm:$0xff] %vm1700_vm0, %v1694_v17  ;;  %v1587_v28 = vmax.f32 %v1377_v19, %v1482_v13  ;;  %v1065_v30 = vld [vmem:[%s1912_s11 + $0x360] sm:$0xff]  ;;  %v1061_v32 = vmax.f32 %v851_v22, %v956_v18  ;;  %v1695_v33 = vmax.f32 %v1586_v23, %v746_v7 }
 0x107   : > { %v1379_v37 = vmax.f32 %v1169_v31, %v1274_v27  ;;  %v1275_v9 = vld [vmem:[%s1912_s11 + $0x37c] sm:$0xff] }
 0x108   : > { %v1588_v34 = vmax.f32 %v1378_v25, %v1483_v20  ;;  %v1696_v36 = vmax.f32 %v1587_v28, %v1591_v24  ;;  %1801 = vst.msk [vmem:[%s1967_s15 + $0x320] sm:$0xff] %vm1700_vm0, %v1695_v33  ;;  %v1170_v40 = vmax.f32 %v1061_v32, %v1065_v30  ;;  %v1594_v26 = vld [vmem:[%s1912_s11 + $0x37e] sm:$0xff] }
 0x109   : > { %v1589_v41 = vmax.f32 %v1379_v37, %v1484_v35 }
 0x10a   : > { %v1697_v38 = vmax.f32 %v1588_v34, %v1592_v29  ;;  %1802 = vst.msk [vmem:[%s1967_s15 + $0x328] sm:$0xff] %vm1700_vm0, %v1696_v36  ;;  %v1380_v43 = vmax.f32 %v1170_v40, %v1275_v9 }
 0x10b   : > { %v1698_v44 = vmax.f32 %v1589_v41, %v1593_v39 }
 0x10c   : > { %1803 = vst.msk [vmem:[%s1967_s15 + $0x330] sm:$0xff] %vm1700_vm0, %v1697_v38  ;;  %v1590_v45 = vmax.f32 %v1380_v43, %v1485_v42 }
 0x10d   : > { %1804 = vst.msk [vmem:[%s1967_s15 + $0x338] sm:$0xff] %vm1700_vm0, %v1698_v44 }
 0x10e   : > { %v1699_v46 = vmax.f32 %v1590_v45, %v1594_v26 }
 0x110   : > { %1805 = vst.msk [vmem:[%s1967_s15 + $0x340] sm:$0xff] %vm1700_vm0, %v1699_v46 }
 0x111 PF: > { %s11_s6 = sadd.s32 1, %s1886_s6  }
 0x112   : > { %p8_p4 = scmp.ge.s32.totalorder %s11_s6, 4  }
 0x114   :  { %10 = sbr.rel (!%p8_p4) target bundleno = 1 (0x1), region = 54 }

// kernel: densenet_forward.16
= control target key start
LH: loop header
LB: loop body
LE: loop exit
PB: predicated region body
PF: predicated region fallthrough
CT: control target
= control target key end

     0   :  { %vm261_vm0 = vcmask 130048   ;;  %s1337_s1 = inlined_call_operand.vmem [shape: bf16[16,16], index: 1, kind: input, shape index: {}]   ;;  %s1338_s0 = inlined_call_operand.vmem [shape: f32[392,16], index: 0, kind: input, shape index: {}]   ;;  %s1339_s2 = inlined_call_operand.vmem [shape: f32[1,16], index: 2, kind: input, shape index: {}]   ;;  %s1340_s3 = inlined_call_operand.vmem [shape: f32[1,16], index: 3, kind: input, shape index: {}]   ;;  %s1341_s4 = inlined_call_operand.vmem [shape: f32[1,16], index: 4, kind: input, shape index: {}]   ;;  %s1342_s5 = inlined_call_operand.vmem [shape: f32[1,16], index: 5, kind: input, shape index: {}]   ;;  %s1343_s6 = inlined_call_operand.vmem [shape: f32[392,16], index: 6, kind: output, shape index: {}]  }
   0x1   :  { %v707_v0 = vld [vmem:[%s1337_s1] sm:$0xff]  ;;  %v25_v2 = vld [vmem:[%s1338_s0 + $0x8] sm:$0xff]  ;;  %v38_v5 = vld [vmem:[%s1338_s0 + $0x70] sm:$0xff] }
   0x2   :  { %v24_v1 = vld [vmem:[%s1338_s0] sm:$0xff]  ;;  %344 = vmatpush.bf16.msra.mxu0 %v707_v0  ;;  %708 = vmatpush.bf16.msra.mxu1 %v707_v0  ;;  %v39_v6 = vld [vmem:[%s1338_s0 + $0x78] sm:$0xff]  ;;  %v53_v12 = vld [vmem:[%s1338_s0 + $0xe8] sm:$0xff] }
   0x3   :  { %v762_v3 = vld [vmem:[%s1339_s2] ss:$0 sm:$0xff]  ;;  %709 = vmatpush.bf16.msra.mxu2 %v707_v0  ;;  %710 = vmatpush.bf16.msra.mxu3 %v707_v0  ;;  %v26_v25 = vld [vmem:[%s1338_s0 + $0x10] sm:$0xff]  ;;  %v27_v26 = vld [vmem:[%s1338_s0 + $0x18] sm:$0xff] }
   0x4   :  { %v767_v4 = vld [vmem:[%s1340_s3] ss:$0 sm:$0xff]  ;;  %v77_v7 = vmul.f32 %v762_v3, %v24_v1  ;;  %v78_v8 = vmul.f32 %v762_v3, %v25_v2  ;;  %v91_v9 = vmul.f32 %v762_v3, %v38_v5  ;;  %v92_v10 = vmul.f32 %v762_v3, %v39_v6  ;;  %v41_v30 = vld [vmem:[%s1338_s0 + $0x88] sm:$0xff]  ;;  %v54_v33 = vld [vmem:[%s1338_s0 + $0xf0] sm:$0xff] }
   0x5   :  { %v52_v11 = vld [vmem:[%s1338_s0 + $0xe0] sm:$0xff]  ;;  %v106_v14 = vmul.f32 %v762_v3, %v53_v12  ;;  %v55_v34 = vld [vmem:[%s1338_s0 + $0xf8] sm:$0xff]  ;;  %v79_v36 = vmul.f32 %v762_v3, %v26_v25  ;;  %v80_v37 = vmul.f32 %v762_v3, %v27_v26  ;;  %v94_v39 = vmul.f32 %v762_v3, %v41_v30  ;;  %v66_v44 = vld [vmem:[%s1338_s0 + $0x150] sm:$0xff] }
   0x6   :  { %v105_v13 = vmul.f32 %v762_v3, %v52_v11  ;;  %v130_v15 = vadd.f32 %v767_v4, %v77_v7  ;;  %v131_v16 = vadd.f32 %v767_v4, %v78_v8  ;;  %v144_v17 = vadd.f32 %v767_v4, %v91_v9  ;;  %v40_v29 = vld [vmem:[%s1338_s0 + $0x80] sm:$0xff]  ;;  %v67_v45 = vld [vmem:[%s1338_s0 + $0x158] sm:$0xff]  ;;  %v29_v1 = vld [vmem:[%s1338_s0 + $0x28] sm:$0xff] }
   0x7   :  { %v145_v18 = vadd.f32 %v767_v4, %v92_v10  ;;  %v159_v20 = vadd.f32 %v767_v4, %v106_v14  ;;  %v93_v38 = vmul.f32 %v762_v3, %v40_v29  ;;  %v107_v40 = vmul.f32 %v762_v3, %v54_v33  ;;  %v28_v0 = vld [vmem:[%s1338_s0 + $0x20] sm:$0xff]  ;;  %v42_v6 = vld [vmem:[%s1338_s0 + $0x90] sm:$0xff]  ;;  %v43_v7 = vld [vmem:[%s1338_s0 + $0x98] sm:$0xff] }
   0x8   :  { %v158_v19 = vadd.f32 %v767_v4, %v105_v13  ;;  %v179_v21 = vmax.f32 %v130_v15, 0.0  ;;  %v180_v22 = vmax.f32 %v131_v16, 0.0  ;;  %v193_v23 = vmax.f32 %v144_v17, 0.0  ;;  %v56_v8 = vld [vmem:[%s1338_s0 + $0x100] sm:$0xff]  ;;  %v57_v9 = vld [vmem:[%s1338_s0 + $0x108] sm:$0xff] }
   0x9   :  { %v194_v24 = vmax.f32 %v145_v18, 0.0  ;;  %v208_v28 = vmax.f32 %v159_v20, 0.0  ;;  %v108_v41 = vmul.f32 %v762_v3, %v55_v34  ;;  %v132_v42 = vadd.f32 %v767_v4, %v79_v36  ;;  %v68_v16 = vld [vmem:[%s1338_s0 + $0x160] sm:$0xff]  ;;  %v69_v17 = vld [vmem:[%s1338_s0 + $0x168] sm:$0xff] }
   0xa   :  { %v207_v27 = vmax.f32 %v158_v19, 0.0  ;;  %v228_v31 = vpack.c.bf16 %v180_v22, %v179_v21  ;;  %v133_v43 = vadd.f32 %v767_v4, %v80_v37  ;;  %v146_v46 = vadd.f32 %v767_v4, %v93_v38 }
   0xb   :  { %v235_v32 = vpack.c.bf16 %v194_v24, %v193_v23  ;;  %v147_v47 = vadd.f32 %v767_v4, %v94_v39  ;;  %v160_v48 = vadd.f32 %v767_v4, %v107_v40  ;;  %v161_v49 = vadd.f32 %v767_v4, %v108_v41  ;;  %v30_v39 = vld [vmem:[%s1338_s0 + $0x30] sm:$0xff]  ;;  %v31_v40 = vld [vmem:[%s1338_s0 + $0x38] sm:$0xff] }
   0xc   :  { %v242_v35 = vpack.c.bf16 %v208_v28, %v207_v27  ;;  %682 = vmatmul.msk.bf16.vlgmr.msra.gmra.mxu0 %vm261_vm0, %v228_v31  ;;  %v119_v50 = vmul.f32 %v762_v3, %v66_v44  ;;  %v120_v51 = vmul.f32 %v762_v3, %v67_v45  ;;  %v181_v52 = vmax.f32 %v132_v42, 0.0  ;;  %v44_v42 = vld [vmem:[%s1338_s0 + $0xa0] sm:$0xff]  ;;  %v58_v44 = vld [vmem:[%s1338_s0 + $0x110] sm:$0xff]  ;;  %v59_v45 = vld [vmem:[%s1338_s0 + $0x118] sm:$0xff] }
   0xd   :  { %689 = vmatmul.msk.bf16.vlgmr.msra.gmra.mxu1 %vm261_vm0, %v235_v32  ;;  %v182_v53 = vmax.f32 %v133_v43, 0.0  ;;  %v195_v54 = vmax.f32 %v146_v46, 0.0  ;;  %v196_v55 = vmax.f32 %v147_v47, 0.0  ;;  %v209_v58 = vmax.f32 %v160_v48, 0.0  ;;  %v45_v43 = vld [vmem:[%s1338_s0 + $0xa8] sm:$0xff] }
   0xe   :  { %696 = vmatmul.msk.bf16.vlgmr.msra.gmra.mxu2 %vm261_vm0, %v242_v35  ;;  %v172_v56 = vadd.f32 %v767_v4, %v119_v50  ;;  %v173_v57 = vadd.f32 %v767_v4, %v120_v51  ;;  %v210_v59 = vmax.f32 %v161_v49, 0.0  ;;  %v81_v10 = vmul.f32 %v762_v3, %v28_v0 }
   0xf   :  { %v229_v62 = vpack.c.bf16 %v182_v53, %v181_v52  ;;  %v236_v63 = vpack.c.bf16 %v196_v55, %v195_v54  ;;  %v82_v11 = vmul.f32 %v762_v3, %v29_v1  ;;  %v95_v12 = vmul.f32 %v762_v3, %v42_v6  ;;  %v70_v52 = vld [vmem:[%s1338_s0 + $0x170] sm:$0xff]  ;;  %v71_v53 = vld [vmem:[%s1338_s0 + $0x178] sm:$0xff] }
  0x10   :  { %v221_v60 = vmax.f32 %v172_v56, 0.0  ;;  %v222_v61 = vmax.f32 %v173_v57, 0.0  ;;  %v243_v5 = vpack.c.bf16 %v210_v59, %v209_v58  ;;  %v96_v13 = vmul.f32 %v762_v3, %v43_v7 }
  0x11   :  { %v109_v14 = vmul.f32 %v762_v3, %v56_v8  ;;  %v110_v15 = vmul.f32 %v762_v3, %v57_v9  ;;  %v121_v18 = vmul.f32 %v762_v3, %v68_v16  ;;  %v122_v19 = vmul.f32 %v762_v3, %v69_v17  ;;  %v46_v16 = vld [vmem:[%s1338_s0 + $0xb0] sm:$0xff]  ;;  %v47_v17 = vld [vmem:[%s1338_s0 + $0xb8] sm:$0xff] }
  0x12   :  { %v249_v2 = vpack.c.bf16 %v222_v61, %v221_v60  ;;  %v134_v20 = vadd.f32 %v767_v4, %v81_v10  ;;  %v135_v21 = vadd.f32 %v767_v4, %v82_v11  ;;  %v148_v22 = vadd.f32 %v767_v4, %v95_v12 }
  0x13   :  { %v149_v23 = vadd.f32 %v767_v4, %v96_v13  ;;  %v174_v24 = vadd.f32 %v767_v4, %v121_v18  ;;  %v175_v25 = vadd.f32 %v767_v4, %v122_v19  ;;  %v162_v26 = vadd.f32 %v767_v4, %v109_v14  ;;  %v32_v13 = vld [vmem:[%s1338_s0 + $0x40] sm:$0xff]  ;;  %v61_v19 = vld [vmem:[%s1338_s0 + $0x128] sm:$0xff] }
  0x14   :  { %703 = vmatmul.msk.bf16.vlgmr.msra.gmra.mxu3 %vm261_vm0, %v249_v2  ;;  %v163_v27 = vadd.f32 %v767_v4, %v110_v15  ;;  %v183_v30 = vmax.f32 %v134_v20, 0.0  ;;  %v184_v31 = vmax.f32 %v135_v21, 0.0  ;;  %v197_v32 = vmax.f32 %v148_v22, 0.0  ;;  %v33_v15 = vld [vmem:[%s1338_s0 + $0x48] sm:$0xff]  ;;  %v60_v18 = vld [vmem:[%s1338_s0 + $0x120] sm:$0xff] }
  0x15   :  { %v223_v28 = vmax.f32 %v174_v24, 0.0  ;;  %v224_v29 = vmax.f32 %v175_v25, 0.0  ;;  %v198_v33 = vmax.f32 %v149_v23, 0.0  ;;  %v211_v34 = vmax.f32 %v162_v26, 0.0  ;;  %v72_v26 = vld [vmem:[%s1338_s0 + $0x180] sm:$0xff] }
  0x16   :  { %v212_v35 = vmax.f32 %v163_v27, 0.0  ;;  %v230_v37 = vpack.c.bf16 %v184_v31, %v183_v30  ;;  %v83_v46 = vmul.f32 %v762_v3, %v30_v39  ;;  %v84_v47 = vmul.f32 %v762_v3, %v31_v40 }
  0x17   :  { %v250_v36 = vpack.c.bf16 %v224_v29, %v223_v28  ;;  %v237_v38 = vpack.c.bf16 %v198_v33, %v197_v32  ;;  %v97_v48 = vmul.f32 %v762_v3, %v44_v42  ;;  %v98_v49 = vmul.f32 %v762_v3, %v45_v43 }
  0x18   :  { %v244_v41 = vpack.c.bf16 %v212_v35, %v211_v34  ;;  %v111_v50 = vmul.f32 %v762_v3, %v58_v44  ;;  %v112_v51 = vmul.f32 %v762_v3, %v59_v45  ;;  %v123_v54 = vmul.f32 %v762_v3, %v70_v52  ;;  %v34_v45 = vld [vmem:[%s1338_s0 + $0x50] sm:$0xff] }
  0x19   :  { %v124_v55 = vmul.f32 %v762_v3, %v71_v53  ;;  %v136_v56 = vadd.f32 %v767_v4, %v83_v46  ;;  %v137_v57 = vadd.f32 %v767_v4, %v84_v47  ;;  %v150_v58 = vadd.f32 %v767_v4, %v97_v48  ;;  %v35_v47 = vld [vmem:[%s1338_s0 + $0x58] sm:$0xff]  ;;  %v48_v48 = vld [vmem:[%s1338_s0 + $0xc0] sm:$0xff] }
  0x1a   :  { %v151_v59 = vadd.f32 %v767_v4, %v98_v49  ;;  %v176_v60 = vadd.f32 %v767_v4, %v123_v54  ;;  %v85_v20 = vmul.f32 %v762_v3, %v32_v13  ;;  %v86_v21 = vmul.f32 %v762_v3, %v33_v15  ;;  %v49_v49 = vld [vmem:[%s1338_s0 + $0xc8] sm:$0xff]  ;;  %v50_v13 = vld [vmem:[%s1338_s0 + $0xd0] sm:$0xff]  ;;  %v64_v15 = vld [vmem:[%s1338_s0 + $0x140] sm:$0xff] }
  0x1b   :  { %v177_v61 = vadd.f32 %v767_v4, %v124_v55  ;;  %v185_v2 = vmax.f32 %v136_v56, 0.0  ;;  %v199_v6 = vmax.f32 %v150_v58, 0.0  ;;  %v99_v22 = vmul.f32 %v762_v3, %v46_v16  ;;  %v65_v16 = vld [vmem:[%s1338_s0 + $0x148] sm:$0xff] }
  0x1c   :  { %683 = vmatmul.msk.bf16.gmra.mxu0 %vm261_vm0, %v229_v62  ;;  %v164_v62 = vadd.f32 %v767_v4, %v111_v50  ;;  %v225_v0 = vmax.f32 %v176_v60, 0.0  ;;  %v200_v7 = vmax.f32 %v151_v59, 0.0  ;;  %v100_v23 = vmul.f32 %v762_v3, %v47_v17  ;;  %v62_v50 = vld [vmem:[%s1338_s0 + $0x130] sm:$0xff] }
  0x1d   :  { %690 = vmatmul.msk.bf16.gmra.mxu1 %vm261_vm0, %v236_v63  ;;  %v165_v63 = vadd.f32 %v767_v4, %v112_v51  ;;  %v226_v1 = vmax.f32 %v177_v61, 0.0  ;;  %v113_v24 = vmul.f32 %v762_v3, %v60_v18  ;;  %v114_v25 = vmul.f32 %v762_v3, %v61_v19  ;;  %v63_v51 = vld [vmem:[%s1338_s0 + $0x138] sm:$0xff] }
  0x1e   :  { %697 = vmatmul.msk.bf16.gmra.mxu2 %vm261_vm0, %v243_v5  ;;  %v186_v5 = vmax.f32 %v137_v57, 0.0  ;;  %v213_v8 = vmax.f32 %v164_v62, 0.0  ;;  %v238_v12 = vpack.c.bf16 %v200_v7, %v199_v6  ;;  %v125_v27 = vmul.f32 %v762_v3, %v72_v26 }
  0x1f   :  { %v214_v9 = vmax.f32 %v165_v63, 0.0  ;;  %v251_v10 = vpack.c.bf16 %v226_v1, %v225_v0  ;;  %v138_v28 = vadd.f32 %v767_v4, %v85_v20  ;;  %v139_v29 = vadd.f32 %v767_v4, %v86_v21 }
  0x20   :  { %v231_v11 = vpack.c.bf16 %v186_v5, %v185_v2  ;;  %v152_v30 = vadd.f32 %v767_v4, %v99_v22  ;;  %v153_v31 = vadd.f32 %v767_v4, %v100_v23  ;;  %v178_v32 = vadd.f32 %v767_v4, %v125_v27 }
  0x21   :  { %v245_v14 = vpack.c.bf16 %v214_v9, %v213_v8  ;;  %v166_v33 = vadd.f32 %v767_v4, %v113_v24  ;;  %v167_v34 = vadd.f32 %v767_v4, %v114_v25  ;;  %v87_v52 = vmul.f32 %v762_v3, %v34_v45 }
  0x22   :  { %v227_v35 = vmax.f32 %v178_v32, 0.0  ;;  %v202_v39 = vmax.f32 %v153_v31, 0.0  ;;  %v88_v53 = vmul.f32 %v762_v3, %v35_v47  ;;  %v101_v54 = vmul.f32 %v762_v3, %v48_v48 }
  0x23   :  { %v215_v40 = vmax.f32 %v166_v33, 0.0  ;;  %v102_v55 = vmul.f32 %v762_v3, %v49_v49  ;;  %v115_v56 = vmul.f32 %v762_v3, %v62_v50  ;;  %v116_v57 = vmul.f32 %v762_v3, %v63_v51 }
  0x24   :  { %704 = vmatmul.msk.bf16.gmra.mxu3 %vm261_vm0, %v250_v36  ;;  %v187_v36 = vmax.f32 %v138_v28, 0.0  ;;  %v252_v42 = vpack.c.bf16 %v227_v35, %v227_v35  ;;  %v140_v58 = vadd.f32 %v767_v4, %v87_v52  ;;  %v141_v59 = vadd.f32 %v767_v4, %v88_v53 }
  0x25   :  { %v154_v60 = vadd.f32 %v767_v4, %v101_v54  ;;  %v155_v61 = vadd.f32 %v767_v4, %v102_v55  ;;  %v168_v62 = vadd.f32 %v767_v4, %v115_v56  ;;  %v169_v63 = vadd.f32 %v767_v4, %v116_v57 }
  0x26   :  { %v189_v0 = vmax.f32 %v140_v58, 0.0  ;;  %v190_v1 = vmax.f32 %v141_v59, 0.0  ;;  %v103_v19 = vmul.f32 %v762_v3, %v50_v13  ;;  %v117_v21 = vmul.f32 %v762_v3, %v64_v15 }
  0x27   :  { %v203_v2 = vmax.f32 %v154_v60, 0.0  ;;  %v204_v5 = vmax.f32 %v155_v61, 0.0  ;;  %v217_v6 = vmax.f32 %v168_v62, 0.0  ;;  %v218_v7 = vmax.f32 %v169_v63, 0.0 }
  0x28   :  { %v233_v8 = vpack.c.bf16 %v190_v1, %v189_v0  ;;  %v118_v22 = vmul.f32 %v762_v3, %v65_v16  ;;  %v156_v25 = vadd.f32 %v767_v4, %v103_v19  ;;  %v170_v27 = vadd.f32 %v767_v4, %v117_v21 }
  0x29   :  { %v240_v9 = vpack.c.bf16 %v204_v5, %v203_v2 }
  0x2a   :  { %v171_v28 = vadd.f32 %v767_v4, %v118_v22  ;;  %v205_v31 = vmax.f32 %v156_v25, 0.0  ;;  %v219_v33 = vmax.f32 %v170_v27, 0.0 }
  0x2c   :  { %684 = vmatmul.msk.bf16.gmra.mxu0 %vm261_vm0, %v230_v37  ;;  %v188_v37 = vmax.f32 %v139_v29, 0.0 }
  0x2d   :  { %691 = vmatmul.msk.bf16.gmra.mxu1 %vm261_vm0, %v237_v38  ;;  %v201_v38 = vmax.f32 %v152_v30, 0.0 }
  0x2e   :  { %698 = vmatmul.msk.bf16.gmra.mxu2 %vm261_vm0, %v244_v41  ;;  %v216_v41 = vmax.f32 %v167_v34, 0.0  ;;  %v232_v43 = vpack.c.bf16 %v188_v37, %v187_v36  ;;  %v220_v34 = vmax.f32 %v171_v28, 0.0  ;;  %v1036_v37 = vld [vmem:[%s1341_s4] ss:$0 sm:$0xff] }
  0x2f   :  { %v239_v44 = vpack.c.bf16 %v202_v39, %v201_v38 }
  0x30   :  { %v246_v46 = vpack.c.bf16 %v216_v41, %v215_v40  ;;  %v248_v36 = vpack.c.bf16 %v220_v34, %v219_v33 }
  0x34   :  { %705 = vmatmul.msk.bf16.gmra.mxu3 %vm261_vm0, %v251_v10  ;;  %v36_v10 = vld [vmem:[%s1338_s0 + $0x60] sm:$0xff] }
  0x35   :  { %v89_v17 = vmul.f32 %v762_v3, %v36_v10 }
  0x37   :  { %v142_v23 = vadd.f32 %v767_v4, %v89_v17 }
  0x39   :  { %v191_v29 = vmax.f32 %v142_v23, 0.0 }
  0x3c   :  { %685 = vmatmul.msk.bf16.gmra.mxu0 %vm261_vm0, %v231_v11  ;;  %v247_v11 = vpack.c.bf16 %v218_v7, %v217_v6 }
  0x3d   :  { %692 = vmatmul.msk.bf16.gmra.mxu1 %vm261_vm0, %v238_v12  ;;  %v37_v12 = vld [vmem:[%s1338_s0 + $0x68] sm:$0xff] }
  0x3e   :  { %699 = vmatmul.msk.bf16.gmra.mxu2 %vm261_vm0, %v245_v14  ;;  %v51_v14 = vld [vmem:[%s1338_s0 + $0xd8] sm:$0xff]  ;;  %v90_v18 = vmul.f32 %v762_v3, %v37_v12 }
  0x3f   :  { %v104_v20 = vmul.f32 %v762_v3, %v51_v14 }
  0x40   :  { %v143_v24 = vadd.f32 %v767_v4, %v90_v18 }
  0x41   :  { %v157_v26 = vadd.f32 %v767_v4, %v104_v20  ;;  %v1041_v4 = vld [vmem:[%s1342_s5] ss:$0 sm:$0xff] }
  0x42   :  { %v192_v30 = vmax.f32 %v143_v24, 0.0 }
  0x43   :  { %v206_v32 = vmax.f32 %v157_v26, 0.0 }
  0x44   :  { %706 = vmatmul.msk.bf16.gmra.mxu3 %vm261_vm0, %v252_v42  ;;  %v234_v35 = vpack.c.bf16 %v192_v30, %v191_v29 }
  0x45   :  { %v241_v3 = vpack.c.bf16 %v206_v32, %v205_v31 }
  0x4c   :  { %686 = vmatmul.msk.bf16.gmra.mxu0 %vm261_vm0, %v232_v43 }
  0x4d   :  { %693 = vmatmul.msk.bf16.gmra.mxu1 %vm261_vm0, %v239_v44 }
  0x4e   :  { %700 = vmatmul.msk.bf16.gmra.mxu2 %vm261_vm0, %v246_v46 }
  0x5c   :  { %687 = vmatmul.msk.bf16.gmra.mxu0 %vm261_vm0, %v233_v8 }
  0x5d   :  { %694 = vmatmul.msk.bf16.gmra.mxu1 %vm261_vm0, %v240_v9 }
  0x5e   :  { %701 = vmatmul.msk.bf16.gmra.mxu2 %vm261_vm0, %v247_v11 }
  0x6c   :  { %688 = vmatmul.msk.bf16.gmra.mxu0 %vm261_vm0, %v234_v35 }
  0x6d   :  { %695 = vmatmul.msk.bf16.gmra.mxu1 %vm261_vm0, %v241_v3 }
  0x6e   :  { %702 = vmatmul.msk.bf16.gmra.mxu2 %vm261_vm0, %v248_v36 }
  0x89   :  { %v346_v38 = vpop.f32.mrf.mxu0 }
  0x8a   :  { %v381_v39 = vpop.f32.mrf.mxu1  ;;  %v474_v40 = vmul.f32 %v1036_v37, %v346_v38 }
  0x8b   :  { %v488_v41 = vmul.f32 %v1036_v37, %v381_v39 }
  0x8c   :  { %v527_v42 = vadd.f32 %v1041_v4, %v474_v40 }
  0x8d   :  { %v541_v43 = vadd.f32 %v1041_v4, %v488_v41 }
  0x8e   :  { %v576_v44 = vmax.f32 %v527_v42, 0.0 }
  0x8f   :  { %v590_v45 = vmax.f32 %v541_v43, 0.0 }
  0x90   :  { %625 = vst.msk [vmem:[%s1343_s6] sm:$0xff] %vm261_vm0, %v576_v44 }
  0x91   :  { %v416_v46 = vpop.f32.mrf.mxu2  ;;  %639 = vst.msk [vmem:[%s1343_s6 + $0x70] sm:$0xff] %vm261_vm0, %v590_v45  ;;  %v348_v48 = vpop.f32.mrf.mxu0 }
  0x92   :  { %v502_v47 = vmul.f32 %v1036_v37, %v416_v46  ;;  %v383_v49 = vpop.f32.mrf.mxu1  ;;  %v475_v50 = vmul.f32 %v1036_v37, %v348_v48 }
  0x93   :  { %v489_v51 = vmul.f32 %v1036_v37, %v383_v49 }
  0x94   :  { %v555_v52 = vadd.f32 %v1041_v4, %v502_v47  ;;  %v528_v53 = vadd.f32 %v1041_v4, %v475_v50 }
  0x95   :  { %v542_v54 = vadd.f32 %v1041_v4, %v489_v51 }
  0x96   :  { %v604_v55 = vmax.f32 %v555_v52, 0.0  ;;  %v577_v56 = vmax.f32 %v528_v53, 0.0 }
  0x97   :  { %v591_v57 = vmax.f32 %v542_v54, 0.0  ;;  %v451_v8 = vpop.f32.mrf.mxu3 }
  0x98   :  { %653 = vst.msk [vmem:[%s1343_s6 + $0xe0] sm:$0xff] %vm261_vm0, %v604_v55  ;;  %v516_v13 = vmul.f32 %v1036_v37, %v451_v8 }
  0x99   :  { %626 = vst.msk [vmem:[%s1343_s6 + $0x8] sm:$0xff] %vm261_vm0, %v577_v56  ;;  %v418_v58 = vpop.f32.mrf.mxu2  ;;  %v351_v60 = vpop.f32.mrf.mxu0 }
  0x9a   :  { %640 = vst.msk [vmem:[%s1343_s6 + $0x78] sm:$0xff] %vm261_vm0, %v591_v57  ;;  %v503_v59 = vmul.f32 %v1036_v37, %v418_v58  ;;  %v386_v61 = vpop.f32.mrf.mxu1  ;;  %v476_v62 = vmul.f32 %v1036_v37, %v351_v60  ;;  %v569_v17 = vadd.f32 %v1041_v4, %v516_v13 }
  0x9b   :  { %v490_v63 = vmul.f32 %v1036_v37, %v386_v61 }
  0x9c   :  { %v556_v0 = vadd.f32 %v1041_v4, %v503_v59  ;;  %v529_v1 = vadd.f32 %v1041_v4, %v476_v62  ;;  %v618_v23 = vmax.f32 %v569_v17, 0.0 }
  0x9d   :  { %v543_v2 = vadd.f32 %v1041_v4, %v490_v63 }
  0x9e   :  { %v605_v5 = vmax.f32 %v556_v0, 0.0  ;;  %v578_v6 = vmax.f32 %v529_v1, 0.0  ;;  %667 = vst.msk [vmem:[%s1343_s6 + $0x150] sm:$0xff] %vm261_vm0, %v618_v23 }
  0x9f   :  { %v592_v7 = vmax.f32 %v543_v2, 0.0  ;;  %v453_v24 = vpop.f32.mrf.mxu3 }
  0xa0   :  { %654 = vst.msk [vmem:[%s1343_s6 + $0xe8] sm:$0xff] %vm261_vm0, %v605_v5  ;;  %v517_v26 = vmul.f32 %v1036_v37, %v453_v24 }
  0xa1   :  { %627 = vst.msk [vmem:[%s1343_s6 + $0x10] sm:$0xff] %vm261_vm0, %v578_v6  ;;  %v421_v9 = vpop.f32.mrf.mxu2  ;;  %v353_v11 = vpop.f32.mrf.mxu0 }
  0xa2   :  { %641 = vst.msk [vmem:[%s1343_s6 + $0x80] sm:$0xff] %vm261_vm0, %v592_v7  ;;  %v504_v10 = vmul.f32 %v1036_v37, %v421_v9  ;;  %v388_v12 = vpop.f32.mrf.mxu1  ;;  %v477_v14 = vmul.f32 %v1036_v37, %v353_v11  ;;  %v570_v32 = vadd.f32 %v1041_v4, %v517_v26 }
  0xa3   :  { %v491_v15 = vmul.f32 %v1036_v37, %v388_v12 }
  0xa4   :  { %v557_v16 = vadd.f32 %v1041_v4, %v504_v10  ;;  %v530_v18 = vadd.f32 %v1041_v4, %v477_v14  ;;  %v619_v3 = vmax.f32 %v570_v32, 0.0 }
  0xa5   :  { %v544_v19 = vadd.f32 %v1041_v4, %v491_v15 }
  0xa6   :  { %v606_v20 = vmax.f32 %v557_v16, 0.0  ;;  %v579_v21 = vmax.f32 %v530_v18, 0.0  ;;  %668 = vst.msk [vmem:[%s1343_s6 + $0x158] sm:$0xff] %vm261_vm0, %v619_v3 }
  0xa7   :  { %v593_v22 = vmax.f32 %v544_v19, 0.0  ;;  %v456_v40 = vpop.f32.mrf.mxu3 }
  0xa8   :  { %655 = vst.msk [vmem:[%s1343_s6 + $0xf0] sm:$0xff] %vm261_vm0, %v606_v20  ;;  %v518_v45 = vmul.f32 %v1036_v37, %v456_v40 }
  0xa9   :  { %628 = vst.msk [vmem:[%s1343_s6 + $0x18] sm:$0xff] %vm261_vm0, %v579_v21  ;;  %v423_v25 = vpop.f32.mrf.mxu2  ;;  %v356_v28 = vpop.f32.mrf.mxu0 }
  0xaa   :  { %642 = vst.msk [vmem:[%s1343_s6 + $0x88] sm:$0xff] %vm261_vm0, %v593_v22  ;;  %v505_v27 = vmul.f32 %v1036_v37, %v423_v25  ;;  %v391_v29 = vpop.f32.mrf.mxu1  ;;  %v478_v30 = vmul.f32 %v1036_v37, %v356_v28  ;;  %v571_v49 = vadd.f32 %v1041_v4, %v518_v45 }
  0xab   :  { %v492_v31 = vmul.f32 %v1036_v37, %v391_v29 }
  0xac   :  { %v558_v33 = vadd.f32 %v1041_v4, %v505_v27  ;;  %v531_v34 = vadd.f32 %v1041_v4, %v478_v30  ;;  %v620_v55 = vmax.f32 %v571_v49, 0.0 }
  0xad   :  { %v545_v35 = vadd.f32 %v1041_v4, %v492_v31 }
  0xae   :  { %v607_v36 = vmax.f32 %v558_v33, 0.0  ;;  %v580_v38 = vmax.f32 %v531_v34, 0.0  ;;  %669 = vst.msk [vmem:[%s1343_s6 + $0x160] sm:$0xff] %vm261_vm0, %v620_v55 }
  0xaf   :  { %v594_v39 = vmax.f32 %v545_v35, 0.0  ;;  %v458_v56 = vpop.f32.mrf.mxu3 }
  0xb0   :  { %656 = vst.msk [vmem:[%s1343_s6 + $0xf8] sm:$0xff] %vm261_vm0, %v607_v36  ;;  %v519_v58 = vmul.f32 %v1036_v37, %v458_v56 }
  0xb1   :  { %629 = vst.msk [vmem:[%s1343_s6 + $0x20] sm:$0xff] %vm261_vm0, %v580_v38  ;;  %v426_v41 = vpop.f32.mrf.mxu2  ;;  %v358_v43 = vpop.f32.mrf.mxu0 }
  0xb2   :  { %643 = vst.msk [vmem:[%s1343_s6 + $0x90] sm:$0xff] %vm261_vm0, %v594_v39  ;;  %v506_v42 = vmul.f32 %v1036_v37, %v426_v41  ;;  %v393_v44 = vpop.f32.mrf.mxu1  ;;  %v479_v46 = vmul.f32 %v1036_v37, %v358_v43  ;;  %v572_v0 = vadd.f32 %v1041_v4, %v519_v58 }
  0xb3   :  { %v493_v47 = vmul.f32 %v1036_v37, %v393_v44 }
  0xb4   :  { %v559_v48 = vadd.f32 %v1041_v4, %v506_v42  ;;  %v532_v50 = vadd.f32 %v1041_v4, %v479_v46  ;;  %v621_v6 = vmax.f32 %v572_v0, 0.0 }
  0xb5   :  { %v546_v51 = vadd.f32 %v1041_v4, %v493_v47 }
  0xb6   :  { %v608_v52 = vmax.f32 %v559_v48, 0.0  ;;  %v581_v53 = vmax.f32 %v532_v50, 0.0  ;;  %670 = vst.msk [vmem:[%s1343_s6 + $0x168] sm:$0xff] %vm261_vm0, %v621_v6 }
  0xb7   :  { %v595_v54 = vmax.f32 %v546_v51, 0.0  ;;  %v461_v10 = vpop.f32.mrf.mxu3 }
  0xb8   :  { %657 = vst.msk [vmem:[%s1343_s6 + $0x100] sm:$0xff] %vm261_vm0, %v608_v52  ;;  %v520_v15 = vmul.f32 %v1036_v37, %v461_v10 }
  0xb9   :  { %630 = vst.msk [vmem:[%s1343_s6 + $0x28] sm:$0xff] %vm261_vm0, %v581_v53  ;;  %v428_v57 = vpop.f32.mrf.mxu2  ;;  %v361_v60 = vpop.f32.mrf.mxu0 }
  0xba   :  { %644 = vst.msk [vmem:[%s1343_s6 + $0x98] sm:$0xff] %vm261_vm0, %v595_v54  ;;  %v507_v59 = vmul.f32 %v1036_v37, %v428_v57  ;;  %v396_v61 = vpop.f32.mrf.mxu1  ;;  %v480_v62 = vmul.f32 %v1036_v37, %v361_v60  ;;  %v573_v19 = vadd.f32 %v1041_v4, %v520_v15 }
  0xbb   :  { %v494_v63 = vmul.f32 %v1036_v37, %v396_v61 }
  0xbc   :  { %v560_v1 = vadd.f32 %v1041_v4, %v507_v59  ;;  %v533_v2 = vadd.f32 %v1041_v4, %v480_v62  ;;  %v622_v25 = vmax.f32 %v573_v19, 0.0 }
  0xbd   :  { %v547_v5 = vadd.f32 %v1041_v4, %v494_v63 }
  0xbe   :  { %v609_v7 = vmax.f32 %v560_v1, 0.0  ;;  %v582_v8 = vmax.f32 %v533_v2, 0.0  ;;  %671 = vst.msk [vmem:[%s1343_s6 + $0x170] sm:$0xff] %vm261_vm0, %v622_v25 }
  0xbf   :  { %v596_v9 = vmax.f32 %v547_v5, 0.0  ;;  %v463_v26 = vpop.f32.mrf.mxu3 }
  0xc0   :  { %658 = vst.msk [vmem:[%s1343_s6 + $0x108] sm:$0xff] %vm261_vm0, %v609_v7  ;;  %v521_v28 = vmul.f32 %v1036_v37, %v463_v26 }
  0xc1   :  { %631 = vst.msk [vmem:[%s1343_s6 + $0x30] sm:$0xff] %vm261_vm0, %v582_v8  ;;  %v431_v11 = vpop.f32.mrf.mxu2  ;;  %v363_v13 = vpop.f32.mrf.mxu0 }
  0xc2   :  { %645 = vst.msk [vmem:[%s1343_s6 + $0xa0] sm:$0xff] %vm261_vm0, %v596_v9  ;;  %v508_v12 = vmul.f32 %v1036_v37, %v431_v11  ;;  %v398_v14 = vpop.f32.mrf.mxu1  ;;  %v481_v16 = vmul.f32 %v1036_v37, %v363_v13  ;;  %v574_v34 = vadd.f32 %v1041_v4, %v521_v28 }
  0xc3   :  { %v495_v17 = vmul.f32 %v1036_v37, %v398_v14 }
  0xc4   :  { %v561_v18 = vadd.f32 %v1041_v4, %v508_v12  ;;  %v534_v20 = vadd.f32 %v1041_v4, %v481_v16  ;;  %v623_v38 = vmax.f32 %v574_v34, 0.0 }
  0xc5   :  { %v548_v21 = vadd.f32 %v1041_v4, %v495_v17 }
  0xc6   :  { %v610_v22 = vmax.f32 %v561_v18, 0.0  ;;  %v583_v23 = vmax.f32 %v534_v20, 0.0  ;;  %672 = vst.msk [vmem:[%s1343_s6 + $0x178] sm:$0xff] %vm261_vm0, %v623_v38 }
  0xc7   :  { %v597_v24 = vmax.f32 %v548_v21, 0.0  ;;  %v466_v42 = vpop.f32.mrf.mxu3 }
  0xc8   :  { %659 = vst.msk [vmem:[%s1343_s6 + $0x110] sm:$0xff] %vm261_vm0, %v610_v22  ;;  %v522_v47 = vmul.f32 %v1036_v37, %v466_v42 }
  0xc9   :  { %632 = vst.msk [vmem:[%s1343_s6 + $0x38] sm:$0xff] %vm261_vm0, %v583_v23  ;;  %v433_v27 = vpop.f32.mrf.mxu2  ;;  %v366_v30 = vpop.f32.mrf.mxu0 }
  0xca   :  { %646 = vst.msk [vmem:[%s1343_s6 + $0xa8] sm:$0xff] %vm261_vm0, %v597_v24  ;;  %v509_v29 = vmul.f32 %v1036_v37, %v433_v27  ;;  %v401_v31 = vpop.f32.mrf.mxu1  ;;  %v482_v32 = vmul.f32 %v1036_v37, %v366_v30  ;;  %v575_v51 = vadd.f32 %v1041_v4, %v522_v47 }
  0xcb   :  { %v496_v33 = vmul.f32 %v1036_v37, %v401_v31 }
  0xcc   :  { %v562_v35 = vadd.f32 %v1041_v4, %v509_v29  ;;  %v535_v3 = vadd.f32 %v1041_v4, %v482_v32  ;;  %v624_v57 = vmax.f32 %v575_v51, 0.0 }
  0xcd   :  { %v549_v36 = vadd.f32 %v1041_v4, %v496_v33 }
  0xce   :  { %v611_v39 = vmax.f32 %v562_v35, 0.0  ;;  %v584_v40 = vmax.f32 %v535_v3, 0.0  ;;  %673 = vst.msk [vmem:[%s1343_s6 + $0x180] sm:$0xff] %vm261_vm0, %v624_v57 }
  0xcf   :  { %v598_v41 = vmax.f32 %v549_v36, 0.0  ;;  %v468_v58 = vpop.f32.mrf.mxu3 }
  0xd0   :  { %660 = vst.msk [vmem:[%s1343_s6 + $0x118] sm:$0xff] %vm261_vm0, %v611_v39 }
  0xd1   :  { %633 = vst.msk [vmem:[%s1343_s6 + $0x40] sm:$0xff] %vm261_vm0, %v584_v40  ;;  %v436_v43 = vpop.f32.mrf.mxu2  ;;  %v368_v45 = vpop.f32.mrf.mxu0 }
  0xd2   :  { %647 = vst.msk [vmem:[%s1343_s6 + $0xb0] sm:$0xff] %vm261_vm0, %v598_v41  ;;  %v510_v44 = vmul.f32 %v1036_v37, %v436_v43  ;;  %v403_v46 = vpop.f32.mrf.mxu1  ;;  %v483_v48 = vmul.f32 %v1036_v37, %v368_v45 }
  0xd3   :  { %v497_v49 = vmul.f32 %v1036_v37, %v403_v46 }
  0xd4   :  { %v563_v50 = vadd.f32 %v1041_v4, %v510_v44  ;;  %v536_v52 = vadd.f32 %v1041_v4, %v483_v48 }
  0xd5   :  { %v550_v53 = vadd.f32 %v1041_v4, %v497_v49 }
  0xd6   :  { %v612_v54 = vmax.f32 %v563_v50, 0.0  ;;  %v585_v55 = vmax.f32 %v536_v52, 0.0 }
  0xd7   :  { %v599_v56 = vmax.f32 %v550_v53, 0.0 }
  0xd8   :  { %661 = vst.msk [vmem:[%s1343_s6 + $0x120] sm:$0xff] %vm261_vm0, %v612_v54 }
  0xd9   :  { %634 = vst.msk [vmem:[%s1343_s6 + $0x48] sm:$0xff] %vm261_vm0, %v585_v55  ;;  %v438_v59 = vpop.f32.mrf.mxu2  ;;  %v371_v61 = vpop.f32.mrf.mxu0 }
  0xda   :  { %648 = vst.msk [vmem:[%s1343_s6 + $0xb8] sm:$0xff] %vm261_vm0, %v599_v56  ;;  %v511_v60 = vmul.f32 %v1036_v37, %v438_v59  ;;  %v406_v62 = vpop.f32.mrf.mxu1  ;;  %v484_v63 = vmul.f32 %v1036_v37, %v371_v61 }
  0xdb   :  { %v498_v0 = vmul.f32 %v1036_v37, %v406_v62 }
  0xdc   :  { %v564_v1 = vadd.f32 %v1041_v4, %v511_v60  ;;  %v537_v2 = vadd.f32 %v1041_v4, %v484_v63 }
  0xdd   :  { %v551_v5 = vadd.f32 %v1041_v4, %v498_v0 }
  0xde   :  { %v613_v6 = vmax.f32 %v564_v1, 0.0  ;;  %v586_v7 = vmax.f32 %v537_v2, 0.0 }
  0xdf   :  { %v600_v8 = vmax.f32 %v551_v5, 0.0 }
  0xe0   :  { %662 = vst.msk [vmem:[%s1343_s6 + $0x128] sm:$0xff] %vm261_vm0, %v613_v6 }
  0xe1   :  { %635 = vst.msk [vmem:[%s1343_s6 + $0x50] sm:$0xff] %vm261_vm0, %v586_v7  ;;  %v441_v9 = vpop.f32.mrf.mxu2  ;;  %v373_v11 = vpop.f32.mrf.mxu0 }
  0xe2   :  { %649 = vst.msk [vmem:[%s1343_s6 + $0xc0] sm:$0xff] %vm261_vm0, %v600_v8  ;;  %v512_v10 = vmul.f32 %v1036_v37, %v441_v9  ;;  %v408_v12 = vpop.f32.mrf.mxu1  ;;  %v485_v13 = vmul.f32 %v1036_v37, %v373_v11 }
  0xe3   :  { %v499_v14 = vmul.f32 %v1036_v37, %v408_v12 }
  0xe4   :  { %v565_v15 = vadd.f32 %v1041_v4, %v512_v10  ;;  %v538_v16 = vadd.f32 %v1041_v4, %v485_v13 }
  0xe5   :  { %v552_v17 = vadd.f32 %v1041_v4, %v499_v14 }
  0xe6   :  { %v614_v18 = vmax.f32 %v565_v15, 0.0  ;;  %v587_v19 = vmax.f32 %v538_v16, 0.0 }
  0xe7   :  { %v601_v20 = vmax.f32 %v552_v17, 0.0 }
  0xe8   :  { %663 = vst.msk [vmem:[%s1343_s6 + $0x130] sm:$0xff] %vm261_vm0, %v614_v18 }
  0xe9   :  { %636 = vst.msk [vmem:[%s1343_s6 + $0x58] sm:$0xff] %vm261_vm0, %v587_v19  ;;  %v443_v21 = vpop.f32.mrf.mxu2  ;;  %v376_v23 = vpop.f32.mrf.mxu0 }
  0xea   :  { %650 = vst.msk [vmem:[%s1343_s6 + $0xc8] sm:$0xff] %vm261_vm0, %v601_v20  ;;  %v513_v22 = vmul.f32 %v1036_v37, %v443_v21  ;;  %v411_v24 = vpop.f32.mrf.mxu1  ;;  %v486_v25 = vmul.f32 %v1036_v37, %v376_v23 }
  0xeb   :  { %v500_v26 = vmul.f32 %v1036_v37, %v411_v24 }
  0xec   :  { %v566_v27 = vadd.f32 %v1041_v4, %v513_v22  ;;  %v539_v28 = vadd.f32 %v1041_v4, %v486_v25 }
  0xed   :  { %v553_v29 = vadd.f32 %v1041_v4, %v500_v26 }
  0xee   :  { %v615_v30 = vmax.f32 %v566_v27, 0.0  ;;  %v588_v31 = vmax.f32 %v539_v28, 0.0 }
  0xef   :  { %v602_v32 = vmax.f32 %v553_v29, 0.0 }
  0xf0   :  { %664 = vst.msk [vmem:[%s1343_s6 + $0x138] sm:$0xff] %vm261_vm0, %v615_v30 }
  0xf1   :  { %637 = vst.msk [vmem:[%s1343_s6 + $0x60] sm:$0xff] %vm261_vm0, %v588_v31  ;;  %v446_v33 = vpop.f32.mrf.mxu2  ;;  %v378_v35 = vpop.f32.mrf.mxu0 }
  0xf2   :  { %651 = vst.msk [vmem:[%s1343_s6 + $0xd0] sm:$0xff] %vm261_vm0, %v602_v32  ;;  %v514_v34 = vmul.f32 %v1036_v37, %v446_v33  ;;  %v413_v3 = vpop.f32.mrf.mxu1  ;;  %v487_v36 = vmul.f32 %v1036_v37, %v378_v35 }
  0xf3   :  { %v501_v38 = vmul.f32 %v1036_v37, %v413_v3 }
  0xf4   :  { %v567_v39 = vadd.f32 %v1041_v4, %v514_v34  ;;  %v540_v40 = vadd.f32 %v1041_v4, %v487_v36 }
  0xf5   :  { %v554_v41 = vadd.f32 %v1041_v4, %v501_v38 }
  0xf6   :  { %v616_v42 = vmax.f32 %v567_v39, 0.0  ;;  %v589_v43 = vmax.f32 %v540_v40, 0.0 }
  0xf7   :  { %v603_v44 = vmax.f32 %v554_v41, 0.0 }
  0xf8   :  { %665 = vst.msk [vmem:[%s1343_s6 + $0x140] sm:$0xff] %vm261_vm0, %v616_v42 }
  0xf9   :  { %638 = vst.msk [vmem:[%s1343_s6 + $0x68] sm:$0xff] %vm261_vm0, %v589_v43  ;;  %v448_v45 = vpop.f32.mrf.mxu2 }
  0xfa   :  { %652 = vst.msk [vmem:[%s1343_s6 + $0xd8] sm:$0xff] %vm261_vm0, %v603_v44  ;;  %v515_v46 = vmul.f32 %v1036_v37, %v448_v45 }
  0xfc   :  { %v568_v47 = vadd.f32 %v1041_v4, %v515_v46 }
  0xfe   :  { %v617_v48 = vmax.f32 %v568_v47, 0.0 }
 0x100   :  { %666 = vst.msk [vmem:[%s1343_s6 + $0x148] sm:$0xff] %vm261_vm0, %v617_v48 }

// kernel: densenet_forward.17
= control target key start
LH: loop header
LB: loop body
LE: loop exit
PB: predicated region body
PF: predicated region fallthrough
CT: control target
= control target key end

     0   :  { %s2205_s9 = smov 0   ;;  %s2901_s0 = inlined_call_operand.vmem [shape: f32[2,272,16], index: 0, kind: input, shape index: {}]   ;;  %s2902_s1 = inlined_call_operand.vmem [shape: bf16[9,16,8], index: 1, kind: input, shape index: {}]   ;;  %s2903_s2 = inlined_call_operand.vmem [shape: f32[2,224,8], index: 2, kind: output, shape index: {}]  }
   0x1 LB: > { %s1973_s10 = sadd.s32 4294967295, %s2188_s9   ;;  %p1977_p0 = scmp.ge.s32.totalorder %s2188_s9, 1  ;;  %s2188_s9 = sphi %s2205_s9, %s12_s9  }
   0x2   : > { %p112_p1 = scmp.lt.s32.totalorder %s2188_s9, 3 }
   0x4   : > { %p113_p2 = pnand %p1977_p0, %p112_p1 }
   0x6   : > { %116 = sbr.rel (%p113_p2) target bundleno = 664 (0x298), region = 28 }
   0xb   : > { %v2161_v0 = vld [vmem:[%s2902_s1 + $0x8] sm:$0xff]  ;;  %p134_p3 = scmp.lt.s32.totalorder %s1973_s10, 1  ;;  %v2162_v1 = vld [vmem:[%s2902_s1 + $0x10] sm:$0xff]  ;;  %v2160_v2 = vld [vmem:[%s2902_s1] sm:$0xff]  ;;  %vm240_vm0 = vcmask 130048   ;;  %vm1889_vm1 = vcmask 64512  }
   0xc   : > { %v2164_v3 = vld [vmem:[%s2902_s1 + $0x20] sm:$0xff]  ;;  %2169 = vmatpush.bf16.msra.mxu1 %v2161_v0  ;;  %2170 = vmatpush.bf16.msra.mxu2 %v2161_v0  ;;  %v2163_v16 = vld [vmem:[%s2902_s1 + $0x18] sm:$0xff]  ;;  %v2166_v41 = vld [vmem:[%s2902_s1 + $0x30] sm:$0xff] }
   0xd   : > { %s2949_s10 = smov (!%p134_p3, %s1973_s10), 1  ;;  %290 = vmatpush.bf16.msra.mxu0 %v2161_v0  ;;  %2171 = vmatpush.bf16.msra.mxu3 %v2161_v0  ;;  %v2167_v42 = vld [vmem:[%s2902_s1 + $0x38] sm:$0xff]  ;;  %v2165_v43 = vld [vmem:[%s2902_s1 + $0x28] sm:$0xff]  ;;  %v2168_v44 = vld [vmem:[%s2902_s1 + $0x40] sm:$0xff] }
   0xe   : > { %s2172_s19 = smul.u32 272, %s2949_s10 }
   0xf   : > { %s2173_s5 = smul.u32 224, %s2949_s10 }
  0x10   : > { %589 = vmatpush.bf16.msrb.mxu2 %v2162_v1  ;;  %417 = vmatpush.bf16.msrb.mxu1 %v2160_v2  ;;  %s2231_s22 = scalar_lea.vmem %s2901_s0, %s2172_s19 }
  0x11   : > { %989 = vmatpush.bf16.msrb.mxu0 %v2164_v3  ;;  %v197_v4 = vld [vmem:[%s2231_s22 + $0x41] sm:$0xff]  ;;  %v198_v5 = vld [vmem:[%s2231_s22 + $0x49] sm:$0xff]  ;;  %789 = vmatpush.bf16.msrb.mxu3 %v2163_v16  ;;  %v199_v17 = vld [vmem:[%s2231_s22 + $0x51] sm:$0xff]  ;;  %s2773_s8 = scalar_lea.vmem %s2903_s2, %s2173_s5 }
  0x12   : > { %v205_v6 = vld [vmem:[%s2231_s22 + $0x81] sm:$0xff]  ;;  %v2236_v7 = vpack.c.bf16 %v198_v5, %v197_v4  ;;  %v206_v8 = vld [vmem:[%s2231_s22 + $0x89] sm:$0xff]  ;;  %v200_v18 = vld [vmem:[%s2231_s22 + $0x59] sm:$0xff] }
  0x13   : > { %v189_v9 = vld [vmem:[%s2231_s22 + $0x1] sm:$0xff]  ;;  %v190_v10 = vld [vmem:[%s2231_s22 + $0x9] sm:$0xff]  ;;  %v2241_v11 = vpack.c.bf16 %v206_v8, %v205_v6  ;;  %v207_v19 = vld [vmem:[%s2231_s22 + $0x91] sm:$0xff]  ;;  %v2263_v23 = vpack.c.bf16 %v200_v18, %v199_v17 }
  0x14   : > { %v217_v12 = vpack.c.bf16 %v190_v10, %v189_v9  ;;  %1990 = vmatmul.msk.bf16.vlgmr.msra.gmra.mxu1 %vm240_vm0, %v2236_v7  ;;  %v213_v13 = vld [vmem:[%s2231_s22 + $0xc1] sm:$0xff]  ;;  %v214_v14 = vld [vmem:[%s2231_s22 + $0xc9] sm:$0xff]  ;;  %v208_v20 = vld [vmem:[%s2231_s22 + $0x99] sm:$0xff] }
  0x15   : > { %1994 = vmatmul.msk.bf16.vlgmr.msra.gmra.mxu2 %vm240_vm0, %v2241_v11  ;;  %v2250_v15 = vpack.c.bf16 %v214_v14, %v213_v13  ;;  %v191_v21 = vld [vmem:[%s2231_s22 + $0x11] sm:$0xff]  ;;  %v192_v22 = vld [vmem:[%s2231_s22 + $0x19] sm:$0xff]  ;;  %v2265_v24 = vpack.c.bf16 %v208_v20, %v207_v19  ;;  %v201_v29 = vld [vmem:[%s2231_s22 + $0x61] sm:$0xff]  ;;  %1189 = vmatpush.bf16.msra.mxu1 %v2165_v43 }
  0x16   : > { %1986 = vmatmul.msk.bf16.vlgmr.msra.gmra.mxu0 %vm240_vm0, %v217_v12  ;;  %v218_v25 = vpack.c.bf16 %v192_v22, %v191_v21  ;;  %v215_v26 = vld [vmem:[%s2231_s22 + $0xd1] sm:$0xff]  ;;  %v216_v27 = vld [vmem:[%s2231_s22 + $0xd9] sm:$0xff]  ;;  %v202_v30 = vld [vmem:[%s2231_s22 + $0x69] sm:$0xff]  ;;  %1389 = vmatpush.bf16.msra.mxu2 %v2166_v41 }
  0x17   : > { %1998 = vmatmul.msk.bf16.vlgmr.msra.gmra.mxu3 %vm240_vm0, %v2250_v15  ;;  %v2271_v28 = vpack.c.bf16 %v216_v27, %v215_v26  ;;  %v209_v31 = vld [vmem:[%s2231_s22 + $0xa1] sm:$0xff]  ;;  %v210_v32 = vld [vmem:[%s2231_s22 + $0xa9] sm:$0xff]  ;;  %v2284_v35 = vpack.c.bf16 %v202_v30, %v201_v29  ;;  %v690_v39 = vld [vmem:[%s2231_s22 + $0x18] sm:$0xff]  ;;  %1789 = vmatpush.bf16.msra.mxu0 %v2168_v44 }
  0x18   : > { %v193_v33 = vld [vmem:[%s2231_s22 + $0x21] sm:$0xff]  ;;  %v194_v34 = vld [vmem:[%s2231_s22 + $0x29] sm:$0xff]  ;;  %v2286_v36 = vpack.c.bf16 %v210_v32, %v209_v31  ;;  %1589 = vmatpush.bf16.msra.mxu3 %v2167_v42  ;;  %v203_v45 = vld [vmem:[%s2231_s22 + $0x71] sm:$0xff] }
  0x19   : > { %v2288_v37 = vpack.c.bf16 %v194_v34, %v193_v33  ;;  %v689_v38 = vld [vmem:[%s2231_s22 + $0x10] sm:$0xff]  ;;  %v204_v46 = vld [vmem:[%s2231_s22 + $0x79] sm:$0xff]  ;;  %v692_v55 = vld [vmem:[%s2231_s22 + $0x28] sm:$0xff] }
  0x1a   : > { %v717_v40 = vpack.c.bf16 %v690_v39, %v689_v38  ;;  %v211_v47 = vld [vmem:[%s2231_s22 + $0xb1] sm:$0xff]  ;;  %v212_v48 = vld [vmem:[%s2231_s22 + $0xb9] sm:$0xff]  ;;  %v2317_v51 = vpack.c.bf16 %v204_v46, %v203_v45  ;;  %v146_v58 = vld [vmem:[%s2231_s22 + $0x8] sm:$0xff] }
  0x1b   : > { %v195_v49 = vld [vmem:[%s2231_s22 + $0x31] sm:$0xff]  ;;  %v196_v50 = vld [vmem:[%s2231_s22 + $0x39] sm:$0xff]  ;;  %v2319_v52 = vpack.c.bf16 %v212_v48, %v211_v47  ;;  %v489_v59 = vld [vmem:[%s2231_s22 + $0x2] sm:$0xff] }
  0x1c   : > { %v2321_v53 = vpack.c.bf16 %v196_v50, %v195_v49  ;;  %v691_v54 = vld [vmem:[%s2231_s22 + $0x20] sm:$0xff]  ;;  %v490_v60 = vld [vmem:[%s2231_s22 + $0xa] sm:$0xff]  ;;  %v694_v0 = vld [vmem:[%s2231_s22 + $0x38] sm:$0xff] }
  0x1d   : > { %v2327_v56 = vpack.c.bf16 %v692_v55, %v691_v54  ;;  %v145_v57 = vld [vmem:[%s2231_s22] sm:$0xff]  ;;  %v517_v62 = vpack.c.bf16 %v490_v60, %v489_v59  ;;  %v693_v63 = vld [vmem:[%s2231_s22 + $0x30] sm:$0xff]  ;;  %v696_v6 = vld [vmem:[%s2231_s22 + $0x48] sm:$0xff] }
  0x1e   : > { %v173_v61 = vpack.c.bf16 %v146_v58, %v145_v57  ;;  %v2342_v1 = vpack.c.bf16 %v694_v0, %v693_v63  ;;  %v491_v2 = vld [vmem:[%s2231_s22 + $0x12] sm:$0xff]  ;;  %v492_v3 = vld [vmem:[%s2231_s22 + $0x1a] sm:$0xff]  ;;  %v493_v9 = vld [vmem:[%s2231_s22 + $0x22] sm:$0xff] }
  0x1f   : > { %v2350_v4 = vpack.c.bf16 %v492_v3, %v491_v2  ;;  %v695_v5 = vld [vmem:[%s2231_s22 + $0x40] sm:$0xff]  ;;  %v494_v10 = vld [vmem:[%s2231_s22 + $0x2a] sm:$0xff]  ;;  %v698_v14 = vld [vmem:[%s2231_s22 + $0x58] sm:$0xff] }
  0x20   : > { %v2355_v8 = vpack.c.bf16 %v696_v6, %v695_v5  ;;  %v2365_v12 = vpack.c.bf16 %v494_v10, %v493_v9  ;;  %v697_v13 = vld [vmem:[%s2231_s22 + $0x50] sm:$0xff]  ;;  %v496_v18 = vld [vmem:[%s2231_s22 + $0x3a] sm:$0xff]  ;;  %v700_v21 = vld [vmem:[%s2231_s22 + $0x68] sm:$0xff] }
  0x21   : > { %v2371_v16 = vpack.c.bf16 %v698_v14, %v697_v13  ;;  %v495_v17 = vld [vmem:[%s2231_s22 + $0x32] sm:$0xff]  ;;  %v699_v20 = vld [vmem:[%s2231_s22 + $0x60] sm:$0xff]  ;;  %v498_v26 = vld [vmem:[%s2231_s22 + $0x4a] sm:$0xff] }
  0x22   : > { %v2381_v19 = vpack.c.bf16 %v496_v18, %v495_v17  ;;  %v2387_v22 = vpack.c.bf16 %v700_v21, %v699_v20  ;;  %v701_v30 = vld [vmem:[%s2231_s22 + $0x70] sm:$0xff]  ;;  %v702_v31 = vld [vmem:[%s2231_s22 + $0x78] sm:$0xff]  ;;  %v703_v46 = vld [vmem:[%s2231_s22 + $0x80] sm:$0xff] }
  0x23   : > { %v2407_v33 = vpack.c.bf16 %v702_v31, %v701_v30  ;;  %v499_v41 = vld [vmem:[%s2231_s22 + $0x52] sm:$0xff]  ;;  %v500_v42 = vld [vmem:[%s2231_s22 + $0x5a] sm:$0xff]  ;;  %v704_v47 = vld [vmem:[%s2231_s22 + $0x88] sm:$0xff] }
  0x24   : > { %1991 = vmatmul.msk.bf16.gmra.mxu1 %vm240_vm0, %v2263_v23  ;;  %2914 = vst [vmem:[#allocation2_spill] sm:$0xff] %v2387_v22  ;;  %v2429_v45 = vpack.c.bf16 %v500_v42, %v499_v41  ;;  %v2439_v50 = vpack.c.bf16 %v704_v47, %v703_v46  ;;  %v501_v59 = vld [vmem:[%s2231_s22 + $0x62] sm:$0xff]  ;;  %v502_v60 = vld [vmem:[%s2231_s22 + $0x6a] sm:$0xff]  ;;  %v706_v2 = vld [vmem:[%s2231_s22 + $0x98] sm:$0xff] }
  0x25   : > { %1995 = vmatmul.msk.bf16.gmra.mxu2 %vm240_vm0, %v2265_v24  ;;  %2915 = vst [vmem:[#allocation3_spill] sm:$0xff] %v2407_v33  ;;  %v2461_v63 = vpack.c.bf16 %v502_v60, %v501_v59  ;;  %v705_v0 = vld [vmem:[%s2231_s22 + $0x90] sm:$0xff]  ;;  %v504_v18 = vld [vmem:[%s2231_s22 + $0x7a] sm:$0xff]  ;;  %v708_v30 = vld [vmem:[%s2231_s22 + $0xa8] sm:$0xff] }
  0x26   : > { %1987 = vmatmul.msk.bf16.gmra.mxu0 %vm240_vm0, %v218_v25  ;;  %2918 = vst [vmem:[#allocation6_spill] sm:$0xff] %v2439_v50  ;;  %v2471_v6 = vpack.c.bf16 %v706_v2, %v705_v0  ;;  %v503_v17 = vld [vmem:[%s2231_s22 + $0x72] sm:$0xff]  ;;  %v505_v0 = vld [vmem:[%s2231_s22 + $0x82] sm:$0xff]  ;;  %v506_v2 = vld [vmem:[%s2231_s22 + $0x8a] sm:$0xff] }
  0x27   : > { %1999 = vmatmul.msk.bf16.gmra.mxu3 %vm240_vm0, %v2271_v28  ;;  %2920 = vst [vmem:[#allocation8_spill] sm:$0xff] %v2461_v63 }
  0x34   : > { %1992 = vmatmul.msk.bf16.gmra.mxu1 %vm240_vm0, %v2284_v35 }
  0x35   : > { %1996 = vmatmul.msk.bf16.gmra.mxu2 %vm240_vm0, %v2286_v36 }
  0x36   : > { %1988 = vmatmul.msk.bf16.gmra.mxu0 %vm240_vm0, %v2288_v37 }
  0x37   : > { %2044 = vmatmul.msk.bf16.vlgmr.msrb.gmra.mxu3 %vm240_vm0, %v717_v40 }
  0x44   : > { %1993 = vmatmul.msk.bf16.gmra.mxu1 %vm240_vm0, %v2317_v51 }
  0x45   : > { %1997 = vmatmul.msk.bf16.gmra.mxu2 %vm240_vm0, %v2319_v52 }
  0x46   : > { %1989 = vmatmul.msk.bf16.gmra.mxu0 %vm240_vm0, %v2321_v53 }
  0x47   : > { %2045 = vmatmul.msk.bf16.gmra.mxu3 %vm240_vm0, %v2327_v56 }
  0x54   : > { %2004 = vmatmul.msk.bf16.vlgmr.msrb.gmra.mxu1 %vm240_vm0, %v173_v61 }
  0x55   : > { %2024 = vmatmul.msk.bf16.vlgmr.msrb.gmra.mxu2 %vm240_vm0, %v517_v62 }
  0x56   : > { %2064 = vmatmul.msk.bf16.vlgmr.msrb.gmra.mxu0 %vm240_vm0, %v218_v25  ;;  %v497_v25 = vld [vmem:[%s2231_s22 + $0x42] sm:$0xff] }
  0x57   : > { %2046 = vmatmul.msk.bf16.gmra.mxu3 %vm240_vm0, %v2342_v1  ;;  %v2399_v29 = vpack.c.bf16 %v498_v26, %v497_v25  ;;  %v2491_v25 = vpack.c.bf16 %v504_v18, %v503_v17  ;;  %v707_v26 = vld [vmem:[%s2231_s22 + $0xa0] sm:$0xff] }
  0x58   : > { %v2499_v42 = vpack.c.bf16 %v708_v30, %v707_v26  ;;  %v2517_v26 = vpack.c.bf16 %v506_v2, %v505_v0  ;;  %v709_v30 = vld [vmem:[%s2231_s22 + $0xb0] sm:$0xff] }
  0x59   : > { %2924 = vst [vmem:[#allocation12_spill] sm:$0xff] %v2491_v25 }
  0x5a   : > { %2927 = vst [vmem:[#allocation15_spill] sm:$0xff] %v2517_v26 }
  0x64   : > { %2005 = vmatmul.msk.bf16.gmra.mxu1 %vm240_vm0, %v717_v40 }
  0x65   : > { %2025 = vmatmul.msk.bf16.gmra.mxu2 %vm240_vm0, %v2350_v4 }
  0x66   : > { %2065 = vmatmul.msk.bf16.gmra.mxu0 %vm240_vm0, %v2288_v37 }
  0x67   : > { %2047 = vmatmul.msk.bf16.gmra.mxu3 %vm240_vm0, %v2355_v8 }
  0x74   : > { %2006 = vmatmul.msk.bf16.gmra.mxu1 %vm240_vm0, %v2327_v56 }
  0x75   : > { %2026 = vmatmul.msk.bf16.gmra.mxu2 %vm240_vm0, %v2365_v12 }
  0x76   : > { %2066 = vmatmul.msk.bf16.gmra.mxu0 %vm240_vm0, %v2321_v53 }
  0x77   : > { %2048 = vmatmul.msk.bf16.gmra.mxu3 %vm240_vm0, %v2371_v16 }
  0x84   : > { %2007 = vmatmul.msk.bf16.gmra.mxu1 %vm240_vm0, %v2342_v1 }
  0x85   : > { %2027 = vmatmul.msk.bf16.gmra.mxu2 %vm240_vm0, %v2381_v19 }
  0x86   : > { %2067 = vmatmul.msk.bf16.gmra.mxu0 %vm240_vm0, %v2236_v7 }
  0x87   : > { %2049 = vmatmul.msk.bf16.gmra.mxu3 %vm240_vm0, %v2387_v22 }
  0x91   : > { %v2397_v27 = vpop.f32.mrf.mxu1 }
  0x93   : > { %v2403_v32 = vpop.f32.mrf.mxu0 }
  0x94   : > { %2008 = vmatmul.msk.bf16.gmra.mxu1 %vm240_vm0, %v2355_v8 }
  0x95   : > { %2028 = vmatmul.msk.bf16.gmra.mxu2 %vm240_vm0, %v2399_v29 }
  0x96   : > { %2068 = vmatmul.msk.bf16.gmra.mxu0 %vm240_vm0, %v2263_v23 }
  0x97   : > { %2050 = vmatmul.msk.bf16.gmra.mxu3 %vm240_vm0, %v2407_v33 }
  0x98   : > { %v2413_v34 = vpop.f32.mrf.mxu2 }
  0x99   : > { %v2417_v38 = vpop.f32.mrf.mxu1 }
  0x9a   : > { %v2421_v40 = vpop.f32.mrf.mxu3 }
  0x9b   : > { %v2419_v39 = vpop.f32.mrf.mxu0  ;;  %2916 = vst [vmem:[#allocation4_spill] sm:$0xff] %v2421_v40 }
  0xa0   : > { %v2425_v43 = vpop.f32.mrf.mxu2 }
  0xa1   : > { %v2427_v44 = vpop.f32.mrf.mxu1 }
  0xa2   : > { %v2435_v49 = vpop.f32.mrf.mxu3 }
  0xa3   : > { %v2433_v48 = vpop.f32.mrf.mxu0  ;;  %2917 = vst [vmem:[#allocation5_spill] sm:$0xff] %v2435_v49 }
  0xa4   : > { %2009 = vmatmul.msk.bf16.gmra.mxu1 %vm240_vm0, %v2371_v16 }
  0xa5   : > { %2029 = vmatmul.msk.bf16.gmra.mxu2 %vm240_vm0, %v2429_v45 }
  0xa6   : > { %2069 = vmatmul.msk.bf16.gmra.mxu0 %vm240_vm0, %v2284_v35 }
  0xa7   : > { %2051 = vmatmul.msk.bf16.gmra.mxu3 %vm240_vm0, %v2439_v50 }
  0xa8   : > { %v2445_v54 = vpop.f32.mrf.mxu2 }
  0xa9   : > { %v2449_v55 = vpop.f32.mrf.mxu1 }
  0xaa   : > { %v2453_v58 = vpop.f32.mrf.mxu3 }
  0xab   : > { %v2451_v57 = vpop.f32.mrf.mxu0  ;;  %2919 = vst [vmem:[#allocation7_spill] sm:$0xff] %v2453_v58 }
  0xb0   : > { %v2457_v61 = vpop.f32.mrf.mxu2 }
  0xb1   : > { %v2459_v62 = vpop.f32.mrf.mxu1 }
  0xb2   : > { %v2467_v5 = vpop.f32.mrf.mxu3 }
  0xb3   : > { %v2465_v3 = vpop.f32.mrf.mxu0  ;;  %2921 = vst [vmem:[#allocation9_spill] sm:$0xff] %v2467_v5  ;;  %v710_v5 = vld [vmem:[%s2231_s22 + $0xb8] sm:$0xff] }
  0xb4   : > { %2010 = vmatmul.msk.bf16.gmra.mxu1 %vm240_vm0, %v2387_v22  ;;  %v2524_v40 = vpack.c.bf16 %v710_v5, %v709_v30 }
  0xb5   : > { %2030 = vmatmul.msk.bf16.gmra.mxu2 %vm240_vm0, %v2461_v63  ;;  %v712_v63 = vld [vmem:[%s2231_s22 + $0xc8] sm:$0xff] }
  0xb6   : > { %2070 = vmatmul.msk.bf16.gmra.mxu0 %vm240_vm0, %v2317_v51 }
  0xb7   : > { %2052 = vmatmul.msk.bf16.gmra.mxu3 %vm240_vm0, %v2471_v6 }
  0xb8   : > { %v2477_v9 = vpop.f32.mrf.mxu2 }
  0xb9   : > { %2922 = vst [vmem:[#allocation10_spill] sm:$0xff] %v2477_v9  ;;  %v2481_v10 = vpop.f32.mrf.mxu1  ;;  %v711_v9 = vld [vmem:[%s2231_s22 + $0xc0] sm:$0xff] }
  0xba   : > { %v791_v14 = vpop.f32.mrf.mxu3 }
  0xbb   : > { %v2483_v13 = vpop.f32.mrf.mxu0 }
  0xc0   : > { %v2487_v20 = vpop.f32.mrf.mxu2 }
  0xc1   : > { %2923 = vst [vmem:[#allocation11_spill] sm:$0xff] %v2487_v20  ;;  %v2489_v21 = vpop.f32.mrf.mxu1 }
  0xc2   : > { %v793_v41 = vpop.f32.mrf.mxu3 }
  0xc3   : > { %v2495_v31 = vpop.f32.mrf.mxu0 }
  0xc4   : > { %2011 = vmatmul.msk.bf16.gmra.mxu1 %vm240_vm0, %v2407_v33 }
  0xc5   : > { %2031 = vmatmul.msk.bf16.gmra.mxu2 %vm240_vm0, %v2491_v25 }
  0xc6   : > { %2071 = vmatmul.msk.bf16.gmra.mxu0 %vm240_vm0, %v2241_v11 }
  0xc7   : > { %2053 = vmatmul.msk.bf16.gmra.mxu3 %vm240_vm0, %v2499_v42 }
  0xc8   : > { %v2505_v46 = vpop.f32.mrf.mxu2 }
  0xc9   : > { %2925 = vst [vmem:[#allocation13_spill] sm:$0xff] %v2505_v46  ;;  %v2509_v47 = vpop.f32.mrf.mxu1  ;;  %v507_v46 = vld [vmem:[%s2231_s22 + $0x92] sm:$0xff] }
  0xca   : > { %v796_v60 = vpop.f32.mrf.mxu3 }
  0xcb   : > { %v2511_v59 = vpop.f32.mrf.mxu0 }
  0xd0   : > { %v2515_v17 = vpop.f32.mrf.mxu2 }
  0xd1   : > { %2926 = vst [vmem:[#allocation14_spill] sm:$0xff] %v2515_v17  ;;  %v419_v18 = vpop.f32.mrf.mxu1 }
  0xd2   : > { %v420_v11 = vadd.f32 %v419_v18, %v2403_v32  ;;  %v798_v49 = vpop.f32.mrf.mxu3 }
  0xd3   : > { %v991_v58 = vpop.f32.mrf.mxu0 }
  0xd4   : > { %2012 = vmatmul.msk.bf16.gmra.mxu1 %vm240_vm0, %v2439_v50 }
  0xd5   : > { %2032 = vmatmul.msk.bf16.gmra.mxu2 %vm240_vm0, %v2517_v26  ;;  %v508_v26 = vld [vmem:[%s2231_s22 + $0x9a] sm:$0xff] }
  0xd6   : > { %2072 = vmatmul.msk.bf16.gmra.mxu0 %vm240_vm0, %v2265_v24  ;;  %v2537_v20 = vpack.c.bf16 %v508_v26, %v507_v46  ;;  %v509_v26 = vld [vmem:[%s2231_s22 + $0xa2] sm:$0xff] }
  0xd7   : > { %2054 = vmatmul.msk.bf16.gmra.mxu3 %vm240_vm0, %v2524_v40 }
  0xd8   : > { %v591_v0 = vpop.f32.mrf.mxu2 }
  0xd9   : > { %v661_v32 = vadd.f32 %v591_v0, %v420_v11  ;;  %v421_v2 = vpop.f32.mrf.mxu1 }
  0xda   : > { %v422_v18 = vadd.f32 %v421_v2, %v2419_v39  ;;  %v801_v5 = vpop.f32.mrf.mxu3 }
  0xdb   : > { %v993_v17 = vpop.f32.mrf.mxu0  ;;  %v861_v50 = vadd.f32 %v791_v14, %v661_v32  ;;  %v510_v32 = vld [vmem:[%s2231_s22 + $0xaa] sm:$0xff] }
  0xdd   : > { %v2533_v30 = vadd.f32 %v991_v58, %v861_v50  ;;  %v2544_v50 = vpack.c.bf16 %v712_v63, %v711_v9 }
  0xe0   : > { %v593_v25 = vpop.f32.mrf.mxu2 }
  0xe1   : > { %v662_v33 = vadd.f32 %v593_v25, %v422_v18  ;;  %v424_v24 = vpop.f32.mrf.mxu1  ;;  %v2559_v18 = vpack.c.bf16 %v510_v32, %v509_v26 }
  0xe2   : > { %v425_v22 = vadd.f32 %v424_v24, %v2433_v48  ;;  %v803_v39 = vpop.f32.mrf.mxu3  ;;  %v713_v24 = vld [vmem:[%s2231_s22 + $0xd0] sm:$0xff] }
  0xe3   : > { %v996_v11 = vpop.f32.mrf.mxu0  ;;  %v862_v0 = vadd.f32 %v793_v41, %v662_v33 }
  0xe4   : > { %2013 = vmatmul.msk.bf16.gmra.mxu1 %vm240_vm0, %v2471_v6 }
  0xe5   : > { %2033 = vmatmul.msk.bf16.gmra.mxu2 %vm240_vm0, %v2537_v20  ;;  %v2550_v58 = vadd.f32 %v993_v17, %v862_v0  ;;  %v714_v0 = vld [vmem:[%s2231_s22 + $0xd8] sm:$0xff] }
  0xe6   : > { %2073 = vmatmul.msk.bf16.gmra.mxu0 %vm240_vm0, %v2286_v36 }
  0xe7   : > { %2928 = vst [vmem:[#allocation16_spill] sm:$0xff] %v2550_v58  ;;  %2055 = vmatmul.msk.bf16.gmra.mxu3 %vm240_vm0, %v2544_v50 }
  0xe8   : > { %v596_v48 = vpop.f32.mrf.mxu2 }
  0xe9   : > { %v663_v33 = vadd.f32 %v596_v48, %v425_v22  ;;  %v426_v14 = vpop.f32.mrf.mxu1 }
  0xea   : > { %v427_v25 = vadd.f32 %v426_v14, %v2451_v57  ;;  %v806_v41 = vpop.f32.mrf.mxu3 }
  0xeb   : > { %v998_v63 = vpop.f32.mrf.mxu0  ;;  %v863_v9 = vadd.f32 %v796_v60, %v663_v33  ;;  %v2566_v60 = vpack.c.bf16 %v714_v0, %v713_v24  ;;  %v715_v0 = vld [vmem:[%s2231_s22 + $0xe0] sm:$0xff] }
  0xed   : > { %v2555_v46 = vadd.f32 %v996_v11, %v863_v9 }
  0xf0   : > { %v598_v36 = vpop.f32.mrf.mxu2 }
  0xf1   : > { %v664_v17 = vadd.f32 %v598_v36, %v427_v25  ;;  %v429_v2 = vpop.f32.mrf.mxu1  ;;  %v511_v36 = vld [vmem:[%s2231_s22 + $0xb2] sm:$0xff] }
  0xf2   : > { %v430_v58 = vadd.f32 %v429_v2, %v2465_v3  ;;  %v808_v57 = vpop.f32.mrf.mxu3 }
  0xf3   : > { %v1001_v22 = vpop.f32.mrf.mxu0  ;;  %v864_v48 = vadd.f32 %v798_v49, %v664_v17  ;;  %v512_v17 = vld [vmem:[%s2231_s22 + $0xba] sm:$0xff] }
  0xf4   : > { %2014 = vmatmul.msk.bf16.gmra.mxu1 %vm240_vm0, %v2499_v42  ;;  %v2581_v24 = vpack.c.bf16 %v512_v17, %v511_v36 }
  0xf5   : > { %2034 = vmatmul.msk.bf16.gmra.mxu2 %vm240_vm0, %v2559_v18  ;;  %v2572_v11 = vadd.f32 %v998_v63, %v864_v48  ;;  %v716_v48 = vld [vmem:[%s2231_s22 + $0xe8] sm:$0xff] }
  0xf6   : > { %2074 = vmatmul.msk.bf16.gmra.mxu0 %vm240_vm0, %v2319_v52 }
  0xf7   : > { %2929 = vst [vmem:[#allocation17_spill] sm:$0xff] %v2572_v11  ;;  %2056 = vmatmul.msk.bf16.gmra.mxu3 %vm240_vm0, %v2566_v60 }
  0xf8   : > { %v601_v3 = vpop.f32.mrf.mxu2 }
  0xf9   : > { %v665_v49 = vadd.f32 %v601_v3, %v430_v58  ;;  %v431_v33 = vpop.f32.mrf.mxu1 }
  0xfa   : > { %v432_v14 = vadd.f32 %v431_v33, %v2483_v13  ;;  %v811_v26 = vpop.f32.mrf.mxu3 }
  0xfb   : > { %v1003_v25 = vpop.f32.mrf.mxu0  ;;  %v865_v9 = vadd.f32 %v801_v5, %v665_v49  ;;  %v2588_v5 = vpack.c.bf16 %v716_v48, %v715_v0 }
  0xfd   : > { %v2577_v32 = vadd.f32 %v1001_v22, %v865_v9  ;;  %2930 = vst [vmem:[#allocation18_spill] sm:$0xff] %v2588_v5 }
 0x100   : > { %v603_v52 = vpop.f32.mrf.mxu2 }
 0x101   : > { %v666_v63 = vadd.f32 %v603_v52, %v432_v14  ;;  %v434_v2 = vpop.f32.mrf.mxu1  ;;  %v513_v52 = vld [vmem:[%s2231_s22 + $0xc2] sm:$0xff] }
 0x102   : > { %v435_v11 = vadd.f32 %v434_v2, %v2495_v31  ;;  %v813_v13 = vpop.f32.mrf.mxu3 }
 0x103   : > { %v1006_v58 = vpop.f32.mrf.mxu0  ;;  %v866_v3 = vadd.f32 %v803_v39, %v666_v63  ;;  %v514_v63 = vld [vmem:[%s2231_s22 + $0xca] sm:$0xff] }
 0x104   : > { %2015 = vmatmul.msk.bf16.gmra.mxu1 %vm240_vm0, %v2524_v40 }
 0x105   : > { %2035 = vmatmul.msk.bf16.gmra.mxu2 %vm240_vm0, %v2581_v24  ;;  %v2594_v22 = vadd.f32 %v1003_v25, %v866_v3  ;;  %v2603_v25 = vpack.c.bf16 %v514_v63, %v513_v52  ;;  %v516_v63 = vld [vmem:[%s2231_s22 + $0xda] sm:$0xff] }
 0x106   : > { %2075 = vmatmul.msk.bf16.gmra.mxu0 %vm240_vm0, %v2250_v15 }
 0x107   : > { %2057 = vmatmul.msk.bf16.gmra.mxu3 %vm240_vm0, %v2588_v5 }
 0x108   : > { %v606_v49 = vpop.f32.mrf.mxu2 }
 0x109   : > { %v667_v31 = vadd.f32 %v606_v49, %v435_v11  ;;  %v436_v39 = vpop.f32.mrf.mxu1 }
 0x10a   : > { %v437_v33 = vadd.f32 %v436_v39, %v2511_v59  ;;  %v816_v36 = vpop.f32.mrf.mxu3 }
 0x10b   : > { %v1008_v14 = vpop.f32.mrf.mxu0  ;;  %v867_v9 = vadd.f32 %v806_v41, %v667_v31 }
 0x10d   : > { %v2599_v17 = vadd.f32 %v1006_v58, %v867_v9  ;;  %v515_v9 = vld [vmem:[%s2231_s22 + $0xd2] sm:$0xff] }
 0x110   : > { %v608_v2 = vpop.f32.mrf.mxu2 }
 0x111   : > { %v668_v0 = vadd.f32 %v608_v2, %v437_v33  ;;  %v439_v15 = vpop.f32.mrf.mxu1  ;;  %v915_v2 = vld [vmem:[%s2231_s22 + $0xe1] sm:$0xff] }
 0x112   : > { %v818_v11 = vpop.f32.mrf.mxu3  ;;  %v440_v41 = vadd.f32 %v439_v15, %v2397_v27  ;;  %v2623_v15 = vpack.c.bf16 %v516_v63, %v515_v9 }
 0x113   : > { %v1011_v48 = vpop.f32.mrf.mxu0  ;;  %v868_v3 = vadd.f32 %v808_v57, %v668_v0  ;;  %v916_v0 = vld [vmem:[%s2231_s22 + $0xe9] sm:$0xff] }
 0x114   : > { %2016 = vmatmul.msk.bf16.gmra.mxu1 %vm240_vm0, %v2544_v50  ;;  %v2625_v5 = vpack.c.bf16 %v916_v0, %v915_v2 }
 0x115   : > { %2036 = vmatmul.msk.bf16.gmra.mxu2 %vm240_vm0, %v2603_v25  ;;  %v2611_v59 = vadd.f32 %v1008_v14, %v868_v3 }
 0x116   : > { %2076 = vmatmul.msk.bf16.gmra.mxu0 %vm240_vm0, %v2271_v28 }
 0x117   : > { %2124 = vmatmul.msk.bf16.vlgmr.msra.gmra.mxu3 %vm240_vm0, %v2288_v37 }
 0x118   : > { %v611_v58 = vpop.f32.mrf.mxu2 }
 0x119   : > { %v669_v57 = vadd.f32 %v611_v58, %v440_v41  ;;  %v441_v49 = vpop.f32.mrf.mxu1 }
 0x11a   : > { %v821_v33 = vpop.f32.mrf.mxu3  ;;  %v442_v28 = vadd.f32 %v441_v49, %v2417_v38 }
 0x11b   : > { %v1013_v31 = vpop.f32.mrf.mxu0  ;;  %v869_v39 = vadd.f32 %v811_v26, %v669_v57 }
 0x11d   : > { %v2617_v52 = vadd.f32 %v1011_v48, %v869_v39 }
 0x120   : > { %v613_v14 = vpop.f32.mrf.mxu2 }
 0x121   : > { %v670_v3 = vadd.f32 %v613_v14, %v442_v28  ;;  %v444_v27 = vpop.f32.mrf.mxu1 }
 0x122   : > { %v823_v58 = vpop.f32.mrf.mxu3  ;;  %v445_v26 = vadd.f32 %v444_v27, %v2427_v44 }
 0x123   : > { %v1016_v37 = vpop.f32.mrf.mxu0  ;;  %v870_v41 = vadd.f32 %v813_v13, %v670_v3 }
 0x124   : > { %2017 = vmatmul.msk.bf16.gmra.mxu1 %vm240_vm0, %v2566_v60 }
 0x125   : > { %2037 = vmatmul.msk.bf16.gmra.mxu2 %vm240_vm0, %v2623_v15  ;;  %v2633_v38 = vadd.f32 %v1013_v31, %v870_v41 }
 0x126   : > { %2077 = vmatmul.msk.bf16.gmra.mxu0 %vm240_vm0, %v2625_v5 }
 0x127   : > { %2125 = vmatmul.msk.bf16.gmra.mxu3 %vm240_vm0, %v2321_v53 }
 0x128   : > { %v616_v48 = vpop.f32.mrf.mxu2 }
 0x129   : > { %v671_v57 = vadd.f32 %v616_v48, %v445_v26  ;;  %v446_v13 = vpop.f32.mrf.mxu1 }
 0x12a   : > { %v826_v9 = vpop.f32.mrf.mxu3  ;;  %v447_v2 = vadd.f32 %v446_v13, %v2449_v55 }
 0x12b   : > { %v1018_v49 = vpop.f32.mrf.mxu0  ;;  %v871_v39 = vadd.f32 %v816_v36, %v671_v57 }
 0x12d   : > { %v2638_v63 = vadd.f32 %v1016_v37, %v871_v39 }
 0x130   : > { %v618_v0 = vpop.f32.mrf.mxu2 }
 0x131   : > { %v672_v28 = vadd.f32 %v618_v0, %v447_v2  ;;  %v449_v14 = vpop.f32.mrf.mxu1 }
 0x132   : > { %v828_v41 = vpop.f32.mrf.mxu3  ;;  %v450_v44 = vadd.f32 %v449_v14, %v2459_v62 }
 0x133   : > { %v1021_v31 = vpop.f32.mrf.mxu0  ;;  %v872_v3 = vadd.f32 %v818_v11, %v672_v28 }
 0x134   : > { %2084 = vmatmul.msk.bf16.vlgmr.msra.gmra.mxu1 %vm240_vm0, %v2350_v4 }
 0x135   : > { %2104 = vmatmul.msk.bf16.vlgmr.msra.gmra.mxu2 %vm240_vm0, %v2327_v56  ;;  %v2647_v53 = vadd.f32 %v1018_v49, %v872_v3 }
 0x136   : > { %2144 = vmatmul.msk.bf16.vlgmr.msra.gmra.mxu0 %vm240_vm0, %v2365_v12 }
 0x137   : > { %2126 = vmatmul.msk.bf16.gmra.mxu3 %vm240_vm0, %v2236_v7 }
 0x138   : > { %v621_v55 = vpop.f32.mrf.mxu2 }
 0x139   : > { %v673_v36 = vadd.f32 %v621_v55, %v450_v44  ;;  %v451_v11 = vpop.f32.mrf.mxu1 }
 0x13a   : > { %v831_v26 = vpop.f32.mrf.mxu3  ;;  %v452_v56 = vadd.f32 %v451_v11, %v2481_v10 }
 0x13b   : > { %v1023_v27 = vpop.f32.mrf.mxu0  ;;  %v873_v37 = vadd.f32 %v821_v33, %v673_v36 }
 0x13d   : > { %v2652_v4 = vadd.f32 %v1021_v31, %v873_v37 }
 0x140   : > { %v623_v48 = vpop.f32.mrf.mxu2 }
 0x141   : > { %v674_v57 = vadd.f32 %v623_v48, %v452_v56  ;;  %v454_v13 = vpop.f32.mrf.mxu1 }
 0x142   : > { %v833_v2 = vpop.f32.mrf.mxu3  ;;  %v455_v62 = vadd.f32 %v454_v13, %v2489_v21 }
 0x143   : > { %v1026_v49 = vpop.f32.mrf.mxu0  ;;  %v874_v39 = vadd.f32 %v823_v58, %v674_v57 }
 0x144   : > { %2085 = vmatmul.msk.bf16.gmra.mxu1 %vm240_vm0, %v2365_v12 }
 0x145   : > { %2105 = vmatmul.msk.bf16.gmra.mxu2 %vm240_vm0, %v2342_v1  ;;  %v2661_v7 = vadd.f32 %v1023_v27, %v874_v39 }
 0x146   : > { %2145 = vmatmul.msk.bf16.gmra.mxu0 %vm240_vm0, %v2381_v19 }
 0x147   : > { %2127 = vmatmul.msk.bf16.gmra.mxu3 %vm240_vm0, %v2263_v23 }
 0x148   : > { %v626_v10 = vpop.f32.mrf.mxu2 }
 0x149   : > { %v675_v33 = vadd.f32 %v626_v10, %v455_v62  ;;  %v456_v58 = vpop.f32.mrf.mxu1 }
 0x14a   : > { %v836_v14 = vpop.f32.mrf.mxu3  ;;  %v457_v1 = vadd.f32 %v456_v58, %v2509_v47 }
 0x14b   : > { %v1028_v0 = vpop.f32.mrf.mxu0  ;;  %v875_v28 = vadd.f32 %v826_v9, %v675_v33 }
 0x14d   : > { %v2666_v12 = vadd.f32 %v1026_v49, %v875_v28 }
 0x150   : > { %v628_v31 = vpop.f32.mrf.mxu2 }
 0x151   : > { %v676_v3 = vadd.f32 %v628_v31, %v457_v1  ;;  %v459_v44 = vpop.f32.mrf.mxu1  ;;  %v1501_v31 = vld [vmem:[%s2231_s22 + $0x81] sm:$0xff] }
 0x152   : > { %v838_v11 = vpop.f32.mrf.mxu3  ;;  %v460_v21 = vadd.f32 %v459_v44, %v2413_v34 }
 0x153   : > { %v1031_v55 = vpop.f32.mrf.mxu0  ;;  %v876_v36 = vadd.f32 %v828_v41, %v676_v3  ;;  %v1502_v3 = vld [vmem:[%s2231_s22 + $0x89] sm:$0xff] }
 0x154   : > { %2086 = vmatmul.msk.bf16.gmra.mxu1 %vm240_vm0, %v2381_v19 }
 0x155   : > { %2106 = vmatmul.msk.bf16.gmra.mxu2 %vm240_vm0, %v2355_v8  ;;  %v2675_v23 = vadd.f32 %v1028_v0, %v876_v36  ;;  %v2931_v36 = vld [vmem:[#allocation2_spill] sm:$0xff] }
 0x156   : > { %2146 = vmatmul.msk.bf16.gmra.mxu0 %vm240_vm0, %v2399_v29 }
 0x157   : > { %2128 = vmatmul.msk.bf16.gmra.mxu3 %vm240_vm0, %v2284_v35 }
 0x158   : > { %v631_v47 = vpop.f32.mrf.mxu2 }
 0x159   : > { %v677_v9 = vadd.f32 %v631_v47, %v460_v21  ;;  %v461_v41 = vpop.f32.mrf.mxu1  ;;  %v2933_v21 = vld [vmem:[#allocation10_spill] sm:$0xff] }
 0x15a   : > { %v841_v56 = vpop.f32.mrf.mxu3  ;;  %v462_v8 = vadd.f32 %v461_v41, %v2425_v43 }
 0x15b   : > { %v1033_v27 = vpop.f32.mrf.mxu0  ;;  %v877_v37 = vadd.f32 %v831_v26, %v677_v9 }
 0x15d   : > { %v2680_v19 = vadd.f32 %v1031_v55, %v877_v37 }
 0x160   : > { %v633_v48 = vpop.f32.mrf.mxu2 }
 0x161   : > { %v678_v57 = vadd.f32 %v633_v48, %v462_v8  ;;  %v464_v13 = vpop.f32.mrf.mxu1  ;;  %v2934_v48 = vld [vmem:[#allocation11_spill] sm:$0xff] }
 0x162   : > { %v843_v62 = vpop.f32.mrf.mxu3  ;;  %v465_v34 = vadd.f32 %v464_v13, %v2445_v54 }
 0x163   : > { %v1036_v49 = vpop.f32.mrf.mxu0  ;;  %v878_v39 = vadd.f32 %v833_v2, %v678_v57 }
 0x164   : > { %2087 = vmatmul.msk.bf16.gmra.mxu1 %vm240_vm0, %v2399_v29 }
 0x165   : > { %2107 = vmatmul.msk.bf16.gmra.mxu2 %vm240_vm0, %v2371_v16  ;;  %v2689_v35 = vadd.f32 %v1033_v27, %v878_v39 }
 0x166   : > { %2147 = vmatmul.msk.bf16.gmra.mxu0 %vm240_vm0, %v2429_v45 }
 0x167   : > { %2129 = vmatmul.msk.bf16.gmra.mxu3 %vm240_vm0, %v2317_v51  ;;  %v1523_v51 = vpack.c.bf16 %v1502_v3, %v1501_v31 }
 0x168   : > { %v636_v43 = vpop.f32.mrf.mxu2 }
 0x169   : > { %v679_v26 = vadd.f32 %v636_v43, %v465_v34  ;;  %v466_v2 = vpop.f32.mrf.mxu1  ;;  %v1503_v34 = vld [vmem:[%s2231_s22 + $0x91] sm:$0xff]  ;;  %v1504_v43 = vld [vmem:[%s2231_s22 + $0x99] sm:$0xff] }
 0x16a   : > { %v846_v33 = vpop.f32.mrf.mxu3  ;;  %v467_v16 = vadd.f32 %v466_v2, %v2457_v61 }
 0x16b   : > { %v1038_v10 = vpop.f32.mrf.mxu0  ;;  %v879_v29 = vadd.f32 %v836_v14, %v679_v26  ;;  %v2932_v14 = vld [vmem:[#allocation8_spill] sm:$0xff] }
 0x16d   : > { %v2694_v58 = vadd.f32 %v1036_v49, %v879_v29  ;;  %v1524_v29 = vpack.c.bf16 %v1504_v43, %v1503_v34  ;;  %v2941_v34 = vld [vmem:[#allocation4_spill] sm:$0xff] }
 0x170   : > { %v638_v0 = vpop.f32.mrf.mxu2 }
 0x171   : > { %v680_v28 = vadd.f32 %v638_v0, %v467_v16  ;;  %v469_v1 = vpop.f32.mrf.mxu1  ;;  %v2935_v16 = vld [vmem:[#allocation3_spill] sm:$0xff] }
 0x172   : > { %v848_v55 = vpop.f32.mrf.mxu3  ;;  %v470_v47 = vadd.f32 %v469_v1, %v2933_v21 }
 0x173   : > { %v1041_v44 = vpop.f32.mrf.mxu0  ;;  %v880_v54 = vadd.f32 %v838_v11, %v680_v28  ;;  %v2937_v28 = vld [vmem:[#allocation13_spill] sm:$0xff] }
 0x174   : > { %2088 = vmatmul.msk.bf16.gmra.mxu1 %vm240_vm0, %v2429_v45 }
 0x175   : > { %2108 = vmatmul.msk.bf16.gmra.mxu2 %vm240_vm0, %v2931_v36  ;;  %v2705_v61 = vadd.f32 %v1038_v10, %v880_v54 }
 0x176   : > { %2148 = vmatmul.msk.bf16.gmra.mxu0 %vm240_vm0, %v2932_v14 }
 0x177   : > { %2130 = vmatmul.msk.bf16.gmra.mxu3 %vm240_vm0, %v1523_v51 }
 0x178   : > { %v641_v9 = vpop.f32.mrf.mxu2 }
 0x179   : > { %v681_v11 = vadd.f32 %v641_v9, %v470_v47  ;;  %v471_v41 = vpop.f32.mrf.mxu1 }
 0x17a   : > { %v851_v37 = vpop.f32.mrf.mxu3  ;;  %v472_v57 = vadd.f32 %v471_v41, %v2934_v48  ;;  %v1505_v41 = vld [vmem:[%s2231_s22 + $0xa1] sm:$0xff] }
 0x17b   : > { %v1043_v27 = vpop.f32.mrf.mxu0  ;;  %v881_v45 = vadd.f32 %v841_v56, %v681_v11  ;;  %v2936_v56 = vld [vmem:[#allocation12_spill] sm:$0xff] }
 0x17d   : > { %v2709_v8 = vadd.f32 %v1041_v44, %v881_v45 }
 0x180   : > { %v643_v13 = vpop.f32.mrf.mxu2 }
 0x181   : > { %v682_v49 = vadd.f32 %v643_v13, %v472_v57  ;;  %v474_v39 = vpop.f32.mrf.mxu1 }
 0x182   : > { %v853_v10 = vpop.f32.mrf.mxu3  ;;  %v475_v1 = vadd.f32 %v474_v39, %v2937_v28 }
 0x183   : > { %v1046_v26 = vpop.f32.mrf.mxu0  ;;  %v882_v2 = vadd.f32 %v843_v62, %v682_v49  ;;  %v2939_v49 = vld [vmem:[#allocation6_spill] sm:$0xff] }
 0x184   : > { %2089 = vmatmul.msk.bf16.gmra.mxu1 %vm240_vm0, %v2932_v14  ;;  %v2938_v14 = vld [vmem:[#allocation14_spill] sm:$0xff] }
 0x185   : > { %2109 = vmatmul.msk.bf16.gmra.mxu2 %vm240_vm0, %v2935_v16  ;;  %v2720_v0 = vadd.f32 %v1043_v27, %v882_v2  ;;  %v1506_v27 = vld [vmem:[%s2231_s22 + $0xa9] sm:$0xff] }
 0x186   : > { %2149 = vmatmul.msk.bf16.gmra.mxu0 %vm240_vm0, %v2936_v56  ;;  %v1525_v13 = vpack.c.bf16 %v1506_v27, %v1505_v41  ;;  %v2943_v41 = vld [vmem:[#allocation7_spill] sm:$0xff] }
 0x187   : > { %2131 = vmatmul.msk.bf16.gmra.mxu3 %vm240_vm0, %v1524_v29 }
 0x188   : > { %v646_v31 = vpop.f32.mrf.mxu2 }
 0x189   : > { %v683_v62 = vadd.f32 %v646_v31, %v475_v1  ;;  %v476_v3 = vpop.f32.mrf.mxu1  ;;  %v2942_v1 = vld [vmem:[#allocation5_spill] sm:$0xff] }
 0x18a   : > { %v856_v51 = vpop.f32.mrf.mxu3  ;;  %v477_v21 = vadd.f32 %v476_v3, %v2938_v14  ;;  %v1507_v14 = vld [vmem:[%s2231_s22 + $0xb1] sm:$0xff] }
 0x18b   : > { %v1048_v44 = vpop.f32.mrf.mxu0  ;;  %v883_v54 = vadd.f32 %v846_v33, %v683_v62  ;;  %v2940_v33 = vld [vmem:[#allocation15_spill] sm:$0xff] }
 0x18d   : > { %v2724_v36 = vadd.f32 %v1046_v26, %v883_v54 }
 0x190   : > { %v648_v47 = vpop.f32.mrf.mxu2 }
 0x191   : > { %v684_v9 = vadd.f32 %v648_v47, %v477_v21  ;;  %v479_v11 = vpop.f32.mrf.mxu1 }
 0x192   : > { %v858_v57 = vpop.f32.mrf.mxu3  ;;  %v480_v43 = vadd.f32 %v479_v11, %v2941_v34 }
 0x193   : > { %v1051_v45 = vpop.f32.mrf.mxu0  ;;  %v884_v48 = vadd.f32 %v848_v55, %v684_v9 }
 0x194   : > { %2090 = vmatmul.msk.bf16.gmra.mxu1 %vm240_vm0, %v2936_v56 }
 0x195   : > { %2110 = vmatmul.msk.bf16.gmra.mxu2 %vm240_vm0, %v2939_v49  ;;  %v2735_v39 = vadd.f32 %v1048_v44, %v884_v48  ;;  %v1508_v44 = vld [vmem:[%s2231_s22 + $0xb9] sm:$0xff] }
 0x196   : > { %2150 = vmatmul.msk.bf16.gmra.mxu0 %vm240_vm0, %v2940_v33  ;;  %v1526_v11 = vpack.c.bf16 %v1508_v44, %v1507_v14 }
 0x197   : > { %2132 = vmatmul.msk.bf16.gmra.mxu3 %vm240_vm0, %v1525_v13 }
 0x198   : > { %v651_v26 = vpop.f32.mrf.mxu2 }
 0x199   : > { %v685_v55 = vadd.f32 %v651_v26, %v480_v43  ;;  %v481_v2 = vpop.f32.mrf.mxu1 }
 0x19a   : > { %v1591_v56 = vpop.f32.mrf.mxu3  ;;  %v482_v31 = vadd.f32 %v481_v2, %v2942_v1 }
 0x19b   : > { %v1053_v29 = vpop.f32.mrf.mxu0  ;;  %v885_v16 = vadd.f32 %v851_v37, %v685_v55 }
 0x19d   : > { %v2739_v28 = vadd.f32 %v1051_v45, %v885_v16  ;;  %v1510_v16 = vld [vmem:[%s2231_s22 + $0xc9] sm:$0xff] }
 0x1a0   : > { %v653_v62 = vpop.f32.mrf.mxu2 }
 0x1a1   : > { %v686_v3 = vadd.f32 %v653_v62, %v482_v31  ;;  %v484_v54 = vpop.f32.mrf.mxu1 }
 0x1a2   : > { %v1593_v9 = vpop.f32.mrf.mxu3  ;;  %v485_v27 = vadd.f32 %v484_v54, %v2943_v41 }
 0x1a3   : > { %v1056_v21 = vpop.f32.mrf.mxu0  ;;  %v886_v47 = vadd.f32 %v853_v10, %v686_v3 }
 0x1a4   : > { %2091 = vmatmul.msk.bf16.gmra.mxu1 %vm240_vm0, %v2940_v33 }
 0x1a5   : > { %2111 = vmatmul.msk.bf16.gmra.mxu2 %vm240_vm0, %v2471_v6  ;;  %v2750_v37 = vadd.f32 %v1053_v29, %v886_v47  ;;  %v2944_v6 = vld [vmem:[#allocation9_spill] sm:$0xff]  ;;  %v1509_v29 = vld [vmem:[%s2231_s22 + $0xc1] sm:$0xff] }
 0x1a6   : > { %2151 = vmatmul.msk.bf16.gmra.mxu0 %vm240_vm0, %v2537_v20  ;;  %v1527_v3 = vpack.c.bf16 %v1510_v16, %v1509_v29 }
 0x1a7   : > { %2133 = vmatmul.msk.bf16.gmra.mxu3 %vm240_vm0, %v1526_v11 }
 0x1a8   : > { %v656_v45 = vpop.f32.mrf.mxu2 }
 0x1a9   : > { %v687_v10 = vadd.f32 %v656_v45, %v485_v27  ;;  %v486_v48 = vpop.f32.mrf.mxu1 }
 0x1aa   : > { %v1596_v33 = vpop.f32.mrf.mxu3  ;;  %v487_v43 = vadd.f32 %v486_v48, %v2944_v6  ;;  %v1512_v48 = vld [vmem:[%s2231_s22 + $0xd9] sm:$0xff] }
 0x1ab   : > { %v1058_v13 = vpop.f32.mrf.mxu0  ;;  %v887_v49 = vadd.f32 %v856_v51, %v687_v10  ;;  %v1511_v10 = vld [vmem:[%s2231_s22 + $0xd1] sm:$0xff] }
 0x1ac   : > { %v1528_v6 = vpack.c.bf16 %v1512_v48, %v1511_v10  ;;  %v1515_v48 = vld [vmem:[%s2231_s22 + $0xf1] sm:$0xff] }
 0x1ad   : > { %v2754_v34 = vadd.f32 %v1056_v21, %v887_v49 }
 0x1b0   : > { %v658_v26 = vpop.f32.mrf.mxu2 }
 0x1b1   : > { %v688_v55 = vadd.f32 %v658_v26, %v487_v43  ;;  %v1191_v2 = vpop.f32.mrf.mxu1 }
 0x1b2   : > { %v1598_v62 = vpop.f32.mrf.mxu3  ;;  %v1261_v54 = vadd.f32 %v1191_v2, %v2533_v30  ;;  %v2945_v30 = vld [vmem:[#allocation16_spill] sm:$0xff] }
 0x1b3   : > { %v1791_v1 = vpop.f32.mrf.mxu0  ;;  %v888_v31 = vadd.f32 %v858_v57, %v688_v55 }
 0x1b4   : > { %2092 = vmatmul.msk.bf16.gmra.mxu1 %vm240_vm0, %v2537_v20 }
 0x1b5   : > { %2112 = vmatmul.msk.bf16.gmra.mxu2 %vm240_vm0, %v2499_v42  ;;  %v2765_v51 = vadd.f32 %v1058_v13, %v888_v31 }
 0x1b6   : > { %2152 = vmatmul.msk.bf16.gmra.mxu0 %vm240_vm0, %v2559_v18 }
 0x1b7   : > { %2134 = vmatmul.msk.bf16.gmra.mxu3 %vm240_vm0, %v1527_v3 }
 0x1b8   : > { %v1391_v14 = vpop.f32.mrf.mxu2 }
 0x1b9   : > { %v1461_v57 = vadd.f32 %v1391_v14, %v1261_v54  ;;  %v1193_v44 = vpop.f32.mrf.mxu1 }
 0x1ba   : > { %v1601_v47 = vpop.f32.mrf.mxu3  ;;  %v1262_v11 = vadd.f32 %v1193_v44, %v2945_v30 }
 0x1bb   : > { %v1793_v20 = vpop.f32.mrf.mxu0  ;;  %v1661_v21 = vadd.f32 %v1591_v56, %v1461_v57 }
 0x1bd   : > { %v1861_v42 = vadd.f32 %v1791_v1, %v1661_v21 }
 0x1bf   : > { %1890 = vst.msk [vmem:[%s2773_s8] sm:$0xff] %vm1889_vm1, %v1861_v42 }
 0x1c0   : > { %v1393_v41 = vpop.f32.mrf.mxu2 }
 0x1c1   : > { %v1462_v27 = vadd.f32 %v1393_v41, %v1262_v11  ;;  %v1196_v45 = vpop.f32.mrf.mxu1 }
 0x1c2   : > { %v1603_v49 = vpop.f32.mrf.mxu3  ;;  %v1263_v26 = vadd.f32 %v1196_v45, %v2555_v46 }
 0x1c3   : > { %v1796_v56 = vpop.f32.mrf.mxu0  ;;  %v1662_v13 = vadd.f32 %v1593_v9, %v1462_v27 }
 0x1c4   : > { %2093 = vmatmul.msk.bf16.gmra.mxu1 %vm240_vm0, %v2559_v18 }
 0x1c5   : > { %v1862_v43 = vadd.f32 %v1793_v20, %v1662_v13  ;;  %2113 = vmatmul.msk.bf16.gmra.mxu2 %vm240_vm0, %v2524_v40  ;;  %v2946_v40 = vld [vmem:[#allocation17_spill] sm:$0xff] }
 0x1c6   : > { %2153 = vmatmul.msk.bf16.gmra.mxu0 %vm240_vm0, %v2581_v24 }
 0x1c7   : > { %1891 = vst.msk [vmem:[%s2773_s8 + $0x8] sm:$0xff] %vm1889_vm1, %v1862_v43  ;;  %2135 = vmatmul.msk.bf16.gmra.mxu3 %vm240_vm0, %v1528_v6 }
 0x1c8   : > { %v1396_v55 = vpop.f32.mrf.mxu2 }
 0x1c9   : > { %v1463_v9 = vadd.f32 %v1396_v55, %v1263_v26  ;;  %v1198_v2 = vpop.f32.mrf.mxu1 }
 0x1ca   : > { %v1606_v16 = vpop.f32.mrf.mxu3  ;;  %v1264_v31 = vadd.f32 %v1198_v2, %v2946_v40 }
 0x1cb   : > { %v1798_v29 = vpop.f32.mrf.mxu0  ;;  %v1663_v18 = vadd.f32 %v1596_v33, %v1463_v9 }
 0x1cd   : > { %v1863_v1 = vadd.f32 %v1796_v56, %v1663_v18  ;;  %v1714_v18 = vld [vmem:[%s2231_s22 + $0xea] sm:$0xff] }
 0x1cf   : > { %1892 = vst.msk [vmem:[%s2773_s8 + $0x10] sm:$0xff] %vm1889_vm1, %v1863_v1 }
 0x1d0   : > { %v1398_v3 = vpop.f32.mrf.mxu2 }
 0x1d1   : > { %v1464_v54 = vadd.f32 %v1398_v3, %v1264_v31  ;;  %v1201_v14 = vpop.f32.mrf.mxu1 }
 0x1d2   : > { %v1608_v46 = vpop.f32.mrf.mxu3  ;;  %v1265_v33 = vadd.f32 %v1201_v14, %v2577_v32  ;;  %v1516_v32 = vld [vmem:[%s2231_s22 + $0xf9] sm:$0xff] }
 0x1d3   : > { %v1801_v57 = vpop.f32.mrf.mxu0  ;;  %v1664_v44 = vadd.f32 %v1598_v62, %v1464_v54 }
 0x1d4   : > { %2094 = vmatmul.msk.bf16.gmra.mxu1 %vm240_vm0, %v2581_v24 }
 0x1d5   : > { %v1864_v20 = vadd.f32 %v1798_v29, %v1664_v44  ;;  %2114 = vmatmul.msk.bf16.gmra.mxu2 %vm240_vm0, %v2544_v50  ;;  %v1713_v29 = vld [vmem:[%s2231_s22 + $0xe2] sm:$0xff] }
 0x1d6   : > { %2154 = vmatmul.msk.bf16.gmra.mxu0 %vm240_vm0, %v2603_v25 }
 0x1d7   : > { %1893 = vst.msk [vmem:[%s2773_s8 + $0x18] sm:$0xff] %vm1889_vm1, %v1864_v20  ;;  %2136 = vmatmul.msk.bf16.gmra.mxu3 %vm240_vm0, %v2625_v5  ;;  %v1530_v5 = vpack.c.bf16 %v1516_v32, %v1515_v48 }
 0x1d8   : > { %v1401_v21 = vpop.f32.mrf.mxu2 }
 0x1d9   : > { %v1465_v62 = vadd.f32 %v1401_v21, %v1265_v33  ;;  %v1203_v42 = vpop.f32.mrf.mxu1 }
 0x1da   : > { %v1611_v11 = vpop.f32.mrf.mxu3  ;;  %v1266_v50 = vadd.f32 %v1203_v42, %v2594_v22 }
 0x1db   : > { %v1803_v24 = vpop.f32.mrf.mxu0  ;;  %v1665_v30 = vadd.f32 %v1601_v47, %v1465_v62 }
 0x1dd   : > { %v1865_v41 = vadd.f32 %v1801_v57, %v1665_v30  ;;  %v2947_v57 = vld [vmem:[#allocation18_spill] sm:$0xff]  ;;  %v1715_v30 = vld [vmem:[%s2231_s22 + $0xf2] sm:$0xff] }
 0x1df   : > { %1894 = vst.msk [vmem:[%s2773_s8 + $0x20] sm:$0xff] %vm1889_vm1, %v1865_v41  ;;  %v1716_v41 = vld [vmem:[%s2231_s22 + $0xfa] sm:$0xff] }
 0x1e0   : > { %v1403_v27 = vpop.f32.mrf.mxu2  ;;  %v1730_v48 = vpack.c.bf16 %v1716_v41, %v1715_v30 }
 0x1e1   : > { %v1466_v45 = vadd.f32 %v1403_v27, %v1266_v50  ;;  %v1206_v10 = vpop.f32.mrf.mxu1 }
 0x1e2   : > { %v1613_v6 = vpop.f32.mrf.mxu3  ;;  %v1267_v22 = vadd.f32 %v1206_v10, %v2599_v17  ;;  %v1729_v17 = vpack.c.bf16 %v1714_v18, %v1713_v29 }
 0x1e3   : > { %v1806_v56 = vpop.f32.mrf.mxu0  ;;  %v1666_v13 = vadd.f32 %v1603_v49, %v1466_v45 }
 0x1e4   : > { %2095 = vmatmul.msk.bf16.gmra.mxu1 %vm240_vm0, %v2603_v25 }
 0x1e5   : > { %v1866_v47 = vadd.f32 %v1803_v24, %v1666_v13  ;;  %2115 = vmatmul.msk.bf16.gmra.mxu2 %vm240_vm0, %v2566_v60  ;;  %v1316_v24 = vld [vmem:[%s2231_s22 + $0xf8] sm:$0xff] }
 0x1e6   : > { %2155 = vmatmul.msk.bf16.gmra.mxu0 %vm240_vm0, %v2623_v15 }
 0x1e7   : > { %1895 = vst.msk [vmem:[%s2773_s8 + $0x28] sm:$0xff] %vm1889_vm1, %v1866_v47  ;;  %2137 = vmatmul.msk.bf16.gmra.mxu3 %vm240_vm0, %v1530_v5 }
 0x1e8   : > { %v1406_v49 = vpop.f32.mrf.mxu2 }
 0x1e9   : > { %v1467_v43 = vadd.f32 %v1406_v49, %v1267_v22  ;;  %v1208_v26 = vpop.f32.mrf.mxu1 }
 0x1ea   : > { %v1616_v9 = vpop.f32.mrf.mxu3  ;;  %v1268_v60 = vadd.f32 %v1208_v26, %v2611_v59 }
 0x1eb   : > { %v1808_v25 = vpop.f32.mrf.mxu0  ;;  %v1667_v55 = vadd.f32 %v1606_v16, %v1467_v43 }
 0x1ed   : > { %v1867_v2 = vadd.f32 %v1806_v56, %v1667_v55 }
 0x1ef   : > { %1896 = vst.msk [vmem:[%s2773_s8 + $0x30] sm:$0xff] %vm1889_vm1, %v1867_v2 }
 0x1f0   : > { %v1408_v1 = vpop.f32.mrf.mxu2 }
 0x1f1   : > { %v1468_v40 = vadd.f32 %v1408_v1, %v1268_v60  ;;  %v1211_v31 = vpop.f32.mrf.mxu1 }
 0x1f2   : > { %v1618_v14 = vpop.f32.mrf.mxu3  ;;  %v1269_v59 = vadd.f32 %v1211_v31, %v2617_v52 }
 0x1f3   : > { %v1811_v3 = vpop.f32.mrf.mxu0  ;;  %v1668_v54 = vadd.f32 %v1608_v46, %v1468_v40 }
 0x1f4   : > { %2096 = vmatmul.msk.bf16.gmra.mxu1 %vm240_vm0, %v2623_v15  ;;  %v1315_v15 = vld [vmem:[%s2231_s22 + $0xf0] sm:$0xff] }
 0x1f5   : > { %v1868_v16 = vadd.f32 %v1808_v25, %v1668_v54  ;;  %2116 = vmatmul.msk.bf16.gmra.mxu2 %vm240_vm0, %v2947_v57  ;;  %v1330_v52 = vpack.c.bf16 %v1316_v24, %v1315_v15 }
 0x1f6   : > { %2156 = vmatmul.msk.bf16.gmra.mxu0 %vm240_vm0, %v1729_v17 }
 0x1f7   : > { %1897 = vst.msk [vmem:[%s2773_s8 + $0x38] sm:$0xff] %vm1889_vm1, %v1868_v16 }
 0x1f8   : > { %v1411_v44 = vpop.f32.mrf.mxu2 }
 0x1f9   : > { %v1469_v46 = vadd.f32 %v1411_v44, %v1269_v59  ;;  %v1213_v20 = vpop.f32.mrf.mxu1 }
 0x1fa   : > { %v1621_v62 = vpop.f32.mrf.mxu3  ;;  %v1270_v50 = vadd.f32 %v1213_v20, %v2633_v38 }
 0x1fb   : > { %v1813_v33 = vpop.f32.mrf.mxu0  ;;  %v1669_v21 = vadd.f32 %v1611_v11, %v1469_v46 }
 0x1fd   : > { %v1869_v42 = vadd.f32 %v1811_v3, %v1669_v21 }
 0x1ff   : > { %1898 = vst.msk [vmem:[%s2773_s8 + $0x40] sm:$0xff] %vm1889_vm1, %v1869_v42 }
 0x200   : > { %v1413_v27 = vpop.f32.mrf.mxu2 }
 0x201   : > { %v1470_v45 = vadd.f32 %v1413_v27, %v1270_v50  ;;  %v1216_v10 = vpop.f32.mrf.mxu1 }
 0x202   : > { %v1623_v13 = vpop.f32.mrf.mxu3  ;;  %v1271_v38 = vadd.f32 %v1216_v10, %v2638_v63 }
 0x203   : > { %v1816_v32 = vpop.f32.mrf.mxu0  ;;  %v1670_v56 = vadd.f32 %v1613_v6, %v1470_v45 }
 0x204   : > { %2097 = vmatmul.msk.bf16.gmra.mxu1 %vm240_vm0, %v1729_v17 }
 0x205   : > { %v1870_v11 = vadd.f32 %v1813_v33, %v1670_v56  ;;  %2117 = vmatmul.msk.bf16.gmra.mxu2 %vm240_vm0, %v1330_v52 }
 0x206   : > { %2157 = vmatmul.msk.bf16.gmra.mxu0 %vm240_vm0, %v1730_v48 }
 0x207   : > { %1899 = vst.msk [vmem:[%s2773_s8 + $0x48] sm:$0xff] %vm1889_vm1, %v1870_v11 }
 0x208   : > { %v1416_v5 = vpop.f32.mrf.mxu2 }
 0x209   : > { %v1471_v47 = vadd.f32 %v1416_v5, %v1271_v38  ;;  %v1218_v22 = vpop.f32.mrf.mxu1 }
 0x20a   : > { %v1272_v6 = vadd.f32 %v1218_v22, %v2647_v53  ;;  %v1626_v55 = vpop.f32.mrf.mxu3 }
 0x20b   : > { %v1818_v49 = vpop.f32.mrf.mxu0  ;;  %v1671_v43 = vadd.f32 %v1616_v9, %v1471_v47 }
 0x20d   : > { %v1871_v26 = vadd.f32 %v1816_v32, %v1671_v43 }
 0x20f   : > { %1900 = vst.msk [vmem:[%s2773_s8 + $0x50] sm:$0xff] %vm1889_vm1, %v1871_v26 }
 0x210   : > { %v1418_v25 = vpop.f32.mrf.mxu2 }
 0x211   : > { %v1472_v2 = vadd.f32 %v1418_v25, %v1272_v6  ;;  %v1221_v29 = vpop.f32.mrf.mxu1 }
 0x212   : > { %v1273_v63 = vadd.f32 %v1221_v29, %v2652_v4  ;;  %v1628_v3 = vpop.f32.mrf.mxu3 }
 0x213   : > { %v1821_v18 = vpop.f32.mrf.mxu0  ;;  %v1672_v60 = vadd.f32 %v1618_v14, %v1472_v2 }
 0x215   : > { %v1872_v1 = vadd.f32 %v1818_v49, %v1672_v60 }
 0x217   : > { %1901 = vst.msk [vmem:[%s2773_s8 + $0x58] sm:$0xff] %vm1889_vm1, %v1872_v1 }
 0x218   : > { %v1421_v40 = vpop.f32.mrf.mxu2 }
 0x219   : > { %v1473_v9 = vadd.f32 %v1421_v40, %v1273_v63  ;;  %v1223_v31 = vpop.f32.mrf.mxu1 }
 0x21a   : > { %v1274_v16 = vadd.f32 %v1223_v31, %v2661_v7  ;;  %v1631_v20 = vpop.f32.mrf.mxu3 }
 0x21b   : > { %v1823_v17 = vpop.f32.mrf.mxu0  ;;  %v1673_v54 = vadd.f32 %v1621_v62, %v1473_v9 }
 0x21d   : > { %v1873_v53 = vadd.f32 %v1821_v18, %v1673_v54 }
 0x21f   : > { %1902 = vst.msk [vmem:[%s2773_s8 + $0x60] sm:$0xff] %vm1889_vm1, %v1873_v53 }
 0x220   : > { %v1423_v57 = vpop.f32.mrf.mxu2 }
 0x221   : > { %v1474_v14 = vadd.f32 %v1423_v57, %v1274_v16  ;;  %v1226_v59 = vpop.f32.mrf.mxu1 }
 0x222   : > { %v1275_v33 = vadd.f32 %v1226_v59, %v2666_v12  ;;  %v1633_v7 = vpop.f32.mrf.mxu3 }
 0x223   : > { %v1826_v44 = vpop.f32.mrf.mxu0  ;;  %v1674_v46 = vadd.f32 %v1623_v13, %v1474_v14 }
 0x225   : > { %v1874_v4 = vadd.f32 %v1823_v17, %v1674_v46 }
 0x227   : > { %1903 = vst.msk [vmem:[%s2773_s8 + $0x68] sm:$0xff] %vm1889_vm1, %v1874_v4 }
 0x228   : > { %v1426_v21 = vpop.f32.mrf.mxu2 }
 0x229   : > { %v1475_v62 = vadd.f32 %v1426_v21, %v1275_v33  ;;  %v1228_v42 = vpop.f32.mrf.mxu1 }
 0x22a   : > { %v1276_v41 = vadd.f32 %v1228_v42, %v2675_v23  ;;  %v1636_v56 = vpop.f32.mrf.mxu3 }
 0x22b   : > { %v1828_v15 = vpop.f32.mrf.mxu0  ;;  %v1675_v24 = vadd.f32 %v1626_v55, %v1475_v62 }
 0x22d   : > { %v1875_v30 = vadd.f32 %v1826_v44, %v1675_v24 }
 0x22f   : > { %1904 = vst.msk [vmem:[%s2773_s8 + $0x70] sm:$0xff] %vm1889_vm1, %v1875_v30 }
 0x230   : > { %v1428_v50 = vpop.f32.mrf.mxu2 }
 0x231   : > { %v1476_v27 = vadd.f32 %v1428_v50, %v1276_v41  ;;  %v1231_v45 = vpop.f32.mrf.mxu1 }
 0x232   : > { %v1277_v12 = vadd.f32 %v1231_v45, %v2680_v19  ;;  %v1638_v6 = vpop.f32.mrf.mxu3 }
 0x233   : > { %v1831_v10 = vpop.f32.mrf.mxu0  ;;  %v1676_v52 = vadd.f32 %v1628_v3, %v1476_v27 }
 0x235   : > { %v1876_v48 = vadd.f32 %v1828_v15, %v1676_v52 }
 0x237   : > { %1905 = vst.msk [vmem:[%s2773_s8 + $0x78] sm:$0xff] %vm1889_vm1, %v1876_v48 }
 0x238   : > { %v1431_v32 = vpop.f32.mrf.mxu2 }
 0x239   : > { %v1477_v11 = vadd.f32 %v1431_v32, %v1277_v12  ;;  %v1233_v13 = vpop.f32.mrf.mxu1 }
 0x23a   : > { %v1278_v23 = vadd.f32 %v1233_v13, %v2689_v35  ;;  %v1641_v63 = vpop.f32.mrf.mxu3 }
 0x23b   : > { %v1833_v38 = vpop.f32.mrf.mxu0  ;;  %v1677_v5 = vadd.f32 %v1631_v20, %v1477_v11 }
 0x23d   : > { %v1877_v47 = vadd.f32 %v1831_v10, %v1677_v5 }
 0x23f   : > { %1906 = vst.msk [vmem:[%s2773_s8 + $0x80] sm:$0xff] %vm1889_vm1, %v1877_v47 }
 0x240   : > { %v1433_v22 = vpop.f32.mrf.mxu2 }
 0x241   : > { %v1478_v49 = vadd.f32 %v1433_v22, %v1278_v23  ;;  %v1236_v43 = vpop.f32.mrf.mxu1 }
 0x242   : > { %v1279_v55 = vadd.f32 %v1236_v43, %v2694_v58  ;;  %v1643_v58 = vpop.f32.mrf.mxu3 }
 0x243   : > { %v1836_v26 = vpop.f32.mrf.mxu0  ;;  %v1678_v25 = vadd.f32 %v1633_v7, %v1478_v49 }
 0x245   : > { %v1878_v19 = vadd.f32 %v1833_v38, %v1678_v25 }
 0x247   : > { %1907 = vst.msk [vmem:[%s2773_s8 + $0x88] sm:$0xff] %vm1889_vm1, %v1878_v19 }
 0x248   : > { %v1436_v2 = vpop.f32.mrf.mxu2 }
 0x249   : > { %v1479_v29 = vadd.f32 %v1436_v2, %v1279_v55  ;;  %v1238_v18 = vpop.f32.mrf.mxu1 }
 0x24a   : > { %v1280_v40 = vadd.f32 %v1238_v18, %v2705_v61  ;;  %v1646_v33 = vpop.f32.mrf.mxu3 }
 0x24b   : > { %v1838_v60 = vpop.f32.mrf.mxu0  ;;  %v1679_v1 = vadd.f32 %v1636_v56, %v1479_v29 }
 0x24d   : > { %v1879_v35 = vadd.f32 %v1836_v26, %v1679_v1 }
 0x24f   : > { %1908 = vst.msk [vmem:[%s2773_s8 + $0x90] sm:$0xff] %vm1889_vm1, %v1879_v35 }
 0x250   : > { %v1438_v9 = vpop.f32.mrf.mxu2 }
 0x251   : > { %v1480_v31 = vadd.f32 %v1438_v9, %v1280_v40  ;;  %v1241_v17 = vpop.f32.mrf.mxu1 }
 0x252   : > { %v1281_v16 = vadd.f32 %v1241_v17, %v2709_v8  ;;  %v1648_v50 = vpop.f32.mrf.mxu3 }
 0x253   : > { %v1841_v3 = vpop.f32.mrf.mxu0  ;;  %v1680_v54 = vadd.f32 %v1638_v6, %v1480_v31 }
 0x255   : > { %v1880_v53 = vadd.f32 %v1838_v60, %v1680_v54 }
 0x257   : > { %1909 = vst.msk [vmem:[%s2773_s8 + $0x98] sm:$0xff] %vm1889_vm1, %v1880_v53 }
 0x258   : > { %v1441_v57 = vpop.f32.mrf.mxu2 }
 0x259   : > { %v1481_v14 = vadd.f32 %v1441_v57, %v1281_v16  ;;  %v1243_v59 = vpop.f32.mrf.mxu1 }
 0x25a   : > { %v1282_v61 = vadd.f32 %v1243_v59, %v2720_v0  ;;  %v1651_v56 = vpop.f32.mrf.mxu3 }
 0x25b   : > { %v1843_v44 = vpop.f32.mrf.mxu0  ;;  %v1681_v46 = vadd.f32 %v1641_v63, %v1481_v14 }
 0x25d   : > { %v1881_v20 = vadd.f32 %v1841_v3, %v1681_v46 }
 0x25f   : > { %1910 = vst.msk [vmem:[%s2773_s8 + $0xa0] sm:$0xff] %vm1889_vm1, %v1881_v20 }
 0x260   : > { %v1443_v4 = vpop.f32.mrf.mxu2 }
 0x261   : > { %v1482_v21 = vadd.f32 %v1443_v4, %v1282_v61  ;;  %v1246_v62 = vpop.f32.mrf.mxu1 }
 0x262   : > { %v1283_v8 = vadd.f32 %v1246_v62, %v2724_v36  ;;  %v1653_v49 = vpop.f32.mrf.mxu3 }
 0x263   : > { %v1846_v42 = vpop.f32.mrf.mxu0  ;;  %v1682_v15 = vadd.f32 %v1643_v58, %v1482_v21 }
 0x265   : > { %v1882_v24 = vadd.f32 %v1843_v44, %v1682_v15 }
 0x267   : > { %1911 = vst.msk [vmem:[%s2773_s8 + $0xa8] sm:$0xff] %vm1889_vm1, %v1882_v24 }
 0x268   : > { %v1446_v30 = vpop.f32.mrf.mxu2 }
 0x269   : > { %v1483_v7 = vadd.f32 %v1446_v30, %v1283_v8  ;;  %v1248_v41 = vpop.f32.mrf.mxu1 }
 0x26a   : > { %v1284_v10 = vadd.f32 %v1248_v41, %v2735_v39  ;;  %v1656_v2 = vpop.f32.mrf.mxu3 }
 0x26b   : > { %v1683_v27 = vadd.f32 %v1646_v33, %v1483_v7  ;;  %v1848_v45 = vpop.f32.mrf.mxu0 }
 0x26d   : > { %v1883_v0 = vadd.f32 %v1846_v42, %v1683_v27 }
 0x26f   : > { %1912 = vst.msk [vmem:[%s2773_s8 + $0xb0] sm:$0xff] %vm1889_vm1, %v1883_v0 }
 0x270   : > { %v1448_v52 = vpop.f32.mrf.mxu2 }
 0x271   : > { %v1484_v48 = vadd.f32 %v1448_v52, %v1284_v10  ;;  %v1251_v12 = vpop.f32.mrf.mxu1 }
 0x272   : > { %v1285_v13 = vadd.f32 %v1251_v12, %v2739_v28  ;;  %v1658_v31 = vpop.f32.mrf.mxu3 }
 0x273   : > { %v1684_v32 = vadd.f32 %v1648_v50, %v1484_v48  ;;  %v1851_v36 = vpop.f32.mrf.mxu0 }
 0x275   : > { %v1884_v11 = vadd.f32 %v1848_v45, %v1684_v32 }
 0x277   : > { %1913 = vst.msk [vmem:[%s2773_s8 + $0xb8] sm:$0xff] %vm1889_vm1, %v1884_v11 }
 0x278   : > { %v1451_v38 = vpop.f32.mrf.mxu2 }
 0x279   : > { %v1485_v5 = vadd.f32 %v1451_v38, %v1285_v13  ;;  %v1253_v47 = vpop.f32.mrf.mxu1 }
 0x27a   : > { %v1286_v39 = vadd.f32 %v1253_v47, %v2750_v37 }
 0x27b   : > { %v1685_v23 = vadd.f32 %v1651_v56, %v1485_v5  ;;  %v1853_v43 = vpop.f32.mrf.mxu0 }
 0x27d   : > { %v1885_v22 = vadd.f32 %v1851_v36, %v1685_v23 }
 0x27f   : > { %1914 = vst.msk [vmem:[%s2773_s8 + $0xc0] sm:$0xff] %vm1889_vm1, %v1885_v22 }
 0x280   : > { %v1453_v26 = vpop.f32.mrf.mxu2 }
 0x281   : > { %v1486_v6 = vadd.f32 %v1453_v26, %v1286_v39  ;;  %v1256_v25 = vpop.f32.mrf.mxu1 }
 0x282   : > { %v1287_v28 = vadd.f32 %v1256_v25, %v2754_v34 }
 0x283   : > { %v1686_v19 = vadd.f32 %v1653_v49, %v1486_v6  ;;  %v1856_v60 = vpop.f32.mrf.mxu0 }
 0x285   : > { %v1886_v55 = vadd.f32 %v1853_v43, %v1686_v19 }
 0x287   : > { %1915 = vst.msk [vmem:[%s2773_s8 + $0xc8] sm:$0xff] %vm1889_vm1, %v1886_v55 }
 0x288   : > { %v1456_v29 = vpop.f32.mrf.mxu2 }
 0x289   : > { %v1487_v18 = vadd.f32 %v1456_v29, %v1287_v28  ;;  %v1258_v63 = vpop.f32.mrf.mxu1 }
 0x28a   : > { %v1288_v37 = vadd.f32 %v1258_v63, %v2765_v51 }
 0x28b   : > { %v1687_v1 = vadd.f32 %v1656_v2, %v1487_v18  ;;  %v1858_v3 = vpop.f32.mrf.mxu0 }
 0x28d   : > { %v1887_v35 = vadd.f32 %v1856_v60, %v1687_v1 }
 0x28f   : > { %1916 = vst.msk [vmem:[%s2773_s8 + $0xd0] sm:$0xff] %vm1889_vm1, %v1887_v35 }
 0x290   : > { %v1458_v40 = vpop.f32.mrf.mxu2 }
 0x291   : > { %v1488_v9 = vadd.f32 %v1458_v40, %v1288_v37 }
 0x293   : > { %v1688_v17 = vadd.f32 %v1658_v31, %v1488_v9 }
 0x295   : > { %v1888_v54 = vadd.f32 %v1858_v3, %v1688_v17 }
 0x297   : > { %1917 = vst.msk [vmem:[%s2773_s8 + $0xd8] sm:$0xff] %vm1889_vm1, %v1888_v54 }
 0x298 PF: > { %s12_s9 = sadd.s32 1, %s2188_s9  }
 0x299   : > { %p9_p4 = scmp.ge.s32.totalorder %s12_s9, 4  }
 0x29b   :  { %11 = sbr.rel (!%p9_p4) target bundleno = 1 (0x1), region = 66 }

// kernel: densenet_forward.18
= control target key start
LH: loop header
LB: loop body
LE: loop exit
PB: predicated region body
PF: predicated region fallthrough
CT: control target
= control target key end

     0   :  { %vm341_vm0 = vcmask 1043456   ;;  %vm265_vm1 = vcmask 195584   ;;  %vm633_vm2 = vcmask 130048   ;;  %s1352_s1 = inlined_call_operand.vmem [shape: bf16[24,16], index: 1, kind: input, shape index: {}]   ;;  %s1353_s0 = inlined_call_operand.vmem [shape: f32[392,24], index: 0, kind: input, shape index: {}]   ;;  %s1354_s2 = inlined_call_operand.vmem [shape: f32[1,24], index: 2, kind: input, shape index: {}]   ;;  %s1355_s3 = inlined_call_operand.vmem [shape: f32[1,24], index: 3, kind: input, shape index: {}]   ;;  %s1356_s4 = inlined_call_operand.vmem [shape: f32[1,16], index: 4, kind: input, shape index: {}]   ;;  %s1357_s5 = inlined_call_operand.vmem [shape: f32[1,16], index: 5, kind: input, shape index: {}]   ;;  %s1358_s6 = inlined_call_operand.vmem [shape: f32[392,16], index: 6, kind: output, shape index: {}]  }
   0x1   :  { %v255_v0 = vld [vmem:[%s1352_s1 + $0x8] sm:$0xf]  ;;  %v36_v1 = vld [vmem:[%s1353_s0 + $0x60] sm:$0xff]  ;;  %v50_v6 = vld [vmem:[%s1353_s0 + $0xd0] sm:$0xff] }
   0x2   :  { %v261_v2 = vunpack.c.l.b16 %v255_v0  ;;  %v37_v3 = vld [vmem:[%s1353_s0 + $0x68] sm:$0xff]  ;;  %v774_v4 = vld [vmem:[%s1354_s2] ss:$0 sm:$0xff]  ;;  %v51_v10 = vld [vmem:[%s1353_s0 + $0xd8] sm:$0xff] }
   0x3   :  { %v779_v5 = vld [vmem:[%s1355_s3] ss:$0 sm:$0xff]  ;;  %v89_v8 = vmul.f32 %v774_v4, %v36_v1  ;;  %v90_v9 = vmul.f32 %v774_v4, %v37_v3  ;;  %v103_v11 = vmul.f32 %v774_v4, %v50_v6  ;;  %v25_v13 = vld [vmem:[%s1353_s0 + $0x8] sm:$0xff]  ;;  %v104_v14 = vmul.f32 %v774_v4, %v51_v10  ;;  %v38_v31 = vld [vmem:[%s1353_s0 + $0x70] sm:$0xff] }
   0x4   :  { %v263_v7 = vpack.c.b16 %v261_v2, %v261_v2  ;;  %v24_v12 = vld [vmem:[%s1353_s0] sm:$0xff]  ;;  %v78_v16 = vmul.f32 %v774_v4, %v25_v13  ;;  %v65_v34 = vld [vmem:[%s1353_s0 + $0x148] sm:$0xff]  ;;  %v39_v37 = vld [vmem:[%s1353_s0 + $0x78] sm:$0xff]  ;;  %v91_v42 = vmul.f32 %v774_v4, %v38_v31 }
   0x5   :  { %v77_v15 = vmul.f32 %v774_v4, %v24_v12  ;;  %v142_v18 = vadd.f32 %v779_v5, %v89_v8  ;;  %v143_v19 = vadd.f32 %v779_v5, %v90_v9  ;;  %v156_v20 = vadd.f32 %v779_v5, %v103_v11  ;;  %v716_v21 = vld [vmem:[%s1352_s1] sm:$0xff]  ;;  %v53_v39 = vld [vmem:[%s1353_s0 + $0xe8] sm:$0xff]  ;;  %v26_v40 = vld [vmem:[%s1353_s0 + $0x10] sm:$0xff] }
   0x6   :  { %v343_v17 = vsel %vm341_vm0, %v263_v7, 0  ;;  %v157_v22 = vadd.f32 %v779_v5, %v104_v14  ;;  %v131_v24 = vadd.f32 %v779_v5, %v78_v16  ;;  %v64_v33 = vld [vmem:[%s1353_s0 + $0x140] sm:$0xff]  ;;  %v27_v41 = vld [vmem:[%s1353_s0 + $0x18] sm:$0xff]  ;;  %v118_v44 = vmul.f32 %v774_v4, %v65_v34  ;;  %v66_v58 = vld [vmem:[%s1353_s0 + $0x150] sm:$0xff] }
   0x7   :  { %717 = vmatpush.bf16.msra.mxu1 %v343_v17  ;;  %718 = vmatpush.bf16.msra.mxu2 %v343_v17  ;;  %v130_v23 = vadd.f32 %v779_v5, %v77_v15  ;;  %v191_v25 = vmax.f32 %v142_v18, 0.0  ;;  %v192_v26 = vmax.f32 %v143_v19, 0.0  ;;  %v205_v27 = vmax.f32 %v156_v20, 0.0  ;;  %v52_v38 = vld [vmem:[%s1353_s0 + $0xe0] sm:$0xff]  ;;  %v67_v59 = vld [vmem:[%s1353_s0 + $0x158] sm:$0xff]  ;;  %v41_v15 = vld [vmem:[%s1353_s0 + $0x88] sm:$0xff] }
   0x8   :  { %351 = vmatpush.bf16.msra.mxu0 %v343_v17  ;;  %719 = vmatpush.bf16.msra.mxu3 %v343_v17  ;;  %v206_v28 = vmax.f32 %v157_v22, 0.0  ;;  %v180_v30 = vmax.f32 %v131_v24, 0.0  ;;  %v117_v43 = vmul.f32 %v774_v4, %v64_v33  ;;  %v92_v45 = vmul.f32 %v774_v4, %v39_v37  ;;  %v40_v13 = vld [vmem:[%s1353_s0 + $0x80] sm:$0xff]  ;;  %v54_v16 = vld [vmem:[%s1353_s0 + $0xf0] sm:$0xff]  ;;  %v55_v17 = vld [vmem:[%s1353_s0 + $0xf8] sm:$0xff] }
   0x9   :  { %v179_v29 = vmax.f32 %v130_v23, 0.0  ;;  %v234_v32 = vpack.c.bf16 %v192_v26, %v191_v25  ;;  %v105_v46 = vmul.f32 %v774_v4, %v52_v38  ;;  %v106_v47 = vmul.f32 %v774_v4, %v53_v39  ;;  %v28_v18 = vld [vmem:[%s1353_s0 + $0x20] sm:$0xff]  ;;  %v29_v19 = vld [vmem:[%s1353_s0 + $0x28] sm:$0xff] }
   0xa   :  { %v241_v35 = vpack.c.bf16 %v206_v28, %v205_v27  ;;  %v79_v48 = vmul.f32 %v774_v4, %v26_v40  ;;  %v80_v49 = vmul.f32 %v774_v4, %v27_v41  ;;  %v170_v50 = vadd.f32 %v779_v5, %v117_v43  ;;  %v68_v33 = vld [vmem:[%s1353_s0 + $0x160] sm:$0xff]  ;;  %v69_v34 = vld [vmem:[%s1353_s0 + $0x168] sm:$0xff] }
   0xb   :  { %720 = vmatpush.bf16.msra.mxu1 %v716_v21  ;;  %721 = vmatpush.bf16.msra.mxu2 %v716_v21  ;;  %v228_v36 = vpack.c.bf16 %v180_v30, %v179_v29  ;;  %v171_v51 = vadd.f32 %v779_v5, %v118_v44  ;;  %v144_v54 = vadd.f32 %v779_v5, %v91_v42 }
   0xc   :  { %352 = vmatpush.bf16.msra.mxu0 %v716_v21  ;;  %722 = vmatpush.bf16.msra.mxu3 %v716_v21  ;;  %v219_v52 = vmax.f32 %v170_v50, 0.0  ;;  %v145_v55 = vadd.f32 %v779_v5, %v92_v45  ;;  %v158_v56 = vadd.f32 %v779_v5, %v105_v46  ;;  %v159_v57 = vadd.f32 %v779_v5, %v106_v47 }
   0xd   :  { %v220_v53 = vmax.f32 %v171_v51, 0.0  ;;  %v132_v60 = vadd.f32 %v779_v5, %v79_v48  ;;  %v133_v61 = vadd.f32 %v779_v5, %v80_v49  ;;  %v119_v63 = vmul.f32 %v774_v4, %v66_v58  ;;  %v42_v49 = vld [vmem:[%s1353_s0 + $0x90] sm:$0xff]  ;;  %v43_v51 = vld [vmem:[%s1353_s0 + $0x98] sm:$0xff] }
   0xe   :  { %697 = vmatmul.msk.bf16.vlgmr.msra.gmra.mxu1 %vm265_vm1, %v234_v32  ;;  %704 = vmatmul.msk.bf16.vlgmr.msra.gmra.mxu2 %vm265_vm1, %v241_v35  ;;  %v120_v0 = vmul.f32 %v774_v4, %v67_v59  ;;  %v193_v1 = vmax.f32 %v144_v54, 0.0  ;;  %v194_v2 = vmax.f32 %v145_v55, 0.0  ;;  %v207_v3 = vmax.f32 %v158_v56, 0.0  ;;  %v30_v54 = vld [vmem:[%s1353_s0 + $0x30] sm:$0xff]  ;;  %v31_v55 = vld [vmem:[%s1353_s0 + $0x38] sm:$0xff] }
   0xf   :  { %691 = vmatmul.msk.bf16.vlgmr.msra.gmra.mxu0 %vm265_vm1, %v228_v36  ;;  %v248_v62 = vpack.c.bf16 %v220_v53, %v219_v52  ;;  %v208_v6 = vmax.f32 %v159_v57, 0.0  ;;  %v181_v7 = vmax.f32 %v132_v60, 0.0  ;;  %v182_v8 = vmax.f32 %v133_v61, 0.0  ;;  %v56_v52 = vld [vmem:[%s1353_s0 + $0x100] sm:$0xff]  ;;  %v57_v53 = vld [vmem:[%s1353_s0 + $0x108] sm:$0xff] }
  0x10   :  { %v172_v9 = vadd.f32 %v779_v5, %v119_v63  ;;  %v173_v10 = vadd.f32 %v779_v5, %v120_v0  ;;  %v235_v11 = vpack.c.bf16 %v194_v2, %v193_v1  ;;  %v93_v20 = vmul.f32 %v774_v4, %v40_v13 }
  0x11   :  { %711 = vmatmul.msk.bf16.vlgmr.msra.gmra.mxu3 %vm265_vm1, %v248_v62  ;;  %v242_v12 = vpack.c.bf16 %v208_v6, %v207_v3  ;;  %v229_v14 = vpack.c.bf16 %v182_v8, %v181_v7  ;;  %v94_v23 = vmul.f32 %v774_v4, %v41_v15  ;;  %v107_v24 = vmul.f32 %v774_v4, %v54_v16  ;;  %v70_v7 = vld [vmem:[%s1353_s0 + $0x170] sm:$0xff]  ;;  %v71_v8 = vld [vmem:[%s1353_s0 + $0x178] sm:$0xff] }
  0x12   :  { %v221_v21 = vmax.f32 %v172_v9, 0.0  ;;  %v222_v22 = vmax.f32 %v173_v10, 0.0  ;;  %v108_v25 = vmul.f32 %v774_v4, %v55_v17  ;;  %v81_v26 = vmul.f32 %v774_v4, %v28_v18 }
  0x13   :  { %v82_v27 = vmul.f32 %v774_v4, %v29_v19  ;;  %v146_v29 = vadd.f32 %v779_v5, %v93_v20  ;;  %v147_v30 = vadd.f32 %v779_v5, %v94_v23  ;;  %v160_v31 = vadd.f32 %v779_v5, %v107_v24  ;;  %v44_v23 = vld [vmem:[%s1353_s0 + $0xa0] sm:$0xff] }
  0x14   :  { %v249_v28 = vpack.c.bf16 %v222_v22, %v221_v21  ;;  %v161_v32 = vadd.f32 %v779_v5, %v108_v25  ;;  %v134_v35 = vadd.f32 %v779_v5, %v81_v26  ;;  %v121_v37 = vmul.f32 %v774_v4, %v68_v33  ;;  %v45_v25 = vld [vmem:[%s1353_s0 + $0xa8] sm:$0xff]  ;;  %v58_v26 = vld [vmem:[%s1353_s0 + $0x110] sm:$0xff] }
  0x15   :  { %v135_v36 = vadd.f32 %v779_v5, %v82_v27  ;;  %v122_v38 = vmul.f32 %v774_v4, %v69_v34  ;;  %v195_v39 = vmax.f32 %v146_v29, 0.0  ;;  %v196_v40 = vmax.f32 %v147_v30, 0.0  ;;  %v59_v27 = vld [vmem:[%s1353_s0 + $0x118] sm:$0xff]  ;;  %v33_v29 = vld [vmem:[%s1353_s0 + $0x48] sm:$0xff] }
  0x16   :  { %v209_v41 = vmax.f32 %v160_v31, 0.0  ;;  %v210_v42 = vmax.f32 %v161_v32, 0.0  ;;  %v183_v43 = vmax.f32 %v134_v35, 0.0  ;;  %v174_v45 = vadd.f32 %v779_v5, %v121_v37 }
  0x17   :  { %v184_v44 = vmax.f32 %v135_v36, 0.0  ;;  %v175_v46 = vadd.f32 %v779_v5, %v122_v38  ;;  %v236_v47 = vpack.c.bf16 %v196_v40, %v195_v39  ;;  %v95_v56 = vmul.f32 %v774_v4, %v42_v49 }
  0x18   :  { %v243_v48 = vpack.c.bf16 %v210_v42, %v209_v41  ;;  %v223_v57 = vmax.f32 %v174_v45, 0.0  ;;  %v96_v59 = vmul.f32 %v774_v4, %v43_v51  ;;  %v109_v60 = vmul.f32 %v774_v4, %v56_v52 }
  0x19   :  { %v230_v50 = vpack.c.bf16 %v184_v44, %v183_v43  ;;  %v224_v58 = vmax.f32 %v175_v46, 0.0  ;;  %v110_v61 = vmul.f32 %v774_v4, %v57_v53  ;;  %v83_v62 = vmul.f32 %v774_v4, %v30_v54  ;;  %v72_v43 = vld [vmem:[%s1353_s0 + $0x180] sm:$0xff] }
  0x1a   :  { %v84_v63 = vmul.f32 %v774_v4, %v31_v55  ;;  %v148_v1 = vadd.f32 %v779_v5, %v95_v56  ;;  %v149_v2 = vadd.f32 %v779_v5, %v96_v59  ;;  %v162_v3 = vadd.f32 %v779_v5, %v109_v60  ;;  %v46_v56 = vld [vmem:[%s1353_s0 + $0xb0] sm:$0xff]  ;;  %v60_v59 = vld [vmem:[%s1353_s0 + $0x120] sm:$0xff]  ;;  %v61_v60 = vld [vmem:[%s1353_s0 + $0x128] sm:$0xff] }
  0x1b   :  { %v250_v0 = vpack.c.bf16 %v224_v58, %v223_v57  ;;  %v163_v6 = vadd.f32 %v779_v5, %v110_v61  ;;  %v136_v9 = vadd.f32 %v779_v5, %v83_v62  ;;  %v97_v30 = vmul.f32 %v774_v4, %v44_v23  ;;  %v47_v58 = vld [vmem:[%s1353_s0 + $0xb8] sm:$0xff]  ;;  %v34_v61 = vld [vmem:[%s1353_s0 + $0x50] sm:$0xff]  ;;  %v48_v23 = vld [vmem:[%s1353_s0 + $0xc0] sm:$0xff] }
  0x1c   :  { %v137_v10 = vadd.f32 %v779_v5, %v84_v63  ;;  %v197_v13 = vmax.f32 %v148_v1, 0.0  ;;  %v211_v15 = vmax.f32 %v162_v3, 0.0  ;;  %v98_v33 = vmul.f32 %v774_v4, %v45_v25  ;;  %v35_v62 = vld [vmem:[%s1353_s0 + $0x58] sm:$0xff]  ;;  %v49_v25 = vld [vmem:[%s1353_s0 + $0xc8] sm:$0xff] }
  0x1d   :  { %v212_v16 = vmax.f32 %v163_v6, 0.0  ;;  %v185_v17 = vmax.f32 %v136_v9, 0.0  ;;  %v111_v34 = vmul.f32 %v774_v4, %v58_v26  ;;  %v112_v35 = vmul.f32 %v774_v4, %v59_v27  ;;  %v62_v26 = vld [vmem:[%s1353_s0 + $0x130] sm:$0xff]  ;;  %v63_v27 = vld [vmem:[%s1353_s0 + $0x138] sm:$0xff] }
  0x1e   :  { %698 = vmatmul.msk.bf16.gmra.mxu1 %vm265_vm1, %v235_v11  ;;  %705 = vmatmul.msk.bf16.gmra.mxu2 %vm265_vm1, %v242_v12  ;;  %v123_v11 = vmul.f32 %v774_v4, %v70_v7  ;;  %v124_v12 = vmul.f32 %v774_v4, %v71_v8  ;;  %v186_v18 = vmax.f32 %v137_v10, 0.0  ;;  %v86_v37 = vmul.f32 %v774_v4, %v33_v29 }
  0x1f   :  { %692 = vmatmul.msk.bf16.gmra.mxu0 %vm265_vm1, %v229_v14  ;;  %v198_v14 = vmax.f32 %v149_v2, 0.0  ;;  %v244_v22 = vpack.c.bf16 %v212_v16, %v211_v15  ;;  %v150_v39 = vadd.f32 %v779_v5, %v97_v30  ;;  %v151_v40 = vadd.f32 %v779_v5, %v98_v33 }
  0x20   :  { %v176_v19 = vadd.f32 %v779_v5, %v123_v11  ;;  %v177_v20 = vadd.f32 %v779_v5, %v124_v12  ;;  %v231_v24 = vpack.c.bf16 %v186_v18, %v185_v17  ;;  %v164_v41 = vadd.f32 %v779_v5, %v111_v34 }
  0x21   :  { %712 = vmatmul.msk.bf16.gmra.mxu3 %vm265_vm1, %v249_v28  ;;  %v237_v21 = vpack.c.bf16 %v198_v14, %v197_v13  ;;  %v32_v28 = vld [vmem:[%s1353_s0 + $0x40] sm:$0xff]  ;;  %v165_v42 = vadd.f32 %v779_v5, %v112_v35  ;;  %v139_v45 = vadd.f32 %v779_v5, %v86_v37  ;;  %v125_v46 = vmul.f32 %v774_v4, %v72_v43 }
  0x22   :  { %v225_v31 = vmax.f32 %v176_v19, 0.0  ;;  %v226_v32 = vmax.f32 %v177_v20, 0.0  ;;  %v85_v36 = vmul.f32 %v774_v4, %v32_v28  ;;  %v213_v49 = vmax.f32 %v164_v41, 0.0 }
  0x23   :  { %v188_v52 = vmax.f32 %v139_v45, 0.0  ;;  %v178_v53 = vadd.f32 %v779_v5, %v125_v46  ;;  %v99_v63 = vmul.f32 %v774_v4, %v46_v56  ;;  %v100_v1 = vmul.f32 %v774_v4, %v47_v58 }
  0x24   :  { %v251_v38 = vpack.c.bf16 %v226_v32, %v225_v31  ;;  %v138_v44 = vadd.f32 %v779_v5, %v85_v36  ;;  %v113_v2 = vmul.f32 %v774_v4, %v60_v59  ;;  %v114_v3 = vmul.f32 %v774_v4, %v61_v60 }
  0x25   :  { %v87_v6 = vmul.f32 %v774_v4, %v34_v61  ;;  %v88_v7 = vmul.f32 %v774_v4, %v35_v62  ;;  %v152_v9 = vadd.f32 %v779_v5, %v99_v63  ;;  %v153_v10 = vadd.f32 %v779_v5, %v100_v1 }
  0x26   :  { %v187_v51 = vmax.f32 %v138_v44, 0.0  ;;  %v166_v11 = vadd.f32 %v779_v5, %v113_v2  ;;  %v167_v12 = vadd.f32 %v779_v5, %v114_v3  ;;  %v101_v28 = vmul.f32 %v774_v4, %v48_v23 }
  0x27   :  { %v140_v13 = vadd.f32 %v779_v5, %v87_v6  ;;  %v141_v14 = vadd.f32 %v779_v5, %v88_v7  ;;  %v201_v15 = vmax.f32 %v152_v9, 0.0  ;;  %v202_v16 = vmax.f32 %v153_v10, 0.0 }
  0x28   :  { %v232_v57 = vpack.c.bf16 %v188_v52, %v187_v51  ;;  %v215_v17 = vmax.f32 %v166_v11, 0.0  ;;  %v216_v18 = vmax.f32 %v167_v12, 0.0  ;;  %v102_v29 = vmul.f32 %v774_v4, %v49_v25 }
  0x29   :  { %v189_v19 = vmax.f32 %v140_v13, 0.0  ;;  %v190_v20 = vmax.f32 %v141_v14, 0.0  ;;  %v115_v30 = vmul.f32 %v774_v4, %v62_v26  ;;  %v116_v31 = vmul.f32 %v774_v4, %v63_v27  ;;  %v1051_v4 = vld [vmem:[%s1356_s4] ss:$0 sm:$0xff] }
  0x2a   :  { %v154_v32 = vadd.f32 %v779_v5, %v101_v28  ;;  %v155_v33 = vadd.f32 %v779_v5, %v102_v29 }
  0x2b   :  { %v168_v34 = vadd.f32 %v779_v5, %v115_v30  ;;  %v169_v35 = vadd.f32 %v779_v5, %v116_v31 }
  0x2c   :  { %v203_v36 = vmax.f32 %v154_v32, 0.0  ;;  %v204_v37 = vmax.f32 %v155_v33, 0.0 }
  0x2e   :  { %699 = vmatmul.msk.bf16.gmra.mxu1 %vm265_vm1, %v236_v47  ;;  %706 = vmatmul.msk.bf16.gmra.mxu2 %vm265_vm1, %v243_v48  ;;  %v199_v47 = vmax.f32 %v150_v39, 0.0  ;;  %v200_v48 = vmax.f32 %v151_v40, 0.0  ;;  %v218_v39 = vmax.f32 %v169_v35, 0.0  ;;  %v240_v40 = vpack.c.bf16 %v204_v37, %v203_v36 }
  0x2f   :  { %693 = vmatmul.msk.bf16.gmra.mxu0 %vm265_vm1, %v230_v50  ;;  %v214_v50 = vmax.f32 %v165_v42, 0.0  ;;  %v1056_v42 = vld [vmem:[%s1357_s5] ss:$0 sm:$0xff] }
  0x30   :  { %v238_v54 = vpack.c.bf16 %v200_v48, %v199_v47 }
  0x31   :  { %713 = vmatmul.msk.bf16.gmra.mxu3 %vm265_vm1, %v250_v0  ;;  %v245_v55 = vpack.c.bf16 %v214_v50, %v213_v49  ;;  %v227_v0 = vmax.f32 %v178_v53, 0.0 }
  0x33   :  { %v252_v8 = vpack.c.bf16 %v227_v0, %v227_v0 }
  0x3e   :  { %700 = vmatmul.msk.bf16.gmra.mxu1 %vm265_vm1, %v237_v21  ;;  %707 = vmatmul.msk.bf16.gmra.mxu2 %vm265_vm1, %v244_v22  ;;  %v239_v21 = vpack.c.bf16 %v202_v16, %v201_v15  ;;  %v246_v22 = vpack.c.bf16 %v216_v18, %v215_v17 }
  0x3f   :  { %694 = vmatmul.msk.bf16.gmra.mxu0 %vm265_vm1, %v231_v24  ;;  %v233_v24 = vpack.c.bf16 %v190_v20, %v189_v19 }
  0x41   :  { %714 = vmatmul.msk.bf16.gmra.mxu3 %vm265_vm1, %v251_v38  ;;  %v217_v38 = vmax.f32 %v168_v34, 0.0 }
  0x43   :  { %v247_v41 = vpack.c.bf16 %v218_v39, %v217_v38 }
  0x4e   :  { %701 = vmatmul.msk.bf16.gmra.mxu1 %vm265_vm1, %v238_v54  ;;  %708 = vmatmul.msk.bf16.gmra.mxu2 %vm265_vm1, %v245_v55 }
  0x4f   :  { %695 = vmatmul.msk.bf16.gmra.mxu0 %vm265_vm1, %v232_v57 }
  0x51   :  { %715 = vmatmul.msk.bf16.gmra.mxu3 %vm265_vm1, %v252_v8 }
  0x5e   :  { %702 = vmatmul.msk.bf16.gmra.mxu1 %vm265_vm1, %v239_v21  ;;  %709 = vmatmul.msk.bf16.gmra.mxu2 %vm265_vm1, %v246_v22 }
  0x5f   :  { %696 = vmatmul.msk.bf16.gmra.mxu0 %vm265_vm1, %v233_v24 }
  0x6e   :  { %703 = vmatmul.msk.bf16.gmra.mxu1 %vm265_vm1, %v240_v40  ;;  %710 = vmatmul.msk.bf16.gmra.mxu2 %vm265_vm1, %v247_v41 }
  0x8b   :  { %v384_v5 = vpop.f32.mrf.mxu1 }
  0x8c   :  { %v494_v43 = vmul.f32 %v1051_v4, %v384_v5  ;;  %v354_v44 = vpop.f32.mrf.mxu0 }
  0x8d   :  { %v482_v45 = vmul.f32 %v1051_v4, %v354_v44 }
  0x8e   :  { %v547_v46 = vadd.f32 %v1056_v42, %v494_v43 }
  0x8f   :  { %v535_v47 = vadd.f32 %v1056_v42, %v482_v45 }
  0x90   :  { %v596_v48 = vmax.f32 %v547_v46, 0.0 }
  0x91   :  { %v419_v49 = vpop.f32.mrf.mxu2  ;;  %v584_v50 = vmax.f32 %v535_v47, 0.0 }
  0x92   :  { %646 = vst.msk [vmem:[%s1358_s6 + $0x60] sm:$0xff] %vm633_vm2, %v596_v48  ;;  %v508_v51 = vmul.f32 %v1051_v4, %v419_v49 }
  0x93   :  { %v386_v52 = vpop.f32.mrf.mxu1  ;;  %634 = vst.msk [vmem:[%s1358_s6] sm:$0xff] %vm633_vm2, %v584_v50 }
  0x94   :  { %v561_v53 = vadd.f32 %v1056_v42, %v508_v51  ;;  %v495_v54 = vmul.f32 %v1051_v4, %v386_v52  ;;  %v356_v55 = vpop.f32.mrf.mxu0  ;;  %v454_v61 = vpop.f32.mrf.mxu3 }
  0x95   :  { %v483_v56 = vmul.f32 %v1051_v4, %v356_v55  ;;  %v522_v0 = vmul.f32 %v1051_v4, %v454_v61 }
  0x96   :  { %v610_v57 = vmax.f32 %v561_v53, 0.0  ;;  %v548_v58 = vadd.f32 %v1056_v42, %v495_v54 }
  0x97   :  { %v536_v59 = vadd.f32 %v1056_v42, %v483_v56  ;;  %v575_v3 = vadd.f32 %v1056_v42, %v522_v0 }
  0x98   :  { %660 = vst.msk [vmem:[%s1358_s6 + $0xd0] sm:$0xff] %vm633_vm2, %v610_v57  ;;  %v597_v60 = vmax.f32 %v548_v58, 0.0 }
  0x99   :  { %v421_v62 = vpop.f32.mrf.mxu2  ;;  %v585_v63 = vmax.f32 %v536_v59, 0.0  ;;  %v624_v10 = vmax.f32 %v575_v3, 0.0 }
  0x9a   :  { %647 = vst.msk [vmem:[%s1358_s6 + $0x68] sm:$0xff] %vm633_vm2, %v597_v60  ;;  %v509_v1 = vmul.f32 %v1051_v4, %v421_v62 }
  0x9b   :  { %v389_v2 = vpop.f32.mrf.mxu1  ;;  %635 = vst.msk [vmem:[%s1358_s6 + $0x8] sm:$0xff] %vm633_vm2, %v585_v63 }
  0x9c   :  { %v562_v6 = vadd.f32 %v1056_v42, %v509_v1  ;;  %v496_v7 = vmul.f32 %v1051_v4, %v389_v2  ;;  %v359_v8 = vpop.f32.mrf.mxu0  ;;  %674 = vst.msk [vmem:[%s1358_s6 + $0x140] sm:$0xff] %vm633_vm2, %v624_v10  ;;  %v456_v15 = vpop.f32.mrf.mxu3 }
  0x9d   :  { %v484_v9 = vmul.f32 %v1051_v4, %v359_v8  ;;  %v523_v18 = vmul.f32 %v1051_v4, %v456_v15 }
  0x9e   :  { %v611_v11 = vmax.f32 %v562_v6, 0.0  ;;  %v549_v12 = vadd.f32 %v1056_v42, %v496_v7 }
  0x9f   :  { %v537_v13 = vadd.f32 %v1056_v42, %v484_v9  ;;  %v576_v21 = vadd.f32 %v1056_v42, %v523_v18 }
  0xa0   :  { %661 = vst.msk [vmem:[%s1358_s6 + $0xd8] sm:$0xff] %vm633_vm2, %v611_v11  ;;  %v598_v14 = vmax.f32 %v549_v12, 0.0 }
  0xa1   :  { %v424_v16 = vpop.f32.mrf.mxu2  ;;  %v586_v17 = vmax.f32 %v537_v13, 0.0  ;;  %v625_v26 = vmax.f32 %v576_v21, 0.0 }
  0xa2   :  { %648 = vst.msk [vmem:[%s1358_s6 + $0x70] sm:$0xff] %vm633_vm2, %v598_v14  ;;  %v510_v19 = vmul.f32 %v1051_v4, %v424_v16 }
  0xa3   :  { %v391_v20 = vpop.f32.mrf.mxu1  ;;  %636 = vst.msk [vmem:[%s1358_s6 + $0x10] sm:$0xff] %vm633_vm2, %v586_v17 }
  0xa4   :  { %v563_v22 = vadd.f32 %v1056_v42, %v510_v19  ;;  %v497_v23 = vmul.f32 %v1051_v4, %v391_v20  ;;  %v361_v24 = vpop.f32.mrf.mxu0  ;;  %675 = vst.msk [vmem:[%s1358_s6 + $0x148] sm:$0xff] %vm633_vm2, %v625_v26  ;;  %v459_v31 = vpop.f32.mrf.mxu3 }
  0xa5   :  { %v485_v25 = vmul.f32 %v1051_v4, %v361_v24  ;;  %v524_v34 = vmul.f32 %v1051_v4, %v459_v31 }
  0xa6   :  { %v612_v27 = vmax.f32 %v563_v22, 0.0  ;;  %v550_v28 = vadd.f32 %v1056_v42, %v497_v23 }
  0xa7   :  { %v538_v29 = vadd.f32 %v1056_v42, %v485_v25  ;;  %v577_v37 = vadd.f32 %v1056_v42, %v524_v34 }
  0xa8   :  { %662 = vst.msk [vmem:[%s1358_s6 + $0xe0] sm:$0xff] %vm633_vm2, %v612_v27  ;;  %v599_v30 = vmax.f32 %v550_v28, 0.0 }
  0xa9   :  { %v426_v32 = vpop.f32.mrf.mxu2  ;;  %v587_v33 = vmax.f32 %v538_v29, 0.0  ;;  %v626_v5 = vmax.f32 %v577_v37, 0.0 }
  0xaa   :  { %649 = vst.msk [vmem:[%s1358_s6 + $0x78] sm:$0xff] %vm633_vm2, %v599_v30  ;;  %v511_v35 = vmul.f32 %v1051_v4, %v426_v32 }
  0xab   :  { %v394_v36 = vpop.f32.mrf.mxu1  ;;  %637 = vst.msk [vmem:[%s1358_s6 + $0x18] sm:$0xff] %vm633_vm2, %v587_v33 }
  0xac   :  { %v564_v38 = vadd.f32 %v1056_v42, %v511_v35  ;;  %v498_v39 = vmul.f32 %v1051_v4, %v394_v36  ;;  %v364_v40 = vpop.f32.mrf.mxu0  ;;  %676 = vst.msk [vmem:[%s1358_s6 + $0x150] sm:$0xff] %vm633_vm2, %v626_v5  ;;  %v461_v47 = vpop.f32.mrf.mxu3 }
  0xad   :  { %v486_v41 = vmul.f32 %v1051_v4, %v364_v40  ;;  %v525_v50 = vmul.f32 %v1051_v4, %v461_v47 }
  0xae   :  { %v613_v43 = vmax.f32 %v564_v38, 0.0  ;;  %v551_v44 = vadd.f32 %v1056_v42, %v498_v39 }
  0xaf   :  { %v539_v45 = vadd.f32 %v1056_v42, %v486_v41  ;;  %v578_v53 = vadd.f32 %v1056_v42, %v525_v50 }
  0xb0   :  { %663 = vst.msk [vmem:[%s1358_s6 + $0xe8] sm:$0xff] %vm633_vm2, %v613_v43  ;;  %v600_v46 = vmax.f32 %v551_v44, 0.0 }
  0xb1   :  { %v429_v48 = vpop.f32.mrf.mxu2  ;;  %v588_v49 = vmax.f32 %v539_v45, 0.0  ;;  %v627_v58 = vmax.f32 %v578_v53, 0.0 }
  0xb2   :  { %650 = vst.msk [vmem:[%s1358_s6 + $0x80] sm:$0xff] %vm633_vm2, %v600_v46  ;;  %v512_v51 = vmul.f32 %v1051_v4, %v429_v48 }
  0xb3   :  { %v396_v52 = vpop.f32.mrf.mxu1  ;;  %638 = vst.msk [vmem:[%s1358_s6 + $0x20] sm:$0xff] %vm633_vm2, %v588_v49 }
  0xb4   :  { %v565_v54 = vadd.f32 %v1056_v42, %v512_v51  ;;  %v499_v55 = vmul.f32 %v1051_v4, %v396_v52  ;;  %v366_v56 = vpop.f32.mrf.mxu0  ;;  %677 = vst.msk [vmem:[%s1358_s6 + $0x158] sm:$0xff] %vm633_vm2, %v627_v58  ;;  %v464_v63 = vpop.f32.mrf.mxu3 }
  0xb5   :  { %v487_v57 = vmul.f32 %v1051_v4, %v366_v56  ;;  %v526_v2 = vmul.f32 %v1051_v4, %v464_v63 }
  0xb6   :  { %v614_v59 = vmax.f32 %v565_v54, 0.0  ;;  %v552_v60 = vadd.f32 %v1056_v42, %v499_v55 }
  0xb7   :  { %v540_v61 = vadd.f32 %v1056_v42, %v487_v57  ;;  %v579_v7 = vadd.f32 %v1056_v42, %v526_v2 }
  0xb8   :  { %664 = vst.msk [vmem:[%s1358_s6 + $0xf0] sm:$0xff] %vm633_vm2, %v614_v59  ;;  %v601_v62 = vmax.f32 %v552_v60, 0.0 }
  0xb9   :  { %v431_v0 = vpop.f32.mrf.mxu2  ;;  %v589_v1 = vmax.f32 %v540_v61, 0.0  ;;  %v628_v12 = vmax.f32 %v579_v7, 0.0 }
  0xba   :  { %651 = vst.msk [vmem:[%s1358_s6 + $0x88] sm:$0xff] %vm633_vm2, %v601_v62  ;;  %v513_v3 = vmul.f32 %v1051_v4, %v431_v0 }
  0xbb   :  { %v399_v6 = vpop.f32.mrf.mxu1  ;;  %639 = vst.msk [vmem:[%s1358_s6 + $0x28] sm:$0xff] %vm633_vm2, %v589_v1 }
  0xbc   :  { %v566_v8 = vadd.f32 %v1056_v42, %v513_v3  ;;  %v500_v9 = vmul.f32 %v1051_v4, %v399_v6  ;;  %v369_v10 = vpop.f32.mrf.mxu0  ;;  %678 = vst.msk [vmem:[%s1358_s6 + $0x160] sm:$0xff] %vm633_vm2, %v628_v12  ;;  %v466_v17 = vpop.f32.mrf.mxu3 }
  0xbd   :  { %v488_v11 = vmul.f32 %v1051_v4, %v369_v10  ;;  %v527_v20 = vmul.f32 %v1051_v4, %v466_v17 }
  0xbe   :  { %v615_v13 = vmax.f32 %v566_v8, 0.0  ;;  %v553_v14 = vadd.f32 %v1056_v42, %v500_v9 }
  0xbf   :  { %v541_v15 = vadd.f32 %v1056_v42, %v488_v11  ;;  %v580_v23 = vadd.f32 %v1056_v42, %v527_v20 }
  0xc0   :  { %665 = vst.msk [vmem:[%s1358_s6 + $0xf8] sm:$0xff] %vm633_vm2, %v615_v13  ;;  %v602_v16 = vmax.f32 %v553_v14, 0.0 }
  0xc1   :  { %v434_v18 = vpop.f32.mrf.mxu2  ;;  %v590_v19 = vmax.f32 %v541_v15, 0.0  ;;  %v629_v28 = vmax.f32 %v580_v23, 0.0 }
  0xc2   :  { %652 = vst.msk [vmem:[%s1358_s6 + $0x90] sm:$0xff] %vm633_vm2, %v602_v16  ;;  %v514_v21 = vmul.f32 %v1051_v4, %v434_v18 }
  0xc3   :  { %v401_v22 = vpop.f32.mrf.mxu1  ;;  %640 = vst.msk [vmem:[%s1358_s6 + $0x30] sm:$0xff] %vm633_vm2, %v590_v19 }
  0xc4   :  { %v567_v24 = vadd.f32 %v1056_v42, %v514_v21  ;;  %v501_v25 = vmul.f32 %v1051_v4, %v401_v22  ;;  %v371_v26 = vpop.f32.mrf.mxu0  ;;  %679 = vst.msk [vmem:[%s1358_s6 + $0x168] sm:$0xff] %vm633_vm2, %v629_v28  ;;  %v469_v33 = vpop.f32.mrf.mxu3 }
  0xc5   :  { %v489_v27 = vmul.f32 %v1051_v4, %v371_v26  ;;  %v528_v36 = vmul.f32 %v1051_v4, %v469_v33 }
  0xc6   :  { %v616_v29 = vmax.f32 %v567_v24, 0.0  ;;  %v554_v30 = vadd.f32 %v1056_v42, %v501_v25 }
  0xc7   :  { %v542_v31 = vadd.f32 %v1056_v42, %v489_v27  ;;  %v581_v39 = vadd.f32 %v1056_v42, %v528_v36 }
  0xc8   :  { %666 = vst.msk [vmem:[%s1358_s6 + $0x100] sm:$0xff] %vm633_vm2, %v616_v29  ;;  %v603_v32 = vmax.f32 %v554_v30, 0.0 }
  0xc9   :  { %v436_v34 = vpop.f32.mrf.mxu2  ;;  %v591_v35 = vmax.f32 %v542_v31, 0.0  ;;  %v630_v44 = vmax.f32 %v581_v39, 0.0 }
  0xca   :  { %653 = vst.msk [vmem:[%s1358_s6 + $0x98] sm:$0xff] %vm633_vm2, %v603_v32  ;;  %v515_v37 = vmul.f32 %v1051_v4, %v436_v34 }
  0xcb   :  { %v404_v38 = vpop.f32.mrf.mxu1  ;;  %641 = vst.msk [vmem:[%s1358_s6 + $0x38] sm:$0xff] %vm633_vm2, %v591_v35 }
  0xcc   :  { %v568_v40 = vadd.f32 %v1056_v42, %v515_v37  ;;  %v502_v41 = vmul.f32 %v1051_v4, %v404_v38  ;;  %v374_v5 = vpop.f32.mrf.mxu0  ;;  %680 = vst.msk [vmem:[%s1358_s6 + $0x170] sm:$0xff] %vm633_vm2, %v630_v44  ;;  %v471_v49 = vpop.f32.mrf.mxu3 }
  0xcd   :  { %v490_v43 = vmul.f32 %v1051_v4, %v374_v5  ;;  %v529_v52 = vmul.f32 %v1051_v4, %v471_v49 }
  0xce   :  { %v617_v45 = vmax.f32 %v568_v40, 0.0  ;;  %v555_v46 = vadd.f32 %v1056_v42, %v502_v41 }
  0xcf   :  { %v543_v47 = vadd.f32 %v1056_v42, %v490_v43  ;;  %v582_v55 = vadd.f32 %v1056_v42, %v529_v52 }
  0xd0   :  { %667 = vst.msk [vmem:[%s1358_s6 + $0x108] sm:$0xff] %vm633_vm2, %v617_v45  ;;  %v604_v48 = vmax.f32 %v555_v46, 0.0 }
  0xd1   :  { %v439_v50 = vpop.f32.mrf.mxu2  ;;  %v592_v51 = vmax.f32 %v543_v47, 0.0  ;;  %v631_v60 = vmax.f32 %v582_v55, 0.0 }
  0xd2   :  { %654 = vst.msk [vmem:[%s1358_s6 + $0xa0] sm:$0xff] %vm633_vm2, %v604_v48  ;;  %v516_v53 = vmul.f32 %v1051_v4, %v439_v50 }
  0xd3   :  { %v406_v54 = vpop.f32.mrf.mxu1  ;;  %642 = vst.msk [vmem:[%s1358_s6 + $0x40] sm:$0xff] %vm633_vm2, %v592_v51 }
  0xd4   :  { %v569_v56 = vadd.f32 %v1056_v42, %v516_v53  ;;  %v503_v57 = vmul.f32 %v1051_v4, %v406_v54  ;;  %v376_v58 = vpop.f32.mrf.mxu0  ;;  %681 = vst.msk [vmem:[%s1358_s6 + $0x178] sm:$0xff] %vm633_vm2, %v631_v60  ;;  %v474_v1 = vpop.f32.mrf.mxu3 }
  0xd5   :  { %v491_v59 = vmul.f32 %v1051_v4, %v376_v58  ;;  %v530_v6 = vmul.f32 %v1051_v4, %v474_v1 }
  0xd6   :  { %v618_v61 = vmax.f32 %v569_v56, 0.0  ;;  %v556_v62 = vadd.f32 %v1056_v42, %v503_v57 }
  0xd7   :  { %v544_v63 = vadd.f32 %v1056_v42, %v491_v59  ;;  %v583_v9 = vadd.f32 %v1056_v42, %v530_v6 }
  0xd8   :  { %668 = vst.msk [vmem:[%s1358_s6 + $0x110] sm:$0xff] %vm633_vm2, %v618_v61  ;;  %v605_v0 = vmax.f32 %v556_v62, 0.0 }
  0xd9   :  { %v441_v2 = vpop.f32.mrf.mxu2  ;;  %v593_v3 = vmax.f32 %v544_v63, 0.0  ;;  %v632_v14 = vmax.f32 %v583_v9, 0.0 }
  0xda   :  { %655 = vst.msk [vmem:[%s1358_s6 + $0xa8] sm:$0xff] %vm633_vm2, %v605_v0  ;;  %v517_v7 = vmul.f32 %v1051_v4, %v441_v2 }
  0xdb   :  { %v409_v8 = vpop.f32.mrf.mxu1  ;;  %643 = vst.msk [vmem:[%s1358_s6 + $0x48] sm:$0xff] %vm633_vm2, %v593_v3 }
  0xdc   :  { %v570_v10 = vadd.f32 %v1056_v42, %v517_v7  ;;  %v504_v11 = vmul.f32 %v1051_v4, %v409_v8  ;;  %v379_v12 = vpop.f32.mrf.mxu0  ;;  %682 = vst.msk [vmem:[%s1358_s6 + $0x180] sm:$0xff] %vm633_vm2, %v632_v14  ;;  %v476_v19 = vpop.f32.mrf.mxu3 }
  0xdd   :  { %v492_v13 = vmul.f32 %v1051_v4, %v379_v12 }
  0xde   :  { %v619_v15 = vmax.f32 %v570_v10, 0.0  ;;  %v557_v16 = vadd.f32 %v1056_v42, %v504_v11 }
  0xdf   :  { %v545_v17 = vadd.f32 %v1056_v42, %v492_v13 }
  0xe0   :  { %669 = vst.msk [vmem:[%s1358_s6 + $0x118] sm:$0xff] %vm633_vm2, %v619_v15  ;;  %v606_v18 = vmax.f32 %v557_v16, 0.0 }
  0xe1   :  { %v444_v20 = vpop.f32.mrf.mxu2  ;;  %v594_v21 = vmax.f32 %v545_v17, 0.0 }
  0xe2   :  { %656 = vst.msk [vmem:[%s1358_s6 + $0xb0] sm:$0xff] %vm633_vm2, %v606_v18  ;;  %v518_v22 = vmul.f32 %v1051_v4, %v444_v20 }
  0xe3   :  { %v411_v23 = vpop.f32.mrf.mxu1  ;;  %644 = vst.msk [vmem:[%s1358_s6 + $0x50] sm:$0xff] %vm633_vm2, %v594_v21 }
  0xe4   :  { %v571_v24 = vadd.f32 %v1056_v42, %v518_v22  ;;  %v505_v25 = vmul.f32 %v1051_v4, %v411_v23  ;;  %v381_v26 = vpop.f32.mrf.mxu0 }
  0xe5   :  { %v493_v27 = vmul.f32 %v1051_v4, %v381_v26 }
  0xe6   :  { %v620_v28 = vmax.f32 %v571_v24, 0.0  ;;  %v558_v29 = vadd.f32 %v1056_v42, %v505_v25 }
  0xe7   :  { %v546_v30 = vadd.f32 %v1056_v42, %v493_v27 }
  0xe8   :  { %670 = vst.msk [vmem:[%s1358_s6 + $0x120] sm:$0xff] %vm633_vm2, %v620_v28  ;;  %v607_v31 = vmax.f32 %v558_v29, 0.0 }
  0xe9   :  { %v446_v32 = vpop.f32.mrf.mxu2  ;;  %v595_v33 = vmax.f32 %v546_v30, 0.0 }
  0xea   :  { %657 = vst.msk [vmem:[%s1358_s6 + $0xb8] sm:$0xff] %vm633_vm2, %v607_v31  ;;  %v519_v34 = vmul.f32 %v1051_v4, %v446_v32 }
  0xeb   :  { %v414_v35 = vpop.f32.mrf.mxu1  ;;  %645 = vst.msk [vmem:[%s1358_s6 + $0x58] sm:$0xff] %vm633_vm2, %v595_v33 }
  0xec   :  { %v572_v36 = vadd.f32 %v1056_v42, %v519_v34  ;;  %v506_v37 = vmul.f32 %v1051_v4, %v414_v35 }
  0xee   :  { %v621_v38 = vmax.f32 %v572_v36, 0.0  ;;  %v559_v39 = vadd.f32 %v1056_v42, %v506_v37 }
  0xf0   :  { %671 = vst.msk [vmem:[%s1358_s6 + $0x128] sm:$0xff] %vm633_vm2, %v621_v38  ;;  %v608_v40 = vmax.f32 %v559_v39, 0.0 }
  0xf1   :  { %v449_v41 = vpop.f32.mrf.mxu2 }
  0xf2   :  { %658 = vst.msk [vmem:[%s1358_s6 + $0xc0] sm:$0xff] %vm633_vm2, %v608_v40  ;;  %v520_v5 = vmul.f32 %v1051_v4, %v449_v41 }
  0xf3   :  { %v416_v43 = vpop.f32.mrf.mxu1 }
  0xf4   :  { %v573_v44 = vadd.f32 %v1056_v42, %v520_v5  ;;  %v507_v45 = vmul.f32 %v1051_v4, %v416_v43 }
  0xf6   :  { %v622_v46 = vmax.f32 %v573_v44, 0.0  ;;  %v560_v47 = vadd.f32 %v1056_v42, %v507_v45 }
  0xf8   :  { %672 = vst.msk [vmem:[%s1358_s6 + $0x130] sm:$0xff] %vm633_vm2, %v622_v46  ;;  %v609_v48 = vmax.f32 %v560_v47, 0.0 }
  0xf9   :  { %v451_v49 = vpop.f32.mrf.mxu2 }
  0xfa   :  { %659 = vst.msk [vmem:[%s1358_s6 + $0xc8] sm:$0xff] %vm633_vm2, %v609_v48  ;;  %v521_v50 = vmul.f32 %v1051_v4, %v451_v49 }
  0xfc   :  { %v574_v51 = vadd.f32 %v1056_v42, %v521_v50 }
  0xfe   :  { %v623_v52 = vmax.f32 %v574_v51, 0.0 }
 0x100   :  { %673 = vst.msk [vmem:[%s1358_s6 + $0x138] sm:$0xff] %vm633_vm2, %v623_v52 }

// kernel: densenet_forward.20
= control target key start
LH: loop header
LB: loop body
LE: loop exit
PB: predicated region body
PF: predicated region fallthrough
CT: control target
= control target key end

     0   :  { %vm269_vm0 = vcmask 261120   ;;  %vm584_vm1 = vcmask 130048   ;;  %s1308_s1 = inlined_call_operand.vmem [shape: bf16[32,16], index: 1, kind: input, shape index: {}]   ;;  %s1309_s0 = inlined_call_operand.vmem [shape: f32[392,32], index: 0, kind: input, shape index: {}]   ;;  %s1310_s2 = inlined_call_operand.vmem [shape: f32[1,32], index: 2, kind: input, shape index: {}]   ;;  %s1311_s3 = inlined_call_operand.vmem [shape: f32[1,32], index: 3, kind: input, shape index: {}]   ;;  %s1312_s4 = inlined_call_operand.vmem [shape: f32[1,16], index: 4, kind: input, shape index: {}]   ;;  %s1313_s5 = inlined_call_operand.vmem [shape: f32[1,16], index: 5, kind: input, shape index: {}]   ;;  %s1314_s6 = inlined_call_operand.vmem [shape: f32[392,16], index: 6, kind: output, shape index: {}]  }
   0x1   :  { %v672_v0 = vld [vmem:[%s1308_s1 + $0x8] sm:$0xff]  ;;  %v671_v1 = vld [vmem:[%s1308_s1] sm:$0xff]  ;;  %v50_v6 = vld [vmem:[%s1309_s0 + $0xd0] sm:$0xff] }
   0x2   :  { %v36_v2 = vld [vmem:[%s1309_s0 + $0x60] sm:$0xff]  ;;  %v37_v3 = vld [vmem:[%s1309_s0 + $0x68] sm:$0xff]  ;;  %673 = vmatpush.bf16.msra.mxu1 %v672_v0  ;;  %674 = vmatpush.bf16.msra.mxu2 %v672_v0  ;;  %v51_v9 = vld [vmem:[%s1309_s0 + $0xd8] sm:$0xff] }
   0x3   :  { %v733_v4 = vld [vmem:[%s1310_s2] ss:$0 sm:$0xff]  ;;  %351 = vmatpush.bf16.msra.mxu0 %v672_v0  ;;  %v25_v12 = vld [vmem:[%s1309_s0 + $0x8] sm:$0xff]  ;;  %675 = vmatpush.bf16.msra.mxu3 %v672_v0  ;;  %v38_v22 = vld [vmem:[%s1309_s0 + $0x70] sm:$0xff] }
   0x4   :  { %v738_v5 = vld [vmem:[%s1311_s3] ss:$0 sm:$0xff]  ;;  %v89_v7 = vmul.f32 %v733_v4, %v36_v2  ;;  %v90_v8 = vmul.f32 %v733_v4, %v37_v3  ;;  %v103_v10 = vmul.f32 %v733_v4, %v50_v6  ;;  %v104_v13 = vmul.f32 %v733_v4, %v51_v9  ;;  %v39_v23 = vld [vmem:[%s1309_s0 + $0x78] sm:$0xff]  ;;  %v53_v28 = vld [vmem:[%s1309_s0 + $0xe8] sm:$0xff] }
   0x5   :  { %v24_v11 = vld [vmem:[%s1309_s0] sm:$0xff]  ;;  %v78_v15 = vmul.f32 %v733_v4, %v25_v12  ;;  %v65_v33 = vld [vmem:[%s1309_s0 + $0x148] sm:$0xff]  ;;  %v26_v35 = vld [vmem:[%s1309_s0 + $0x10] sm:$0xff]  ;;  %v91_v39 = vmul.f32 %v733_v4, %v38_v22  ;;  %v92_v41 = vmul.f32 %v733_v4, %v39_v23  ;;  %v106_v43 = vmul.f32 %v733_v4, %v53_v28 }
   0x6   :  { %v77_v14 = vmul.f32 %v733_v4, %v24_v11  ;;  %v142_v16 = vadd.f32 %v738_v5, %v89_v7  ;;  %v143_v17 = vadd.f32 %v738_v5, %v90_v8  ;;  %v156_v18 = vadd.f32 %v738_v5, %v103_v10  ;;  %676 = vmatpush.bf16.msra.mxu1 %v671_v1  ;;  %v52_v27 = vld [vmem:[%s1309_s0 + $0xe0] sm:$0xff]  ;;  %v27_v36 = vld [vmem:[%s1309_s0 + $0x18] sm:$0xff]  ;;  %v66_v57 = vld [vmem:[%s1309_s0 + $0x150] sm:$0xff] }
   0x7   :  { %677 = vmatpush.bf16.msra.mxu2 %v671_v1  ;;  %v157_v19 = vadd.f32 %v738_v5, %v104_v13  ;;  %v131_v21 = vadd.f32 %v738_v5, %v78_v15  ;;  %352 = vmatpush.bf16.msra.mxu0 %v671_v1  ;;  %v64_v29 = vld [vmem:[%s1309_s0 + $0x140] sm:$0xff]  ;;  %v105_v42 = vmul.f32 %v733_v4, %v52_v27  ;;  %v67_v58 = vld [vmem:[%s1309_s0 + $0x158] sm:$0xff]  ;;  %v41_v12 = vld [vmem:[%s1309_s0 + $0x88] sm:$0xff] }
   0x8   :  { %v130_v20 = vadd.f32 %v738_v5, %v77_v14  ;;  %v191_v24 = vmax.f32 %v142_v16, 0.0  ;;  %v192_v25 = vmax.f32 %v143_v17, 0.0  ;;  %v205_v26 = vmax.f32 %v156_v18, 0.0  ;;  %678 = vmatpush.bf16.msra.mxu3 %v671_v1  ;;  %v40_v7 = vld [vmem:[%s1309_s0 + $0x80] sm:$0xff]  ;;  %v54_v13 = vld [vmem:[%s1309_s0 + $0xf0] sm:$0xff]  ;;  %v55_v14 = vld [vmem:[%s1309_s0 + $0xf8] sm:$0xff] }
   0x9   :  { %v206_v30 = vmax.f32 %v157_v19, 0.0  ;;  %v180_v32 = vmax.f32 %v131_v21, 0.0  ;;  %v117_v40 = vmul.f32 %v733_v4, %v64_v29  ;;  %v118_v44 = vmul.f32 %v733_v4, %v65_v33  ;;  %v28_v15 = vld [vmem:[%s1309_s0 + $0x20] sm:$0xff]  ;;  %v29_v16 = vld [vmem:[%s1309_s0 + $0x28] sm:$0xff] }
   0xa   :  { %v179_v31 = vmax.f32 %v130_v20, 0.0  ;;  %v234_v34 = vpack.c.bf16 %v192_v25, %v191_v24  ;;  %v79_v46 = vmul.f32 %v733_v4, %v26_v35  ;;  %v80_v47 = vmul.f32 %v733_v4, %v27_v36  ;;  %v69_v33 = vld [vmem:[%s1309_s0 + $0x168] sm:$0xff] }
   0xb   :  { %v241_v37 = vpack.c.bf16 %v206_v30, %v205_v26  ;;  %v170_v45 = vadd.f32 %v738_v5, %v117_v40  ;;  %v171_v48 = vadd.f32 %v738_v5, %v118_v44  ;;  %v144_v50 = vadd.f32 %v738_v5, %v91_v39 }
   0xc   :  { %v228_v38 = vpack.c.bf16 %v180_v32, %v179_v31  ;;  %652 = vmatmul.msk.bf16.vlgmr.msra.gmra.mxu1 %vm269_vm0, %v234_v34  ;;  %v145_v51 = vadd.f32 %v738_v5, %v92_v41  ;;  %v158_v53 = vadd.f32 %v738_v5, %v105_v42  ;;  %v159_v54 = vadd.f32 %v738_v5, %v106_v43  ;;  %v68_v32 = vld [vmem:[%s1309_s0 + $0x160] sm:$0xff]  ;;  %v42_v43 = vld [vmem:[%s1309_s0 + $0x90] sm:$0xff] }
   0xd   :  { %659 = vmatmul.msk.bf16.vlgmr.msra.gmra.mxu2 %vm269_vm0, %v241_v37  ;;  %v219_v49 = vmax.f32 %v170_v45, 0.0  ;;  %v220_v52 = vmax.f32 %v171_v48, 0.0  ;;  %v132_v55 = vadd.f32 %v738_v5, %v79_v46  ;;  %v133_v56 = vadd.f32 %v738_v5, %v80_v47  ;;  %v43_v48 = vld [vmem:[%s1309_s0 + $0x98] sm:$0xff] }
   0xe   :  { %646 = vmatmul.msk.bf16.vlgmr.msra.gmra.mxu0 %vm269_vm0, %v228_v38  ;;  %v193_v60 = vmax.f32 %v144_v50, 0.0  ;;  %v194_v61 = vmax.f32 %v145_v51, 0.0  ;;  %v119_v62 = vmul.f32 %v733_v4, %v66_v57  ;;  %v120_v63 = vmul.f32 %v733_v4, %v67_v58  ;;  %v57_v50 = vld [vmem:[%s1309_s0 + $0x108] sm:$0xff]  ;;  %v30_v51 = vld [vmem:[%s1309_s0 + $0x30] sm:$0xff] }
   0xf   :  { %v248_v59 = vpack.c.bf16 %v220_v52, %v219_v49  ;;  %v207_v0 = vmax.f32 %v158_v53, 0.0  ;;  %v208_v1 = vmax.f32 %v159_v54, 0.0  ;;  %v181_v2 = vmax.f32 %v132_v55, 0.0  ;;  %v56_v49 = vld [vmem:[%s1309_s0 + $0x100] sm:$0xff]  ;;  %v31_v52 = vld [vmem:[%s1309_s0 + $0x38] sm:$0xff] }
  0x10   :  { %v182_v3 = vmax.f32 %v133_v56, 0.0  ;;  %v235_v6 = vpack.c.bf16 %v194_v61, %v193_v60  ;;  %v172_v8 = vadd.f32 %v738_v5, %v119_v62  ;;  %v173_v9 = vadd.f32 %v738_v5, %v120_v63 }
  0x11   :  { %666 = vmatmul.msk.bf16.vlgmr.msra.gmra.mxu3 %vm269_vm0, %v248_v59  ;;  %v242_v10 = vpack.c.bf16 %v208_v1, %v207_v0  ;;  %v93_v17 = vmul.f32 %v733_v4, %v40_v7  ;;  %v94_v18 = vmul.f32 %v733_v4, %v41_v12  ;;  %v107_v19 = vmul.f32 %v733_v4, %v54_v13  ;;  %v71_v7 = vld [vmem:[%s1309_s0 + $0x178] sm:$0xff] }
  0x12   :  { %v229_v11 = vpack.c.bf16 %v182_v3, %v181_v2  ;;  %v221_v20 = vmax.f32 %v172_v8, 0.0  ;;  %v222_v21 = vmax.f32 %v173_v9, 0.0  ;;  %v108_v22 = vmul.f32 %v733_v4, %v55_v14 }
  0x13   :  { %v81_v23 = vmul.f32 %v733_v4, %v28_v15  ;;  %v82_v24 = vmul.f32 %v733_v4, %v29_v16  ;;  %v146_v25 = vadd.f32 %v738_v5, %v93_v17  ;;  %v147_v26 = vadd.f32 %v738_v5, %v94_v18  ;;  %v44_v17 = vld [vmem:[%s1309_s0 + $0xa0] sm:$0xff] }
  0x14   :  { %v249_v27 = vpack.c.bf16 %v222_v21, %v221_v20  ;;  %v160_v28 = vadd.f32 %v738_v5, %v107_v19  ;;  %v161_v29 = vadd.f32 %v738_v5, %v108_v22  ;;  %v121_v36 = vmul.f32 %v733_v4, %v68_v32  ;;  %v45_v22 = vld [vmem:[%s1309_s0 + $0xa8] sm:$0xff] }
  0x15   :  { %v134_v30 = vadd.f32 %v738_v5, %v81_v23  ;;  %v135_v31 = vadd.f32 %v738_v5, %v82_v24  ;;  %v195_v34 = vmax.f32 %v146_v25, 0.0  ;;  %v196_v35 = vmax.f32 %v147_v26, 0.0  ;;  %v58_v23 = vld [vmem:[%s1309_s0 + $0x110] sm:$0xff]  ;;  %v59_v24 = vld [vmem:[%s1309_s0 + $0x118] sm:$0xff]  ;;  %v32_v25 = vld [vmem:[%s1309_s0 + $0x40] sm:$0xff] }
  0x16   :  { %v122_v37 = vmul.f32 %v733_v4, %v69_v33  ;;  %v209_v38 = vmax.f32 %v160_v28, 0.0  ;;  %v210_v39 = vmax.f32 %v161_v29, 0.0  ;;  %v174_v44 = vadd.f32 %v738_v5, %v121_v36  ;;  %v33_v26 = vld [vmem:[%s1309_s0 + $0x48] sm:$0xff] }
  0x17   :  { %v183_v40 = vmax.f32 %v134_v30, 0.0  ;;  %v184_v41 = vmax.f32 %v135_v31, 0.0  ;;  %v236_v42 = vpack.c.bf16 %v196_v35, %v195_v34  ;;  %v95_v53 = vmul.f32 %v733_v4, %v42_v43 }
  0x18   :  { %v175_v45 = vadd.f32 %v738_v5, %v122_v37  ;;  %v243_v46 = vpack.c.bf16 %v210_v39, %v209_v38  ;;  %v96_v54 = vmul.f32 %v733_v4, %v43_v48  ;;  %v109_v55 = vmul.f32 %v733_v4, %v56_v49 }
  0x19   :  { %v230_v47 = vpack.c.bf16 %v184_v41, %v183_v40  ;;  %v223_v56 = vmax.f32 %v174_v44, 0.0  ;;  %v110_v58 = vmul.f32 %v733_v4, %v57_v50  ;;  %v83_v59 = vmul.f32 %v733_v4, %v30_v51 }
  0x1a   :  { %v224_v57 = vmax.f32 %v175_v45, 0.0  ;;  %v84_v60 = vmul.f32 %v733_v4, %v31_v52  ;;  %v148_v61 = vadd.f32 %v738_v5, %v95_v53  ;;  %v149_v62 = vadd.f32 %v738_v5, %v96_v54  ;;  %v46_v54 = vld [vmem:[%s1309_s0 + $0xb0] sm:$0xff] }
  0x1b   :  { %v162_v0 = vadd.f32 %v738_v5, %v109_v55  ;;  %v163_v1 = vadd.f32 %v738_v5, %v110_v58  ;;  %v136_v2 = vadd.f32 %v738_v5, %v83_v59  ;;  %v98_v28 = vmul.f32 %v733_v4, %v45_v22  ;;  %v47_v55 = vld [vmem:[%s1309_s0 + $0xb8] sm:$0xff]  ;;  %v34_v58 = vld [vmem:[%s1309_s0 + $0x50] sm:$0xff]  ;;  %v49_v22 = vld [vmem:[%s1309_s0 + $0xc8] sm:$0xff] }
  0x1c   :  { %653 = vmatmul.msk.bf16.gmra.mxu1 %vm269_vm0, %v235_v6  ;;  %v250_v63 = vpack.c.bf16 %v224_v57, %v223_v56  ;;  %v137_v3 = vadd.f32 %v738_v5, %v84_v60  ;;  %v70_v6 = vld [vmem:[%s1309_s0 + $0x170] sm:$0xff]  ;;  %v197_v8 = vmax.f32 %v148_v61, 0.0  ;;  %v198_v9 = vmax.f32 %v149_v62, 0.0  ;;  %v60_v56 = vld [vmem:[%s1309_s0 + $0x120] sm:$0xff]  ;;  %v61_v57 = vld [vmem:[%s1309_s0 + $0x128] sm:$0xff] }
  0x1d   :  { %660 = vmatmul.msk.bf16.gmra.mxu2 %vm269_vm0, %v242_v10  ;;  %v123_v10 = vmul.f32 %v733_v4, %v70_v6  ;;  %v211_v12 = vmax.f32 %v162_v0, 0.0  ;;  %v212_v13 = vmax.f32 %v163_v1, 0.0  ;;  %v185_v14 = vmax.f32 %v136_v2, 0.0  ;;  %v35_v59 = vld [vmem:[%s1309_s0 + $0x58] sm:$0xff] }
  0x1e   :  { %647 = vmatmul.msk.bf16.gmra.mxu0 %vm269_vm0, %v229_v11  ;;  %v124_v11 = vmul.f32 %v733_v4, %v71_v7  ;;  %v186_v15 = vmax.f32 %v137_v3, 0.0  ;;  %v237_v16 = vpack.c.bf16 %v198_v9, %v197_v8  ;;  %v111_v29 = vmul.f32 %v733_v4, %v58_v23  ;;  %v62_v23 = vld [vmem:[%s1309_s0 + $0x130] sm:$0xff] }
  0x1f   :  { %v176_v18 = vadd.f32 %v738_v5, %v123_v10  ;;  %v244_v20 = vpack.c.bf16 %v212_v13, %v211_v12  ;;  %v112_v32 = vmul.f32 %v733_v4, %v59_v24  ;;  %v85_v33 = vmul.f32 %v733_v4, %v32_v25  ;;  %v63_v24 = vld [vmem:[%s1309_s0 + $0x138] sm:$0xff] }
  0x20   :  { %v177_v19 = vadd.f32 %v738_v5, %v124_v11  ;;  %v231_v21 = vpack.c.bf16 %v186_v15, %v185_v14  ;;  %v86_v34 = vmul.f32 %v733_v4, %v33_v26  ;;  %v151_v36 = vadd.f32 %v738_v5, %v98_v28 }
  0x21   :  { %667 = vmatmul.msk.bf16.gmra.mxu3 %vm269_vm0, %v249_v27  ;;  %v97_v27 = vmul.f32 %v733_v4, %v44_v17  ;;  %v225_v30 = vmax.f32 %v176_v18, 0.0  ;;  %v164_v38 = vadd.f32 %v738_v5, %v111_v29  ;;  %v165_v39 = vadd.f32 %v738_v5, %v112_v32 }
  0x22   :  { %v226_v31 = vmax.f32 %v177_v19, 0.0  ;;  %v138_v40 = vadd.f32 %v738_v5, %v85_v33  ;;  %v139_v41 = vadd.f32 %v738_v5, %v86_v34  ;;  %v200_v44 = vmax.f32 %v151_v36, 0.0 }
  0x23   :  { %v150_v35 = vadd.f32 %v738_v5, %v97_v27  ;;  %v99_v60 = vmul.f32 %v733_v4, %v46_v54  ;;  %v100_v61 = vmul.f32 %v733_v4, %v47_v55  ;;  %v113_v62 = vmul.f32 %v733_v4, %v60_v56 }
  0x24   :  { %v251_v37 = vpack.c.bf16 %v226_v31, %v225_v30  ;;  %v187_v48 = vmax.f32 %v138_v40, 0.0  ;;  %v188_v49 = vmax.f32 %v139_v41, 0.0  ;;  %v114_v0 = vmul.f32 %v733_v4, %v61_v57 }
  0x25   :  { %v199_v43 = vmax.f32 %v150_v35, 0.0  ;;  %v87_v1 = vmul.f32 %v733_v4, %v34_v58  ;;  %v88_v2 = vmul.f32 %v733_v4, %v35_v59  ;;  %v152_v3 = vadd.f32 %v738_v5, %v99_v60 }
  0x26   :  { %v232_v53 = vpack.c.bf16 %v188_v49, %v187_v48  ;;  %v153_v6 = vadd.f32 %v738_v5, %v100_v61  ;;  %v166_v8 = vadd.f32 %v738_v5, %v113_v62  ;;  %v167_v9 = vadd.f32 %v738_v5, %v114_v0 }
  0x27   :  { %v238_v50 = vpack.c.bf16 %v200_v44, %v199_v43  ;;  %v140_v10 = vadd.f32 %v738_v5, %v87_v1  ;;  %v141_v11 = vadd.f32 %v738_v5, %v88_v2  ;;  %v201_v12 = vmax.f32 %v152_v3, 0.0 }
  0x28   :  { %v202_v13 = vmax.f32 %v153_v6, 0.0  ;;  %v215_v14 = vmax.f32 %v166_v8, 0.0  ;;  %v216_v15 = vmax.f32 %v167_v9, 0.0  ;;  %v102_v26 = vmul.f32 %v733_v4, %v49_v22 }
  0x29   :  { %v190_v17 = vmax.f32 %v141_v11, 0.0  ;;  %v115_v27 = vmul.f32 %v733_v4, %v62_v23  ;;  %v116_v28 = vmul.f32 %v733_v4, %v63_v24 }
  0x2a   :  { %v239_v18 = vpack.c.bf16 %v202_v13, %v201_v12  ;;  %v246_v19 = vpack.c.bf16 %v216_v15, %v215_v14  ;;  %v155_v30 = vadd.f32 %v738_v5, %v102_v26 }
  0x2b   :  { %v168_v31 = vadd.f32 %v738_v5, %v115_v27  ;;  %v169_v32 = vadd.f32 %v738_v5, %v116_v28 }
  0x2c   :  { %654 = vmatmul.msk.bf16.gmra.mxu1 %vm269_vm0, %v236_v42  ;;  %v72_v42 = vld [vmem:[%s1309_s0 + $0x180] sm:$0xff]  ;;  %v204_v34 = vmax.f32 %v155_v30, 0.0 }
  0x2d   :  { %661 = vmatmul.msk.bf16.gmra.mxu2 %vm269_vm0, %v243_v46  ;;  %v125_v45 = vmul.f32 %v733_v4, %v72_v42  ;;  %v213_v46 = vmax.f32 %v164_v38, 0.0  ;;  %v217_v35 = vmax.f32 %v168_v31, 0.0  ;;  %v218_v36 = vmax.f32 %v169_v32, 0.0 }
  0x2e   :  { %648 = vmatmul.msk.bf16.gmra.mxu0 %vm269_vm0, %v230_v47  ;;  %v214_v47 = vmax.f32 %v165_v39, 0.0  ;;  %v1012_v39 = vld [vmem:[%s1313_s5] ss:$0 sm:$0xff] }
  0x2f   :  { %v178_v51 = vadd.f32 %v738_v5, %v125_v45  ;;  %v247_v38 = vpack.c.bf16 %v218_v36, %v217_v35 }
  0x30   :  { %v245_v52 = vpack.c.bf16 %v214_v47, %v213_v46 }
  0x31   :  { %668 = vmatmul.msk.bf16.gmra.mxu3 %vm269_vm0, %v250_v63  ;;  %v227_v63 = vmax.f32 %v178_v51, 0.0 }
  0x33   :  { %v252_v7 = vpack.c.bf16 %v227_v63, %v227_v63 }
  0x3c   :  { %655 = vmatmul.msk.bf16.gmra.mxu1 %vm269_vm0, %v237_v16  ;;  %v189_v16 = vmax.f32 %v140_v10, 0.0 }
  0x3d   :  { %662 = vmatmul.msk.bf16.gmra.mxu2 %vm269_vm0, %v244_v20 }
  0x3e   :  { %649 = vmatmul.msk.bf16.gmra.mxu0 %vm269_vm0, %v231_v21  ;;  %v233_v20 = vpack.c.bf16 %v190_v17, %v189_v16  ;;  %v48_v21 = vld [vmem:[%s1309_s0 + $0xc0] sm:$0xff] }
  0x3f   :  { %v101_v25 = vmul.f32 %v733_v4, %v48_v21  ;;  %v1007_v4 = vld [vmem:[%s1312_s4] ss:$0 sm:$0xff] }
  0x41   :  { %669 = vmatmul.msk.bf16.gmra.mxu3 %vm269_vm0, %v251_v37  ;;  %v154_v29 = vadd.f32 %v738_v5, %v101_v25 }
  0x43   :  { %v203_v33 = vmax.f32 %v154_v29, 0.0 }
  0x45   :  { %v240_v37 = vpack.c.bf16 %v204_v34, %v203_v33 }
  0x4c   :  { %656 = vmatmul.msk.bf16.gmra.mxu1 %vm269_vm0, %v238_v50 }
  0x4d   :  { %663 = vmatmul.msk.bf16.gmra.mxu2 %vm269_vm0, %v245_v52 }
  0x4e   :  { %650 = vmatmul.msk.bf16.gmra.mxu0 %vm269_vm0, %v232_v53 }
  0x51   :  { %670 = vmatmul.msk.bf16.gmra.mxu3 %vm269_vm0, %v252_v7 }
  0x5c   :  { %657 = vmatmul.msk.bf16.gmra.mxu1 %vm269_vm0, %v239_v18 }
  0x5d   :  { %664 = vmatmul.msk.bf16.gmra.mxu2 %vm269_vm0, %v246_v19 }
  0x5e   :  { %651 = vmatmul.msk.bf16.gmra.mxu0 %vm269_vm0, %v233_v20 }
  0x6c   :  { %658 = vmatmul.msk.bf16.gmra.mxu1 %vm269_vm0, %v240_v37 }
  0x6d   :  { %665 = vmatmul.msk.bf16.gmra.mxu2 %vm269_vm0, %v247_v38 }
  0x89   :  { %v384_v5 = vpop.f32.mrf.mxu1 }
  0x8a   :  { %v494_v40 = vmul.f32 %v1007_v4, %v384_v5 }
  0x8b   :  { %v354_v41 = vpop.f32.mrf.mxu0 }
  0x8c   :  { %v482_v42 = vmul.f32 %v1007_v4, %v354_v41  ;;  %v547_v43 = vadd.f32 %v1012_v39, %v494_v40 }
  0x8e   :  { %v535_v44 = vadd.f32 %v1012_v39, %v482_v42  ;;  %597 = vst.msk [vmem:[%s1314_s6 + $0x60] sm:$0xff] %vm584_vm1, %v547_v43 }
  0x90   :  { %585 = vst.msk [vmem:[%s1314_s6] sm:$0xff] %vm584_vm1, %v535_v44  ;;  %v419_v45 = vpop.f32.mrf.mxu2 }
  0x91   :  { %v508_v46 = vmul.f32 %v1007_v4, %v419_v45  ;;  %v386_v47 = vpop.f32.mrf.mxu1 }
  0x92   :  { %v495_v48 = vmul.f32 %v1007_v4, %v386_v47 }
  0x93   :  { %v356_v49 = vpop.f32.mrf.mxu0  ;;  %v561_v50 = vadd.f32 %v1012_v39, %v508_v46 }
  0x94   :  { %v483_v51 = vmul.f32 %v1007_v4, %v356_v49  ;;  %v548_v52 = vadd.f32 %v1012_v39, %v495_v48  ;;  %v454_v54 = vpop.f32.mrf.mxu3 }
  0x95   :  { %611 = vst.msk [vmem:[%s1314_s6 + $0xd0] sm:$0xff] %vm584_vm1, %v561_v50  ;;  %v522_v56 = vmul.f32 %v1007_v4, %v454_v54 }
  0x96   :  { %v536_v53 = vadd.f32 %v1012_v39, %v483_v51  ;;  %598 = vst.msk [vmem:[%s1314_s6 + $0x68] sm:$0xff] %vm584_vm1, %v548_v52 }
  0x97   :  { %v575_v61 = vadd.f32 %v1012_v39, %v522_v56 }
  0x98   :  { %586 = vst.msk [vmem:[%s1314_s6 + $0x8] sm:$0xff] %vm584_vm1, %v536_v53  ;;  %v421_v55 = vpop.f32.mrf.mxu2 }
  0x99   :  { %v509_v57 = vmul.f32 %v1007_v4, %v421_v55  ;;  %v389_v58 = vpop.f32.mrf.mxu1  ;;  %625 = vst.msk [vmem:[%s1314_s6 + $0x140] sm:$0xff] %vm584_vm1, %v575_v61 }
  0x9a   :  { %v496_v59 = vmul.f32 %v1007_v4, %v389_v58 }
  0x9b   :  { %v359_v60 = vpop.f32.mrf.mxu0  ;;  %v562_v62 = vadd.f32 %v1012_v39, %v509_v57 }
  0x9c   :  { %v484_v63 = vmul.f32 %v1007_v4, %v359_v60  ;;  %v549_v0 = vadd.f32 %v1012_v39, %v496_v59  ;;  %v456_v2 = vpop.f32.mrf.mxu3 }
  0x9d   :  { %612 = vst.msk [vmem:[%s1314_s6 + $0xd8] sm:$0xff] %vm584_vm1, %v562_v62  ;;  %v523_v6 = vmul.f32 %v1007_v4, %v456_v2 }
  0x9e   :  { %v537_v1 = vadd.f32 %v1012_v39, %v484_v63  ;;  %599 = vst.msk [vmem:[%s1314_s6 + $0x70] sm:$0xff] %vm584_vm1, %v549_v0 }
  0x9f   :  { %v576_v11 = vadd.f32 %v1012_v39, %v523_v6 }
  0xa0   :  { %587 = vst.msk [vmem:[%s1314_s6 + $0x10] sm:$0xff] %vm584_vm1, %v537_v1  ;;  %v424_v3 = vpop.f32.mrf.mxu2 }
  0xa1   :  { %v510_v7 = vmul.f32 %v1007_v4, %v424_v3  ;;  %v391_v8 = vpop.f32.mrf.mxu1  ;;  %626 = vst.msk [vmem:[%s1314_s6 + $0x148] sm:$0xff] %vm584_vm1, %v576_v11 }
  0xa2   :  { %v497_v9 = vmul.f32 %v1007_v4, %v391_v8 }
  0xa3   :  { %v361_v10 = vpop.f32.mrf.mxu0  ;;  %v563_v12 = vadd.f32 %v1012_v39, %v510_v7 }
  0xa4   :  { %v485_v13 = vmul.f32 %v1007_v4, %v361_v10  ;;  %v550_v14 = vadd.f32 %v1012_v39, %v497_v9  ;;  %v459_v16 = vpop.f32.mrf.mxu3 }
  0xa5   :  { %613 = vst.msk [vmem:[%s1314_s6 + $0xe0] sm:$0xff] %vm584_vm1, %v563_v12  ;;  %v524_v18 = vmul.f32 %v1007_v4, %v459_v16 }
  0xa6   :  { %v538_v15 = vadd.f32 %v1012_v39, %v485_v13  ;;  %600 = vst.msk [vmem:[%s1314_s6 + $0x78] sm:$0xff] %vm584_vm1, %v550_v14 }
  0xa7   :  { %v577_v23 = vadd.f32 %v1012_v39, %v524_v18 }
  0xa8   :  { %588 = vst.msk [vmem:[%s1314_s6 + $0x18] sm:$0xff] %vm584_vm1, %v538_v15  ;;  %v426_v17 = vpop.f32.mrf.mxu2 }
  0xa9   :  { %v511_v19 = vmul.f32 %v1007_v4, %v426_v17  ;;  %v394_v20 = vpop.f32.mrf.mxu1  ;;  %627 = vst.msk [vmem:[%s1314_s6 + $0x150] sm:$0xff] %vm584_vm1, %v577_v23 }
  0xaa   :  { %v498_v21 = vmul.f32 %v1007_v4, %v394_v20 }
  0xab   :  { %v364_v22 = vpop.f32.mrf.mxu0  ;;  %v564_v24 = vadd.f32 %v1012_v39, %v511_v19 }
  0xac   :  { %v486_v25 = vmul.f32 %v1007_v4, %v364_v22  ;;  %v551_v26 = vadd.f32 %v1012_v39, %v498_v21  ;;  %v461_v28 = vpop.f32.mrf.mxu3 }
  0xad   :  { %614 = vst.msk [vmem:[%s1314_s6 + $0xe8] sm:$0xff] %vm584_vm1, %v564_v24  ;;  %v525_v30 = vmul.f32 %v1007_v4, %v461_v28 }
  0xae   :  { %v539_v27 = vadd.f32 %v1012_v39, %v486_v25  ;;  %601 = vst.msk [vmem:[%s1314_s6 + $0x80] sm:$0xff] %vm584_vm1, %v551_v26 }
  0xaf   :  { %v578_v35 = vadd.f32 %v1012_v39, %v525_v30 }
  0xb0   :  { %589 = vst.msk [vmem:[%s1314_s6 + $0x20] sm:$0xff] %vm584_vm1, %v539_v27  ;;  %v429_v29 = vpop.f32.mrf.mxu2 }
  0xb1   :  { %v512_v31 = vmul.f32 %v1007_v4, %v429_v29  ;;  %v396_v32 = vpop.f32.mrf.mxu1  ;;  %628 = vst.msk [vmem:[%s1314_s6 + $0x158] sm:$0xff] %vm584_vm1, %v578_v35 }
  0xb2   :  { %v499_v33 = vmul.f32 %v1007_v4, %v396_v32 }
  0xb3   :  { %v366_v34 = vpop.f32.mrf.mxu0  ;;  %v565_v36 = vadd.f32 %v1012_v39, %v512_v31 }
  0xb4   :  { %v487_v37 = vmul.f32 %v1007_v4, %v366_v34  ;;  %v552_v38 = vadd.f32 %v1012_v39, %v499_v33  ;;  %v464_v40 = vpop.f32.mrf.mxu3 }
  0xb5   :  { %615 = vst.msk [vmem:[%s1314_s6 + $0xf0] sm:$0xff] %vm584_vm1, %v565_v36  ;;  %v526_v42 = vmul.f32 %v1007_v4, %v464_v40 }
  0xb6   :  { %v540_v5 = vadd.f32 %v1012_v39, %v487_v37  ;;  %602 = vst.msk [vmem:[%s1314_s6 + $0x88] sm:$0xff] %vm584_vm1, %v552_v38 }
  0xb7   :  { %v579_v47 = vadd.f32 %v1012_v39, %v526_v42 }
  0xb8   :  { %590 = vst.msk [vmem:[%s1314_s6 + $0x28] sm:$0xff] %vm584_vm1, %v540_v5  ;;  %v431_v41 = vpop.f32.mrf.mxu2 }
  0xb9   :  { %v513_v43 = vmul.f32 %v1007_v4, %v431_v41  ;;  %v399_v44 = vpop.f32.mrf.mxu1  ;;  %629 = vst.msk [vmem:[%s1314_s6 + $0x160] sm:$0xff] %vm584_vm1, %v579_v47 }
  0xba   :  { %v500_v45 = vmul.f32 %v1007_v4, %v399_v44 }
  0xbb   :  { %v369_v46 = vpop.f32.mrf.mxu0  ;;  %v566_v48 = vadd.f32 %v1012_v39, %v513_v43 }
  0xbc   :  { %v488_v49 = vmul.f32 %v1007_v4, %v369_v46  ;;  %v553_v50 = vadd.f32 %v1012_v39, %v500_v45  ;;  %v466_v52 = vpop.f32.mrf.mxu3 }
  0xbd   :  { %616 = vst.msk [vmem:[%s1314_s6 + $0xf8] sm:$0xff] %vm584_vm1, %v566_v48  ;;  %v527_v54 = vmul.f32 %v1007_v4, %v466_v52 }
  0xbe   :  { %v541_v51 = vadd.f32 %v1012_v39, %v488_v49  ;;  %603 = vst.msk [vmem:[%s1314_s6 + $0x90] sm:$0xff] %vm584_vm1, %v553_v50 }
  0xbf   :  { %v580_v59 = vadd.f32 %v1012_v39, %v527_v54 }
  0xc0   :  { %591 = vst.msk [vmem:[%s1314_s6 + $0x30] sm:$0xff] %vm584_vm1, %v541_v51  ;;  %v434_v53 = vpop.f32.mrf.mxu2 }
  0xc1   :  { %v514_v55 = vmul.f32 %v1007_v4, %v434_v53  ;;  %v401_v56 = vpop.f32.mrf.mxu1  ;;  %630 = vst.msk [vmem:[%s1314_s6 + $0x168] sm:$0xff] %vm584_vm1, %v580_v59 }
  0xc2   :  { %v501_v57 = vmul.f32 %v1007_v4, %v401_v56 }
  0xc3   :  { %v371_v58 = vpop.f32.mrf.mxu0  ;;  %v567_v60 = vadd.f32 %v1012_v39, %v514_v55 }
  0xc4   :  { %v489_v61 = vmul.f32 %v1007_v4, %v371_v58  ;;  %v554_v62 = vadd.f32 %v1012_v39, %v501_v57  ;;  %v469_v0 = vpop.f32.mrf.mxu3 }
  0xc5   :  { %617 = vst.msk [vmem:[%s1314_s6 + $0x100] sm:$0xff] %vm584_vm1, %v567_v60  ;;  %v528_v2 = vmul.f32 %v1007_v4, %v469_v0 }
  0xc6   :  { %v542_v63 = vadd.f32 %v1012_v39, %v489_v61  ;;  %604 = vst.msk [vmem:[%s1314_s6 + $0x98] sm:$0xff] %vm584_vm1, %v554_v62 }
  0xc7   :  { %v581_v9 = vadd.f32 %v1012_v39, %v528_v2 }
  0xc8   :  { %592 = vst.msk [vmem:[%s1314_s6 + $0x38] sm:$0xff] %vm584_vm1, %v542_v63  ;;  %v436_v1 = vpop.f32.mrf.mxu2 }
  0xc9   :  { %v515_v3 = vmul.f32 %v1007_v4, %v436_v1  ;;  %v404_v6 = vpop.f32.mrf.mxu1  ;;  %631 = vst.msk [vmem:[%s1314_s6 + $0x170] sm:$0xff] %vm584_vm1, %v581_v9 }
  0xca   :  { %v502_v7 = vmul.f32 %v1007_v4, %v404_v6 }
  0xcb   :  { %v374_v8 = vpop.f32.mrf.mxu0  ;;  %v568_v10 = vadd.f32 %v1012_v39, %v515_v3 }
  0xcc   :  { %v490_v11 = vmul.f32 %v1007_v4, %v374_v8  ;;  %v555_v12 = vadd.f32 %v1012_v39, %v502_v7  ;;  %v471_v14 = vpop.f32.mrf.mxu3 }
  0xcd   :  { %618 = vst.msk [vmem:[%s1314_s6 + $0x108] sm:$0xff] %vm584_vm1, %v568_v10  ;;  %v529_v16 = vmul.f32 %v1007_v4, %v471_v14 }
  0xce   :  { %v543_v13 = vadd.f32 %v1012_v39, %v490_v11  ;;  %605 = vst.msk [vmem:[%s1314_s6 + $0xa0] sm:$0xff] %vm584_vm1, %v555_v12 }
  0xcf   :  { %v582_v21 = vadd.f32 %v1012_v39, %v529_v16 }
  0xd0   :  { %593 = vst.msk [vmem:[%s1314_s6 + $0x40] sm:$0xff] %vm584_vm1, %v543_v13  ;;  %v439_v15 = vpop.f32.mrf.mxu2 }
  0xd1   :  { %v516_v17 = vmul.f32 %v1007_v4, %v439_v15  ;;  %v406_v18 = vpop.f32.mrf.mxu1  ;;  %632 = vst.msk [vmem:[%s1314_s6 + $0x178] sm:$0xff] %vm584_vm1, %v582_v21 }
  0xd2   :  { %v503_v19 = vmul.f32 %v1007_v4, %v406_v18 }
  0xd3   :  { %v376_v20 = vpop.f32.mrf.mxu0  ;;  %v569_v22 = vadd.f32 %v1012_v39, %v516_v17 }
  0xd4   :  { %v491_v23 = vmul.f32 %v1007_v4, %v376_v20  ;;  %v556_v24 = vadd.f32 %v1012_v39, %v503_v19  ;;  %v474_v26 = vpop.f32.mrf.mxu3 }
  0xd5   :  { %619 = vst.msk [vmem:[%s1314_s6 + $0x110] sm:$0xff] %vm584_vm1, %v569_v22  ;;  %v530_v28 = vmul.f32 %v1007_v4, %v474_v26 }
  0xd6   :  { %v544_v25 = vadd.f32 %v1012_v39, %v491_v23  ;;  %606 = vst.msk [vmem:[%s1314_s6 + $0xa8] sm:$0xff] %vm584_vm1, %v556_v24 }
  0xd7   :  { %v583_v33 = vadd.f32 %v1012_v39, %v530_v28 }
  0xd8   :  { %594 = vst.msk [vmem:[%s1314_s6 + $0x48] sm:$0xff] %vm584_vm1, %v544_v25  ;;  %v441_v27 = vpop.f32.mrf.mxu2 }
  0xd9   :  { %v517_v29 = vmul.f32 %v1007_v4, %v441_v27  ;;  %v409_v30 = vpop.f32.mrf.mxu1  ;;  %633 = vst.msk [vmem:[%s1314_s6 + $0x180] sm:$0xff] %vm584_vm1, %v583_v33 }
  0xda   :  { %v504_v31 = vmul.f32 %v1007_v4, %v409_v30 }
  0xdb   :  { %v379_v32 = vpop.f32.mrf.mxu0  ;;  %v570_v34 = vadd.f32 %v1012_v39, %v517_v29 }
  0xdc   :  { %v492_v35 = vmul.f32 %v1007_v4, %v379_v32  ;;  %v557_v36 = vadd.f32 %v1012_v39, %v504_v31  ;;  %v476_v38 = vpop.f32.mrf.mxu3 }
  0xdd   :  { %620 = vst.msk [vmem:[%s1314_s6 + $0x118] sm:$0xff] %vm584_vm1, %v570_v34 }
  0xde   :  { %v545_v37 = vadd.f32 %v1012_v39, %v492_v35  ;;  %607 = vst.msk [vmem:[%s1314_s6 + $0xb0] sm:$0xff] %vm584_vm1, %v557_v36 }
  0xe0   :  { %595 = vst.msk [vmem:[%s1314_s6 + $0x50] sm:$0xff] %vm584_vm1, %v545_v37  ;;  %v444_v5 = vpop.f32.mrf.mxu2 }
  0xe1   :  { %v518_v40 = vmul.f32 %v1007_v4, %v444_v5  ;;  %v411_v41 = vpop.f32.mrf.mxu1 }
  0xe2   :  { %v505_v42 = vmul.f32 %v1007_v4, %v411_v41 }
  0xe3   :  { %v381_v43 = vpop.f32.mrf.mxu0  ;;  %v571_v44 = vadd.f32 %v1012_v39, %v518_v40 }
  0xe4   :  { %v493_v45 = vmul.f32 %v1007_v4, %v381_v43  ;;  %v558_v46 = vadd.f32 %v1012_v39, %v505_v42 }
  0xe5   :  { %621 = vst.msk [vmem:[%s1314_s6 + $0x120] sm:$0xff] %vm584_vm1, %v571_v44 }
  0xe6   :  { %v546_v47 = vadd.f32 %v1012_v39, %v493_v45  ;;  %608 = vst.msk [vmem:[%s1314_s6 + $0xb8] sm:$0xff] %vm584_vm1, %v558_v46 }
  0xe8   :  { %596 = vst.msk [vmem:[%s1314_s6 + $0x58] sm:$0xff] %vm584_vm1, %v546_v47  ;;  %v446_v48 = vpop.f32.mrf.mxu2 }
  0xe9   :  { %v519_v49 = vmul.f32 %v1007_v4, %v446_v48  ;;  %v414_v50 = vpop.f32.mrf.mxu1 }
  0xea   :  { %v506_v51 = vmul.f32 %v1007_v4, %v414_v50 }
  0xeb   :  { %v572_v52 = vadd.f32 %v1012_v39, %v519_v49 }
  0xec   :  { %v559_v53 = vadd.f32 %v1012_v39, %v506_v51 }
  0xed   :  { %622 = vst.msk [vmem:[%s1314_s6 + $0x128] sm:$0xff] %vm584_vm1, %v572_v52 }
  0xee   :  { %609 = vst.msk [vmem:[%s1314_s6 + $0xc0] sm:$0xff] %vm584_vm1, %v559_v53 }
  0xf0   :  { %v449_v54 = vpop.f32.mrf.mxu2 }
  0xf1   :  { %v520_v55 = vmul.f32 %v1007_v4, %v449_v54  ;;  %v416_v56 = vpop.f32.mrf.mxu1 }
  0xf2   :  { %v507_v57 = vmul.f32 %v1007_v4, %v416_v56 }
  0xf3   :  { %v573_v58 = vadd.f32 %v1012_v39, %v520_v55 }
  0xf4   :  { %v560_v59 = vadd.f32 %v1012_v39, %v507_v57 }
  0xf5   :  { %623 = vst.msk [vmem:[%s1314_s6 + $0x130] sm:$0xff] %vm584_vm1, %v573_v58 }
  0xf6   :  { %610 = vst.msk [vmem:[%s1314_s6 + $0xc8] sm:$0xff] %vm584_vm1, %v560_v59 }
  0xf8   :  { %v451_v60 = vpop.f32.mrf.mxu2 }
  0xf9   :  { %v521_v61 = vmul.f32 %v1007_v4, %v451_v60 }
  0xfb   :  { %v574_v62 = vadd.f32 %v1012_v39, %v521_v61 }
  0xfd   :  { %624 = vst.msk [vmem:[%s1314_s6 + $0x138] sm:$0xff] %vm584_vm1, %v574_v62 }

// kernel: densenet_forward.21
= control target key start
LH: loop header
LB: loop body
LE: loop exit
PB: predicated region body
PF: predicated region fallthrough
CT: control target
= control target key end

     0   :  { %s418_s6 = smov 0   ;;  %s580_s0 = inlined_call_operand.vmem [shape: f32[2,210,16], index: 0, kind: input, shape index: {}]   ;;  %s581_s1 = inlined_call_operand.vmem [shape: f32[2,182,16], index: 1, kind: output, shape index: {}]  }
   0x1 LB: > { %s381_s7 = sadd.s32 4294967295, %s406_s6   ;;  %p385_p0 = scmp.ge.s32.totalorder %s406_s6, 1  ;;  %s406_s6 = sphi %s418_s6, %s11_s6  }
   0x2   : > { %p87_p1 = scmp.lt.s32.totalorder %s406_s6, 3 }
   0x4   : > { %p88_p2 = pnand %p385_p0, %p87_p1 }
   0x5   : > { %p107_p3 = scmp.lt.s32.totalorder (!%p88_p2), %s381_s7, 1 }
   0x6   : > { %91 = sbr.rel (%p88_p2) target bundleno = 55 (0x37), region = 24 }
   0xb   : > { %s583_s7 = smov (!%p107_p3, %s381_s7), 1  ;;  %vm301_vm0 = vcmask 130048   ;;  %vm324_vm1 = vcmask 128000  }
   0xc   : > { %s390_s8 = smul.u32 216, %s583_s7 }
   0xd   : > { %s391_s12 = smul.u32 184, %s583_s7 }
   0xe   : > { %s432_s11 = scalar_lea.vmem %s580_s0, %s390_s8 }
   0xf   : > { %v117_v0 = vld [vmem:[%s432_s11] sm:$0xff]  ;;  %v186_v2 = vld [vmem:[%s432_s11 + $0xe] sm:$0xff]  ;;  %v187_v8 = vld [vmem:[%s432_s11 + $0x16] sm:$0xff]  ;;  %s455_s15 = scalar_lea.vmem %s581_s1, %s391_s12 }
  0x10   : > { %v140_v1 = vld [vmem:[%s432_s11 + $0x1] sm:$0xff]  ;;  %v141_v5 = vld [vmem:[%s432_s11 + $0x9] sm:$0xff]  ;;  %v233_v11 = vld [vmem:[%s432_s11 + $0x17] sm:$0xff] }
  0x11   : > { %v163_v3 = vadd.f32 %v140_v1, %v117_v0  ;;  %v118_v4 = vld [vmem:[%s432_s11 + $0x8] sm:$0xff]  ;;  %v119_v9 = vld [vmem:[%s432_s11 + $0x10] sm:$0xff]  ;;  %v188_v13 = vld [vmem:[%s432_s11 + $0x1e] sm:$0xff] }
  0x12   : > { %v232_v6 = vld [vmem:[%s432_s11 + $0xf] sm:$0xff]  ;;  %v164_v7 = vadd.f32 %v141_v5, %v118_v4  ;;  %v120_v16 = vld [vmem:[%s432_s11 + $0x18] sm:$0xff]  ;;  %v189_v18 = vld [vmem:[%s432_s11 + $0x26] sm:$0xff] }
  0x13   : > { %v209_v10 = vadd.f32 %v186_v2, %v163_v3  ;;  %v142_v12 = vld [vmem:[%s432_s11 + $0x11] sm:$0xff]  ;;  %v143_v17 = vld [vmem:[%s432_s11 + $0x19] sm:$0xff]  ;;  %v144_v23 = vld [vmem:[%s432_s11 + $0x21] sm:$0xff] }
  0x14   : > { %v210_v14 = vadd.f32 %v187_v8, %v164_v7  ;;  %v165_v15 = vadd.f32 %v142_v12, %v119_v9  ;;  %v234_v20 = vld [vmem:[%s432_s11 + $0x1f] sm:$0xff]  ;;  %v166_v21 = vadd.f32 %v143_v17, %v120_v16  ;;  %v235_v26 = vld [vmem:[%s432_s11 + $0x27] sm:$0xff]  ;;  %v236_v32 = vld [vmem:[%s432_s11 + $0x2f] sm:$0xff] }
  0x15   : > { %v255_v19 = vadd.f32 %v232_v6, %v209_v10  ;;  %v121_v22 = vld [vmem:[%s432_s11 + $0x20] sm:$0xff]  ;;  %v190_v28 = vld [vmem:[%s432_s11 + $0x2e] sm:$0xff]  ;;  %v191_v34 = vld [vmem:[%s432_s11 + $0x36] sm:$0xff] }
  0x16   : > { %v256_v24 = vadd.f32 %v233_v11, %v210_v14  ;;  %v211_v25 = vadd.f32 %v188_v13, %v165_v15  ;;  %v167_v27 = vadd.f32 %v144_v23, %v121_v22  ;;  %v122_v29 = vld [vmem:[%s432_s11 + $0x28] sm:$0xff]  ;;  %v212_v31 = vadd.f32 %v189_v18, %v166_v21  ;;  %v123_v39 = vld [vmem:[%s432_s11 + $0x30] sm:$0xff]  ;;  %v192_v41 = vld [vmem:[%s432_s11 + $0x3e] sm:$0xff] }
  0x17   : > { %v278_v30 = vmul.f32 0.25, %v255_v19  ;;  %v145_v33 = vld [vmem:[%s432_s11 + $0x29] sm:$0xff]  ;;  %v146_v40 = vld [vmem:[%s432_s11 + $0x31] sm:$0xff]  ;;  %v147_v46 = vld [vmem:[%s432_s11 + $0x39] sm:$0xff] }
  0x18   : > { %v279_v35 = vmul.f32 0.25, %v256_v24  ;;  %v257_v36 = vadd.f32 %v234_v20, %v211_v25  ;;  %v213_v37 = vadd.f32 %v190_v28, %v167_v27  ;;  %v168_v38 = vadd.f32 %v145_v33, %v122_v29  ;;  %v237_v43 = vld [vmem:[%s432_s11 + $0x37] sm:$0xff]  ;;  %v238_v50 = vld [vmem:[%s432_s11 + $0x3f] sm:$0xff]  ;;  %v239_v56 = vld [vmem:[%s432_s11 + $0x47] sm:$0xff] }
  0x19   : > { %302 = vst.msk [vmem:[%s455_s15] sm:$0xff] %vm301_vm0, %v278_v30  ;;  %v258_v42 = vadd.f32 %v235_v26, %v212_v31  ;;  %v169_v44 = vadd.f32 %v146_v40, %v123_v39  ;;  %v124_v45 = vld [vmem:[%s432_s11 + $0x38] sm:$0xff]  ;;  %v193_v52 = vld [vmem:[%s432_s11 + $0x46] sm:$0xff]  ;;  %v194_v58 = vld [vmem:[%s432_s11 + $0x4e] sm:$0xff] }
  0x1a   : > { %303 = vst.msk [vmem:[%s455_s15 + $0x8] sm:$0xff] %vm301_vm0, %v279_v35  ;;  %v280_v47 = vmul.f32 0.25, %v257_v36  ;;  %v259_v48 = vadd.f32 %v236_v32, %v213_v37  ;;  %v214_v49 = vadd.f32 %v191_v34, %v168_v38  ;;  %v170_v51 = vadd.f32 %v147_v46, %v124_v45  ;;  %v125_v53 = vld [vmem:[%s432_s11 + $0x40] sm:$0xff]  ;;  %v126_v63 = vld [vmem:[%s432_s11 + $0x48] sm:$0xff]  ;;  %v195_v1 = vld [vmem:[%s432_s11 + $0x56] sm:$0xff] }
  0x1b   : > { %v281_v54 = vmul.f32 0.25, %v258_v42  ;;  %v215_v55 = vadd.f32 %v192_v41, %v169_v44  ;;  %v148_v57 = vld [vmem:[%s432_s11 + $0x41] sm:$0xff]  ;;  %v149_v0 = vld [vmem:[%s432_s11 + $0x49] sm:$0xff]  ;;  %v150_v6 = vld [vmem:[%s432_s11 + $0x51] sm:$0xff] }
  0x1c   : > { %304 = vst.msk [vmem:[%s455_s15 + $0x10] sm:$0xff] %vm301_vm0, %v280_v47  ;;  %v282_v59 = vmul.f32 0.25, %v259_v48  ;;  %v260_v60 = vadd.f32 %v237_v43, %v214_v49  ;;  %v216_v61 = vadd.f32 %v193_v52, %v170_v51  ;;  %v171_v62 = vadd.f32 %v148_v57, %v125_v53  ;;  %v240_v3 = vld [vmem:[%s432_s11 + $0x4f] sm:$0xff]  ;;  %v241_v10 = vld [vmem:[%s432_s11 + $0x57] sm:$0xff]  ;;  %v242_v16 = vld [vmem:[%s432_s11 + $0x5f] sm:$0xff] }
  0x1d   : > { %305 = vst.msk [vmem:[%s455_s15 + $0x18] sm:$0xff] %vm301_vm0, %v281_v54  ;;  %v261_v2 = vadd.f32 %v238_v50, %v215_v55  ;;  %v172_v4 = vadd.f32 %v149_v0, %v126_v63  ;;  %v127_v5 = vld [vmem:[%s432_s11 + $0x50] sm:$0xff]  ;;  %v196_v12 = vld [vmem:[%s432_s11 + $0x5e] sm:$0xff]  ;;  %v197_v18 = vld [vmem:[%s432_s11 + $0x66] sm:$0xff] }
  0x1e   : > { %306 = vst.msk [vmem:[%s455_s15 + $0x20] sm:$0xff] %vm301_vm0, %v282_v59  ;;  %v283_v7 = vmul.f32 0.25, %v260_v60  ;;  %v262_v8 = vadd.f32 %v239_v56, %v216_v61  ;;  %v217_v9 = vadd.f32 %v194_v58, %v171_v62  ;;  %v173_v11 = vadd.f32 %v150_v6, %v127_v5  ;;  %v128_v13 = vld [vmem:[%s432_s11 + $0x58] sm:$0xff]  ;;  %v129_v23 = vld [vmem:[%s432_s11 + $0x60] sm:$0xff]  ;;  %v198_v25 = vld [vmem:[%s432_s11 + $0x6e] sm:$0xff] }
  0x1f   : > { %v284_v14 = vmul.f32 0.25, %v261_v2  ;;  %v218_v15 = vadd.f32 %v195_v1, %v172_v4  ;;  %v151_v17 = vld [vmem:[%s432_s11 + $0x59] sm:$0xff]  ;;  %v152_v24 = vld [vmem:[%s432_s11 + $0x61] sm:$0xff]  ;;  %v153_v30 = vld [vmem:[%s432_s11 + $0x69] sm:$0xff] }
  0x20   : > { %307 = vst.msk [vmem:[%s455_s15 + $0x28] sm:$0xff] %vm301_vm0, %v283_v7  ;;  %v285_v19 = vmul.f32 0.25, %v262_v8  ;;  %v263_v20 = vadd.f32 %v240_v3, %v217_v9  ;;  %v219_v21 = vadd.f32 %v196_v12, %v173_v11  ;;  %v174_v22 = vadd.f32 %v151_v17, %v128_v13  ;;  %v243_v27 = vld [vmem:[%s432_s11 + $0x67] sm:$0xff]  ;;  %v244_v34 = vld [vmem:[%s432_s11 + $0x6f] sm:$0xff]  ;;  %v245_v40 = vld [vmem:[%s432_s11 + $0x77] sm:$0xff] }
  0x21   : > { %308 = vst.msk [vmem:[%s455_s15 + $0x30] sm:$0xff] %vm301_vm0, %v284_v14  ;;  %v264_v26 = vadd.f32 %v241_v10, %v218_v15  ;;  %v175_v28 = vadd.f32 %v152_v24, %v129_v23  ;;  %v130_v29 = vld [vmem:[%s432_s11 + $0x68] sm:$0xff]  ;;  %v199_v36 = vld [vmem:[%s432_s11 + $0x76] sm:$0xff]  ;;  %v200_v42 = vld [vmem:[%s432_s11 + $0x7e] sm:$0xff] }
  0x22   : > { %309 = vst.msk [vmem:[%s455_s15 + $0x38] sm:$0xff] %vm301_vm0, %v285_v19  ;;  %v286_v31 = vmul.f32 0.25, %v263_v20  ;;  %v265_v32 = vadd.f32 %v242_v16, %v219_v21  ;;  %v220_v33 = vadd.f32 %v197_v18, %v174_v22  ;;  %v176_v35 = vadd.f32 %v153_v30, %v130_v29  ;;  %v131_v37 = vld [vmem:[%s432_s11 + $0x70] sm:$0xff]  ;;  %v132_v47 = vld [vmem:[%s432_s11 + $0x78] sm:$0xff]  ;;  %v201_v49 = vld [vmem:[%s432_s11 + $0x86] sm:$0xff] }
  0x23   : > { %v287_v38 = vmul.f32 0.25, %v264_v26  ;;  %v221_v39 = vadd.f32 %v198_v25, %v175_v28  ;;  %v154_v41 = vld [vmem:[%s432_s11 + $0x71] sm:$0xff]  ;;  %v155_v48 = vld [vmem:[%s432_s11 + $0x79] sm:$0xff]  ;;  %v156_v54 = vld [vmem:[%s432_s11 + $0x81] sm:$0xff] }
  0x24   : > { %310 = vst.msk [vmem:[%s455_s15 + $0x40] sm:$0xff] %vm301_vm0, %v286_v31  ;;  %v288_v43 = vmul.f32 0.25, %v265_v32  ;;  %v266_v44 = vadd.f32 %v243_v27, %v220_v33  ;;  %v222_v45 = vadd.f32 %v199_v36, %v176_v35  ;;  %v177_v46 = vadd.f32 %v154_v41, %v131_v37  ;;  %v246_v51 = vld [vmem:[%s432_s11 + $0x7f] sm:$0xff]  ;;  %v247_v58 = vld [vmem:[%s432_s11 + $0x87] sm:$0xff]  ;;  %v248_v0 = vld [vmem:[%s432_s11 + $0x8f] sm:$0xff] }
  0x25   : > { %311 = vst.msk [vmem:[%s455_s15 + $0x48] sm:$0xff] %vm301_vm0, %v287_v38  ;;  %v267_v50 = vadd.f32 %v244_v34, %v221_v39  ;;  %v178_v52 = vadd.f32 %v155_v48, %v132_v47  ;;  %v133_v53 = vld [vmem:[%s432_s11 + $0x80] sm:$0xff]  ;;  %v202_v60 = vld [vmem:[%s432_s11 + $0x8e] sm:$0xff]  ;;  %v203_v2 = vld [vmem:[%s432_s11 + $0x96] sm:$0xff] }
  0x26   : > { %312 = vst.msk [vmem:[%s455_s15 + $0x50] sm:$0xff] %vm301_vm0, %v288_v43  ;;  %v289_v55 = vmul.f32 0.25, %v266_v44  ;;  %v268_v56 = vadd.f32 %v245_v40, %v222_v45  ;;  %v223_v57 = vadd.f32 %v200_v42, %v177_v46  ;;  %v179_v59 = vadd.f32 %v156_v54, %v133_v53  ;;  %v134_v61 = vld [vmem:[%s432_s11 + $0x88] sm:$0xff]  ;;  %v135_v7 = vld [vmem:[%s432_s11 + $0x90] sm:$0xff]  ;;  %v204_v9 = vld [vmem:[%s432_s11 + $0x9e] sm:$0xff] }
  0x27   : > { %v290_v62 = vmul.f32 0.25, %v267_v50  ;;  %v224_v63 = vadd.f32 %v201_v49, %v178_v52  ;;  %v157_v1 = vld [vmem:[%s432_s11 + $0x89] sm:$0xff]  ;;  %v158_v8 = vld [vmem:[%s432_s11 + $0x91] sm:$0xff]  ;;  %v159_v14 = vld [vmem:[%s432_s11 + $0x99] sm:$0xff] }
  0x28   : > { %313 = vst.msk [vmem:[%s455_s15 + $0x58] sm:$0xff] %vm301_vm0, %v289_v55  ;;  %v291_v3 = vmul.f32 0.25, %v268_v56  ;;  %v269_v4 = vadd.f32 %v246_v51, %v223_v57  ;;  %v225_v5 = vadd.f32 %v202_v60, %v179_v59  ;;  %v180_v6 = vadd.f32 %v157_v1, %v134_v61  ;;  %v249_v11 = vld [vmem:[%s432_s11 + $0x97] sm:$0xff]  ;;  %v250_v18 = vld [vmem:[%s432_s11 + $0x9f] sm:$0xff]  ;;  %v251_v24 = vld [vmem:[%s432_s11 + $0xa7] sm:$0xff] }
  0x29   : > { %314 = vst.msk [vmem:[%s455_s15 + $0x60] sm:$0xff] %vm301_vm0, %v290_v62  ;;  %v270_v10 = vadd.f32 %v247_v58, %v224_v63  ;;  %v181_v12 = vadd.f32 %v158_v8, %v135_v7  ;;  %v136_v13 = vld [vmem:[%s432_s11 + $0x98] sm:$0xff]  ;;  %v205_v20 = vld [vmem:[%s432_s11 + $0xa6] sm:$0xff]  ;;  %v206_v26 = vld [vmem:[%s432_s11 + $0xae] sm:$0xff] }
  0x2a   : > { %315 = vst.msk [vmem:[%s455_s15 + $0x68] sm:$0xff] %vm301_vm0, %v291_v3  ;;  %v292_v15 = vmul.f32 0.25, %v269_v4  ;;  %v271_v16 = vadd.f32 %v248_v0, %v225_v5  ;;  %v226_v17 = vadd.f32 %v203_v2, %v180_v6  ;;  %v182_v19 = vadd.f32 %v159_v14, %v136_v13  ;;  %v137_v21 = vld [vmem:[%s432_s11 + $0xa0] sm:$0xff]  ;;  %v138_v31 = vld [vmem:[%s432_s11 + $0xa8] sm:$0xff]  ;;  %v207_v33 = vld [vmem:[%s432_s11 + $0xb6] sm:$0xff] }
  0x2b   : > { %v293_v22 = vmul.f32 0.25, %v270_v10  ;;  %v227_v23 = vadd.f32 %v204_v9, %v181_v12  ;;  %v160_v25 = vld [vmem:[%s432_s11 + $0xa1] sm:$0xff]  ;;  %v161_v32 = vld [vmem:[%s432_s11 + $0xa9] sm:$0xff]  ;;  %v162_v38 = vld [vmem:[%s432_s11 + $0xb1] sm:$0x3f] }
  0x2c   : > { %316 = vst.msk [vmem:[%s455_s15 + $0x70] sm:$0xff] %vm301_vm0, %v292_v15  ;;  %v294_v27 = vmul.f32 0.25, %v271_v16  ;;  %v272_v28 = vadd.f32 %v249_v11, %v226_v17  ;;  %v228_v29 = vadd.f32 %v205_v20, %v182_v19  ;;  %v183_v30 = vadd.f32 %v160_v25, %v137_v21  ;;  %v252_v35 = vld [vmem:[%s432_s11 + $0xaf] sm:$0xff]  ;;  %v253_v42 = vld [vmem:[%s432_s11 + $0xb7] sm:$0xff]  ;;  %v254_v47 = vld [vmem:[%s432_s11 + $0xbf] sm:$0x3f] }
  0x2d   : > { %317 = vst.msk [vmem:[%s455_s15 + $0x78] sm:$0xff] %vm301_vm0, %v293_v22  ;;  %v273_v34 = vadd.f32 %v250_v18, %v227_v23  ;;  %v184_v36 = vadd.f32 %v161_v32, %v138_v31  ;;  %v139_v37 = vld [vmem:[%s432_s11 + $0xb0] sm:$0x3f]  ;;  %v208_v44 = vld [vmem:[%s432_s11 + $0xbe] sm:$0x3f] }
  0x2e   : > { %318 = vst.msk [vmem:[%s455_s15 + $0x80] sm:$0xff] %vm301_vm0, %v294_v27  ;;  %v295_v39 = vmul.f32 0.25, %v272_v28  ;;  %v274_v40 = vadd.f32 %v251_v24, %v228_v29  ;;  %v229_v41 = vadd.f32 %v206_v26, %v183_v30  ;;  %v185_v43 = vadd.f32 %v162_v38, %v139_v37 }
  0x2f   : > { %v296_v45 = vmul.f32 0.25, %v273_v34  ;;  %v230_v46 = vadd.f32 %v207_v33, %v184_v36 }
  0x30   : > { %319 = vst.msk [vmem:[%s455_s15 + $0x88] sm:$0xff] %vm301_vm0, %v295_v39  ;;  %v297_v48 = vmul.f32 0.25, %v274_v40  ;;  %v275_v49 = vadd.f32 %v252_v35, %v229_v41  ;;  %v231_v50 = vadd.f32 %v208_v44, %v185_v43 }
  0x31   : > { %320 = vst.msk [vmem:[%s455_s15 + $0x90] sm:$0xff] %vm301_vm0, %v296_v45  ;;  %v276_v51 = vadd.f32 %v253_v42, %v230_v46 }
  0x32   : > { %321 = vst.msk [vmem:[%s455_s15 + $0x98] sm:$0xff] %vm301_vm0, %v297_v48  ;;  %v298_v52 = vmul.f32 0.25, %v275_v49  ;;  %v277_v53 = vadd.f32 %v254_v47, %v231_v50 }
  0x33   : > { %v299_v54 = vmul.f32 0.25, %v276_v51 }
  0x34   : > { %322 = vst.msk [vmem:[%s455_s15 + $0xa0] sm:$0xff] %vm301_vm0, %v298_v52  ;;  %v300_v55 = vmul.f32 0.25, %v277_v53 }
  0x35   : > { %323 = vst.msk [vmem:[%s455_s15 + $0xa8] sm:$0xff] %vm301_vm0, %v299_v54 }
  0x36   : > { %325 = vst.msk [vmem:[%s455_s15 + $0xb0] sm:$0x3f] %vm324_vm1, %v300_v55 }
  0x37 PF: > { %s11_s6 = sadd.s32 1, %s406_s6  }
  0x38   : > { %p8_p4 = scmp.ge.s32.totalorder %s11_s6, 4  }
  0x3a   :  { %10 = sbr.rel (!%p8_p4) target bundleno = 1 (0x1), region = 54 }

// kernel: densenet_forward.22
= control target key start
LH: loop header
LB: loop body
LE: loop exit
PB: predicated region body
PF: predicated region fallthrough
CT: control target
= control target key end

     0   :  { %vm99_vm0 = vcmask 130048   ;;  %s395_s1 = inlined_call_operand.vmem [shape: bf16[16,16], index: 1, kind: input, shape index: {}]   ;;  %s396_s0 = inlined_call_operand.vmem [shape: f32[98,16], index: 0, kind: input, shape index: {}]   ;;  %s397_s2 = inlined_call_operand.vmem [shape: f32[1,16], index: 2, kind: input, shape index: {}]   ;;  %s398_s3 = inlined_call_operand.vmem [shape: f32[1,16], index: 3, kind: input, shape index: {}]   ;;  %s399_s4 = inlined_call_operand.vmem [shape: f32[1,16], index: 4, kind: input, shape index: {}]   ;;  %s400_s5 = inlined_call_operand.vmem [shape: f32[1,16], index: 5, kind: input, shape index: {}]   ;;  %s401_s6 = inlined_call_operand.vmem [shape: f32[98,16], index: 6, kind: output, shape index: {}]  }
   0x1   :  { %v239_v0 = vld [vmem:[%s395_s1] sm:$0xff]  ;;  %v25_v2 = vld [vmem:[%s396_s0 + $0x8] sm:$0xff]  ;;  %v34_v10 = vld [vmem:[%s396_s0 + $0x50] sm:$0xff] }
   0x2   :  { %v24_v1 = vld [vmem:[%s396_s0] sm:$0xff]  ;;  %128 = vmatpush.bf16.msra.mxu0 %v239_v0  ;;  %240 = vmatpush.bf16.msra.mxu1 %v239_v0  ;;  %v29_v6 = vld [vmem:[%s396_s0 + $0x28] sm:$0xff]  ;;  %v35_v11 = vld [vmem:[%s396_s0 + $0x58] sm:$0xff] }
   0x3   :  { %v243_v3 = vld [vmem:[%s397_s2] ss:$0 sm:$0xff]  ;;  %242 = vmatpush.bf16.msra.mxu3 %v239_v0  ;;  %241 = vmatpush.bf16.msra.mxu2 %v239_v0  ;;  %v33_v16 = vld [vmem:[%s396_s0 + $0x48] sm:$0xff]  ;;  %v26_v34 = vld [vmem:[%s396_s0 + $0x10] sm:$0xff] }
   0x4   :  { %v244_v4 = vld [vmem:[%s398_s3] ss:$0 sm:$0xff]  ;;  %v41_v7 = vmul.f32 %v243_v3, %v24_v1  ;;  %v42_v8 = vmul.f32 %v243_v3, %v25_v2  ;;  %v46_v13 = vmul.f32 %v243_v3, %v29_v6  ;;  %v51_v14 = vmul.f32 %v243_v3, %v34_v10  ;;  %v27_v35 = vld [vmem:[%s396_s0 + $0x18] sm:$0xff]  ;;  %v30_v38 = vld [vmem:[%s396_s0 + $0x30] sm:$0xff] }
   0x5   :  { %v28_v5 = vld [vmem:[%s396_s0 + $0x20] sm:$0xff]  ;;  %v52_v15 = vmul.f32 %v243_v3, %v35_v11  ;;  %v50_v21 = vmul.f32 %v243_v3, %v33_v16  ;;  %v31_v39 = vld [vmem:[%s396_s0 + $0x38] sm:$0xff]  ;;  %v43_v44 = vmul.f32 %v243_v3, %v26_v34  ;;  %v44_v45 = vmul.f32 %v243_v3, %v27_v35 }
   0x6   :  { %v45_v9 = vmul.f32 %v243_v3, %v28_v5  ;;  %v32_v12 = vld [vmem:[%s396_s0 + $0x40] sm:$0xff]  ;;  %v58_v18 = vadd.f32 %v244_v4, %v41_v7  ;;  %v59_v19 = vadd.f32 %v244_v4, %v42_v8  ;;  %v63_v22 = vadd.f32 %v244_v4, %v46_v13 }
   0x7   :  { %v49_v17 = vmul.f32 %v243_v3, %v32_v12  ;;  %v68_v23 = vadd.f32 %v244_v4, %v51_v14  ;;  %v69_v24 = vadd.f32 %v244_v4, %v52_v15  ;;  %v67_v29 = vadd.f32 %v244_v4, %v50_v21  ;;  %v36_v40 = vld [vmem:[%s396_s0 + $0x60] sm:$0xff] }
   0x8   :  { %v62_v20 = vadd.f32 %v244_v4, %v45_v9  ;;  %v71_v26 = vmax.f32 %v58_v18, 0.0  ;;  %v72_v27 = vmax.f32 %v59_v19, 0.0  ;;  %v76_v30 = vmax.f32 %v63_v22, 0.0  ;;  %v245_v62 = vld [vmem:[%s399_s4] ss:$0 sm:$0xff] }
   0x9   :  { %v66_v25 = vadd.f32 %v244_v4, %v49_v17  ;;  %v81_v31 = vmax.f32 %v68_v23, 0.0  ;;  %v82_v32 = vmax.f32 %v69_v24, 0.0  ;;  %v80_v37 = vmax.f32 %v67_v29, 0.0  ;;  %v246_v63 = vld [vmem:[%s400_s5] ss:$0 sm:$0xff] }
   0xa   :  { %v75_v28 = vmax.f32 %v62_v20, 0.0  ;;  %v84_v36 = vpack.c.bf16 %v72_v27, %v71_v26  ;;  %v47_v46 = vmul.f32 %v243_v3, %v30_v38  ;;  %v48_v47 = vmul.f32 %v243_v3, %v31_v39 }
   0xb   :  { %v79_v33 = vmax.f32 %v66_v25, 0.0  ;;  %v89_v42 = vpack.c.bf16 %v82_v32, %v81_v31  ;;  %v53_v48 = vmul.f32 %v243_v3, %v36_v40  ;;  %v60_v49 = vadd.f32 %v244_v4, %v43_v44 }
   0xc   :  { %v86_v41 = vpack.c.bf16 %v76_v30, %v75_v28  ;;  %232 = vmatmul.msk.bf16.vlgmr.msra.gmra.mxu0 %vm99_vm0, %v84_v36  ;;  %v61_v50 = vadd.f32 %v244_v4, %v44_v45  ;;  %v64_v51 = vadd.f32 %v244_v4, %v47_v46  ;;  %v65_v52 = vadd.f32 %v244_v4, %v48_v47 }
   0xd   :  { %v88_v43 = vpack.c.bf16 %v80_v37, %v79_v33  ;;  %237 = vmatmul.msk.bf16.vlgmr.msra.gmra.mxu3 %vm99_vm0, %v89_v42  ;;  %v70_v53 = vadd.f32 %v244_v4, %v53_v48  ;;  %v73_v54 = vmax.f32 %v60_v49, 0.0 }
   0xe   :  { %234 = vmatmul.msk.bf16.vlgmr.msra.gmra.mxu1 %vm99_vm0, %v86_v41  ;;  %v74_v55 = vmax.f32 %v61_v50, 0.0  ;;  %v77_v56 = vmax.f32 %v64_v51, 0.0  ;;  %v78_v57 = vmax.f32 %v65_v52, 0.0 }
   0xf   :  { %236 = vmatmul.msk.bf16.vlgmr.msra.gmra.mxu2 %vm99_vm0, %v88_v43  ;;  %v83_v58 = vmax.f32 %v70_v53, 0.0 }
  0x10   :  { %v85_v59 = vpack.c.bf16 %v74_v55, %v73_v54  ;;  %v87_v60 = vpack.c.bf16 %v78_v57, %v77_v56 }
  0x11   :  { %v90_v61 = vpack.c.bf16 %v83_v58, %v83_v58 }
  0x1c   :  { %233 = vmatmul.msk.bf16.gmra.mxu0 %vm99_vm0, %v85_v59 }
  0x1d   :  { %238 = vmatmul.msk.bf16.gmra.mxu3 %vm99_vm0, %v90_v61 }
  0x1e   :  { %235 = vmatmul.msk.bf16.gmra.mxu1 %vm99_vm0, %v87_v60 }
  0x89   :  { %v130_v0 = vpop.f32.mrf.mxu0 }
  0x8a   :  { %v168_v1 = vmul.f32 %v245_v62, %v130_v0 }
  0x8b   :  { %v140_v2 = vpop.f32.mrf.mxu1 }
  0x8c   :  { %v172_v3 = vmul.f32 %v245_v62, %v140_v2  ;;  %v185_v4 = vadd.f32 %v246_v63, %v168_v1 }
  0x8e   :  { %v189_v5 = vadd.f32 %v246_v63, %v172_v3  ;;  %v198_v6 = vmax.f32 %v185_v4, 0.0 }
  0x90   :  { %v202_v7 = vmax.f32 %v189_v5, 0.0  ;;  %211 = vst.msk [vmem:[%s401_s6] sm:$0xff] %vm99_vm0, %v198_v6  ;;  %v155_v8 = vpop.f32.mrf.mxu3 }
  0x91   :  { %v178_v9 = vmul.f32 %v245_v62, %v155_v8  ;;  %v132_v10 = vpop.f32.mrf.mxu0 }
  0x92   :  { %215 = vst.msk [vmem:[%s401_s6 + $0x20] sm:$0xff] %vm99_vm0, %v202_v7  ;;  %v150_v11 = vpop.f32.mrf.mxu2  ;;  %v169_v12 = vmul.f32 %v245_v62, %v132_v10 }
  0x93   :  { %v142_v13 = vpop.f32.mrf.mxu1  ;;  %v176_v14 = vmul.f32 %v245_v62, %v150_v11  ;;  %v195_v15 = vadd.f32 %v246_v63, %v178_v9 }
  0x94   :  { %v173_v16 = vmul.f32 %v245_v62, %v142_v13  ;;  %v186_v17 = vadd.f32 %v246_v63, %v169_v12 }
  0x95   :  { %v193_v18 = vadd.f32 %v246_v63, %v176_v14  ;;  %v208_v19 = vmax.f32 %v195_v15, 0.0 }
  0x96   :  { %v190_v20 = vadd.f32 %v246_v63, %v173_v16  ;;  %v199_v21 = vmax.f32 %v186_v17, 0.0 }
  0x97   :  { %v206_v22 = vmax.f32 %v193_v18, 0.0  ;;  %221 = vst.msk [vmem:[%s401_s6 + $0x50] sm:$0xff] %vm99_vm0, %v208_v19 }
  0x98   :  { %v203_v23 = vmax.f32 %v190_v20, 0.0  ;;  %212 = vst.msk [vmem:[%s401_s6 + $0x8] sm:$0xff] %vm99_vm0, %v199_v21  ;;  %v157_v24 = vpop.f32.mrf.mxu3 }
  0x99   :  { %v179_v25 = vmul.f32 %v245_v62, %v157_v24  ;;  %v135_v26 = vpop.f32.mrf.mxu0  ;;  %219 = vst.msk [vmem:[%s401_s6 + $0x40] sm:$0xff] %vm99_vm0, %v206_v22 }
  0x9a   :  { %216 = vst.msk [vmem:[%s401_s6 + $0x28] sm:$0xff] %vm99_vm0, %v203_v23  ;;  %v152_v27 = vpop.f32.mrf.mxu2  ;;  %v170_v28 = vmul.f32 %v245_v62, %v135_v26 }
  0x9b   :  { %v145_v29 = vpop.f32.mrf.mxu1  ;;  %v177_v30 = vmul.f32 %v245_v62, %v152_v27  ;;  %v196_v31 = vadd.f32 %v246_v63, %v179_v25 }
  0x9c   :  { %v174_v32 = vmul.f32 %v245_v62, %v145_v29  ;;  %v187_v33 = vadd.f32 %v246_v63, %v170_v28 }
  0x9d   :  { %v194_v34 = vadd.f32 %v246_v63, %v177_v30  ;;  %v209_v35 = vmax.f32 %v196_v31, 0.0 }
  0x9e   :  { %v191_v36 = vadd.f32 %v246_v63, %v174_v32  ;;  %v200_v37 = vmax.f32 %v187_v33, 0.0 }
  0x9f   :  { %v207_v38 = vmax.f32 %v194_v34, 0.0  ;;  %222 = vst.msk [vmem:[%s401_s6 + $0x58] sm:$0xff] %vm99_vm0, %v209_v35 }
  0xa0   :  { %v204_v39 = vmax.f32 %v191_v36, 0.0  ;;  %213 = vst.msk [vmem:[%s401_s6 + $0x10] sm:$0xff] %vm99_vm0, %v200_v37  ;;  %v160_v40 = vpop.f32.mrf.mxu3 }
  0xa1   :  { %v180_v41 = vmul.f32 %v245_v62, %v160_v40  ;;  %v137_v42 = vpop.f32.mrf.mxu0  ;;  %220 = vst.msk [vmem:[%s401_s6 + $0x48] sm:$0xff] %vm99_vm0, %v207_v38 }
  0xa2   :  { %217 = vst.msk [vmem:[%s401_s6 + $0x30] sm:$0xff] %vm99_vm0, %v204_v39  ;;  %v171_v43 = vmul.f32 %v245_v62, %v137_v42 }
  0xa3   :  { %v147_v44 = vpop.f32.mrf.mxu1  ;;  %v197_v45 = vadd.f32 %v246_v63, %v180_v41 }
  0xa4   :  { %v175_v46 = vmul.f32 %v245_v62, %v147_v44  ;;  %v188_v47 = vadd.f32 %v246_v63, %v171_v43 }
  0xa5   :  { %v210_v48 = vmax.f32 %v197_v45, 0.0 }
  0xa6   :  { %v192_v49 = vadd.f32 %v246_v63, %v175_v46  ;;  %v201_v50 = vmax.f32 %v188_v47, 0.0 }
  0xa7   :  { %223 = vst.msk [vmem:[%s401_s6 + $0x60] sm:$0xff] %vm99_vm0, %v210_v48 }
  0xa8   :  { %v205_v51 = vmax.f32 %v192_v49, 0.0  ;;  %214 = vst.msk [vmem:[%s401_s6 + $0x18] sm:$0xff] %vm99_vm0, %v201_v50  ;;  %v162_v52 = vpop.f32.mrf.mxu3 }
  0xaa   :  { %218 = vst.msk [vmem:[%s401_s6 + $0x38] sm:$0xff] %vm99_vm0, %v205_v51 }

// kernel: densenet_forward.23
= control target key start
LH: loop header
LB: loop body
LE: loop exit
PB: predicated region body
PF: predicated region fallthrough
CT: control target
= control target key end

     0   :  { %s967_s9 = smov 0   ;;  %s1178_s0 = inlined_call_operand.vmem [shape: f32[2,90,16], index: 0, kind: input, shape index: {}]   ;;  %s1179_s1 = inlined_call_operand.vmem [shape: bf16[9,16,8], index: 1, kind: input, shape index: {}]   ;;  %s1180_s2 = inlined_call_operand.vmem [shape: f32[2,63,8], index: 2, kind: output, shape index: {}]  }
   0x1 LB: > { %s824_s10 = sadd.s32 4294967295, %s950_s9   ;;  %p828_p0 = scmp.ge.s32.totalorder %s950_s9, 1  ;;  %s950_s9 = sphi %s967_s9, %s12_s9  }
   0x2   : > { %p112_p1 = scmp.lt.s32.totalorder %s950_s9, 3 }
   0x4   : > { %p113_p2 = pnand %p828_p0, %p112_p1 }
   0x5   : > { %p134_p3 = scmp.lt.s32.totalorder (!%p113_p2), %s824_s10, 1 }
   0x6   : > { %116 = sbr.rel (%p113_p2) target bundleno = 294 (0x126), region = 28 }
   0xb   : > { %v924_v0 = vld [vmem:[%s1179_s1 + $0x8] sm:$0xff]  ;;  %v925_v1 = vld [vmem:[%s1179_s1 + $0x10] sm:$0xff]  ;;  %v926_v2 = vld [vmem:[%s1179_s1 + $0x18] sm:$0xff]  ;;  %s1182_s10 = smov (!%p134_p3, %s824_s10), 1  ;;  %vm180_vm0 = vcmask 130048   ;;  %vm759_vm1 = vcmask 64512  }
   0xc   : > { %v923_v3 = vld [vmem:[%s1179_s1] sm:$0xff]  ;;  %932 = vmatpush.bf16.msra.mxu1 %v924_v0  ;;  %933 = vmatpush.bf16.msra.mxu2 %v924_v0  ;;  %s935_s21 = smul.u32 96, %s1182_s10  ;;  %v929_v5 = vld [vmem:[%s1179_s1 + $0x30] sm:$0xff]  ;;  %v930_v9 = vld [vmem:[%s1179_s1 + $0x38] sm:$0xff]  ;;  %s922_s5 = sshll.u32 %s1182_s10, 6  ;;  %vm767_vm2 = vcmask 63488  }
   0xd   : > { %v927_v4 = vld [vmem:[%s1179_s1 + $0x20] sm:$0xff]  ;;  %934 = vmatpush.bf16.msra.mxu3 %v924_v0  ;;  %200 = vmatpush.bf16.msra.mxu0 %v924_v0  ;;  %v928_v18 = vld [vmem:[%s1179_s1 + $0x28] sm:$0xff]  ;;  %s1138_s8 = scalar_lea.vmem %s1180_s2, %s922_s5 }
   0xe   : > { %s996_s24 = scalar_lea.vmem %s1178_s0, %s935_s21  ;;  %v931_v20 = vld [vmem:[%s1179_s1 + $0x40] sm:$0xff] }
   0xf   : > { %v161_v6 = vld [vmem:[%s996_s24 + $0x11] sm:$0xff]  ;;  %v162_v7 = vld [vmem:[%s996_s24 + $0x19] sm:$0xff]  ;;  %v163_v8 = vld [vmem:[%s996_s24 + $0x21] sm:$0xff] }
  0x10   : > { %309 = vmatpush.bf16.msrb.mxu2 %v925_v1  ;;  %247 = vmatpush.bf16.msrb.mxu1 %v923_v3  ;;  %v168_v10 = vpack.c.bf16 %v162_v7, %v161_v6  ;;  %v164_v11 = vld [vmem:[%s996_s24 + $0x29] sm:$0xff]  ;;  %v165_v12 = vld [vmem:[%s996_s24 + $0x31] sm:$0xff]  ;;  %v166_v13 = vld [vmem:[%s996_s24 + $0x39] sm:$0x7f]  ;;  %v348_v36 = vpack.c.bf16 %v163_v8, %v162_v7 }
  0x11   : > { %379 = vmatpush.bf16.msrb.mxu3 %v926_v2  ;;  %449 = vmatpush.bf16.msrb.mxu0 %v927_v4  ;;  %v169_v14 = vpack.c.bf16 %v164_v11, %v163_v8  ;;  %v170_v15 = vpack.c.bf16 %v166_v13, %v165_v12  ;;  %v159_v16 = vld [vmem:[%s996_s24 + $0x1] sm:$0xff]  ;;  %v160_v17 = vld [vmem:[%s996_s24 + $0x9] sm:$0xff]  ;;  %v410_v25 = vld [vmem:[%s996_s24 + $0x12] sm:$0xff]  ;;  %v349_v44 = vpack.c.bf16 %v165_v12, %v164_v11 }
  0x12   : > { %839 = vmatmul.msk.bf16.vlgmr.msra.gmra.mxu1 %vm180_vm0, %v168_v10  ;;  %v167_v19 = vpack.c.bf16 %v160_v17, %v159_v16  ;;  %v145_v21 = vld [vmem:[%s996_s24] sm:$0xff]  ;;  %v146_v22 = vld [vmem:[%s996_s24 + $0x8] sm:$0xff]  ;;  %v347_v28 = vpack.c.bf16 %v161_v6, %v160_v17  ;;  %v147_v30 = vld [vmem:[%s996_s24 + $0x10] sm:$0xff] }
  0x13   : > { %840 = vmatmul.msk.bf16.vlgmr.msra.gmra.mxu2 %vm180_vm0, %v169_v14  ;;  %841 = vmatmul.msk.bf16.vlgmr.msra.gmra.mxu3 %vm180_vm0, %v170_v15  ;;  %v269_v23 = vld [vmem:[%s996_s24 + $0x2] sm:$0xff]  ;;  %v270_v24 = vld [vmem:[%s996_s24 + $0xa] sm:$0xff]  ;;  %v153_v26 = vpack.c.bf16 %v146_v22, %v145_v21  ;;  %v148_v31 = vld [vmem:[%s996_s24 + $0x18] sm:$0xff] }
  0x14   : > { %838 = vmatmul.msk.bf16.vlgmr.msra.gmra.mxu0 %vm180_vm0, %v167_v19  ;;  %589 = vmatpush.bf16.msra.mxu2 %v929_v5  ;;  %v277_v27 = vpack.c.bf16 %v270_v24, %v269_v23  ;;  %v417_v29 = vpack.c.bf16 %v410_v25, %v270_v24  ;;  %v272_v32 = vld [vmem:[%s996_s24 + $0x1a] sm:$0xff]  ;;  %v412_v33 = vld [vmem:[%s996_s24 + $0x22] sm:$0xff]  ;;  %v154_v34 = vpack.c.bf16 %v148_v31, %v147_v30  ;;  %v274_v40 = vld [vmem:[%s996_s24 + $0x2a] sm:$0xff] }
  0x15   : > { %659 = vmatpush.bf16.msra.mxu3 %v930_v9  ;;  %519 = vmatpush.bf16.msra.mxu1 %v928_v18  ;;  %v278_v35 = vpack.c.bf16 %v272_v32, %v410_v25  ;;  %v418_v37 = vpack.c.bf16 %v412_v33, %v272_v32  ;;  %v149_v38 = vld [vmem:[%s996_s24 + $0x20] sm:$0xff]  ;;  %v150_v39 = vld [vmem:[%s996_s24 + $0x28] sm:$0xff]  ;;  %v414_v41 = vld [vmem:[%s996_s24 + $0x32] sm:$0xff]  ;;  %v279_v43 = vpack.c.bf16 %v274_v40, %v412_v33 }
  0x16   : > { %729 = vmatpush.bf16.msra.mxu0 %v931_v20  ;;  %v155_v42 = vpack.c.bf16 %v150_v39, %v149_v38  ;;  %v419_v45 = vpack.c.bf16 %v414_v41, %v274_v40  ;;  %v151_v46 = vld [vmem:[%s996_s24 + $0x30] sm:$0xff]  ;;  %v152_v47 = vld [vmem:[%s996_s24 + $0x38] sm:$0x7f]  ;;  %v346_v50 = vld [vmem:[%s996_s24 + $0x41] sm:$0x7f] }
  0x17   : > { %v276_v48 = vld [vmem:[%s996_s24 + $0x3a] sm:$0x7f]  ;;  %v416_v52 = vld [vmem:[%s996_s24 + $0x42] sm:$0x7f]  ;;  %v156_v53 = vpack.c.bf16 %v152_v47, %v151_v46  ;;  %v479_v57 = vld [vmem:[%s996_s24 + $0xb] sm:$0xff] }
  0x18   : > { %v345_v49 = vld [vmem:[%s996_s24 + $0x39] sm:$0xff]  ;;  %v280_v54 = vpack.c.bf16 %v276_v48, %v414_v41  ;;  %v482_v1 = vld [vmem:[%s996_s24 + $0x23] sm:$0xff]  ;;  %v622_v2 = vld [vmem:[%s996_s24 + $0x2b] sm:$0xff] }
  0x19   : > { %v415_v51 = vld [vmem:[%s996_s24 + $0x3a] sm:$0xff]  ;;  %v350_v55 = vpack.c.bf16 %v346_v50, %v345_v49  ;;  %v691_v3 = vld [vmem:[%s996_s24 + $0x24] sm:$0xff]  ;;  %v692_v4 = vld [vmem:[%s996_s24 + $0x2c] sm:$0xff]  ;;  %v628_v6 = vpack.c.bf16 %v622_v2, %v482_v1 }
  0x1a   : > { %v420_v56 = vpack.c.bf16 %v416_v52, %v415_v51  ;;  %v480_v58 = vld [vmem:[%s996_s24 + $0x13] sm:$0xff]  ;;  %v620_v59 = vld [vmem:[%s996_s24 + $0x1b] sm:$0xff]  ;;  %v698_v7 = vpack.c.bf16 %v692_v4, %v691_v3  ;;  %v559_v13 = vpack.c.bf16 %v415_v51, %v414_v41  ;;  %v486_v16 = vld [vmem:[%s996_s24 + $0x43] sm:$0x7f] }
  0x1b   : > { %v689_v60 = vld [vmem:[%s996_s24 + $0x14] sm:$0xff]  ;;  %v690_v61 = vld [vmem:[%s996_s24 + $0x1c] sm:$0xff]  ;;  %v487_v62 = vpack.c.bf16 %v480_v58, %v479_v57  ;;  %v627_v63 = vpack.c.bf16 %v620_v59, %v480_v58  ;;  %v488_v5 = vpack.c.bf16 %v482_v1, %v620_v59  ;;  %v556_v18 = vld [vmem:[%s996_s24 + $0x4a] sm:$0x7f] }
  0x1c   : > { %v697_v0 = vpack.c.bf16 %v690_v61, %v689_v60  ;;  %v484_v8 = vld [vmem:[%s996_s24 + $0x33] sm:$0xff]  ;;  %v624_v9 = vld [vmem:[%s996_s24 + $0x3b] sm:$0xff]  ;;  %v625_v19 = vld [vmem:[%s996_s24 + $0x43] sm:$0xff] }
  0x1d   : > { %v693_v10 = vld [vmem:[%s996_s24 + $0x34] sm:$0xff]  ;;  %v694_v11 = vld [vmem:[%s996_s24 + $0x3c] sm:$0xff]  ;;  %v489_v12 = vpack.c.bf16 %v484_v8, %v622_v2  ;;  %v629_v14 = vpack.c.bf16 %v624_v9, %v484_v8  ;;  %v626_v20 = vld [vmem:[%s996_s24 + $0x4b] sm:$0x7f]  ;;  %v490_v23 = vpack.c.bf16 %v486_v16, %v624_v9 }
  0x1e   : > { %v699_v15 = vpack.c.bf16 %v694_v11, %v693_v10  ;;  %v555_v17 = vld [vmem:[%s996_s24 + $0x42] sm:$0xff]  ;;  %v696_v22 = vld [vmem:[%s996_s24 + $0x4c] sm:$0x7f] }
  0x1f   : > { %v695_v21 = vld [vmem:[%s996_s24 + $0x44] sm:$0xff]  ;;  %v560_v25 = vpack.c.bf16 %v556_v18, %v555_v17 }
  0x22   : > { %846 = vmatmul.msk.bf16.vlgmr.msrb.gmra.mxu1 %vm180_vm0, %v153_v26  ;;  %v630_v26 = vpack.c.bf16 %v626_v20, %v625_v19 }
  0x23   : > { %856 = vmatmul.msk.bf16.vlgmr.msrb.gmra.mxu2 %vm180_vm0, %v277_v27  ;;  %866 = vmatmul.msk.bf16.vlgmr.msrb.gmra.mxu3 %vm180_vm0, %v347_v28  ;;  %v700_v27 = vpack.c.bf16 %v696_v22, %v695_v21 }
  0x24   : > { %876 = vmatmul.msk.bf16.vlgmr.msrb.gmra.mxu0 %vm180_vm0, %v417_v29 }
  0x32   : > { %847 = vmatmul.msk.bf16.gmra.mxu1 %vm180_vm0, %v154_v34 }
  0x33   : > { %857 = vmatmul.msk.bf16.gmra.mxu2 %vm180_vm0, %v278_v35  ;;  %867 = vmatmul.msk.bf16.gmra.mxu3 %vm180_vm0, %v348_v36 }
  0x34   : > { %877 = vmatmul.msk.bf16.gmra.mxu0 %vm180_vm0, %v418_v37 }
  0x42   : > { %848 = vmatmul.msk.bf16.gmra.mxu1 %vm180_vm0, %v155_v42 }
  0x43   : > { %858 = vmatmul.msk.bf16.gmra.mxu2 %vm180_vm0, %v279_v43  ;;  %868 = vmatmul.msk.bf16.gmra.mxu3 %vm180_vm0, %v349_v44 }
  0x44   : > { %878 = vmatmul.msk.bf16.gmra.mxu0 %vm180_vm0, %v419_v45 }
  0x52   : > { %849 = vmatmul.msk.bf16.gmra.mxu1 %vm180_vm0, %v156_v53 }
  0x53   : > { %859 = vmatmul.msk.bf16.gmra.mxu2 %vm180_vm0, %v280_v54  ;;  %869 = vmatmul.msk.bf16.gmra.mxu3 %vm180_vm0, %v350_v55 }
  0x54   : > { %879 = vmatmul.msk.bf16.gmra.mxu0 %vm180_vm0, %v420_v56 }
  0x62   : > { %886 = vmatmul.msk.bf16.vlgmr.msra.gmra.mxu1 %vm180_vm0, %v487_v62 }
  0x63   : > { %896 = vmatmul.msk.bf16.vlgmr.msra.gmra.mxu2 %vm180_vm0, %v278_v35  ;;  %906 = vmatmul.msk.bf16.vlgmr.msra.gmra.mxu3 %vm180_vm0, %v627_v63 }
  0x64   : > { %916 = vmatmul.msk.bf16.vlgmr.msra.gmra.mxu0 %vm180_vm0, %v697_v0 }
  0x72   : > { %887 = vmatmul.msk.bf16.gmra.mxu1 %vm180_vm0, %v488_v5 }
  0x73   : > { %897 = vmatmul.msk.bf16.gmra.mxu2 %vm180_vm0, %v279_v43  ;;  %907 = vmatmul.msk.bf16.gmra.mxu3 %vm180_vm0, %v628_v6 }
  0x74   : > { %917 = vmatmul.msk.bf16.gmra.mxu0 %vm180_vm0, %v698_v7 }
  0x82   : > { %888 = vmatmul.msk.bf16.gmra.mxu1 %vm180_vm0, %v489_v12 }
  0x83   : > { %898 = vmatmul.msk.bf16.gmra.mxu2 %vm180_vm0, %v559_v13  ;;  %908 = vmatmul.msk.bf16.gmra.mxu3 %vm180_vm0, %v629_v14 }
  0x84   : > { %918 = vmatmul.msk.bf16.gmra.mxu0 %vm180_vm0, %v699_v15 }
  0x8f   : > { %v207_v24 = vpop.f32.mrf.mxu1 }
  0x91   : > { %v202_v28 = vpop.f32.mrf.mxu0 }
  0x92   : > { %889 = vmatmul.msk.bf16.gmra.mxu1 %vm180_vm0, %v490_v23 }
  0x93   : > { %899 = vmatmul.msk.bf16.gmra.mxu2 %vm180_vm0, %v560_v25  ;;  %909 = vmatmul.msk.bf16.gmra.mxu3 %vm180_vm0, %v630_v26 }
  0x94   : > { %919 = vmatmul.msk.bf16.gmra.mxu0 %vm180_vm0, %v700_v27 }
  0x96   : > { %v1094_v29 = vpop.f32.mrf.mxu2  ;;  %v1096_v30 = vpop.f32.mrf.mxu3 }
  0x97   : > { %v1098_v31 = vpop.f32.mrf.mxu1 }
  0x99   : > { %v204_v32 = vpop.f32.mrf.mxu0 }
  0x9e   : > { %v1100_v33 = vpop.f32.mrf.mxu2  ;;  %v1102_v34 = vpop.f32.mrf.mxu3 }
  0x9f   : > { %v249_v35 = vpop.f32.mrf.mxu1 }
  0xa0   : > { %v250_v0 = vadd.f32 %v249_v35, %v202_v28 }
  0xa1   : > { %v451_v36 = vpop.f32.mrf.mxu0 }
  0xa6   : > { %v311_v37 = vpop.f32.mrf.mxu2  ;;  %v381_v38 = vpop.f32.mrf.mxu3 }
  0xa7   : > { %v251_v39 = vpop.f32.mrf.mxu1  ;;  %v331_v2 = vadd.f32 %v311_v37, %v250_v0 }
  0xa8   : > { %v252_v7 = vadd.f32 %v251_v39, %v204_v32 }
  0xa9   : > { %v453_v40 = vpop.f32.mrf.mxu0  ;;  %v401_v5 = vadd.f32 %v381_v38, %v331_v2 }
  0xab   : > { %v471_v10 = vadd.f32 %v451_v36, %v401_v5 }
  0xae   : > { %v313_v41 = vpop.f32.mrf.mxu2  ;;  %v383_v42 = vpop.f32.mrf.mxu3 }
  0xaf   : > { %v254_v43 = vpop.f32.mrf.mxu1  ;;  %v332_v9 = vadd.f32 %v313_v41, %v252_v7 }
  0xb0   : > { %v255_v17 = vadd.f32 %v254_v43, %v207_v24 }
  0xb1   : > { %v456_v44 = vpop.f32.mrf.mxu0  ;;  %v402_v14 = vadd.f32 %v383_v42, %v332_v9 }
  0xb3   : > { %v472_v22 = vadd.f32 %v453_v40, %v402_v14 }
  0xb6   : > { %v316_v45 = vpop.f32.mrf.mxu2  ;;  %v386_v46 = vpop.f32.mrf.mxu3 }
  0xb7   : > { %v256_v47 = vpop.f32.mrf.mxu1  ;;  %v333_v20 = vadd.f32 %v316_v45, %v255_v17 }
  0xb8   : > { %v257_v32 = vadd.f32 %v256_v47, %v1098_v31 }
  0xb9   : > { %v1104_v48 = vpop.f32.mrf.mxu0  ;;  %v403_v27 = vadd.f32 %v386_v46, %v333_v20 }
  0xbb   : > { %v473_v39 = vadd.f32 %v456_v44, %v403_v27 }
  0xbe   : > { %v318_v49 = vpop.f32.mrf.mxu2  ;;  %v388_v50 = vpop.f32.mrf.mxu3 }
  0xbf   : > { %v259_v51 = vpop.f32.mrf.mxu1  ;;  %v334_v37 = vadd.f32 %v318_v49, %v257_v32 }
  0xc0   : > { %v260_v46 = vadd.f32 %v259_v51, %v1094_v29 }
  0xc1   : > { %v1106_v52 = vpop.f32.mrf.mxu0  ;;  %v404_v43 = vadd.f32 %v388_v50, %v334_v37 }
  0xc3   : > { %v474_v47 = vadd.f32 %v1104_v48, %v404_v43 }
  0xc6   : > { %v321_v53 = vpop.f32.mrf.mxu2  ;;  %v1108_v54 = vpop.f32.mrf.mxu3 }
  0xc7   : > { %v1110_v55 = vpop.f32.mrf.mxu1 }
  0xc9   : > { %v1112_v56 = vpop.f32.mrf.mxu0 }
  0xce   : > { %v1114_v57 = vpop.f32.mrf.mxu2  ;;  %v1116_v58 = vpop.f32.mrf.mxu3 }
  0xcf   : > { %v1118_v59 = vpop.f32.mrf.mxu1 }
  0xd1   : > { %v1120_v60 = vpop.f32.mrf.mxu0 }
  0xd6   : > { %v1122_v61 = vpop.f32.mrf.mxu2  ;;  %v1124_v62 = vpop.f32.mrf.mxu3 }
  0xd7   : > { %v1126_v63 = vpop.f32.mrf.mxu1 }
  0xd9   : > { %v1128_v1 = vpop.f32.mrf.mxu0 }
  0xde   : > { %v1130_v3 = vpop.f32.mrf.mxu2  ;;  %v1132_v4 = vpop.f32.mrf.mxu3 }
  0xdf   : > { %v521_v6 = vpop.f32.mrf.mxu1 }
  0xe0   : > { %v541_v11 = vadd.f32 %v521_v6, %v471_v10  ;;  %v335_v6 = vadd.f32 %v321_v53, %v260_v46  ;;  %v262_v10 = vadd.f32 %v1110_v55, %v1100_v33  ;;  %v265_v33 = vadd.f32 %v1118_v59, %v1096_v30 }
  0xe1   : > { %v731_v8 = vpop.f32.mrf.mxu0  ;;  %v267_v30 = vadd.f32 %v1126_v63, %v1102_v34 }
  0xe2   : > { %v336_v51 = vadd.f32 %v1114_v57, %v262_v10  ;;  %v337_v57 = vadd.f32 %v1122_v61, %v265_v33 }
  0xe3   : > { %v338_v61 = vadd.f32 %v1130_v3, %v267_v30 }
  0xe6   : > { %v591_v12 = vpop.f32.mrf.mxu2  ;;  %v661_v13 = vpop.f32.mrf.mxu3 }
  0xe7   : > { %v611_v15 = vadd.f32 %v591_v12, %v541_v11  ;;  %v523_v16 = vpop.f32.mrf.mxu1 }
  0xe8   : > { %v542_v23 = vadd.f32 %v523_v16, %v472_v22 }
  0xe9   : > { %v681_v18 = vadd.f32 %v661_v13, %v611_v15  ;;  %v733_v19 = vpop.f32.mrf.mxu0 }
  0xeb   : > { %v751_v21 = vadd.f32 %v731_v8, %v681_v18  ;;  %v405_v8 = vadd.f32 %v1108_v54, %v335_v6  ;;  %v406_v54 = vadd.f32 %v1116_v58, %v336_v51  ;;  %v407_v58 = vadd.f32 %v1124_v62, %v337_v57 }
  0xed   : > { %760 = vst.msk [vmem:[%s1138_s8] sm:$0xff] %vm759_vm1, %v751_v21  ;;  %v475_v11 = vadd.f32 %v1106_v52, %v405_v8  ;;  %v476_v52 = vadd.f32 %v1112_v56, %v406_v54  ;;  %v477_v56 = vadd.f32 %v1120_v60, %v407_v58 }
  0xee   : > { %v593_v25 = vpop.f32.mrf.mxu2  ;;  %v663_v26 = vpop.f32.mrf.mxu3 }
  0xef   : > { %v612_v24 = vadd.f32 %v593_v25, %v542_v23  ;;  %v526_v28 = vpop.f32.mrf.mxu1 }
  0xf0   : > { %v543_v41 = vadd.f32 %v526_v28, %v473_v39  ;;  %v408_v28 = vadd.f32 %v1132_v4, %v338_v61 }
  0xf1   : > { %v682_v35 = vadd.f32 %v663_v26, %v612_v24  ;;  %v736_v36 = vpop.f32.mrf.mxu0 }
  0xf2   : > { %v478_v63 = vadd.f32 %v1128_v1, %v408_v28 }
  0xf3   : > { %v752_v38 = vadd.f32 %v733_v19, %v682_v35 }
  0xf5   : > { %761 = vst.msk [vmem:[%s1138_s8 + $0x8] sm:$0xff] %vm759_vm1, %v752_v38 }
  0xf6   : > { %v596_v40 = vpop.f32.mrf.mxu2  ;;  %v666_v42 = vpop.f32.mrf.mxu3 }
  0xf7   : > { %v613_v45 = vadd.f32 %v596_v40, %v543_v41  ;;  %v528_v0 = vpop.f32.mrf.mxu1 }
  0xf8   : > { %v544_v44 = vadd.f32 %v528_v0, %v474_v47 }
  0xf9   : > { %v683_v2 = vadd.f32 %v666_v42, %v613_v45  ;;  %v738_v5 = vpop.f32.mrf.mxu0 }
  0xfb   : > { %v753_v31 = vadd.f32 %v736_v36, %v683_v2 }
  0xfd   : > { %762 = vst.msk [vmem:[%s1138_s8 + $0x10] sm:$0xff] %vm759_vm1, %v753_v31 }
  0xfe   : > { %v598_v49 = vpop.f32.mrf.mxu2  ;;  %v668_v7 = vpop.f32.mrf.mxu3 }
  0xff   : > { %v614_v9 = vadd.f32 %v598_v49, %v544_v44  ;;  %v531_v50 = vpop.f32.mrf.mxu1 }
 0x100   : > { %v545_v12 = vadd.f32 %v531_v50, %v475_v11 }
 0x101   : > { %v684_v29 = vadd.f32 %v668_v7, %v614_v9  ;;  %v741_v48 = vpop.f32.mrf.mxu0 }
 0x103   : > { %v754_v53 = vadd.f32 %v738_v5, %v684_v29 }
 0x105   : > { %763 = vst.msk [vmem:[%s1138_s8 + $0x18] sm:$0xff] %vm759_vm1, %v754_v53 }
 0x106   : > { %v601_v13 = vpop.f32.mrf.mxu2  ;;  %v671_v14 = vpop.f32.mrf.mxu3 }
 0x107   : > { %v615_v15 = vadd.f32 %v601_v13, %v545_v12  ;;  %v533_v16 = vpop.f32.mrf.mxu1 }
 0x108   : > { %v546_v18 = vadd.f32 %v533_v16, %v476_v52 }
 0x109   : > { %v685_v55 = vadd.f32 %v671_v14, %v615_v15  ;;  %v743_v19 = vpop.f32.mrf.mxu0 }
 0x10b   : > { %v755_v17 = vadd.f32 %v741_v48, %v685_v55 }
 0x10d   : > { %764 = vst.msk [vmem:[%s1138_s8 + $0x20] sm:$0xff] %vm759_vm1, %v755_v17 }
 0x10e   : > { %v603_v20 = vpop.f32.mrf.mxu2  ;;  %v673_v21 = vpop.f32.mrf.mxu3 }
 0x10f   : > { %v616_v22 = vadd.f32 %v603_v20, %v546_v18  ;;  %v536_v23 = vpop.f32.mrf.mxu1 }
 0x110   : > { %v547_v26 = vadd.f32 %v536_v23, %v477_v56 }
 0x111   : > { %v686_v59 = vadd.f32 %v673_v21, %v616_v22  ;;  %v746_v32 = vpop.f32.mrf.mxu0 }
 0x113   : > { %v756_v25 = vadd.f32 %v743_v19, %v686_v59 }
 0x115   : > { %765 = vst.msk [vmem:[%s1138_s8 + $0x28] sm:$0xff] %vm759_vm1, %v756_v25 }
 0x116   : > { %v606_v27 = vpop.f32.mrf.mxu2  ;;  %v676_v24 = vpop.f32.mrf.mxu3 }
 0x117   : > { %v617_v62 = vadd.f32 %v606_v27, %v547_v26  ;;  %v538_v36 = vpop.f32.mrf.mxu1 }
 0x118   : > { %v548_v3 = vadd.f32 %v538_v36, %v478_v63 }
 0x119   : > { %v687_v35 = vadd.f32 %v676_v24, %v617_v62  ;;  %v748_v41 = vpop.f32.mrf.mxu0 }
 0x11b   : > { %v757_v34 = vadd.f32 %v746_v32, %v687_v35 }
 0x11d   : > { %766 = vst.msk [vmem:[%s1138_s8 + $0x30] sm:$0xff] %vm759_vm1, %v757_v34 }
 0x11e   : > { %v608_v37 = vpop.f32.mrf.mxu2  ;;  %v678_v38 = vpop.f32.mrf.mxu3 }
 0x11f   : > { %v618_v60 = vadd.f32 %v608_v37, %v548_v3 }
 0x121   : > { %v688_v39 = vadd.f32 %v678_v38, %v618_v60 }
 0x123   : > { %v758_v40 = vadd.f32 %v748_v41, %v688_v39 }
 0x125   : > { %768 = vst.msk [vmem:[%s1138_s8 + $0x38] sm:$0x7f] %vm767_vm2, %v758_v40 }
 0x126 PF: > { %s12_s9 = sadd.s32 1, %s950_s9  }
 0x127   : > { %p9_p4 = scmp.ge.s32.totalorder %s12_s9, 4  }
 0x129   :  { %11 = sbr.rel (!%p9_p4) target bundleno = 1 (0x1), region = 66 }

// kernel: densenet_forward.24
= control target key start
LH: loop header
LB: loop body
LE: loop exit
PB: predicated region body
PF: predicated region fallthrough
CT: control target
= control target key end

     0   :  { %vm125_vm0 = vcmask 1043456   ;;  %vm103_vm1 = vcmask 195584   ;;  %vm219_vm2 = vcmask 130048   ;;  %s440_s1 = inlined_call_operand.vmem [shape: bf16[24,16], index: 1, kind: input, shape index: {}]   ;;  %s441_s0 = inlined_call_operand.vmem [shape: f32[98,24], index: 0, kind: input, shape index: {}]   ;;  %s442_s2 = inlined_call_operand.vmem [shape: f32[1,24], index: 2, kind: input, shape index: {}]   ;;  %s443_s3 = inlined_call_operand.vmem [shape: f32[1,24], index: 3, kind: input, shape index: {}]   ;;  %s444_s4 = inlined_call_operand.vmem [shape: f32[1,16], index: 4, kind: input, shape index: {}]   ;;  %s445_s5 = inlined_call_operand.vmem [shape: f32[1,16], index: 5, kind: input, shape index: {}]   ;;  %s446_s6 = inlined_call_operand.vmem [shape: f32[98,16], index: 6, kind: output, shape index: {}]  }
   0x1   :  { %v93_v0 = vld [vmem:[%s440_s1 + $0x8] sm:$0xf]  ;;  %v24_v1 = vld [vmem:[%s441_s0] sm:$0xff]  ;;  %v34_v12 = vld [vmem:[%s441_s0 + $0x50] sm:$0xff] }
   0x2   :  { %v99_v2 = vunpack.c.l.b16 %v93_v0  ;;  %v25_v3 = vld [vmem:[%s441_s0 + $0x8] sm:$0xff]  ;;  %v306_v4 = vld [vmem:[%s442_s2] ss:$0 sm:$0xff]  ;;  %v35_v13 = vld [vmem:[%s441_s0 + $0x58] sm:$0xff] }
   0x3   :  { %v311_v5 = vld [vmem:[%s443_s3] ss:$0 sm:$0xff]  ;;  %v41_v8 = vmul.f32 %v306_v4, %v24_v1  ;;  %v42_v9 = vmul.f32 %v306_v4, %v25_v3  ;;  %v29_v10 = vld [vmem:[%s441_s0 + $0x28] sm:$0xff]  ;;  %v51_v15 = vmul.f32 %v306_v4, %v34_v12  ;;  %v52_v16 = vmul.f32 %v306_v4, %v35_v13  ;;  %v26_v37 = vld [vmem:[%s441_s0 + $0x10] sm:$0xff] }
   0x4   :  { %v28_v6 = vld [vmem:[%s441_s0 + $0x20] sm:$0xff]  ;;  %v101_v7 = vpack.c.b16 %v99_v2, %v99_v2  ;;  %v46_v14 = vmul.f32 %v306_v4, %v29_v10  ;;  %v33_v22 = vld [vmem:[%s441_s0 + $0x48] sm:$0xff]  ;;  %v27_v41 = vld [vmem:[%s441_s0 + $0x18] sm:$0xff]  ;;  %v43_v47 = vmul.f32 %v306_v4, %v26_v37 }
   0x5   :  { %v45_v11 = vmul.f32 %v306_v4, %v28_v6  ;;  %v32_v17 = vld [vmem:[%s441_s0 + $0x40] sm:$0xff]  ;;  %v58_v19 = vadd.f32 %v311_v5, %v41_v8  ;;  %v59_v20 = vadd.f32 %v311_v5, %v42_v9  ;;  %v68_v25 = vadd.f32 %v311_v5, %v51_v15  ;;  %v30_v42 = vld [vmem:[%s441_s0 + $0x30] sm:$0xff]  ;;  %v31_v43 = vld [vmem:[%s441_s0 + $0x38] sm:$0xff] }
   0x6   :  { %v127_v18 = vsel %vm125_vm0, %v101_v7, 0  ;;  %v248_v23 = vld [vmem:[%s440_s1] sm:$0xff]  ;;  %v63_v24 = vadd.f32 %v311_v5, %v46_v14  ;;  %v69_v26 = vadd.f32 %v311_v5, %v52_v16  ;;  %v49_v30 = vmul.f32 %v306_v4, %v32_v17 }
   0x7   :  { %v62_v21 = vadd.f32 %v311_v5, %v45_v11  ;;  %135 = vmatpush.bf16.msra.mxu0 %v127_v18  ;;  %249 = vmatpush.bf16.msra.mxu1 %v127_v18  ;;  %v71_v27 = vmax.f32 %v58_v19, 0.0  ;;  %v72_v28 = vmax.f32 %v59_v20, 0.0  ;;  %v81_v32 = vmax.f32 %v68_v25, 0.0  ;;  %v36_v45 = vld [vmem:[%s441_s0 + $0x60] sm:$0xff] }
   0x8   :  { %251 = vmatpush.bf16.msra.mxu3 %v127_v18  ;;  %250 = vmatpush.bf16.msra.mxu2 %v127_v18  ;;  %v76_v31 = vmax.f32 %v63_v24, 0.0  ;;  %v82_v33 = vmax.f32 %v69_v26, 0.0  ;;  %v50_v34 = vmul.f32 %v306_v4, %v33_v22  ;;  %v66_v36 = vadd.f32 %v311_v5, %v49_v30  ;;  %v257_v2 = vld [vmem:[%s444_s4] ss:$0 sm:$0xff] }
   0x9   :  { %v75_v29 = vmax.f32 %v62_v21, 0.0  ;;  %v84_v35 = vpack.c.bf16 %v72_v28, %v71_v27  ;;  %v44_v48 = vmul.f32 %v306_v4, %v27_v41  ;;  %v47_v49 = vmul.f32 %v306_v4, %v30_v42  ;;  %v258_v3 = vld [vmem:[%s445_s5] ss:$0 sm:$0xff] }
   0xa   :  { %v89_v39 = vpack.c.bf16 %v82_v33, %v81_v32  ;;  %v67_v40 = vadd.f32 %v311_v5, %v50_v34  ;;  %v79_v44 = vmax.f32 %v66_v36, 0.0  ;;  %v48_v50 = vmul.f32 %v306_v4, %v31_v43 }
   0xb   :  { %136 = vmatpush.bf16.msra.mxu0 %v248_v23  ;;  %252 = vmatpush.bf16.msra.mxu1 %v248_v23  ;;  %v86_v38 = vpack.c.bf16 %v76_v31, %v75_v29  ;;  %v53_v52 = vmul.f32 %v306_v4, %v36_v45  ;;  %v60_v53 = vadd.f32 %v311_v5, %v43_v47 }
   0xc   :  { %254 = vmatpush.bf16.msra.mxu3 %v248_v23  ;;  %253 = vmatpush.bf16.msra.mxu2 %v248_v23  ;;  %v80_v46 = vmax.f32 %v67_v40, 0.0  ;;  %v61_v54 = vadd.f32 %v311_v5, %v44_v48  ;;  %v64_v55 = vadd.f32 %v311_v5, %v47_v49  ;;  %v65_v56 = vadd.f32 %v311_v5, %v48_v50 }
   0xd   :  { %v70_v57 = vadd.f32 %v311_v5, %v53_v52  ;;  %v73_v58 = vmax.f32 %v60_v53, 0.0 }
   0xe   :  { %241 = vmatmul.msk.bf16.vlgmr.msra.gmra.mxu0 %vm103_vm1, %v84_v35  ;;  %243 = vmatmul.msk.bf16.vlgmr.msra.gmra.mxu1 %vm103_vm1, %v86_v38  ;;  %v88_v51 = vpack.c.bf16 %v80_v46, %v79_v44  ;;  %v74_v59 = vmax.f32 %v61_v54, 0.0  ;;  %v77_v60 = vmax.f32 %v64_v55, 0.0  ;;  %v78_v61 = vmax.f32 %v65_v56, 0.0 }
   0xf   :  { %246 = vmatmul.msk.bf16.vlgmr.msra.gmra.mxu3 %vm103_vm1, %v89_v39  ;;  %v83_v62 = vmax.f32 %v70_v57, 0.0 }
  0x10   :  { %245 = vmatmul.msk.bf16.vlgmr.msra.gmra.mxu2 %vm103_vm1, %v88_v51  ;;  %v85_v63 = vpack.c.bf16 %v74_v59, %v73_v58  ;;  %v87_v0 = vpack.c.bf16 %v78_v61, %v77_v60 }
  0x11   :  { %v90_v1 = vpack.c.bf16 %v83_v62, %v83_v62 }
  0x1e   :  { %242 = vmatmul.msk.bf16.gmra.mxu0 %vm103_vm1, %v85_v63  ;;  %244 = vmatmul.msk.bf16.gmra.mxu1 %vm103_vm1, %v87_v0 }
  0x1f   :  { %247 = vmatmul.msk.bf16.gmra.mxu3 %vm103_vm1, %v90_v1 }
  0x8b   :  { %v138_v4 = vpop.f32.mrf.mxu0  ;;  %v148_v5 = vpop.f32.mrf.mxu1 }
  0x8c   :  { %v176_v6 = vmul.f32 %v257_v2, %v138_v4  ;;  %v180_v7 = vmul.f32 %v257_v2, %v148_v5 }
  0x8e   :  { %v193_v8 = vadd.f32 %v258_v3, %v176_v6  ;;  %v197_v9 = vadd.f32 %v258_v3, %v180_v7 }
  0x90   :  { %v206_v10 = vmax.f32 %v193_v8, 0.0  ;;  %v210_v11 = vmax.f32 %v197_v9, 0.0 }
  0x92   :  { %220 = vst.msk [vmem:[%s446_s6] sm:$0xff] %vm219_vm2, %v206_v10  ;;  %v163_v12 = vpop.f32.mrf.mxu3 }
  0x93   :  { %224 = vst.msk [vmem:[%s446_s6 + $0x20] sm:$0xff] %vm219_vm2, %v210_v11  ;;  %v186_v13 = vmul.f32 %v257_v2, %v163_v12  ;;  %v140_v14 = vpop.f32.mrf.mxu0  ;;  %v150_v15 = vpop.f32.mrf.mxu1 }
  0x94   :  { %v177_v16 = vmul.f32 %v257_v2, %v140_v14  ;;  %v181_v17 = vmul.f32 %v257_v2, %v150_v15  ;;  %v158_v18 = vpop.f32.mrf.mxu2 }
  0x95   :  { %v203_v19 = vadd.f32 %v258_v3, %v186_v13  ;;  %v184_v20 = vmul.f32 %v257_v2, %v158_v18 }
  0x96   :  { %v194_v21 = vadd.f32 %v258_v3, %v177_v16  ;;  %v198_v22 = vadd.f32 %v258_v3, %v181_v17 }
  0x97   :  { %v216_v23 = vmax.f32 %v203_v19, 0.0  ;;  %v201_v24 = vadd.f32 %v258_v3, %v184_v20 }
  0x98   :  { %v207_v25 = vmax.f32 %v194_v21, 0.0  ;;  %v211_v26 = vmax.f32 %v198_v22, 0.0 }
  0x99   :  { %230 = vst.msk [vmem:[%s446_s6 + $0x50] sm:$0xff] %vm219_vm2, %v216_v23  ;;  %v214_v27 = vmax.f32 %v201_v24, 0.0 }
  0x9a   :  { %221 = vst.msk [vmem:[%s446_s6 + $0x8] sm:$0xff] %vm219_vm2, %v207_v25  ;;  %v165_v28 = vpop.f32.mrf.mxu3 }
  0x9b   :  { %225 = vst.msk [vmem:[%s446_s6 + $0x28] sm:$0xff] %vm219_vm2, %v211_v26  ;;  %v187_v29 = vmul.f32 %v257_v2, %v165_v28  ;;  %v143_v30 = vpop.f32.mrf.mxu0  ;;  %v153_v31 = vpop.f32.mrf.mxu1 }
  0x9c   :  { %228 = vst.msk [vmem:[%s446_s6 + $0x40] sm:$0xff] %vm219_vm2, %v214_v27  ;;  %v178_v32 = vmul.f32 %v257_v2, %v143_v30  ;;  %v182_v33 = vmul.f32 %v257_v2, %v153_v31  ;;  %v160_v34 = vpop.f32.mrf.mxu2 }
  0x9d   :  { %v204_v35 = vadd.f32 %v258_v3, %v187_v29  ;;  %v185_v36 = vmul.f32 %v257_v2, %v160_v34 }
  0x9e   :  { %v195_v37 = vadd.f32 %v258_v3, %v178_v32  ;;  %v199_v38 = vadd.f32 %v258_v3, %v182_v33 }
  0x9f   :  { %v217_v39 = vmax.f32 %v204_v35, 0.0  ;;  %v202_v40 = vadd.f32 %v258_v3, %v185_v36 }
  0xa0   :  { %v208_v41 = vmax.f32 %v195_v37, 0.0  ;;  %v212_v42 = vmax.f32 %v199_v38, 0.0 }
  0xa1   :  { %231 = vst.msk [vmem:[%s446_s6 + $0x58] sm:$0xff] %vm219_vm2, %v217_v39  ;;  %v215_v43 = vmax.f32 %v202_v40, 0.0 }
  0xa2   :  { %222 = vst.msk [vmem:[%s446_s6 + $0x10] sm:$0xff] %vm219_vm2, %v208_v41  ;;  %v168_v44 = vpop.f32.mrf.mxu3 }
  0xa3   :  { %226 = vst.msk [vmem:[%s446_s6 + $0x30] sm:$0xff] %vm219_vm2, %v212_v42  ;;  %v188_v45 = vmul.f32 %v257_v2, %v168_v44  ;;  %v145_v46 = vpop.f32.mrf.mxu0  ;;  %v155_v47 = vpop.f32.mrf.mxu1 }
  0xa4   :  { %229 = vst.msk [vmem:[%s446_s6 + $0x48] sm:$0xff] %vm219_vm2, %v215_v43  ;;  %v179_v48 = vmul.f32 %v257_v2, %v145_v46  ;;  %v183_v49 = vmul.f32 %v257_v2, %v155_v47 }
  0xa5   :  { %v205_v50 = vadd.f32 %v258_v3, %v188_v45 }
  0xa6   :  { %v196_v51 = vadd.f32 %v258_v3, %v179_v48  ;;  %v200_v52 = vadd.f32 %v258_v3, %v183_v49 }
  0xa7   :  { %v218_v53 = vmax.f32 %v205_v50, 0.0 }
  0xa8   :  { %v209_v54 = vmax.f32 %v196_v51, 0.0  ;;  %v213_v55 = vmax.f32 %v200_v52, 0.0 }
  0xa9   :  { %232 = vst.msk [vmem:[%s446_s6 + $0x60] sm:$0xff] %vm219_vm2, %v218_v53 }
  0xaa   :  { %223 = vst.msk [vmem:[%s446_s6 + $0x18] sm:$0xff] %vm219_vm2, %v209_v54  ;;  %v170_v56 = vpop.f32.mrf.mxu3 }
  0xab   :  { %227 = vst.msk [vmem:[%s446_s6 + $0x38] sm:$0xff] %vm219_vm2, %v213_v55 }

// kernel: densenet_forward.26
= control target key start
LH: loop header
LB: loop body
LE: loop exit
PB: predicated region body
PF: predicated region fallthrough
CT: control target
= control target key end

     0   :  { %s417_s15 = smov 0   ;;  %s471_s0 = inlined_call_operand.vmem [shape: f32[2,49,32], index: 0, kind: input, shape index: {}]   ;;  %s472_s1 = inlined_call_operand.vmem [shape: f32[1,32], index: 1, kind: input, shape index: {}]   ;;  %s473_s2 = inlined_call_operand.vmem [shape: f32[1,32], index: 2, kind: input, shape index: {}]   ;;  %s474_s3 = inlined_call_operand.vmem [shape: f32[2,49,32], index: 3, kind: output, shape index: {0}]   ;;  %s475_s4 = inlined_call_operand.vmem [shape: f32[2,1,32], index: 4, kind: output, shape index: {1}]  }
   0x1 LB: > { %s360_s16 = sadd.s32 4294967295, %s389_s15   ;;  %p364_p0 = scmp.ge.s32.totalorder %s389_s15, 1  ;;  %s389_s15 = sphi %s417_s15, %s15_s15  }
   0x2   : > { %p165_p1 = scmp.lt.s32.totalorder %s389_s15, 3 }
   0x4   : > { %p166_p2 = pnand %p364_p0, %p165_p1 }
   0x5   : > { %p194_p3 = scmp.lt.s32.totalorder (!%p166_p2), %s360_s16, 1 }
   0x6   : > { %169 = sbr.rel (%p166_p2) target bundleno = 50 (0x32), region = 32 }
   0xb   : > { %s477_s16 = smov (!%p194_p3, %s360_s16), 1  ;;  %v379_v0 = vld [vmem:[%s472_s1] ss:$0 sm:$0xff]  ;;  %vm236_vm0 = vcmask 261120   ;;  %v391_v21 = vmov 49.0   ;;  %vm243_vm1 = vcmask 253952  }
   0xc   : > { %s369_s17 = smul.u32 56, %s477_s16  ;;  %v380_v1 = vld [vmem:[%s473_s2] ss:$0 sm:$0xff]  ;;  %381 = vrcp.f32 %v391_v21  ;;  %s206_s30 = scalar_lea.vmem %s475_s4, %s477_s16 }
   0xe   : > { %s198_s22 = scalar_lea.vmem %s471_s0, %s369_s17  ;;  %s440_s27 = scalar_lea.vmem %s474_s3, %s369_s17 }
   0xf   : > { %v207_v2 = vld [vmem:[%s198_s22] sm:$0xff]  ;;  %v208_v3 = vld [vmem:[%s198_s22 + $0x8] sm:$0xff]  ;;  %v209_v4 = vld [vmem:[%s198_s22 + $0x10] sm:$0xff] }
  0x10   : > { %v218_v5 = vmul.f32 %v379_v0, %v207_v2  ;;  %v219_v6 = vmul.f32 %v379_v0, %v208_v3  ;;  %v220_v7 = vmul.f32 %v379_v0, %v209_v4  ;;  %v210_v8 = vld [vmem:[%s198_s22 + $0x18] sm:$0xff]  ;;  %v211_v9 = vld [vmem:[%s198_s22 + $0x20] sm:$0xff]  ;;  %v212_v10 = vld [vmem:[%s198_s22 + $0x28] sm:$0xff] }
  0x11   : > { %v221_v11 = vmul.f32 %v379_v0, %v210_v8  ;;  %v222_v12 = vmul.f32 %v379_v0, %v211_v9  ;;  %v223_v13 = vmul.f32 %v379_v0, %v212_v10  ;;  %v213_v14 = vld [vmem:[%s198_s22 + $0x30] sm:$0x1] }
  0x12   : > { %v229_v15 = vadd.f32 %v380_v1, %v218_v5  ;;  %v230_v16 = vadd.f32 %v380_v1, %v219_v6  ;;  %v231_v17 = vadd.f32 %v380_v1, %v220_v7  ;;  %v224_v18 = vmul.f32 %v379_v0, %v213_v14  ;;  %v382_v35 = vpop.eup %381 }
  0x13   : > { %v232_v19 = vadd.f32 %v380_v1, %v221_v11  ;;  %v233_v20 = vadd.f32 %v380_v1, %v222_v12  ;;  %v234_v25 = vadd.f32 %v380_v1, %v223_v13  ;;  %v272_v41 = vmul.f32 49.0, %v382_v35 }
  0x14   : > { %237 = vst.msk [vmem:[%s440_s27] sm:$0xff] %vm236_vm0, %v229_v15  ;;  %v245_v22 = vmax.f32 %v229_v15, 0.0  ;;  %v246_v23 = vmax.f32 %v230_v16, 0.0  ;;  %v247_v24 = vmax.f32 %v231_v17, 0.0  ;;  %v235_v27 = vadd.f32 %v380_v1, %v224_v18 }
  0x15   : > { %238 = vst.msk [vmem:[%s440_s27 + $0x8] sm:$0xff] %vm236_vm0, %v230_v16  ;;  %v248_v26 = vmax.f32 %v232_v19, 0.0  ;;  %v249_v31 = vmax.f32 %v233_v20, 0.0  ;;  %v250_v34 = vmax.f32 %v234_v25, 0.0  ;;  %v273_v45 = vsub.f32 1.0, %v272_v41 }
  0x16   : > { %v252_v28 = vsel %vm236_vm0, %v245_v22, 0.0  ;;  %v253_v29 = vsel %vm236_vm0, %v246_v23, 0.0  ;;  %239 = vst.msk [vmem:[%s440_s27 + $0x10] sm:$0xff] %vm236_vm0, %v231_v17  ;;  %v255_v30 = vsel %vm236_vm0, %v247_v24, 0.0  ;;  %v251_v38 = vmax.f32 %v235_v27, 0.0 }
  0x17   : > { %v254_v32 = vadd.f32 %v253_v29, %v252_v28  ;;  %240 = vst.msk [vmem:[%s440_s27 + $0x18] sm:$0xff] %vm236_vm0, %v232_v19  ;;  %v257_v33 = vsel %vm236_vm0, %v248_v26, 0.0  ;;  %v259_v37 = vsel %vm236_vm0, %v249_v31, 0.0  ;;  %v261_v40 = vsel %vm236_vm0, %v250_v34, 0.0 }
  0x18   : > { %241 = vst.msk [vmem:[%s440_s27 + $0x20] sm:$0xff] %vm236_vm0, %v233_v20  ;;  %v263_v43 = vsel %vm243_vm1, %v251_v38, 0.0  ;;  %v274_v48 = vmul.f32 %v382_v35, %v273_v45  ;;  %vm276_vm2 = vweird.f32 %v382_v35 }
  0x19   : > { %v256_v36 = vadd.f32 %v255_v30, %v254_v32  ;;  %242 = vst.msk [vmem:[%s440_s27 + $0x28] sm:$0xff] %vm236_vm0, %v234_v25 }
  0x1a   : > { %244 = vst.msk [vmem:[%s440_s27 + $0x30] sm:$0x1] %vm243_vm1, %v235_v27  ;;  %v275_v51 = vadd.f32 %v382_v35, %v274_v48 }
  0x1b   : > { %v258_v39 = vadd.f32 %v257_v33, %v256_v36 }
  0x1c   : > { %v277_v54 = vsel %vm276_vm2, %v382_v35, %v275_v51 }
  0x1d   : > { %v260_v42 = vadd.f32 %v259_v37, %v258_v39 }
  0x1f   : > { %v262_v44 = vadd.f32 %v261_v40, %v260_v42 }
  0x21   : > { %v264_v46 = vadd.f32 %v263_v43, %v262_v44 }
  0x23   : > { %v265_v47 = vrot.slane %v264_v46, 4 }
  0x25   : > { %v266_v49 = vadd.f32 %v265_v47, %v264_v46 }
  0x27   : > { %v267_v50 = vrot.slane %v266_v49, 2 }
  0x29   : > { %v268_v52 = vadd.f32 %v267_v50, %v266_v49 }
  0x2b   : > { %v269_v53 = vrot.slane %v268_v52, 1 }
  0x2d   : > { %v270_v55 = vadd.f32 %v269_v53, %v268_v52 }
  0x2f   : > { %v278_v56 = vmul.f32 %v277_v54, %v270_v55 }
  0x31   : > { %279 = vst.msk [vmem:[%s206_s30] sm:$0x1] %vm243_vm1, %v278_v56 }
  0x32 PF: > { %s15_s15 = sadd.s32 1, %s389_s15  }
  0x33   : > { %p12_p4 = scmp.ge.s32.totalorder %s15_s15, 4  }
  0x35   :  { %14 = sbr.rel (!%p12_p4) target bundleno = 1 (0x1), region = 74 }

// kernel: densenet_forward.27
= control target key start
LH: loop header
LB: loop body
LE: loop exit
PB: predicated region body
PF: predicated region fallthrough
CT: control target
= control target key end

     0   :  { %s161_s0 = inlined_call_operand.vmem [shape: f32[2,32], index: 0, kind: input, shape index: {}]   ;;  %s162_s1 = inlined_call_operand.vmem [shape: f32[32,10], index: 1, kind: input, shape index: {}]   ;;  %s163_s2 = inlined_call_operand.vmem [shape: f32[1,10], index: 2, kind: input, shape index: {}]   ;;  %s164_s3 = inlined_call_operand.hbm [shape: f32[2,10], index: 3, kind: output, shape index: {}]  }
   0x1   :  { %v19_v0 = vld [vmem:[%s162_s1 + $0x18] sm:$0xff]  ;;  %v18_v1 = vld [vmem:[%s162_s1 + $0x10] sm:$0xff]  ;;  %v17_v2 = vld [vmem:[%s162_s1 + $0x8] sm:$0xff] }
   0x2   :  { %40 = vmatpush.msra.mxu0 %v19_v0 }
   0x3   :  { %8 = vsyncpa [#allocation3], 0  ;;  %v16_v3 = vld [vmem:[%s162_s1] sm:$0xff]  ;;  %vm24_vm0 = vcmask 261120   ;;  %vm67_vm4 = vcmask 74752  }
   0x4   :  { %41 = vmatpush.msra.mxu0 %v18_v1  ;;  %v15_v4 = vld [vmem:[%s161_s0] sm:$0x3]  ;;  %s119_s0 = smov [#allocation2]  }
   0x5   :  { %v88_v5 = vld [vmem:[%s163_s2] ss:$0 sm:$0xff]  ;;  %s74_s1 = sshll.u32 %s119_s0, 4  ;;  %s76_s2 = sshll.u32 %s164_s3, 4  ;;  %s75_s1 = int_to_ptr.vmem [resolvable:$true] %s74_s1  ;;  %s77_s2 = int_to_ptr.hbm [resolvable:$true] %s76_s2 }
   0x6   :  { %42 = vmatpush.msra.mxu0 %v17_v2 }
   0x8   :  { %43 = vmatpush.msra.mxu0 %v16_v3 }
   0x9   :  { %85 = vmatmul.msk.f32.vlgmr.msra.gmra.mxu0 %vm24_vm0, %v15_v4 }
  0x86   :  { %v45_v6 = vpop.f32.mrf.mxu0 }
  0x87   :  { %v46_v7 = vadd.f32 %v88_v5, %v45_v6 }
  0x89   :  { %v86_v8 = vmul.f32 -1.442695, %v46_v7 }
  0x8b   :  { %89 = vpow2.f32 %v86_v8 }
  0x91   :  { %v90_v9 = vpop.eup %89 }
  0x92   :  { %v51_v10 = vadd.f32 1.0, %v90_v9 }
  0x94   :  { %91 = vrcp.f32 %v51_v10  ;;  %v63_v14 = vand.u32 2147483648, %v51_v10  ;;  %v61_v16 = vand.u32 2147483647, %v51_v10  ;;  %vm57_vm2 = vweird.f32 %v51_v10 }
  0x96   :  { %v64_v18 = vor.u32 1.1754944e-38, %v63_v14  ;;  %vm62_vm5 = vcmp.eq.f32.partialorder %v61_v16, 8.507059e+37 }
  0x9a   :  { %v92_v11 = vpop.eup %91 }
  0x9b   :  { %v53_v12 = vmul.f32 %v92_v11, %v51_v10  ;;  %vm58_vm1 = vweird.f32 %v92_v11 }
  0x9c   :  { %vm59_vm3 = vmor %vm57_vm2, %vm58_vm1 }
  0x9d   :  { %v54_v13 = vsub.f32 1.0, %v53_v12 }
  0x9f   :  { %v55_v15 = vmul.f32 %v92_v11, %v54_v13 }
  0xa1   :  { %v56_v17 = vadd.f32 %v92_v11, %v55_v15 }
  0xa3   :  { %v60_v19 = vsel %vm59_vm3, %v92_v11, %v56_v17 }
  0xa4   :  { %v65_v20 = vsel %vm62_vm5, %v64_v18, %v60_v19 }
  0xa5   :  { %68 = vst.msk [vmem:[#allocation2] sm:$0x3] %vm67_vm4, %v65_v20 }
  0xa6   :  { %79 = dma.vmem_to_hbm [thread:$0]  %s75_s1, 32, %s77_s2, [#allocation3]  }
  0xa7   :  { %117 = dma.done.wait [#allocation3], 32  }
  0xa8   :  { %118 = vsyncadd [#allocation3], 4294967264 }
  0xa9   :  { %84 = vsyncpa [#allocation3], 1 }

</bundles_post_ra>
